<compile_context>
chip_gen: v5e
topology: v5e:2x2
jax: 0.10.0
libtpu: 0.0.40
codegen_flags: <defaults>
</compile_context>

<pallas_src>
import functools
from math import ceil

import jax
import jax.numpy as jnp
from jax.experimental import pallas as pl
from jax.experimental.pallas import tpu as pltpu

ATOM_MAX_NUM = 16
NEG_INF = -1e30


# ----------------------------------------------------------------------------
# In-kernel helpers (feature-major: activations are [D, nodes])
# ----------------------------------------------------------------------------
def _elu(x):
    # exp only ever sees the non-positive branch (no overflow)
    return jnp.where(x > 0, x, jnp.exp(jnp.minimum(x, 0.0)) - 1.0)


def _gat_t(hs, hd, mask, a_src, a_dst, bias, *, n_heads, d_head, gate_isolated):
    """Dense multi-head GAT, feature-major.

    hs, hd : [H*Dh, M]  (source / dest transformed features, column = node)
    mask   : [M, M]     additive (0 for edge src->dst, NEG_INF otherwise)
    a_src, a_dst : [H, H*Dh] block-row attention vectors
    bias   : [H*Dh, 1]
    returns [H*Dh, M]
    """
    alpha_s = jnp.dot(a_src, hs, preferred_element_type=jnp.float32)   # [H, M]
    alpha_d = jnp.dot(a_dst, hd, preferred_element_type=jnp.float32)   # [H, M]

    e = alpha_d[:, :, None] + alpha_s[:, None, :]                      # [H, Mt, Ms]
    e = jnp.where(e > 0, e, 0.2 * e) + mask[None]                      # LeakyReLU(0.2) + mask
    m = jnp.max(e, axis=-1, keepdims=True)
    p = jnp.exp(e - m)                                                 # masked entries underflow to 0
    attn = p * pl.reciprocal(jnp.sum(p, axis=-1, keepdims=True), approx=True)
    if gate_isolated:
        # Bipartite dst nodes with no in-edge aggregate nothing (bias only).
        # Reuses the softmax row-max -> no extra cross-lane reduce.
        attn = attn * (m > 0.5 * NEG_INF).astype(attn.dtype)

    hs_h = hs.reshape(n_heads, d_head, hs.shape[-1])                   # leading-dim split, no relayout
    out = jax.lax.dot_general(hs_h, attn, (((2,), (2,)), ((0,), (0,))),
                              preferred_element_type=jnp.float32)      # [H, Dh, Mt]
    return out.reshape(n_heads * d_head, -1) + bias                    # [H*Dh, Mt]


# ----------------------------------------------------------------------------
# Pallas kernels
# ----------------------------------------------------------------------------
def _gat_block_kernel(x_ref, mi_ref, me_ref,
                      w0_ref, a0s_ref, a0d_ref, b0_ref,
                      wi_ref, ais_ref, aid_ref, bi_ref,
                      ws_ref, wd_ref, aes_ref, aed_ref, be_ref,
                      rep_ref, *, heads0, dh0, heads1, dh1):
    """Fused feature_conv GAT + ELU + intra GAT + (bidirectional) inter GAT.

    One grid step owns M = 2*GP*N nodes (GP (h,t) pairs).  The intra mask is
    block-diagonal over the 2*GP graphs; the inter mask holds the h<->t cross
    blocks of each pair, so both inter directions come out of one pass.
    """
    x = x_ref[...]                                                     # [F, M]
    mi = mi_ref[0]                                                     # [M, M]
    me = me_ref[0]                                                     # [M, M]

    # 1) feature_conv GATConv on raw features (self-loops baked into mi)
    g0 = jnp.dot(w0_ref[...], x, preferred_element_type=jnp.float32)   # [HDh0, M]
    feat = _gat_t(g0, g0, mi, a0s_ref[...], a0d_ref[...], b0_ref[...],
                  n_heads=heads0, d_head=dh0, gate_isolated=False)
    z = _elu(feat)

    # 2) IntraGraphAttention
    gi = jnp.dot(wi_ref[...], z, preferred_element_type=jnp.float32)   # [HDh1, M]
    intra = _gat_t(gi, gi, mi, ais_ref[...], aid_ref[...], bi_ref[...],
                   n_heads=heads1, d_head=dh1, gate_isolated=False)

    # 3) InterGraphAttention (both directions via the pair-cross mask)
    gs = jnp.dot(ws_ref[...], z, preferred_element_type=jnp.float32)   # source transform
    gd = jnp.dot(wd_ref[...], z, preferred_element_type=jnp.float32)   # dest transform
    inter = _gat_t(gs, gd, me, aes_ref[...], aed_ref[...], be_ref[...],
                   n_heads=heads1, d_head=dh1, gate_isolated=True)

    # Single full-slab store: rep = cat(intra, inter) along the feature axis.
    rep_ref[...] = jnp.concatenate([intra, inter], axis=0)             # [2*HDh1, M]


def _mhsa_kernel(x_ref, gate_ref, mask_ref, wq_ref, wk_ref, wv_ref, wo_ref,
                 out_ref, *, n_heads, d_head):
    """Multi-head self-attention over TopK-selected nodes, feature-major.

    gate : [1, M] tanh(score) pooling gate (fused multiply).
    mask : [M, M] block-diag over graphs AND key-restricted to selected nodes,
           so selected-node outputs equal MHSA over the pooled token set; the
           non-selected rows are discarded by the wrapper's gather.
    """
    x = x_ref[...] * gate_ref[0]                                       # [D, M]
    q = jnp.dot(wq_ref[...], x, preferred_element_type=jnp.float32)
    k = jnp.dot(wk_ref[...], x, preferred_element_type=jnp.float32)
    v = jnp.dot(wv_ref[...], x, preferred_element_type=jnp.float32)

    m2 = x.shape[-1]
    qh = q.reshape(n_heads, d_head, m2)                                # leading-dim splits
    kh = k.reshape(n_heads, d_head, m2)
    vh = v.reshape(n_heads, d_head, m2)

    s = jax.lax.dot_general(qh, kh, (((1,), (1,)), ((0,), (0,))),
                            preferred_element_type=jnp.float32) * (1.0 / d_head ** 0.5)
    s = s + mask_ref[0][None]                                          # [H, M, M]
    m = jnp.max(s, axis=-1, keepdims=True)
    p = jnp.exp(s - m)
    attn = p * pl.reciprocal(jnp.sum(p, axis=-1, keepdims=True), approx=True)

    o = jax.lax.dot_general(vh, attn, (((2,), (2,)), ((0,), (0,))),
                            preferred_element_type=jnp.float32)        # [H, Dh, M]
    out_ref[...] = jnp.dot(wo_ref[...], o.reshape(n_heads * d_head, m2),
                           preferred_element_type=jnp.float32)         # [D, M]


# ----------------------------------------------------------------------------
# pallas_call wrappers
# ----------------------------------------------------------------------------
def gat_block(x_t, mask_intra, mask_inter, feat_p, intra_p, inter_p):
    w0, a0s, a0d, b0 = feat_p
    wi, ais, aid, bi = intra_p
    ws, wd, aes, aed, be = inter_p
    F, TN = x_t.shape
    NB, M, _ = mask_intra.shape
    hdh0, h0 = w0.shape[0], a0s.shape[0]
    hdh1, h1 = wi.shape[0], ais.shape[0]

    kernel = functools.partial(_gat_block_kernel, heads0=h0, dh0=hdh0 // h0,
                               heads1=h1, dh1=hdh1 // h1)
    const = lambda g: (0, 0)
    return pl.pallas_call(
        kernel,
        out_shape=jax.ShapeDtypeStruct((2 * hdh1, TN), jnp.float32),
        grid=(NB,),
        in_specs=[
            pl.BlockSpec((F, M), lambda g: (0, g)),
            pl.BlockSpec((1, M, M), lambda g: (g, 0, 0)),
            pl.BlockSpec((1, M, M), lambda g: (g, 0, 0)),
            pl.BlockSpec(w0.shape, const), pl.BlockSpec(a0s.shape, const),
            pl.BlockSpec(a0d.shape, const), pl.BlockSpec(b0.shape, const),
            pl.BlockSpec(wi.shape, const), pl.BlockSpec(ais.shape, const),
            pl.BlockSpec(aid.shape, const), pl.BlockSpec(bi.shape, const),
            pl.BlockSpec(ws.shape, const), pl.BlockSpec(wd.shape, const),
            pl.BlockSpec(aes.shape, const), pl.BlockSpec(aed.shape, const),
            pl.BlockSpec(be.shape, const),
        ],
        out_specs=pl.BlockSpec((2 * hdh1, M), lambda g: (0, g)),
        compiler_params=pltpu.CompilerParams(dimension_semantics=("parallel",)),
    )(x_t, mask_intra, mask_inter,
      w0, a0s, a0d, b0, wi, ais, aid, bi, ws, wd, aes, aed, be)


def mhsa_block(rep, gate, mask_att, att_p, *, n_heads=8):
    wq, wk, wv, wo = att_p
    D, TN = rep.shape
    NB2, M2, _ = mask_att.shape
    kernel = functools.partial(_mhsa_kernel, n_heads=n_heads, d_head=D // n_heads)
    const = lambda g: (0, 0)
    return pl.pallas_call(
        kernel,
        out_shape=jax.ShapeDtypeStruct((D, TN), jnp.float32),
        grid=(NB2,),
        in_specs=[
            pl.BlockSpec((D, M2), lambda g: (0, g)),
            pl.BlockSpec((1, 1, M2), lambda g: (g, 0, 0)),
            pl.BlockSpec((1, M2, M2), lambda g: (g, 0, 0)),
            pl.BlockSpec(wq.shape, const), pl.BlockSpec(wk.shape, const),
            pl.BlockSpec(wv.shape, const), pl.BlockSpec(wo.shape, const),
        ],
        out_specs=pl.BlockSpec((D, M2), lambda g: (0, g)),
        compiler_params=pltpu.CompilerParams(dimension_semantics=("parallel",)),
    )(rep, gate, mask_att, wq, wk, wv, wo)


# ----------------------------------------------------------------------------
# Full forward
# ----------------------------------------------------------------------------
def _graphs_per_block(total, nodes_per_graph, lane=128):
    """Smallest divisor g of `total` whose node count is lane-aligned;
    fall back to a single full-extent block (always legal)."""
    for g in range(1, total + 1):
        if total % g == 0 and (g * nodes_per_graph) % lane == 0:
            return g
    return total


def dvrl_block_forward(params, h_x, h_adj, t_x, t_adj, b_adj):
    B, N, F = h_x.shape
    G = 2 * B
    hdh1 = params["intra"][0].shape[0]
    Drep = 2 * hdh1
    k = ceil(N * 0.6)

    # ---- block sizing: ~128 nodes per grid step, >=2 steps when possible
    GP = _graphs_per_block(B, 2 * N)          # (h,t) pairs per GAT block
    NB = B // GP
    M = 2 * GP * N
    GBm = _graphs_per_block(G, N)             # graphs per MHSA block
    NB2 = G // GBm
    M2 = GBm * N

    # ---- pair-major node order, feature-major slabs
    x_pm = jnp.stack([h_x, t_x], axis=1).reshape(G * N, F)        # (b, side, n) flat
    x_t = jnp.transpose(x_pm)                                     # [F, G*N]

    # ---- additive masks (built once in JAX)
    eye_n = jnp.eye(N, dtype=jnp.float32)
    adj_pm = jnp.stack([h_adj, t_adj], axis=1).reshape(G, N, N)
    adj_sl = jnp.maximum(adj_pm, eye_n[None])                     # self-loops (PyG default)
    eye_g2 = jnp.eye(2 * GP, dtype=jnp.float32)
    intra_bd = jnp.einsum('ngij,gh->ngihj',
                          adj_sl.reshape(NB, 2 * GP, N, N), eye_g2).reshape(NB, M, M)
    mask_intra = jnp.where(intra_bd > 0, 0.0, NEG_INF).astype(jnp.float32)

    zero_nn = jnp.zeros_like(b_adj)
    pair_adj = jnp.concatenate([
        jnp.concatenate([zero_nn, b_adj], axis=2),                # h rows <- t cols
        jnp.concatenate([jnp.swapaxes(b_adj, 1, 2), zero_nn], axis=2),
    ], axis=1)                                                    # [B, 2N, 2N]
    eye_gp = jnp.eye(GP, dtype=jnp.float32)
    inter_bd = jnp.einsum('npij,pq->npiqj',
                          pair_adj.reshape(NB, GP, 2 * N, 2 * N), eye_gp).reshape(NB, M, M)
    mask_inter = jnp.where(inter_bd > 0, 0.0, NEG_INF).astype(jnp.float32)

    # ---- 1) fused feature_conv + intra + inter GAT  (one pallas_call)
    rep = gat_block(x_t, mask_intra, mask_inter,
                    params["feat"], params["intra"], params["inter"])   # [Drep, G*N]

    # ---- 2) TopKPooling(ratio=0.6) score / selection in plain JAX
    # TODO(synk): data-dependent top-k sort has no clean Pallas equivalent; kept in JAX.
    p_vec = params["pool_p"].reshape(-1)
    p_vec = p_vec / jnp.linalg.norm(p_vec)
    score = jnp.dot(p_vec, rep)                                         # [G*N]
    top_val, top_idx = jax.lax.top_k(score.reshape(G, N), k)            # descending (PyG perm order)
    gate = jnp.tanh(score).reshape(NB2, 1, M2)                          # per-node tanh gate

    keep = jnp.sum(jax.nn.one_hot(top_idx, N, dtype=jnp.float32), axis=1)       # [G, N]
    km = jnp.broadcast_to(keep[:, None, :], (G, N, N))                           # key mask
    eye_gb = jnp.eye(GBm, dtype=jnp.float32)
    att_bd = jnp.einsum('ngij,gh->ngihj',
                        km.reshape(NB2, GBm, N, N), eye_gb).reshape(NB2, M2, M2)
    mask_att = jnp.where(att_bd > 0, 0.0, NEG_INF).astype(jnp.float32)

    # ---- 3) MultiHeadSelfAttention over the pooled graphs (one pallas_call)
    att_full = mhsa_block(rep, gate, mask_att, params["att"])            # [Drep, G*N]

    # gather the k kept tokens per graph in perm (descending score) order
    flat_sel = (jnp.arange(G)[:, None] * N + top_idx).reshape(-1)        # [G*k]
    att_sel = jnp.take(att_full, flat_sel, axis=1)                       # [Drep, G*k]

    # ---- back to node-major outputs
    rep_nm = jnp.transpose(rep).reshape(B, 2, N, Drep)
    att_nm = jnp.transpose(att_sel).reshape(B, 2, k, Drep)
    return rep_nm[:, 0], rep_nm[:, 1], att_nm[:, 0], att_nm[:, 1]


# ----------------------------------------------------------------------------
# Deterministic parameter construction (feature-major: weights are [out, in])
# ----------------------------------------------------------------------------
def _glorot(key, shape):
    s = (6.0 / (shape[0] + shape[-1])) ** 0.5
    return jax.random.uniform(key, shape, jnp.float32, -s, s)


def _head_block_rows(att):  # [H, Dh] -> [H, H*Dh], row h holds att[h] in its block
    H, Dh = att.shape
    m = jnp.zeros((H, H * Dh), att.dtype)
    for h in range(H):
        m = m.at[h, h * Dh:(h + 1) * Dh].set(att[h])
    return m


def make_gat_params(key, f_in, n_heads, d_head, *, bipartite):
    hdh = n_heads * d_head
    k1, k2, k3, k4 = jax.random.split(key, 4)
    w_src = _glorot(k1, (hdh, f_in))
    a_src = _head_block_rows(_glorot(k3, (n_heads, d_head)))
    a_dst = _head_block_rows(_glorot(k4, (n_heads, d_head)))
    bias = jnp.zeros((hdh, 1), jnp.float32)
    if bipartite:
        w_dst = _glorot(k2, (hdh, f_in))
        return (w_src, w_dst, a_src, a_dst, bias)
    return (w_src, a_src, a_dst, bias)


if __name__ == "__main__":
    key = jax.random.PRNGKey(0)
    keys = jax.random.split(key, 16)

    B = 8                      # (h, t) pairs
    N = ATOM_MAX_NUM           # 16 nodes per graph (dense padded)
    in_features = 8
    n_heads, head_out = 2, 8                       # feature_conv GAT
    d_gat1 = n_heads * head_out                    # 16
    intra_heads, intra_out = 2, 8                  # intra / inter GAT
    final_out_feats = 2 * intra_heads * intra_out  # 32 = cat(intra, inter)
    dims = ceil(N * 0.6)                           # 10

    h_x = jax.random.normal(keys[0], (B, N, in_features), jnp.float32)
    t_x = jax.random.normal(keys[1], (B, N, in_features), jnp.float32)
    h_adj = (jax.random.uniform(keys[2], (B, N, N)) < 0.3).astype(jnp.float32)
    t_adj = (jax.random.uniform(keys[3], (B, N, N)) < 0.3).astype(jnp.float32)
    b_adj = (jax.random.uniform(keys[4], (B, N, N)) < 0.3).astype(jnp.float32)

    params = {
        "feat":  make_gat_params(keys[5], in_features, n_heads, head_out, bipartite=False),
        "intra": make_gat_params(keys[6], d_gat1, intra_heads, intra_out, bipartite=False),
        "inter": make_gat_params(keys[7], d_gat1, intra_heads, intra_out, bipartite=True),
        "pool_p": jax.random.normal(keys[8], (final_out_feats, 1), jnp.float32),
        "att": tuple(_glorot(keys[9 + i], (final_out_feats, final_out_feats))
                     for i in range(4)),
    }

    fwd = jax.jit(dvrl_block_forward)
    h_rep, t_rep, h_att, t_att = fwd(params, h_x, h_adj, t_x, t_adj, b_adj)
    jax.block_until_ready((h_rep, t_rep, h_att, t_att))

    assert h_rep.shape == (B, N, final_out_feats)
    assert t_rep.shape == (B, N, final_out_feats)
    assert h_att.shape == (B, dims, final_out_feats)
    assert t_att.shape == (B, dims, final_out_feats)
    assert bool(jnp.all(jnp.isfinite(h_rep))) and bool(jnp.all(jnp.isfinite(t_rep)))
    assert bool(jnp.all(jnp.isfinite(h_att))) and bool(jnp.all(jnp.isfinite(t_att)))
    print("KERNEL_OK")
</pallas_src>

<mosaic_0001>
module attributes {stable_mosaic.version = 11 : i64} {
  func.func @_gat_block_kernel(%arg0: i32, %arg1: memref<8x128xf32, #tpu.memory_space<vmem>>, %arg2: memref<1x128x128xf32, #tpu.memory_space<vmem>>, %arg3: memref<1x128x128xf32, #tpu.memory_space<vmem>>, %arg4: memref<16x8xf32, #tpu.memory_space<vmem>>, %arg5: memref<2x16xf32, #tpu.memory_space<vmem>>, %arg6: memref<2x16xf32, #tpu.memory_space<vmem>>, %arg7: memref<16x1xf32, #tpu.memory_space<vmem>>, %arg8: memref<16x16xf32, #tpu.memory_space<vmem>>, %arg9: memref<2x16xf32, #tpu.memory_space<vmem>>, %arg10: memref<2x16xf32, #tpu.memory_space<vmem>>, %arg11: memref<16x1xf32, #tpu.memory_space<vmem>>, %arg12: memref<16x16xf32, #tpu.memory_space<vmem>>, %arg13: memref<16x16xf32, #tpu.memory_space<vmem>>, %arg14: memref<2x16xf32, #tpu.memory_space<vmem>>, %arg15: memref<2x16xf32, #tpu.memory_space<vmem>>, %arg16: memref<16x1xf32, #tpu.memory_space<vmem>>, %arg17: memref<32x128xf32, #tpu.memory_space<vmem>>) attributes {dimension_semantics = [#tpu.dimension_semantics<parallel>], iteration_bounds = array<i64: 2>, scalar_prefetch = 0 : i64, scratch_operands = 0 : i64, tpu.core_type = #tpu.core_type<tc>, window_params = [{transform_indices = @transform_0, window_bounds = array<i64: 8, 128>}, {transform_indices = @transform_1, window_bounds = array<i64: 1, 128, 128>}, {transform_indices = @transform_2, window_bounds = array<i64: 1, 128, 128>}, {pipeline_mode = #tpu.pipeline_mode<synchronous>, transform_indices = @transform_3, window_bounds = array<i64: 16, 8>}, {pipeline_mode = #tpu.pipeline_mode<synchronous>, transform_indices = @transform_4, window_bounds = array<i64: 2, 16>}, {pipeline_mode = #tpu.pipeline_mode<synchronous>, transform_indices = @transform_5, window_bounds = array<i64: 2, 16>}, {pipeline_mode = #tpu.pipeline_mode<synchronous>, transform_indices = @transform_6, window_bounds = array<i64: 16, 1>}, {pipeline_mode = #tpu.pipeline_mode<synchronous>, transform_indices = @transform_7, window_bounds = array<i64: 16, 16>}, {pipeline_mode = #tpu.pipeline_mode<synchronous>, transform_indices = @transform_8, window_bounds = array<i64: 2, 16>}, {pipeline_mode = #tpu.pipeline_mode<synchronous>, transform_indices = @transform_9, window_bounds = array<i64: 2, 16>}, {pipeline_mode = #tpu.pipeline_mode<synchronous>, transform_indices = @transform_10, window_bounds = array<i64: 16, 1>}, {pipeline_mode = #tpu.pipeline_mode<synchronous>, transform_indices = @transform_11, window_bounds = array<i64: 16, 16>}, {pipeline_mode = #tpu.pipeline_mode<synchronous>, transform_indices = @transform_12, window_bounds = array<i64: 16, 16>}, {pipeline_mode = #tpu.pipeline_mode<synchronous>, transform_indices = @transform_13, window_bounds = array<i64: 2, 16>}, {pipeline_mode = #tpu.pipeline_mode<synchronous>, transform_indices = @transform_14, window_bounds = array<i64: 2, 16>}, {pipeline_mode = #tpu.pipeline_mode<synchronous>, transform_indices = @transform_15, window_bounds = array<i64: 16, 1>}, {transform_indices = @transform_16, window_bounds = array<i64: 32, 128>}]} {
    %c0 = arith.constant 0 : index
    %c0_0 = arith.constant 0 : index
    %0 = vector.load %arg1[%c0, %c0_0] : memref<8x128xf32, #tpu.memory_space<vmem>>, vector<8x128xf32>
    %c0_1 = arith.constant 0 : index
    %c0_2 = arith.constant 0 : index
    %c0_3 = arith.constant 0 : index
    %1 = vector.load %arg2[%c0_1, %c0_2, %c0_3] : memref<1x128x128xf32, #tpu.memory_space<vmem>>, vector<1x128x128xf32>
    %2 = vector.shape_cast %1 : vector<1x128x128xf32> to vector<128x128xf32>
    %c0_4 = arith.constant 0 : index
    %c0_5 = arith.constant 0 : index
    %c0_6 = arith.constant 0 : index
    %3 = vector.load %arg3[%c0_4, %c0_5, %c0_6] : memref<1x128x128xf32, #tpu.memory_space<vmem>>, vector<1x128x128xf32>
    %4 = vector.shape_cast %3 : vector<1x128x128xf32> to vector<128x128xf32>
    %c0_7 = arith.constant 0 : index
    %c0_8 = arith.constant 0 : index
    %5 = vector.load %arg4[%c0_7, %c0_8] : memref<16x8xf32, #tpu.memory_space<vmem>>, vector<16x8xf32>
    %cst = arith.constant dense<0.000000e+00> : vector<16x128xf32>
    %6 = tpu.matmul %5, %0, %cst {dimension_numbers = #tpu.dot_dimension_numbers<[1], [0], [0], [1], [0, 0, 1, 1], [], []>} : vector<16x8xf32>, vector<8x128xf32>, vector<16x128xf32> -> vector<16x128xf32>
    %c0_9 = arith.constant 0 : index
    %c0_10 = arith.constant 0 : index
    %7 = vector.load %arg5[%c0_9, %c0_10] : memref<2x16xf32, #tpu.memory_space<vmem>>, vector<2x16xf32>
    %c0_11 = arith.constant 0 : index
    %c0_12 = arith.constant 0 : index
    %8 = vector.load %arg6[%c0_11, %c0_12] : memref<2x16xf32, #tpu.memory_space<vmem>>, vector<2x16xf32>
    %c0_13 = arith.constant 0 : index
    %c0_14 = arith.constant 0 : index
    %9 = vector.load %arg7[%c0_13, %c0_14] : memref<16x1xf32, #tpu.memory_space<vmem>>, vector<16x1xf32>
    %cst_15 = arith.constant dense<0.000000e+00> : vector<2x128xf32>
    %10 = tpu.matmul %7, %6, %cst_15 {dimension_numbers = #tpu.dot_dimension_numbers<[1], [0], [0], [1], [0, 0, 1, 1], [], []>} : vector<2x16xf32>, vector<16x128xf32>, vector<2x128xf32> -> vector<2x128xf32>
    %cst_16 = arith.constant dense<0.000000e+00> : vector<2x128xf32>
    %11 = tpu.matmul %8, %6, %cst_16 {dimension_numbers = #tpu.dot_dimension_numbers<[1], [0], [0], [1], [0, 0, 1, 1], [], []>} : vector<2x16xf32>, vector<16x128xf32>, vector<2x128xf32> -> vector<2x128xf32>
    %12 = vector.shape_cast %11 : vector<2x128xf32> to vector<2x128x1xf32>
    %13 = vector.shape_cast %10 : vector<2x128xf32> to vector<2x1x128xf32>
    %14 = vector.broadcast %12 : vector<2x128x1xf32> to vector<2x128x128xf32>
    %15 = vector.broadcast %13 : vector<2x1x128xf32> to vector<2x128x128xf32>
    %16 = arith.addf %14, %15 : vector<2x128x128xf32>
    %cst_17 = arith.constant 0.000000e+00 : f32
    %17 = vector.broadcast %cst_17 : f32 to vector<2x128x128xf32>
    %18 = arith.cmpf ogt, %16, %17 : vector<2x128x128xf32>
    %cst_18 = arith.constant 2.000000e-01 : f32
    %19 = vector.broadcast %cst_18 : f32 to vector<2x128x128xf32>
    %20 = arith.mulf %19, %16 : vector<2x128x128xf32>
    %21 = arith.select %18, %16, %20 : vector<2x128x128xi1>, vector<2x128x128xf32>
    %22 = vector.shape_cast %2 : vector<128x128xf32> to vector<1x128x128xf32>
    %23 = vector.broadcast %22 : vector<1x128x128xf32> to vector<2x128x128xf32>
    %24 = arith.addf %21, %23 : vector<2x128x128xf32>
    %cst_19 = arith.constant dense<0xFF800000> : vector<2x128xf32>
    %25 = vector.multi_reduction <maximumf>, %24, %cst_19 [2] : vector<2x128x128xf32> to vector<2x128xf32>
    %26 = vector.shape_cast %25 : vector<2x128xf32> to vector<2x128x1xf32>
    %27 = vector.broadcast %26 : vector<2x128x1xf32> to vector<2x128x128xf32>
    %28 = arith.subf %24, %27 : vector<2x128x128xf32>
    %29 = math.exp %28 : vector<2x128x128xf32>
    %cst_20 = arith.constant dense<0.000000e+00> : vector<2x128xf32>
    %30 = vector.multi_reduction <add>, %29, %cst_20 [2] : vector<2x128x128xf32> to vector<2x128xf32>
    %31 = vector.shape_cast %30 : vector<2x128xf32> to vector<2x128x1xf32>
    %32 = tpu.reciprocal %31 {approx = true} : vector<2x128x1xf32> -> vector<2x128x1xf32>
    %33 = vector.broadcast %32 : vector<2x128x1xf32> to vector<2x128x128xf32>
    %34 = arith.mulf %29, %33 : vector<2x128x128xf32>
    %35 = vector.shape_cast %6 : vector<16x128xf32> to vector<2x8x128xf32>
    %cst_21 = arith.constant dense<0.000000e+00> : vector<2x8x128xf32>
    %36 = tpu.matmul %35, %34, %cst_21 {dimension_numbers = #tpu.dot_dimension_numbers<[2], [2], [1], [1], [0, 0, 0, 1, 1, 1], [0], [0]>} : vector<2x8x128xf32>, vector<2x128x128xf32>, vector<2x8x128xf32> -> vector<2x8x128xf32>
    %37 = vector.shape_cast %36 : vector<2x8x128xf32> to vector<16x128xf32>
    %38 = vector.broadcast %9 : vector<16x1xf32> to vector<16x128xf32>
    %39 = arith.addf %37, %38 : vector<16x128xf32>
    %cst_22 = arith.constant 0.000000e+00 : f32
    %40 = vector.broadcast %cst_22 : f32 to vector<16x128xf32>
    %41 = arith.cmpf ogt, %39, %40 : vector<16x128xf32>
    %cst_23 = arith.constant 0.000000e+00 : f32
    %42 = vector.broadcast %cst_23 : f32 to vector<16x128xf32>
    %43 = arith.minimumf %39, %42 : vector<16x128xf32>
    %44 = math.exp %43 : vector<16x128xf32>
    %cst_24 = arith.constant 1.000000e+00 : f32
    %45 = vector.broadcast %cst_24 : f32 to vector<16x128xf32>
    %46 = arith.subf %44, %45 : vector<16x128xf32>
    %47 = arith.select %41, %39, %46 : vector<16x128xi1>, vector<16x128xf32>
    %c0_25 = arith.constant 0 : index
    %c0_26 = arith.constant 0 : index
    %48 = vector.load %arg8[%c0_25, %c0_26] : memref<16x16xf32, #tpu.memory_space<vmem>>, vector<16x16xf32>
    %cst_27 = arith.constant dense<0.000000e+00> : vector<16x128xf32>
    %49 = tpu.matmul %48, %47, %cst_27 {dimension_numbers = #tpu.dot_dimension_numbers<[1], [0], [0], [1], [0, 0, 1, 1], [], []>} : vector<16x16xf32>, vector<16x128xf32>, vector<16x128xf32> -> vector<16x128xf32>
    %c0_28 = arith.constant 0 : index
    %c0_29 = arith.constant 0 : index
    %50 = vector.load %arg9[%c0_28, %c0_29] : memref<2x16xf32, #tpu.memory_space<vmem>>, vector<2x16xf32>
    %c0_30 = arith.constant 0 : index
    %c0_31 = arith.constant 0 : index
    %51 = vector.load %arg10[%c0_30, %c0_31] : memref<2x16xf32, #tpu.memory_space<vmem>>, vector<2x16xf32>
    %c0_32 = arith.constant 0 : index
    %c0_33 = arith.constant 0 : index
    %52 = vector.load %arg11[%c0_32, %c0_33] : memref<16x1xf32, #tpu.memory_space<vmem>>, vector<16x1xf32>
    %cst_34 = arith.constant dense<0.000000e+00> : vector<2x128xf32>
    %53 = tpu.matmul %50, %49, %cst_34 {dimension_numbers = #tpu.dot_dimension_numbers<[1], [0], [0], [1], [0, 0, 1, 1], [], []>} : vector<2x16xf32>, vector<16x128xf32>, vector<2x128xf32> -> vector<2x128xf32>
    %cst_35 = arith.constant dense<0.000000e+00> : vector<2x128xf32>
    %54 = tpu.matmul %51, %49, %cst_35 {dimension_numbers = #tpu.dot_dimension_numbers<[1], [0], [0], [1], [0, 0, 1, 1], [], []>} : vector<2x16xf32>, vector<16x128xf32>, vector<2x128xf32> -> vector<2x128xf32>
    %55 = vector.shape_cast %54 : vector<2x128xf32> to vector<2x128x1xf32>
    %56 = vector.shape_cast %53 : vector<2x128xf32> to vector<2x1x128xf32>
    %57 = vector.broadcast %55 : vector<2x128x1xf32> to vector<2x128x128xf32>
    %58 = vector.broadcast %56 : vector<2x1x128xf32> to vector<2x128x128xf32>
    %59 = arith.addf %57, %58 : vector<2x128x128xf32>
    %cst_36 = arith.constant 0.000000e+00 : f32
    %60 = vector.broadcast %cst_36 : f32 to vector<2x128x128xf32>
    %61 = arith.cmpf ogt, %59, %60 : vector<2x128x128xf32>
    %cst_37 = arith.constant 2.000000e-01 : f32
    %62 = vector.broadcast %cst_37 : f32 to vector<2x128x128xf32>
    %63 = arith.mulf %62, %59 : vector<2x128x128xf32>
    %64 = arith.select %61, %59, %63 : vector<2x128x128xi1>, vector<2x128x128xf32>
    %65 = vector.shape_cast %2 : vector<128x128xf32> to vector<1x128x128xf32>
    %66 = vector.broadcast %65 : vector<1x128x128xf32> to vector<2x128x128xf32>
    %67 = arith.addf %64, %66 : vector<2x128x128xf32>
    %cst_38 = arith.constant dense<0xFF800000> : vector<2x128xf32>
    %68 = vector.multi_reduction <maximumf>, %67, %cst_38 [2] : vector<2x128x128xf32> to vector<2x128xf32>
    %69 = vector.shape_cast %68 : vector<2x128xf32> to vector<2x128x1xf32>
    %70 = vector.broadcast %69 : vector<2x128x1xf32> to vector<2x128x128xf32>
    %71 = arith.subf %67, %70 : vector<2x128x128xf32>
    %72 = math.exp %71 : vector<2x128x128xf32>
    %cst_39 = arith.constant dense<0.000000e+00> : vector<2x128xf32>
    %73 = vector.multi_reduction <add>, %72, %cst_39 [2] : vector<2x128x128xf32> to vector<2x128xf32>
    %74 = vector.shape_cast %73 : vector<2x128xf32> to vector<2x128x1xf32>
    %75 = tpu.reciprocal %74 {approx = true} : vector<2x128x1xf32> -> vector<2x128x1xf32>
    %76 = vector.broadcast %75 : vector<2x128x1xf32> to vector<2x128x128xf32>
    %77 = arith.mulf %72, %76 : vector<2x128x128xf32>
    %78 = vector.shape_cast %49 : vector<16x128xf32> to vector<2x8x128xf32>
    %cst_40 = arith.constant dense<0.000000e+00> : vector<2x8x128xf32>
    %79 = tpu.matmul %78, %77, %cst_40 {dimension_numbers = #tpu.dot_dimension_numbers<[2], [2], [1], [1], [0, 0, 0, 1, 1, 1], [0], [0]>} : vector<2x8x128xf32>, vector<2x128x128xf32>, vector<2x8x128xf32> -> vector<2x8x128xf32>
    %80 = vector.shape_cast %79 : vector<2x8x128xf32> to vector<16x128xf32>
    %81 = vector.broadcast %52 : vector<16x1xf32> to vector<16x128xf32>
    %82 = arith.addf %80, %81 : vector<16x128xf32>
    %c0_41 = arith.constant 0 : index
    %c0_42 = arith.constant 0 : index
    %83 = vector.load %arg12[%c0_41, %c0_42] : memref<16x16xf32, #tpu.memory_space<vmem>>, vector<16x16xf32>
    %cst_43 = arith.constant dense<0.000000e+00> : vector<16x128xf32>
    %84 = tpu.matmul %83, %47, %cst_43 {dimension_numbers = #tpu.dot_dimension_numbers<[1], [0], [0], [1], [0, 0, 1, 1], [], []>} : vector<16x16xf32>, vector<16x128xf32>, vector<16x128xf32> -> vector<16x128xf32>
    %c0_44 = arith.constant 0 : index
    %c0_45 = arith.constant 0 : index
    %85 = vector.load %arg13[%c0_44, %c0_45] : memref<16x16xf32, #tpu.memory_space<vmem>>, vector<16x16xf32>
    %cst_46 = arith.constant dense<0.000000e+00> : vector<16x128xf32>
    %86 = tpu.matmul %85, %47, %cst_46 {dimension_numbers = #tpu.dot_dimension_numbers<[1], [0], [0], [1], [0, 0, 1, 1], [], []>} : vector<16x16xf32>, vector<16x128xf32>, vector<16x128xf32> -> vector<16x128xf32>
    %c0_47 = arith.constant 0 : index
    %c0_48 = arith.constant 0 : index
    %87 = vector.load %arg14[%c0_47, %c0_48] : memref<2x16xf32, #tpu.memory_space<vmem>>, vector<2x16xf32>
    %c0_49 = arith.constant 0 : index
    %c0_50 = arith.constant 0 : index
    %88 = vector.load %arg15[%c0_49, %c0_50] : memref<2x16xf32, #tpu.memory_space<vmem>>, vector<2x16xf32>
    %c0_51 = arith.constant 0 : index
    %c0_52 = arith.constant 0 : index
    %89 = vector.load %arg16[%c0_51, %c0_52] : memref<16x1xf32, #tpu.memory_space<vmem>>, vector<16x1xf32>
    %cst_53 = arith.constant dense<0.000000e+00> : vector<2x128xf32>
    %90 = tpu.matmul %87, %84, %cst_53 {dimension_numbers = #tpu.dot_dimension_numbers<[1], [0], [0], [1], [0, 0, 1, 1], [], []>} : vector<2x16xf32>, vector<16x128xf32>, vector<2x128xf32> -> vector<2x128xf32>
    %cst_54 = arith.constant dense<0.000000e+00> : vector<2x128xf32>
    %91 = tpu.matmul %88, %86, %cst_54 {dimension_numbers = #tpu.dot_dimension_numbers<[1], [0], [0], [1], [0, 0, 1, 1], [], []>} : vector<2x16xf32>, vector<16x128xf32>, vector<2x128xf32> -> vector<2x128xf32>
    %92 = vector.shape_cast %91 : vector<2x128xf32> to vector<2x128x1xf32>
    %93 = vector.shape_cast %90 : vector<2x128xf32> to vector<2x1x128xf32>
    %94 = vector.broadcast %92 : vector<2x128x1xf32> to vector<2x128x128xf32>
    %95 = vector.broadcast %93 : vector<2x1x128xf32> to vector<2x128x128xf32>
    %96 = arith.addf %94, %95 : vector<2x128x128xf32>
    %cst_55 = arith.constant 0.000000e+00 : f32
    %97 = vector.broadcast %cst_55 : f32 to vector<2x128x128xf32>
    %98 = arith.cmpf ogt, %96, %97 : vector<2x128x128xf32>
    %cst_56 = arith.constant 2.000000e-01 : f32
    %99 = vector.broadcast %cst_56 : f32 to vector<2x128x128xf32>
    %100 = arith.mulf %99, %96 : vector<2x128x128xf32>
    %101 = arith.select %98, %96, %100 : vector<2x128x128xi1>, vector<2x128x128xf32>
    %102 = vector.shape_cast %4 : vector<128x128xf32> to vector<1x128x128xf32>
    %103 = vector.broadcast %102 : vector<1x128x128xf32> to vector<2x128x128xf32>
    %104 = arith.addf %101, %103 : vector<2x128x128xf32>
    %cst_57 = arith.constant dense<0xFF800000> : vector<2x128xf32>
    %105 = vector.multi_reduction <maximumf>, %104, %cst_57 [2] : vector<2x128x128xf32> to vector<2x128xf32>
    %106 = vector.shape_cast %105 : vector<2x128xf32> to vector<2x128x1xf32>
    %107 = vector.broadcast %106 : vector<2x128x1xf32> to vector<2x128x128xf32>
    %108 = arith.subf %104, %107 : vector<2x128x128xf32>
    %109 = math.exp %108 : vector<2x128x128xf32>
    %cst_58 = arith.constant dense<0.000000e+00> : vector<2x128xf32>
    %110 = vector.multi_reduction <add>, %109, %cst_58 [2] : vector<2x128x128xf32> to vector<2x128xf32>
    %111 = vector.shape_cast %110 : vector<2x128xf32> to vector<2x128x1xf32>
    %112 = tpu.reciprocal %111 {approx = true} : vector<2x128x1xf32> -> vector<2x128x1xf32>
    %113 = vector.broadcast %112 : vector<2x128x1xf32> to vector<2x128x128xf32>
    %114 = arith.mulf %109, %113 : vector<2x128x128xf32>
    %cst_59 = arith.constant -5.000000e+29 : f32
    %115 = vector.broadcast %cst_59 : f32 to vector<2x128x1xf32>
    %116 = arith.cmpf ogt, %106, %115 : vector<2x128x1xf32>
    %117 = arith.extui %116 : vector<2x128x1xi1> to vector<2x128x1xi32>
    %118 = arith.sitofp %117 : vector<2x128x1xi32> to vector<2x128x1xf32>
    %119 = vector.broadcast %118 : vector<2x128x1xf32> to vector<2x128x128xf32>
    %120 = arith.mulf %114, %119 : vector<2x128x128xf32>
    %121 = vector.shape_cast %84 : vector<16x128xf32> to vector<2x8x128xf32>
    %cst_60 = arith.constant dense<0.000000e+00> : vector<2x8x128xf32>
    %122 = tpu.matmul %121, %120, %cst_60 {dimension_numbers = #tpu.dot_dimension_numbers<[2], [2], [1], [1], [0, 0, 0, 1, 1, 1], [0], [0]>} : vector<2x8x128xf32>, vector<2x128x128xf32>, vector<2x8x128xf32> -> vector<2x8x128xf32>
    %123 = vector.shape_cast %122 : vector<2x8x128xf32> to vector<16x128xf32>
    %124 = vector.broadcast %89 : vector<16x1xf32> to vector<16x128xf32>
    %125 = arith.addf %123, %124 : vector<16x128xf32>
    %126 = tpu.concatenate %82, %125 in 0 : vector<16x128xf32>, vector<16x128xf32> -> vector<32x128xf32>
    %c0_61 = arith.constant 0 : index
    %c0_62 = arith.constant 0 : index
    %127 = vector.load %arg17[%c0_61, %c0_62] : memref<32x128xf32, #tpu.memory_space<vmem>>, vector<32x128xf32>
    tpu.vector_store %arg17[%c0_61, %c0_62], %126 {strides = array<i32>} : memref<32x128xf32, #tpu.memory_space<vmem>>, vector<32x128xf32>,
    return
  }
  func.func @transform_0(%arg0: i32) -> (i32, i32) {
    %c0_i32 = arith.constant 0 : i32
    %c0_i32_0 = arith.constant 0 : i32
    return %c0_i32, %arg0 : i32, i32
  }
  func.func @transform_1(%arg0: i32) -> (i32, i32, i32) {
    %c0_i32 = arith.constant 0 : i32
    %c0_i32_0 = arith.constant 0 : i32
    %c0_i32_1 = arith.constant 0 : i32
    return %arg0, %c0_i32, %c0_i32_0 : i32, i32, i32
  }
  func.func @transform_2(%arg0: i32) -> (i32, i32, i32) {
    %c0_i32 = arith.constant 0 : i32
    %c0_i32_0 = arith.constant 0 : i32
    %c0_i32_1 = arith.constant 0 : i32
    return %arg0, %c0_i32, %c0_i32_0 : i32, i32, i32
  }
  func.func @transform_3(%arg0: i32) -> (i32, i32) {
    %c0_i32 = arith.constant 0 : i32
    %c0_i32_0 = arith.constant 0 : i32
    %c0_i32_1 = arith.constant 0 : i32
    return %c0_i32, %c0_i32_0 : i32, i32
  }
  func.func @transform_4(%arg0: i32) -> (i32, i32) {
    %c0_i32 = arith.constant 0 : i32
    %c0_i32_0 = arith.constant 0 : i32
    %c0_i32_1 = arith.constant 0 : i32
    return %c0_i32, %c0_i32_0 : i32, i32
  }
  func.func @transform_5(%arg0: i32) -> (i32, i32) {
    %c0_i32 = arith.constant 0 : i32
    %c0_i32_0 = arith.constant 0 : i32
    %c0_i32_1 = arith.constant 0 : i32
    return %c0_i32, %c0_i32_0 : i32, i32
  }
  func.func @transform_6(%arg0: i32) -> (i32, i32) {
    %c0_i32 = arith.constant 0 : i32
    %c0_i32_0 = arith.constant 0 : i32
    %c0_i32_1 = arith.constant 0 : i32
    return %c0_i32, %c0_i32_0 : i32, i32
  }
  func.func @transform_7(%arg0: i32) -> (i32, i32) {
    %c0_i32 = arith.constant 0 : i32
    %c0_i32_0 = arith.constant 0 : i32
    %c0_i32_1 = arith.constant 0 : i32
    return %c0_i32, %c0_i32_0 : i32, i32
  }
  func.func @transform_8(%arg0: i32) -> (i32, i32) {
    %c0_i32 = arith.constant 0 : i32
    %c0_i32_0 = arith.constant 0 : i32
    %c0_i32_1 = arith.constant 0 : i32
    return %c0_i32, %c0_i32_0 : i32, i32
  }
  func.func @transform_9(%arg0: i32) -> (i32, i32) {
    %c0_i32 = arith.constant 0 : i32
    %c0_i32_0 = arith.constant 0 : i32
    %c0_i32_1 = arith.constant 0 : i32
    return %c0_i32, %c0_i32_0 : i32, i32
  }
  func.func @transform_10(%arg0: i32) -> (i32, i32) {
    %c0_i32 = arith.constant 0 : i32
    %c0_i32_0 = arith.constant 0 : i32
    %c0_i32_1 = arith.constant 0 : i32
    return %c0_i32, %c0_i32_0 : i32, i32
  }
  func.func @transform_11(%arg0: i32) -> (i32, i32) {
    %c0_i32 = arith.constant 0 : i32
    %c0_i32_0 = arith.constant 0 : i32
    %c0_i32_1 = arith.constant 0 : i32
    return %c0_i32, %c0_i32_0 : i32, i32
  }
  func.func @transform_12(%arg0: i32) -> (i32, i32) {
    %c0_i32 = arith.constant 0 : i32
    %c0_i32_0 = arith.constant 0 : i32
    %c0_i32_1 = arith.constant 0 : i32
    return %c0_i32, %c0_i32_0 : i32, i32
  }
  func.func @transform_13(%arg0: i32) -> (i32, i32) {
    %c0_i32 = arith.constant 0 : i32
    %c0_i32_0 = arith.constant 0 : i32
    %c0_i32_1 = arith.constant 0 : i32
    return %c0_i32, %c0_i32_0 : i32, i32
  }
  func.func @transform_14(%arg0: i32) -> (i32, i32) {
    %c0_i32 = arith.constant 0 : i32
    %c0_i32_0 = arith.constant 0 : i32
    %c0_i32_1 = arith.constant 0 : i32
    return %c0_i32, %c0_i32_0 : i32, i32
  }
  func.func @transform_15(%arg0: i32) -> (i32, i32) {
    %c0_i32 = arith.constant 0 : i32
    %c0_i32_0 = arith.constant 0 : i32
    %c0_i32_1 = arith.constant 0 : i32
    return %c0_i32, %c0_i32_0 : i32, i32
  }
  func.func @transform_16(%arg0: i32) -> (i32, i32) {
    %c0_i32 = arith.constant 0 : i32
    %c0_i32_0 = arith.constant 0 : i32
    return %c0_i32, %arg0 : i32, i32
  }
}

module attributes {stable_mosaic.version = 11 : i64} {
  func.func @_mhsa_kernel(%arg0: i32, %arg1: memref<32x128xf32, #tpu.memory_space<vmem>>, %arg2: memref<1x1x128xf32, #tpu.memory_space<vmem>>, %arg3: memref<1x128x128xf32, #tpu.memory_space<vmem>>, %arg4: memref<32x32xf32, #tpu.memory_space<vmem>>, %arg5: memref<32x32xf32, #tpu.memory_space<vmem>>, %arg6: memref<32x32xf32, #tpu.memory_space<vmem>>, %arg7: memref<32x32xf32, #tpu.memory_space<vmem>>, %arg8: memref<32x128xf32, #tpu.memory_space<vmem>>) attributes {dimension_semantics = [#tpu.dimension_semantics<parallel>], iteration_bounds = array<i64: 2>, scalar_prefetch = 0 : i64, scratch_operands = 0 : i64, tpu.core_type = #tpu.core_type<tc>, window_params = [{transform_indices = @transform_0, window_bounds = array<i64: 32, 128>}, {transform_indices = @transform_1, window_bounds = array<i64: 1, 1, 128>}, {transform_indices = @transform_2, window_bounds = array<i64: 1, 128, 128>}, {pipeline_mode = #tpu.pipeline_mode<synchronous>, transform_indices = @transform_3, window_bounds = array<i64: 32, 32>}, {pipeline_mode = #tpu.pipeline_mode<synchronous>, transform_indices = @transform_4, window_bounds = array<i64: 32, 32>}, {pipeline_mode = #tpu.pipeline_mode<synchronous>, transform_indices = @transform_5, window_bounds = array<i64: 32, 32>}, {pipeline_mode = #tpu.pipeline_mode<synchronous>, transform_indices = @transform_6, window_bounds = array<i64: 32, 32>}, {transform_indices = @transform_7, window_bounds = array<i64: 32, 128>}]} {
    %c0 = arith.constant 0 : index
    %c0_0 = arith.constant 0 : index
    %0 = vector.load %arg1[%c0, %c0_0] : memref<32x128xf32, #tpu.memory_space<vmem>>, vector<32x128xf32>
    %c0_1 = arith.constant 0 : index
    %c0_2 = arith.constant 0 : index
    %c0_3 = arith.constant 0 : index
    %1 = vector.load %arg2[%c0_1, %c0_2, %c0_3] : memref<1x1x128xf32, #tpu.memory_space<vmem>>, vector<1x1x128xf32>
    %2 = vector.shape_cast %1 : vector<1x1x128xf32> to vector<1x128xf32>
    %3 = vector.broadcast %2 : vector<1x128xf32> to vector<32x128xf32>
    %4 = arith.mulf %0, %3 : vector<32x128xf32>
    %c0_4 = arith.constant 0 : index
    %c0_5 = arith.constant 0 : index
    %5 = vector.load %arg4[%c0_4, %c0_5] : memref<32x32xf32, #tpu.memory_space<vmem>>, vector<32x32xf32>
    %cst = arith.constant dense<0.000000e+00> : vector<32x128xf32>
    %6 = tpu.matmul %5, %4, %cst {dimension_numbers = #tpu.dot_dimension_numbers<[1], [0], [0], [1], [0, 0, 1, 1], [], []>} : vector<32x32xf32>, vector<32x128xf32>, vector<32x128xf32> -> vector<32x128xf32>
    %c0_6 = arith.constant 0 : index
    %c0_7 = arith.constant 0 : index
    %7 = vector.load %arg5[%c0_6, %c0_7] : memref<32x32xf32, #tpu.memory_space<vmem>>, vector<32x32xf32>
    %cst_8 = arith.constant dense<0.000000e+00> : vector<32x128xf32>
    %8 = tpu.matmul %7, %4, %cst_8 {dimension_numbers = #tpu.dot_dimension_numbers<[1], [0], [0], [1], [0, 0, 1, 1], [], []>} : vector<32x32xf32>, vector<32x128xf32>, vector<32x128xf32> -> vector<32x128xf32>
    %c0_9 = arith.constant 0 : index
    %c0_10 = arith.constant 0 : index
    %9 = vector.load %arg6[%c0_9, %c0_10] : memref<32x32xf32, #tpu.memory_space<vmem>>, vector<32x32xf32>
    %cst_11 = arith.constant dense<0.000000e+00> : vector<32x128xf32>
    %10 = tpu.matmul %9, %4, %cst_11 {dimension_numbers = #tpu.dot_dimension_numbers<[1], [0], [0], [1], [0, 0, 1, 1], [], []>} : vector<32x32xf32>, vector<32x128xf32>, vector<32x128xf32> -> vector<32x128xf32>
    %11 = vector.shape_cast %6 : vector<32x128xf32> to vector<8x4x128xf32>
    %12 = vector.shape_cast %8 : vector<32x128xf32> to vector<8x4x128xf32>
    %13 = vector.shape_cast %10 : vector<32x128xf32> to vector<8x4x128xf32>
    %cst_12 = arith.constant dense<0.000000e+00> : vector<8x128x128xf32>
    %14 = tpu.matmul %11, %12, %cst_12 {dimension_numbers = #tpu.dot_dimension_numbers<[1], [1], [2], [2], [0, 0, 0, 2, 1, 2], [0], [0]>} : vector<8x4x128xf32>, vector<8x4x128xf32>, vector<8x128x128xf32> -> vector<8x128x128xf32>
    %cst_13 = arith.constant 5.000000e-01 : f32
    %15 = vector.broadcast %cst_13 : f32 to vector<8x128x128xf32>
    %16 = arith.mulf %14, %15 : vector<8x128x128xf32>
    %c0_14 = arith.constant 0 : index
    %c0_15 = arith.constant 0 : index
    %c0_16 = arith.constant 0 : index
    %17 = vector.load %arg3[%c0_14, %c0_15, %c0_16] : memref<1x128x128xf32, #tpu.memory_space<vmem>>, vector<1x128x128xf32>
    %18 = vector.shape_cast %17 : vector<1x128x128xf32> to vector<128x128xf32>
    %19 = vector.shape_cast %18 : vector<128x128xf32> to vector<1x128x128xf32>
    %20 = vector.broadcast %19 : vector<1x128x128xf32> to vector<8x128x128xf32>
    %21 = arith.addf %16, %20 : vector<8x128x128xf32>
    %cst_17 = arith.constant dense<0xFF800000> : vector<8x128xf32>
    %22 = vector.multi_reduction <maximumf>, %21, %cst_17 [2] : vector<8x128x128xf32> to vector<8x128xf32>
    %23 = vector.shape_cast %22 : vector<8x128xf32> to vector<8x128x1xf32>
    %24 = vector.broadcast %23 : vector<8x128x1xf32> to vector<8x128x128xf32>
    %25 = arith.subf %21, %24 : vector<8x128x128xf32>
    %26 = math.exp %25 : vector<8x128x128xf32>
    %cst_18 = arith.constant dense<0.000000e+00> : vector<8x128xf32>
    %27 = vector.multi_reduction <add>, %26, %cst_18 [2] : vector<8x128x128xf32> to vector<8x128xf32>
    %28 = vector.shape_cast %27 : vector<8x128xf32> to vector<8x128x1xf32>
    %29 = tpu.reciprocal %28 {approx = true} : vector<8x128x1xf32> -> vector<8x128x1xf32>
    %30 = vector.broadcast %29 : vector<8x128x1xf32> to vector<8x128x128xf32>
    %31 = arith.mulf %26, %30 : vector<8x128x128xf32>
    %cst_19 = arith.constant dense<0.000000e+00> : vector<8x4x128xf32>
    %32 = tpu.matmul %13, %31, %cst_19 {dimension_numbers = #tpu.dot_dimension_numbers<[2], [2], [1], [1], [0, 0, 0, 1, 1, 1], [0], [0]>} : vector<8x4x128xf32>, vector<8x128x128xf32>, vector<8x4x128xf32> -> vector<8x4x128xf32>
    %c0_20 = arith.constant 0 : index
    %c0_21 = arith.constant 0 : index
    %33 = vector.load %arg7[%c0_20, %c0_21] : memref<32x32xf32, #tpu.memory_space<vmem>>, vector<32x32xf32>
    %34 = vector.shape_cast %32 : vector<8x4x128xf32> to vector<32x128xf32>
    %cst_22 = arith.constant dense<0.000000e+00> : vector<32x128xf32>
    %35 = tpu.matmul %33, %34, %cst_22 {dimension_numbers = #tpu.dot_dimension_numbers<[1], [0], [0], [1], [0, 0, 1, 1], [], []>} : vector<32x32xf32>, vector<32x128xf32>, vector<32x128xf32> -> vector<32x128xf32>
    %c0_23 = arith.constant 0 : index
    %c0_24 = arith.constant 0 : index
    %36 = vector.load %arg8[%c0_23, %c0_24] : memref<32x128xf32, #tpu.memory_space<vmem>>, vector<32x128xf32>
    tpu.vector_store %arg8[%c0_23, %c0_24], %35 {strides = array<i32>} : memref<32x128xf32, #tpu.memory_space<vmem>>, vector<32x128xf32>,
    return
  }
  func.func @transform_0(%arg0: i32) -> (i32, i32) {
    %c0_i32 = arith.constant 0 : i32
    %c0_i32_0 = arith.constant 0 : i32
    return %c0_i32, %arg0 : i32, i32
  }
  func.func @transform_1(%arg0: i32) -> (i32, i32, i32) {
    %c0_i32 = arith.constant 0 : i32
    %c0_i32_0 = arith.constant 0 : i32
    %c0_i32_1 = arith.constant 0 : i32
    return %arg0, %c0_i32, %c0_i32_0 : i32, i32, i32
  }
  func.func @transform_2(%arg0: i32) -> (i32, i32, i32) {
    %c0_i32 = arith.constant 0 : i32
    %c0_i32_0 = arith.constant 0 : i32
    %c0_i32_1 = arith.constant 0 : i32
    return %arg0, %c0_i32, %c0_i32_0 : i32, i32, i32
  }
  func.func @transform_3(%arg0: i32) -> (i32, i32) {
    %c0_i32 = arith.constant 0 : i32
    %c0_i32_0 = arith.constant 0 : i32
    %c0_i32_1 = arith.constant 0 : i32
    return %c0_i32, %c0_i32_0 : i32, i32
  }
  func.func @transform_4(%arg0: i32) -> (i32, i32) {
    %c0_i32 = arith.constant 0 : i32
    %c0_i32_0 = arith.constant 0 : i32
    %c0_i32_1 = arith.constant 0 : i32
    return %c0_i32, %c0_i32_0 : i32, i32
  }
  func.func @transform_5(%arg0: i32) -> (i32, i32) {
    %c0_i32 = arith.constant 0 : i32
    %c0_i32_0 = arith.constant 0 : i32
    %c0_i32_1 = arith.constant 0 : i32
    return %c0_i32, %c0_i32_0 : i32, i32
  }
  func.func @transform_6(%arg0: i32) -> (i32, i32) {
    %c0_i32 = arith.constant 0 : i32
    %c0_i32_0 = arith.constant 0 : i32
    %c0_i32_1 = arith.constant 0 : i32
    return %c0_i32, %c0_i32_0 : i32, i32
  }
  func.func @transform_7(%arg0: i32) -> (i32, i32) {
    %c0_i32 = arith.constant 0 : i32
    %c0_i32_0 = arith.constant 0 : i32
    return %c0_i32, %arg0 : i32, i32
  }
}

</mosaic_0001>

<bundles_post_ra>
// kernel: dvrl_block_forward.2
= control target key start
LH: loop header
LB: loop body
LE: loop exit
PB: predicated region body
PF: predicated region fallthrough
CT: control target
= control target key end

     0   :  { %s5635_s0 = inlined_call_operand.vmem [shape: f32[8,256], index: 0, kind: input, shape index: {}]   ;;  %s5636_s1 = inlined_call_operand.vmem [shape: f32[2,128,128], index: 1, kind: input, shape index: {}]   ;;  %s5637_s2 = inlined_call_operand.vmem [shape: f32[2,128,128], index: 2, kind: input, shape index: {}]   ;;  %s5638_s3 = inlined_call_operand.vmem [shape: f32[16,8], index: 3, kind: input, shape index: {}]   ;;  %s5639_s4 = inlined_call_operand.vmem [shape: f32[2,16], index: 4, kind: input, shape index: {}]   ;;  %s5640_s5 = inlined_call_operand.vmem [shape: f32[2,16], index: 5, kind: input, shape index: {}]   ;;  %s5641_s6 = inlined_call_operand.vmem [shape: f32[16,1], index: 6, kind: input, shape index: {}]   ;;  %s5642_s7 = inlined_call_operand.vmem [shape: f32[16,16], index: 7, kind: input, shape index: {}]   ;;  %s5643_s8 = inlined_call_operand.vmem [shape: f32[2,16], index: 8, kind: input, shape index: {}]   ;;  %s5644_s9 = inlined_call_operand.vmem [shape: f32[2,16], index: 9, kind: input, shape index: {}]   ;;  %s5645_s10 = inlined_call_operand.vmem [shape: f32[16,1], index: 10, kind: input, shape index: {}]   ;;  %s5646_s11 = inlined_call_operand.vmem [shape: f32[16,16], index: 11, kind: input, shape index: {}]   ;;  %s5647_s12 = inlined_call_operand.vmem [shape: f32[16,16], index: 12, kind: input, shape index: {}]   ;;  %s5648_s13 = inlined_call_operand.vmem [shape: f32[2,16], index: 13, kind: input, shape index: {}]   ;;  %s5649_s14 = inlined_call_operand.vmem [shape: f32[2,16], index: 14, kind: input, shape index: {}]   ;;  %s5650_s15 = inlined_call_operand.vmem [shape: f32[16,1], index: 15, kind: input, shape index: {}]   ;;  %s5651_s16 = inlined_call_operand.vmem [shape: f32[32,256], index: 16, kind: output, shape index: {}]  }
   0x1   :  { %5682 = sst [smem:[#allocation26_spill]] %s5635_s0 }
   0x2   :  { %s3930_s21 = smov 0   ;;  %s3932_s22 = smov 0  }
   0x3   :  { %s3934_s23 = smov 0  }
   0x4 LB: > { %s3943_s24 = sadd.s32 4294967295, %s3841_s23   ;;  %s3945_s25 = sadd.s32 1, %s3841_s23   ;;  %s3841_s23 = sphi %s3934_s23, %s5743_s23   ;;  %s3837_s22 = sphi %s3932_s22, %s5742_s22   ;;  %s3833_s21 = sphi %s3930_s21, %s5741_s21  }
   0x5   : > { %s381_s26 = ssub.s32 %s3841_s23, %s3945_s25  ;;  %s384_s27 = sadd.s32 1, %s3837_s22 }
   0x6   : > { %p382_p0 = scmp.eq.s32.totalorder %s381_s26, 0  ;;  %p394_p1 = scmp.ne.s32.totalorder %s3837_s22, %s3833_s21 }
   0x7   : > { %p395_p2 = scmp.eq.s32.totalorder %s3943_s24, 1  ;;  %p3238_p3 = scmp.ge.s32.totalorder %s3841_s23, 1 }
   0x8   : > { %s3953_s28 = scalar_select %p382_p0, %s3837_s22, %s384_s27  }
   0x9   : > { %p3955_p4 = por %p395_p2, %p394_p1  ;;  %p481_p5 = scmp.lt.s32.totalorder %s3841_s23, 3 }
   0xa   : > { %5683 = sst [smem:[#allocation3_spill]] %s3953_s28 }
   0xb   : > { %p482_p6 = pnand %p3238_p3, %p481_p5 }
   0xd   : > { %485 = sbr.rel (%p482_p6) target bundleno = 2836 (0xb14), region = 84 }
  0x12   : > { %p539_p7 = scmp.lt.s32.totalorder %s3943_s24, 1  ;;  %s5685_s19 = sld [smem:[#allocation26_spill]]  ;;  %v586_v0 = vld [vmem:[%s5638_s3] sm:$0xff]  ;;  %vm588_vm0 = vcmask 64512   ;;  %v587_v2 = vld [vmem:[%s5638_s3 + $0x8] sm:$0xff]  ;;  %vm622_vm1 = vcmask 130048   ;;  %v670_v7 = vlaneseq }
  0x13   : > { %v618_v5 = vld [vmem:[%s5639_s4] sm:$0x3] }
  0x14   : > { %s3961_s30 = scalar_select %p539_p7, %s3943_s24, 1  ;;  %v619_v6 = vld [vmem:[%s5640_s5] sm:$0x3]  ;;  %v3989_v8 = vshrl.u32 %v670_v7, 7 }
  0x16   : > { %s3240_s0 = sshll.u32 %s3961_s30, 3  ;;  %v3992_v9 = vadd.s32 120, %v3989_v8  ;;  %v3995_v10 = vadd.s32 112, %v3989_v8  ;;  %v4010_v15 = vadd.s32 96, %v3989_v8  ;;  %v4013_v16 = vadd.s32 104, %v3989_v8 }
  0x17   : > { %v4022_v17 = vadd.s32 88, %v3989_v8  ;;  %v4028_v18 = vadd.s32 80, %v3989_v8  ;;  %v4034_v19 = vadd.s32 64, %v3989_v8  ;;  %v4040_v20 = vadd.s32 72, %v3989_v8 }
  0x18   : > { %s542_s20 = scalar_lea.vmem %s5685_s19, %s3240_s0  ;;  %5686 = vst [vmem:[#allocation4_spill] sm:$0xff] %v3992_v9  ;;  %3327 = vset.pattern.permute.xlu1 %v3992_v9  ;;  %3325 = vset.pattern.permute.xlu0 %v3992_v9  ;;  %v4046_v21 = vadd.s32 56, %v3989_v8  ;;  %v4055_v22 = vadd.s32 16, %v3989_v8  ;;  %v4061_v23 = vadd.s32 48, %v3989_v8  ;;  %v4067_v24 = vadd.s32 40, %v3989_v8  ;;  %s3297_s19 = sshll.u32 %s3961_s30, 7 }
  0x19   : > { %v553_v1 = vld [vmem:[%s542_s20] sm:$0xff]  ;;  %3329 = vset.pattern.permute.xlu2 %v3995_v10  ;;  %v4076_v25 = vadd.s32 32, %v3989_v8  ;;  %v4083_v26 = vadd.s32 24, %v3989_v8  ;;  %v4097_v33 = vadd.s32 8, %v3989_v8  ;;  %s4104_s27 = scalar_lea.vmem %s5636_s1, %s3297_s19  ;;  %s5031_s28 = scalar_lea.vmem %s5637_s2, %s3297_s19 }
  0x1a   : > { %610 = vmatpush.msra.mxu2 %v553_v1  ;;  %5687 = vst [vmem:[#allocation5_spill] sm:$0xff] %v4055_v22  ;;  %v569_v35 = vld [vmem:[%s4104_s27 + $0x78] sm:$0xff]  ;;  %v4117_v42 = vld [vmem:[%s4104_s27 + $0x68] sm:$0xff]  ;;  %v4146_v62 = vld [vmem:[%s4104_s27 + $0x40] sm:$0xff]  ;;  %s536_s20 = sand.u32 1, %s3833_s21   ;;  %s3294_s30 = sshll.u32 (%p3955_p4), %s3943_s24, 3 }
  0x1b   : > { %3245 = vmatmul.msk.f32.vlgmr.msra.gmra.mxu2 %vm588_vm0, %v586_v0  ;;  %5688 = vst [vmem:[#allocation6_spill] sm:$0xff] %v4097_v33  ;;  %v566_v7 = vld [vmem:[%s4104_s27 + $0x60] sm:$0xff]  ;;  %s3239_s26 = sshll.u32 %s536_s20, 5 }
  0x1c   : > { %s5579_s21 = scalar_lea.vmem [#allocation2], %s3239_s26 }
  0x23   : > { %3246 = vmatmul.msk.f32.gmra.mxu2 %vm588_vm0, %v587_v2 }
  0x9e   : > { %v3973_v3 = vpop.f32.mrf.mxu2 }
  0xa6   : > { %v3975_v4 = vpop.f32.mrf.mxu2 }
  0xa7   : > { %640 = vmatpush.msrb.mxu2 %v3975_v4 }
  0xa9   : > { %641 = vmatpush.msrb.mxu2 %v3973_v3 }
  0xaa   : > { %3247 = vmatmul.msk.f32.vlgmr.msrb.gmra.mxu2 %vm622_vm1, %v618_v5 }
  0xab   : > { %663 = vmatpush.msra.mxu2 %v3975_v4 }
  0xad   : > { %664 = vmatpush.msra.mxu2 %v3973_v3 }
  0xb2   : > { %3248 = vmatmul.msk.f32.vlgmr.msra.gmra.mxu2 %vm622_vm1, %v619_v6 }
 0x12d   : > { %v4000_v11 = vpop.f32.mrf.mxu2 }
 0x12e   : > { %v4088_v29 = vperm.slane %v4000_v11, 0  ;;  %v864_v34 = vrot.slane %v4000_v11, 1 }
 0x130   : > { %v4110_v37 = vperm.slane %v864_v34, 0 }
 0x135   : > { %v666_v12 = vpop.f32.mrf.mxu2 }
 0x136   : > { %v4002_v13 = vperm.slane %v666_v12, 0  ;;  %v4004_v14 = vperm.slane %v666_v12, 1 }
 0x138   : > { %855 = vperm.xlu2 %3329, %v4004_v14   ;;  %861 = vperm.xlu1 %3327, %v4004_v14  }
 0x139   : > { %764 = vperm.xlu0 %3325, %v4002_v13  }
 0x140   : > { %3330 = vset.pattern.permute.xlu2 %v4010_v15  ;;  %3328 = vset.pattern.permute.xlu1 %v4013_v16 }
 0x141   : > { %3326 = vset.pattern.permute.xlu0 %v3995_v10 }
 0x148   : > { %746 = vperm.xlu2 %3330, %v4002_v13   ;;  %752 = vperm.xlu1 %3328, %v4002_v13  }
 0x149   : > { %758 = vperm.xlu0 %3326, %v4002_v13  }
 0x150   : > { %3331 = vset.pattern.permute.xlu2 %v4022_v17  ;;  %849 = vperm.xlu1 %3328, %v4004_v14  }
 0x151   : > { %3332 = vset.pattern.permute.xlu0 %v4010_v15 }
 0x158   : > { %740 = vperm.xlu2 %3331, %v4002_v13   ;;  %3333 = vset.pattern.permute.xlu1 %v4028_v18 }
 0x159   : > { %843 = vperm.xlu0 %3332, %v4004_v14  }
 0x160   : > { %837 = vperm.xlu2 %3331, %v4004_v14   ;;  %734 = vperm.xlu1 %3333, %v4002_v13  }
 0x161   : > { %3336 = vset.pattern.permute.xlu0 %v4034_v19 }
 0x168   : > { %3335 = vset.pattern.permute.xlu2 %v4028_v18  ;;  %3334 = vset.pattern.permute.xlu1 %v4040_v20 }
 0x169   : > { %722 = vperm.xlu0 %3336, %v4002_v13  }
 0x170   : > { %831 = vperm.xlu2 %3335, %v4004_v14   ;;  %728 = vperm.xlu1 %3334, %v4002_v13  }
 0x171   : > { %3340 = vset.pattern.permute.xlu0 %v4046_v21 }
 0x178   : > { %3337 = vset.pattern.permute.xlu2 %v4046_v21  ;;  %825 = vperm.xlu1 %3334, %v4004_v14  }
 0x179   : > { %813 = vperm.xlu0 %3340, %v4004_v14  }
 0x180   : > { %716 = vperm.xlu2 %3337, %v4002_v13   ;;  %3338 = vset.pattern.permute.xlu1 %v4034_v19 }
 0x181   : > { %3346 = vset.pattern.permute.xlu0 %v4055_v22 }
 0x188   : > { %3339 = vset.pattern.permute.xlu2 %v4061_v23  ;;  %819 = vperm.xlu1 %3338, %v4004_v14  }
 0x189   : > { %686 = vperm.xlu0 %3346, %v4002_v13  }
 0x190   : > { %710 = vperm.xlu2 %3339, %v4002_v13   ;;  %3341 = vset.pattern.permute.xlu1 %v4067_v24 }
 0x191   : > { %3352 = vset.pattern.permute.xlu0 %v3989_v8 }
 0x192   : > { %v856_v45 = vpop.permute.xlu2 %855 }
 0x198   : > { %807 = vperm.xlu2 %3339, %v4004_v14   ;;  %704 = vperm.xlu1 %3341, %v4002_v13  }
 0x199   : > { %771 = vperm.xlu0 %3352, %v4004_v14  }
 0x1a0   : > { %3343 = vset.pattern.permute.xlu2 %v4067_v24  ;;  %3342 = vset.pattern.permute.xlu1 %v4076_v25 }
 0x1a2   : > { %v747_v46 = vpop.permute.xlu2 %746 }
 0x1a3   : > { %v881_v58 = vadd.f32 %v4088_v29, %v747_v46 }
 0x1a5   : > { %v945_v0 = vmul.f32 0.2, %v881_v58  ;;  %vm913_vm6 = vcmp.gt.f32.partialorder %v881_v58, 0.0 }
 0x1a7   : > { %v977_v11 = vsel %vm913_vm6, %v881_v58, %v945_v0 }
 0x1a8   : > { %801 = vperm.xlu2 %3343, %v4004_v14   ;;  %698 = vperm.xlu1 %3342, %v4002_v13  }
 0x1aa   : > { %v862_v27 = vpop.permute.xlu1 %861 }
 0x1ab   : > { %v765_v28 = vpop.permute.xlu0 %764  ;;  %v900_v52 = vadd.f32 %v4110_v37, %v862_v27 }
 0x1ac   : > { %v884_v30 = vadd.f32 %v4088_v29, %v765_v28 }
 0x1ad   : > { %v964_v53 = vmul.f32 0.2, %v900_v52  ;;  %vm932_vm4 = vcmp.gt.f32.partialorder %v900_v52, 0.0 }
 0x1ae   : > { %v948_v31 = vmul.f32 0.2, %v884_v30  ;;  %vm916_vm2 = vcmp.gt.f32.partialorder %v884_v30, 0.0 }
 0x1af   : > { %v996_v59 = vsel %vm932_vm4, %v900_v52, %v964_v53  ;;  %v899_v52 = vadd.f32 %v4110_v37, %v856_v45 }
 0x1b0   : > { %3345 = vset.pattern.permute.xlu2 %v4076_v25  ;;  %3344 = vset.pattern.permute.xlu1 %v4083_v26  ;;  %v980_v36 = vsel %vm916_vm2, %v884_v30, %v948_v31  ;;  %v4143_v61 = vadd.f32 %v996_v59, %v569_v35 }
 0x1b1   : > { %v4112_v38 = vadd.f32 %v980_v36, %v569_v35  ;;  %v963_v59 = vmul.f32 0.2, %v899_v52  ;;  %vm931_vm12 = vcmp.gt.f32.partialorder %v899_v52, 0.0 }
 0x1b2   : > { %v4130_v48 = vpop.permute.xlu2 %740 }
 0x1b3   : > { %v995_v0 = vsel %vm931_vm12, %v899_v52, %v963_v59 }
 0x1b8   : > { %795 = vperm.xlu2 %3345, %v4004_v14   ;;  %692 = vperm.xlu1 %3344, %v4002_v13  }
 0x1ba   : > { %v4094_v32 = vpop.permute.xlu1 %752  ;;  %v838_v50 = vpop.permute.xlu2 %837 }
 0x1bb   : > { %v759_v55 = vpop.permute.xlu0 %758  ;;  %v882_v34 = vadd.f32 %v4088_v29, %v4094_v32 }
 0x1bc   : > { %v883_v12 = vadd.f32 %v4088_v29, %v759_v55  ;;  %v564_v55 = vld [vmem:[%s4104_s27 + $0x50] sm:$0xff] }
 0x1bd   : > { %vm914_vm10 = vcmp.gt.f32.partialorder %v882_v34, 0.0 }
 0x1be   : > { %v947_v28 = vmul.f32 0.2, %v883_v12  ;;  %vm915_vm8 = vcmp.gt.f32.partialorder %v883_v12, 0.0 }
 0x1c0   : > { %3347 = vset.pattern.permute.xlu2 %v4083_v26  ;;  %3348 = vset.pattern.permute.xlu1 %v4097_v33  ;;  %v979_v35 = vsel %vm915_vm8, %v883_v12, %v947_v28 }
 0x1c2   : > { %v850_v39 = vpop.permute.xlu1 %849 }
 0x1c3   : > { %v898_v40 = vadd.f32 %v4110_v37, %v850_v39  ;;  %1059 = vmax.xlane.f32.xlu0 %v4112_v38  ;;  %v568_v39 = vld [vmem:[%s4104_s27 + $0x70] sm:$0xff] }
 0x1c5   : > { %v962_v41 = vmul.f32 0.2, %v898_v40  ;;  %vm930_vm3 = vcmp.gt.f32.partialorder %v898_v40, 0.0 }
 0x1c7   : > { %v994_v43 = vsel %vm930_vm3, %v898_v40, %v962_v41  ;;  %v4169_v41 = vadd.f32 %v979_v35, %v568_v39 }
 0x1c8   : > { %789 = vperm.xlu2 %3347, %v4004_v14   ;;  %680 = vperm.xlu1 %3348, %v4002_v13   ;;  %v4122_v44 = vadd.f32 %v994_v43, %v4117_v42  ;;  %v946_v43 = vmul.f32 0.2, %v882_v34 }
 0x1ca   : > { %v4139_v54 = vpop.permute.xlu2 %831  ;;  %v978_v53 = vsel %vm914_vm10, %v882_v34, %v946_v43 }
 0x1cb   : > { %1087 = vmax.xlane.f32.xlu0 %v4122_v44  ;;  %v844_v5 = vpop.permute.xlu0 %843  ;;  %v4181_v58 = vadd.f32 %v978_v53, %v4117_v42  ;;  %v565_v42 = vld [vmem:[%s4104_s27 + $0x58] sm:$0xff] }
 0x1cc   : > { %v897_v6 = vadd.f32 %v4110_v37, %v844_v5 }
 0x1ce   : > { %vm929_vm7 = vcmp.gt.f32.partialorder %v897_v6, 0.0 }
 0x1d0   : > { %3349 = vset.pattern.permute.xlu2 %v4055_v22  ;;  %3350 = vset.pattern.permute.xlu1 %v3989_v8 }
 0x1d2   : > { %v735_v47 = vpop.permute.xlu1 %734 }
 0x1d3   : > { %v879_v30 = vadd.f32 %v4088_v29, %v735_v47  ;;  %v896_v47 = vadd.f32 %v4110_v37, %v838_v50 }
 0x1d5   : > { %v943_v40 = vmul.f32 0.2, %v879_v30  ;;  %vm911_vm9 = vcmp.gt.f32.partialorder %v879_v30, 0.0  ;;  %vm928_vm11 = vcmp.gt.f32.partialorder %v896_v47, 0.0 }
 0x1d7   : > { %v975_v32 = vsel %vm911_vm9, %v879_v30, %v943_v40  ;;  %v895_v30 = vadd.f32 %v4110_v37, %v4139_v54 }
 0x1d8   : > { %783 = vperm.xlu2 %3349, %v4004_v14   ;;  %674 = vperm.xlu1 %3350, %v4002_v13   ;;  %v4158_v13 = vadd.f32 %v977_v11, %v566_v7 }
 0x1d9   : > { %v959_v40 = vmul.f32 0.2, %v895_v30  ;;  %vm927_vm0 = vcmp.gt.f32.partialorder %v895_v30, 0.0 }
 0x1da   : > { %v4148_v1 = vpop.permute.xlu2 %716 }
 0x1db   : > { %v723_v12 = vpop.permute.xlu0 %722  ;;  %v991_v53 = vsel %vm927_vm0, %v895_v30, %v959_v40 }
 0x1e0   : > { %3351 = vset.pattern.permute.xlu1 %v4097_v33 }
 0x1e2   : > { %v4132_v49 = vpop.permute.xlu1 %728 }
 0x1e3   : > { %v878_v45 = vadd.f32 %v4088_v29, %v4132_v49  ;;  %v877_v49 = vadd.f32 %v4088_v29, %v723_v12 }
 0x1e5   : > { %vm910_vm13 = vcmp.gt.f32.partialorder %v878_v45, 0.0  ;;  %v941_v35 = vmul.f32 0.2, %v877_v49  ;;  %vm909_vm15 = vcmp.gt.f32.partialorder %v877_v49, 0.0 }
 0x1e7   : > { %v973_v54 = vsel %vm909_vm15, %v877_v49, %v941_v35 }
 0x1e8   : > { %777 = vperm.xlu1 %3351, %v4004_v14   ;;  %v961_v14 = vmul.f32 0.2, %v897_v6 }
 0x1ea   : > { %v4136_v51 = vpop.permute.xlu1 %825  ;;  %v4160_v27 = vpop.permute.xlu2 %710  ;;  %v993_v31 = vsel %vm929_vm7, %v897_v6, %v961_v14  ;;  %v942_v6 = vmul.f32 0.2, %v878_v45 }
 0x1eb   : > { %v4166_v36 = vadd.f32 %v993_v31, %v566_v7  ;;  %v4194_v7 = vadd.f32 %v995_v0, %v568_v39  ;;  %v894_v52 = vadd.f32 %v4110_v37, %v4136_v51 }
 0x1ec   : > { %v974_v28 = vsel %vm910_vm13, %v878_v45, %v942_v6  ;;  %v4219_v45 = vadd.f32 %v991_v53, %v564_v55 }
 0x1ed   : > { %vm926_vm3 = vcmp.gt.f32.partialorder %v894_v52, 0.0 }
 0x1f0   : > { %3355 = vset.pattern.permute.xlu1 %v3992_v9 }
 0x1f2   : > { %v4172_v46 = vpop.permute.xlu2 %807 }
 0x1fa   : > { %v820_v56 = vpop.permute.xlu1 %819 }
 0x1fb   : > { %v893_v57 = vadd.f32 %v4110_v37, %v820_v56  ;;  %v4178_v56 = vadd.f32 %v975_v32, %v564_v55  ;;  %v876_v32 = vadd.f32 %v4088_v29, %v4148_v1  ;;  %v875_v55 = vadd.f32 %v4088_v29, %v4160_v27 }
 0x1fd   : > { %v957_v60 = vmul.f32 0.2, %v893_v57  ;;  %vm925_vm5 = vcmp.gt.f32.partialorder %v893_v57, 0.0  ;;  %v940_v59 = vmul.f32 0.2, %v876_v32  ;;  %vm908_vm2 = vcmp.gt.f32.partialorder %v876_v32, 0.0 }
 0x1fe   : > { %vm907_vm6 = vcmp.gt.f32.partialorder %v875_v55, 0.0 }
 0x1ff   : > { %v989_v63 = vsel %vm925_vm5, %v893_v57, %v957_v60  ;;  %v960_v57 = vmul.f32 0.2, %v896_v47  ;;  %v972_v6 = vsel %vm908_vm2, %v876_v32, %v940_v59  ;;  %v891_v32 = vadd.f32 %v4110_v37, %v4172_v46  ;;  %v560_v59 = vld [vmem:[%s4104_s27 + $0x30] sm:$0xff] }
 0x200   : > { %v4151_v2 = vadd.f32 %v989_v63, %v4146_v62  ;;  %v880_v63 = vadd.f32 %v4088_v29, %v4130_v48  ;;  %v563_v48 = vld [vmem:[%s4104_s27 + $0x48] sm:$0xff] }
 0x201   : > { %1091 = vmax.xlane.f32.xlu2 %v4143_v61  ;;  %v992_v50 = vsel %vm928_vm11, %v896_v47, %v960_v57  ;;  %v4204_v34 = vadd.f32 %v974_v28, %v563_v48  ;;  %v4217_v57 = vadd.f32 %v973_v54, %v4146_v62  ;;  %v561_v62 = vld [vmem:[%s4104_s27 + $0x38] sm:$0xff]  ;;  %v4231_v28 = vld [vmem:[%s4104_s27 + $0x10] sm:$0xff]  ;;  %v939_v54 = vmul.f32 0.2, %v875_v55 }
 0x202   : > { %1077 = vmax.xlane.f32.xlu0 %v4151_v2  ;;  %v4184_v60 = vpop.permute.xlu2 %801  ;;  %v4192_v5 = vadd.f32 %v992_v50, %v565_v42  ;;  %v944_v11 = vmul.f32 0.2, %v880_v63  ;;  %vm912_vm14 = vcmp.gt.f32.partialorder %v880_v63, 0.0  ;;  %v958_v50 = vmul.f32 0.2, %v894_v52 }
 0x203   : > { %v4228_v49 = vadd.f32 %v972_v6, %v561_v62  ;;  %vm923_vm7 = vcmp.gt.f32.partialorder %v891_v32, 0.0  ;;  %v890_v46 = vadd.f32 %v4110_v37, %v4184_v60 }
 0x204   : > { %v976_v31 = vsel %vm912_vm14, %v880_v63, %v944_v11  ;;  %v814_v63 = vpop.permute.xlu0 %813  ;;  %v990_v12 = vsel %vm926_vm3, %v894_v52, %v958_v50 }
 0x205   : > { %v4206_v39 = vadd.f32 %v976_v31, %v565_v42  ;;  %v892_v42 = vadd.f32 %v4110_v37, %v814_v63  ;;  %v4236_v40 = vadd.f32 %v990_v12, %v563_v48  ;;  %v971_v48 = vsel %vm907_vm6, %v875_v55, %v939_v54 }
 0x206   : > { %v955_v63 = vmul.f32 0.2, %v891_v32  ;;  %v954_v12 = vmul.f32 0.2, %v890_v46  ;;  %vm922_vm9 = vcmp.gt.f32.partialorder %v890_v46, 0.0 }
 0x207   : > { %v956_v31 = vmul.f32 0.2, %v892_v42  ;;  %vm924_vm5 = vcmp.gt.f32.partialorder %v892_v42, 0.0 }
 0x209   : > { %1053 = vmax.xlane.f32.xlu2 %v4158_v13  ;;  %v988_v52 = vsel %vm924_vm5, %v892_v42, %v956_v31 }
 0x20a   : > { %v705_v43 = vpop.permute.xlu1 %704  ;;  %v4245_v50 = vadd.f32 %v988_v52, %v561_v62 }
 0x20b   : > { %v874_v53 = vadd.f32 %v4088_v29, %v705_v43  ;;  %v987_v43 = vsel %vm923_vm7, %v891_v32, %v955_v63  ;;  %v986_v32 = vsel %vm922_vm9, %v890_v46, %v954_v12  ;;  %v554_v63 = vld [vmem:[%s4104_s27] sm:$0xff]  ;;  %v557_v12 = vld [vmem:[%s4104_s27 + $0x18] sm:$0xff] }
 0x20c   : > { %v4254_v62 = vadd.f32 %v987_v43, %v560_v59  ;;  %v558_v43 = vld [vmem:[%s4104_s27 + $0x20] sm:$0xff] }
 0x20d   : > { %vm906_vm8 = vcmp.gt.f32.partialorder %v874_v53, 0.0 }
 0x211   : > { %1085 = vmax.xlane.f32.xlu2 %v4166_v36 }
 0x212   : > { %1057 = vmax.xlane.f32.xlu1 %v4169_v41  ;;  %v4197_v14 = vpop.permute.xlu2 %795 }
 0x219   : > { %1049 = vmax.xlane.f32.xlu2 %v4178_v56 }
 0x21a   : > { %1055 = vmax.xlane.f32.xlu1 %v4181_v58  ;;  %v699_v0 = vpop.permute.xlu1 %698 }
 0x21b   : > { %v873_v42 = vadd.f32 %v4088_v29, %v699_v0  ;;  %v889_v0 = vadd.f32 %v4110_v37, %v4197_v14 }
 0x21d   : > { %v937_v31 = vmul.f32 0.2, %v873_v42  ;;  %vm905_vm10 = vcmp.gt.f32.partialorder %v873_v42, 0.0  ;;  %v953_v9 = vmul.f32 0.2, %v889_v0  ;;  %vm921_vm12 = vcmp.gt.f32.partialorder %v889_v0, 0.0 }
 0x221   : > { %1083 = vmax.xlane.f32.xlu2 %v4192_v5 }
 0x222   : > { %1089 = vmax.xlane.f32.xlu1 %v4194_v7  ;;  %v4209_v47 = vpop.permute.xlu2 %789 }
 0x223   : > { %v888_v46 = vadd.f32 %v4110_v37, %v4209_v47 }
 0x225   : > { %vm920_vm15 = vcmp.gt.f32.partialorder %v888_v46, 0.0 }
 0x229   : > { %1047 = vmax.xlane.f32.xlu2 %v4204_v34 }
 0x22a   : > { %1051 = vmax.xlane.f32.xlu1 %v4206_v39  ;;  %v693_v27 = vpop.permute.xlu1 %692 }
 0x22b   : > { %v872_v52 = vadd.f32 %v4088_v29, %v693_v27  ;;  %v985_v27 = vsel %vm921_vm12, %v889_v0, %v953_v9 }
 0x22d   : > { %v936_v33 = vmul.f32 0.2, %v872_v52  ;;  %vm904_vm13 = vcmp.gt.f32.partialorder %v872_v52, 0.0 }
 0x231   : > { %1045 = vmax.xlane.f32.xlu2 %v4217_v57 }
 0x232   : > { %v784_v1 = vpop.permute.xlu2 %783  ;;  %1081 = vmax.xlane.f32.xlu1 %v4219_v45 }
 0x233   : > { %v887_v51 = vadd.f32 %v4110_v37, %v784_v1  ;;  %v4247_v1 = vadd.f32 %v971_v48, %v560_v59  ;;  %v969_v59 = vsel %vm905_vm10, %v873_v42, %v937_v31  ;;  %v968_v42 = vsel %vm904_vm13, %v872_v52, %v936_v33 }
 0x235   : > { %v951_v11 = vmul.f32 0.2, %v887_v51  ;;  %vm919_vm4 = vcmp.gt.f32.partialorder %v887_v51, 0.0 }
 0x237   : > { %v983_v30 = vsel %vm919_vm4, %v887_v51, %v951_v11  ;;  %v938_v51 = vmul.f32 0.2, %v874_v53  ;;  %v559_v11 = vld [vmem:[%s4104_s27 + $0x28] sm:$0xff] }
 0x238   : > { %v4234_v35 = vadd.f32 %v983_v30, %v4231_v28  ;;  %v4265_v48 = vadd.f32 %v986_v32, %v559_v11  ;;  %v4282_v32 = vadd.f32 %v968_v42, %v557_v12 }
 0x239   : > { %1043 = vmax.xlane.f32.xlu2 %v4228_v49  ;;  %v970_v55 = vsel %vm906_vm8, %v874_v53, %v938_v51 }
 0x23a   : > { %1065 = vmax.xlane.f32.xlu0 %v4234_v35  ;;  %1079 = vmax.xlane.f32.xlu1 %v4236_v40  ;;  %v681_v6 = vpop.permute.xlu1 %680  ;;  %v4257_v30 = vadd.f32 %v970_v55, %v559_v11  ;;  %v687_v55 = vpop.permute.xlu0 %686  ;;  %v4279_v11 = vadd.f32 %v985_v27, %v558_v43 }
 0x23b   : > { %v871_v14 = vadd.f32 %v4088_v29, %v687_v55  ;;  %v870_v33 = vadd.f32 %v4088_v29, %v681_v6  ;;  %v555_v6 = vld [vmem:[%s4104_s27 + $0x8] sm:$0xff] }
 0x23d   : > { %v935_v31 = vmul.f32 0.2, %v871_v14  ;;  %vm903_vm14 = vcmp.gt.f32.partialorder %v871_v14, 0.0  ;;  %v934_v27 = vmul.f32 0.2, %v870_v33  ;;  %vm902_vm2 = vcmp.gt.f32.partialorder %v870_v33, 0.0 }
 0x23f   : > { %v967_v47 = vsel %vm903_vm14, %v871_v14, %v935_v31 }
 0x240   : > { %v4289_v52 = vadd.f32 %v967_v47, %v4231_v28 }
 0x241   : > { %1075 = vmax.xlane.f32.xlu2 %v4245_v50 }
 0x242   : > { %1041 = vmax.xlane.f32.xlu1 %v4247_v1 }
 0x249   : > { %1073 = vmax.xlane.f32.xlu2 %v4254_v62 }
 0x24a   : > { %v675_v54 = vpop.permute.xlu1 %674  ;;  %1039 = vmax.xlane.f32.xlu1 %v4257_v30 }
 0x24b   : > { %v869_v60 = vadd.f32 %v4088_v29, %v675_v54  ;;  %v4271_v54 = vadd.f32 %v969_v59, %v558_v43 }
 0x24d   : > { %v933_v53 = vmul.f32 0.2, %v869_v60  ;;  %vm901_vm11 = vcmp.gt.f32.partialorder %v869_v60, 0.0 }
 0x24f   : > { %v965_v51 = vsel %vm901_vm11, %v869_v60, %v933_v53  ;;  %v772_v60 = vpop.permute.xlu0 %771  ;;  %v952_v53 = vmul.f32 0.2, %v888_v46 }
 0x250   : > { %v4269_v22 = vadd.f32 %v965_v51, %v554_v63  ;;  %v885_v14 = vadd.f32 %v4110_v37, %v772_v60 }
 0x251   : > { %1071 = vmax.xlane.f32.xlu2 %v4265_v48  ;;  %v984_v0 = vsel %vm920_vm15, %v888_v46, %v952_v53  ;;  %v966_v46 = vsel %vm902_vm2, %v870_v33, %v934_v27 }
 0x252   : > { %1029 = vmax.xlane.f32.xlu0 %v4269_v22  ;;  %1037 = vmax.xlane.f32.xlu1 %v4271_v54  ;;  %v4291_v55 = vadd.f32 %v984_v0, %v557_v12  ;;  %v949_v53 = vmul.f32 0.2, %v885_v14  ;;  %v4300_v12 = vadd.f32 %v966_v46, %v555_v6  ;;  %vm917_vm3 = vcmp.gt.f32.partialorder %v885_v14, 0.0 }
 0x257   : > { %v1060_v51 = vpop.xlane.xlu0 %1059 }
 0x258   : > { %v1108_v42 = vsub.f32 %v4112_v38, %v1060_v51 }
 0x259   : > { %1069 = vmax.xlane.f32.xlu2 %v4279_v11 }
 0x25a   : > { %v778_v59 = vpop.permute.xlu1 %777  ;;  %1035 = vmax.xlane.f32.xlu1 %v4282_v32  ;;  %v1155_v28 = vmul.f32 1.442695, %v1108_v42 }
 0x25b   : > { %v886_v9 = vadd.f32 %v4110_v37, %v778_v59  ;;  %v981_v59 = vsel %vm917_vm3, %v885_v14, %v949_v53 }
 0x25c   : > { %3415 = vpow2.f32 %v1155_v28  ;;  %v4304_v47 = vadd.f32 %v981_v59, %v554_v63 }
 0x25d   : > { %v950_v43 = vmul.f32 0.2, %v886_v9  ;;  %vm918_vm0 = vcmp.gt.f32.partialorder %v886_v9, 0.0 }
 0x25f   : > { %v982_v29 = vsel %vm918_vm0, %v886_v9, %v950_v43  ;;  %v1088_v63 = vpop.xlane.xlu0 %1087 }
 0x260   : > { %v4298_v31 = vadd.f32 %v982_v29, %v555_v6  ;;  %v1122_v14 = vsub.f32 %v4122_v44, %v1088_v63 }
 0x261   : > { %1033 = vmax.xlane.f32.xlu2 %v4289_v52 }
 0x262   : > { %1067 = vmax.xlane.f32.xlu1 %v4291_v55  ;;  %v4306_v38 = vpop.eup %3415  ;;  %v1183_v6 = vmul.f32 1.442695, %v1122_v14 }
 0x269   : > { %1063 = vmax.xlane.f32.xlu2 %v4298_v31 }
 0x26a   : > { %1031 = vmax.xlane.f32.xlu1 %v4300_v12 }
 0x271   : > { %1061 = vmax.xlane.f32.xlu2 %v4304_v47 }
 0x272   : > { %1219 = vadd.xlane.f32.xlu1 %v4306_v38 }
 0x274   : > { %v1092_v37 = vpop.xlane.xlu2 %1091 }
 0x275   : > { %v1124_v60 = vsub.f32 %v4143_v61, %v1092_v37 }
 0x277   : > { %v1187_v9 = vmul.f32 1.442695, %v1124_v60 }
 0x279   : > { %3417 = vpow2.f32 %v1187_v9 }
 0x27c   : > { %v1054_v33 = vpop.xlane.xlu2 %1053 }
 0x27f   : > { %v4311_v0 = vpop.eup %3417 }
 0x280   : > { %1251 = vadd.xlane.f32.xlu2 %v4311_v0 }
 0x284   : > { %v1086_v51 = vpop.xlane.xlu2 %1085 }
 0x285   : > { %v1058_v43 = vpop.xlane.xlu1 %1057 }
 0x286   : > { %v1107_v27 = vsub.f32 %v4169_v41, %v1058_v43  ;;  %v1121_v41 = vsub.f32 %v4166_v36, %v1086_v51 }
 0x288   : > { %v1153_v42 = vmul.f32 1.442695, %v1107_v27  ;;  %v1181_v63 = vmul.f32 1.442695, %v1121_v41 }
 0x28a   : > { %3419 = vpow2.f32 %v1153_v42 }
 0x28b   : > { %3421 = vpow2.f32 %v1183_v6 }
 0x28c   : > { %v1050_v29 = vpop.xlane.xlu2 %1049 }
 0x28d   : > { %v1056_v46 = vpop.xlane.xlu1 %1055  ;;  %v1103_v59 = vsub.f32 %v4178_v56, %v1050_v29  ;;  %v1105_v56 = vsub.f32 %v4158_v13, %v1054_v33 }
 0x28e   : > { %v1106_v61 = vsub.f32 %v4181_v58, %v1056_v46 }
 0x28f   : > { %v1145_v60 = vmul.f32 1.442695, %v1103_v59 }
 0x290   : > { %v4317_v28 = vpop.eup %3419  ;;  %v1151_v53 = vmul.f32 1.442695, %v1106_v61 }
 0x291   : > { %1217 = vadd.xlane.f32.xlu0 %v4317_v28  ;;  %v4323_v43 = vpop.eup %3421 }
 0x292   : > { %3423 = vpow2.f32 %v1151_v53 }
 0x293   : > { %3425 = vpow2.f32 %v1145_v60 }
 0x294   : > { %v1084_v37 = vpop.xlane.xlu2 %1083 }
 0x295   : > { %v1090_v44 = vpop.xlane.xlu1 %1089  ;;  %v1120_v60 = vsub.f32 %v4192_v5, %v1084_v37 }
 0x296   : > { %v1123_v9 = vsub.f32 %v4194_v7, %v1090_v44  ;;  %v1149_v7 = vmul.f32 1.442695, %v1105_v56 }
 0x298   : > { %v4325_v58 = vpop.eup %3423  ;;  %v1185_v27 = vmul.f32 1.442695, %v1123_v9 }
 0x299   : > { %1215 = vadd.xlane.f32.xlu2 %v4325_v58  ;;  %1247 = vadd.xlane.f32.xlu0 %v4323_v43  ;;  %v4331_v14 = vpop.eup %3425 }
 0x29a   : > { %3427 = vpow2.f32 %v1185_v27 }
 0x29b   : > { %3429 = vpow2.f32 %v1181_v63 }
 0x29c   : > { %v1048_v36 = vpop.xlane.xlu2 %1047 }
 0x29d   : > { %v1102_v51 = vsub.f32 %v4204_v34, %v1048_v36  ;;  %v1052_v42 = vpop.xlane.xlu1 %1051 }
 0x29e   : > { %v1104_v61 = vsub.f32 %v4206_v39, %v1052_v42  ;;  %v1179_v39 = vmul.f32 1.442695, %v1120_v60 }
 0x29f   : > { %v1143_v29 = vmul.f32 1.442695, %v1102_v51 }
 0x2a0   : > { %v4333_v6 = vpop.eup %3427  ;;  %v1147_v34 = vmul.f32 1.442695, %v1104_v61 }
 0x2a1   : > { %v4335_v46 = vpop.eup %3429  ;;  %3431 = vpow2.f32 %v1143_v29  ;;  %1209 = vadd.xlane.f32.xlu2 %v4331_v14  ;;  %1249 = vadd.xlane.f32.xlu1 %v4333_v6 }
 0x2a2   : > { %3433 = vpow2.f32 %v1149_v7  ;;  %1245 = vadd.xlane.f32.xlu0 %v4335_v46 }
 0x2a3   : > { %3435 = vpow2.f32 %v1147_v34 }
 0x2a4   : > { %v1046_v13 = vpop.xlane.xlu2 %1045 }
 0x2a5   : > { %v1082_v33 = vpop.xlane.xlu1 %1081  ;;  %v1101_v5 = vsub.f32 %v4217_v57, %v1046_v13 }
 0x2a6   : > { %v1119_v53 = vsub.f32 %v4219_v45, %v1082_v33  ;;  %v1078_v33 = vpop.xlane.xlu0 %1077 }
 0x2a7   : > { %v4342_v59 = vpop.eup %3431  ;;  %v1141_v42 = vmul.f32 1.442695, %v1101_v5 }
 0x2a8   : > { %v4344_v41 = vpop.eup %3433  ;;  %v1177_v44 = vmul.f32 1.442695, %v1119_v53 }
 0x2a9   : > { %1213 = vadd.xlane.f32.xlu1 %v4344_v41  ;;  %v4351_v56 = vpop.eup %3435 }
 0x2aa   : > { %3437 = vpow2.f32 %v1177_v44  ;;  %1207 = vadd.xlane.f32.xlu0 %v4342_v59 }
 0x2ab   : > { %3439 = vpow2.f32 %v1179_v39 }
 0x2ac   : > { %v1044_v9 = vpop.xlane.xlu2 %1043 }
 0x2ad   : > { %v1100_v63 = vsub.f32 %v4228_v49, %v1044_v9  ;;  %v1080_v27 = vpop.xlane.xlu1 %1079 }
 0x2ae   : > { %v1118_v45 = vsub.f32 %v4236_v40, %v1080_v27 }
 0x2af   : > { %v1139_v36 = vmul.f32 1.442695, %v1100_v63 }
 0x2b0   : > { %v4353_v51 = vpop.eup %3437  ;;  %v1175_v37 = vmul.f32 1.442695, %v1118_v45 }
 0x2b1   : > { %3441 = vpow2.f32 %v1139_v36  ;;  %1241 = vadd.xlane.f32.xlu2 %v4353_v51  ;;  %1211 = vadd.xlane.f32.xlu1 %v4351_v56  ;;  %v4359_v29 = vpop.eup %3439 }
 0x2b2   : > { %3443 = vpow2.f32 %v1175_v37 }
 0x2b3   : > { %3445 = vpow2.f32 %v1141_v42 }
 0x2b4   : > { %v1076_v49 = vpop.xlane.xlu2 %1075 }
 0x2b5   : > { %v1116_v7 = vsub.f32 %v4245_v50, %v1076_v49  ;;  %v1042_v40 = vpop.xlane.xlu1 %1041  ;;  %v1117_v50 = vsub.f32 %v4151_v2, %v1078_v33 }
 0x2b6   : > { %v1099_v61 = vsub.f32 %v4247_v1, %v1042_v40 }
 0x2b7   : > { %v4362_v34 = vpop.eup %3441  ;;  %v1171_v57 = vmul.f32 1.442695, %v1116_v7  ;;  %v1173_v9 = vmul.f32 1.442695, %v1117_v50 }
 0x2b8   : > { %v4364_v13 = vpop.eup %3443  ;;  %v1137_v53 = vmul.f32 1.442695, %v1099_v61 }
 0x2b9   : > { %3447 = vpow2.f32 %v1171_v57  ;;  %1203 = vadd.xlane.f32.xlu2 %v4362_v34  ;;  %1243 = vadd.xlane.f32.xlu1 %v4359_v29  ;;  %v4371_v39 = vpop.eup %3445  ;;  %v1066_v57 = vpop.xlane.xlu0 %1065 }
 0x2ba   : > { %3449 = vpow2.f32 %v1137_v53  ;;  %1239 = vadd.xlane.f32.xlu0 %v4364_v13 }
 0x2bc   : > { %v1074_v60 = vpop.xlane.xlu2 %1073 }
 0x2bd   : > { %v1115_v1 = vsub.f32 %v4254_v62, %v1074_v60  ;;  %v1040_v44 = vpop.xlane.xlu1 %1039 }
 0x2be   : > { %v1098_v36 = vsub.f32 %v4257_v30, %v1040_v44 }
 0x2bf   : > { %v4373_v63 = vpop.eup %3447  ;;  %v1169_v27 = vmul.f32 1.442695, %v1115_v1 }
 0x2c0   : > { %v4375_v45 = vpop.eup %3449  ;;  %v1135_v62 = vmul.f32 1.442695, %v1098_v36 }
 0x2c1   : > { %3451 = vpow2.f32 %v1169_v27  ;;  %1235 = vadd.xlane.f32.xlu2 %v4373_v63  ;;  %1205 = vadd.xlane.f32.xlu1 %v4371_v39 }
 0x2c2   : > { %3453 = vpow2.f32 %v1173_v9  ;;  %1201 = vadd.xlane.f32.xlu0 %v4375_v45 }
 0x2c3   : > { %3455 = vpow2.f32 %v1135_v62 }
 0x2c4   : > { %v1072_v2 = vpop.xlane.xlu2 %1071 }
 0x2c5   : > { %v1038_v5 = vpop.xlane.xlu1 %1037  ;;  %v1114_v30 = vsub.f32 %v4265_v48, %v1072_v2  ;;  %v1030_v27 = vpop.xlane.xlu0 %1029 }
 0x2c6   : > { %v1097_v37 = vsub.f32 %v4271_v54, %v1038_v5 }
 0x2c7   : > { %v4382_v42 = vpop.eup %3451  ;;  %v1167_v50 = vmul.f32 1.442695, %v1114_v30 }
 0x2c8   : > { %v4384_v49 = vpop.eup %3453  ;;  %v1133_v7 = vmul.f32 1.442695, %v1097_v37 }
 0x2c9   : > { %1237 = vadd.xlane.f32.xlu1 %v4384_v49  ;;  %v4391_v53 = vpop.eup %3455 }
 0x2ca   : > { %3457 = vpow2.f32 %v1133_v7  ;;  %1233 = vadd.xlane.f32.xlu0 %v4382_v42  ;;  %v1093_v7 = vsub.f32 %v4269_v22, %v1030_v27 }
 0x2cc   : > { %v1070_v40 = vpop.xlane.xlu2 %1069  ;;  %v1125_v30 = vmul.f32 1.442695, %v1093_v7 }
 0x2cd   : > { %v1113_v61 = vsub.f32 %v4279_v11, %v1070_v40  ;;  %v1036_v33 = vpop.xlane.xlu1 %1035 }
 0x2ce   : > { %v1096_v54 = vsub.f32 %v4282_v32, %v1036_v33 }
 0x2cf   : > { %v1165_v60 = vmul.f32 1.442695, %v1113_v61 }
 0x2d0   : > { %v4393_v1 = vpop.eup %3457  ;;  %v1131_v44 = vmul.f32 1.442695, %v1096_v54 }
 0x2d1   : > { %3459 = vpow2.f32 %v1165_v60  ;;  %1197 = vadd.xlane.f32.xlu2 %v4393_v1  ;;  %1199 = vadd.xlane.f32.xlu1 %v4391_v53 }
 0x2d2   : > { %3461 = vpow2.f32 %v1131_v44 }
 0x2d3   : > { %3463 = vpow2.f32 %v1167_v50 }
 0x2d4   : > { %v1034_v48 = vpop.xlane.xlu2 %1033 }
 0x2d5   : > { %v1095_v11 = vsub.f32 %v4289_v52, %v1034_v48  ;;  %v1068_v9 = vpop.xlane.xlu1 %1067  ;;  %v1111_v52 = vsub.f32 %v4234_v35, %v1066_v57 }
 0x2d6   : > { %v1112_v32 = vsub.f32 %v4291_v55, %v1068_v9 }
 0x2d7   : > { %v4399_v36 = vpop.eup %3459  ;;  %v1129_v2 = vmul.f32 1.442695, %v1095_v11  ;;  %v1161_v54 = vmul.f32 1.442695, %v1111_v52 }
 0x2d8   : > { %v4401_v62 = vpop.eup %3461  ;;  %v1163_v5 = vmul.f32 1.442695, %v1112_v32 }
 0x2d9   : > { %v4403_v37 = vpop.eup %3463  ;;  %3465 = vpow2.f32 %v1129_v2  ;;  %1229 = vadd.xlane.f32.xlu2 %v4399_v36  ;;  %1195 = vadd.xlane.f32.xlu0 %v4401_v62 }
 0x2da   : > { %3467 = vpow2.f32 %v1163_v5  ;;  %1231 = vadd.xlane.f32.xlu1 %v4403_v37 }
 0x2db   : > { %3469 = vpow2.f32 %v1125_v30 }
 0x2dc   : > { %v1064_v55 = vpop.xlane.xlu2 %1063 }
 0x2dd   : > { %v1032_v40 = vpop.xlane.xlu1 %1031  ;;  %v1110_v60 = vsub.f32 %v4298_v31, %v1064_v55 }
 0x2de   : > { %v1094_v61 = vsub.f32 %v4300_v12, %v1032_v40 }
 0x2df   : > { %v4411_v33 = vpop.eup %3465  ;;  %v1159_v12 = vmul.f32 1.442695, %v1110_v60 }
 0x2e0   : > { %v4413_v50 = vpop.eup %3467  ;;  %v1127_v22 = vmul.f32 1.442695, %v1094_v61 }
 0x2e1   : > { %1227 = vadd.xlane.f32.xlu0 %v4413_v50  ;;  %v4419_v48 = vpop.eup %3469 }
 0x2e2   : > { %3471 = vpow2.f32 %v1127_v22  ;;  %1193 = vadd.xlane.f32.xlu1 %v4411_v33 }
 0x2e3   : > { %3473 = vpow2.f32 %v1161_v54 }
 0x2e4   : > { %v1062_v35 = vpop.xlane.xlu2 %1061 }
 0x2e5   : > { %v1109_v57 = vsub.f32 %v4304_v47, %v1062_v35  ;;  %v1220_v44 = vpop.xlane.xlu1 %1219 }
 0x2e6   : > { %3475 = vrcp.f32 %v1220_v44 }
 0x2e7   : > { %v1157_v11 = vmul.f32 1.442695, %v1109_v57 }
 0x2e8   : > { %v4421_v9 = vpop.eup %3471 }
 0x2e9   : > { %v4423_v27 = vpop.eup %3473  ;;  %3477 = vpow2.f32 %v1157_v11  ;;  %1191 = vadd.xlane.f32.xlu2 %v4421_v9  ;;  %1189 = vadd.xlane.f32.xlu0 %v4419_v48 }
 0x2ea   : > { %3479 = vpow2.f32 %v1159_v12  ;;  %1225 = vadd.xlane.f32.xlu1 %v4423_v27 }
 0x2ec   : > { %v3476_v31 = vpop.eup %3475 }
 0x2ed   : > { %v1300_v47 = vmul.f32 %v3476_v31, %v4306_v38 }
 0x2ef   : > { %v4429_v32 = vpop.eup %3477  ;;  %1317 = vmatpush.xpose.msra.mxu3 %v1300_v47 }
 0x2f0   : > { %v4431_v2 = vpop.eup %3479 }
 0x2f1   : > { %1223 = vadd.xlane.f32.xlu2 %v4431_v2 }
 0x2f2   : > { %1221 = vadd.xlane.f32.xlu1 %v4429_v32 }
 0x2f3   : > { %v1252_v5 = vpop.xlane.xlu2 %1251 }
 0x2f4   : > { %3481 = vrcp.f32 %v1252_v5 }
 0x2fa   : > { %v3482_v7 = vpop.eup %3481 }
 0x2fb   : > { %v1316_v52 = vmul.f32 %v3482_v7, %v4311_v0 }
 0x2fd   : > { %1337 = vmatpush.xpose.msra.mxu0 %v1316_v52 }
 0x304   : > { %v1218_v55 = vpop.xlane.xlu0 %1217 }
 0x305   : > { %3483 = vrcp.f32 %v1218_v55 }
 0x30b   : > { %v3484_v30 = vpop.eup %3483 }
 0x30c   : > { %v1216_v40 = vpop.xlane.xlu2 %1215  ;;  %v1299_v38 = vmul.f32 %v3484_v30, %v4317_v28  ;;  %v1248_v61 = vpop.xlane.xlu0 %1247 }
 0x30d   : > { %3485 = vrcp.f32 %v1216_v40 }
 0x30e   : > { %1318 = vmatpush.xpose.msra.mxu3 %v1299_v38 }
 0x313   : > { %v3486_v54 = vpop.eup %3485 }
 0x314   : > { %v1250_v22 = vpop.xlane.xlu1 %1249  ;;  %v1298_v60 = vmul.f32 %v3486_v54, %v4325_v58  ;;  %v1210_v28 = vpop.xlane.xlu2 %1209 }
 0x315   : > { %3487 = vrcp.f32 %v1250_v22  ;;  %v1246_v35 = vpop.xlane.xlu0 %1245 }
 0x316   : > { %1319 = vmatpush.xpose.msra.mxu3 %v1298_v60  ;;  %3489 = vrcp.f32 %v1248_v61 }
 0x317   : > { %3491 = vrcp.f32 %v1246_v35 }
 0x31b   : > { %v3488_v57 = vpop.eup %3487 }
 0x31c   : > { %v1214_v0 = vpop.xlane.xlu1 %1213  ;;  %v1315_v44 = vmul.f32 %v3488_v57, %v4333_v6  ;;  %v3490_v12 = vpop.eup %3489 }
 0x31d   : > { %3493 = vrcp.f32 %v1214_v0  ;;  %v1314_v11 = vmul.f32 %v3490_v12, %v4323_v43  ;;  %v3492_v31 = vpop.eup %3491  ;;  %v1208_v7 = vpop.xlane.xlu0 %1207 }
 0x31e   : > { %1338 = vmatpush.xpose.msra.mxu0 %v1315_v44  ;;  %v1313_v52 = vmul.f32 %v3492_v31, %v4335_v46 }
 0x322   : > { %1339 = vmatpush.xpose.msra.mxu0 %v1314_v11 }
 0x323   : > { %v3494_v47 = vpop.eup %3493 }
 0x324   : > { %v1212_v5 = vpop.xlane.xlu1 %1211  ;;  %v1297_v58 = vmul.f32 %v3494_v47, %v4344_v41  ;;  %v1242_v55 = vpop.xlane.xlu2 %1241 }
 0x325   : > { %3495 = vrcp.f32 %v1212_v5 }
 0x326   : > { %1320 = vmatpush.xpose.msra.mxu3 %v1297_v58  ;;  %1340 = vmatpush.xpose.msra.mxu0 %v1313_v52  ;;  %3497 = vrcp.f32 %v1210_v28 }
 0x327   : > { %3499 = vrcp.f32 %v1208_v7 }
 0x32b   : > { %v3496_v6 = vpop.eup %3495 }
 0x32c   : > { %v1244_v30 = vpop.xlane.xlu1 %1243  ;;  %v1296_v43 = vmul.f32 %v3496_v6, %v4351_v56  ;;  %v3498_v38 = vpop.eup %3497 }
 0x32d   : > { %v1240_v40 = vpop.xlane.xlu0 %1239  ;;  %3501 = vrcp.f32 %v1244_v30  ;;  %v1295_v41 = vmul.f32 %v3498_v38, %v4331_v14  ;;  %v3500_v61 = vpop.eup %3499 }
 0x32e   : > { %1321 = vmatpush.xpose.msra.mxu3 %v1296_v43  ;;  %3503 = vrcp.f32 %v1242_v55  ;;  %v1204_v54 = vpop.xlane.xlu2 %1203  ;;  %v1294_v60 = vmul.f32 %v3500_v61, %v4342_v59 }
 0x32f   : > { %3505 = vrcp.f32 %v1240_v40 }
 0x332   : > { %1322 = vmatpush.xpose.msra.mxu3 %v1295_v41 }
 0x333   : > { %v3502_v46 = vpop.eup %3501 }
 0x334   : > { %v1206_v22 = vpop.xlane.xlu1 %1205  ;;  %v1312_v35 = vmul.f32 %v3502_v46, %v4359_v29  ;;  %v3504_v57 = vpop.eup %3503 }
 0x335   : > { %3507 = vrcp.f32 %v1206_v22  ;;  %v1202_v0 = vpop.xlane.xlu0 %1201  ;;  %v1311_v56 = vmul.f32 %v3504_v57, %v4353_v51  ;;  %v3506_v44 = vpop.eup %3505  ;;  %v620_v22 = vld [vmem:[%s5641_s6] sm:$0xff] }
 0x336   : > { %1323 = vmatpush.xpose.msra.mxu3 %v1294_v60  ;;  %1341 = vmatpush.xpose.msra.mxu0 %v1312_v35  ;;  %3509 = vrcp.f32 %v1204_v54  ;;  %v1236_v12 = vpop.xlane.xlu2 %1235  ;;  %v1310_v59 = vmul.f32 %v3506_v44, %v4364_v13  ;;  %v5658_v35 = vmov 0  }
 0x337   : > { %3511 = vrcp.f32 %v1202_v0  ;;  %3353 = vset.pattern.permute.xlu0 %v5658_v35  ;;  %3354 = vset.pattern.permute.xlu2 %v5658_v35 }
 0x338   : > { %1359 = vperm.xlu2 %3354, %v620_v22   ;;  %v5691_v22 = vld [vmem:[#allocation5_spill] sm:$0xff] }
 0x33a   : > { %1342 = vmatpush.xpose.msra.mxu0 %v1311_v56 }
 0x33b   : > { %v3508_v14 = vpop.eup %3507 }
 0x33c   : > { %v1238_v28 = vpop.xlane.xlu1 %1237  ;;  %v1293_v11 = vmul.f32 %v3508_v14, %v4371_v39  ;;  %v3510_v29 = vpop.eup %3509 }
 0x33d   : > { %3513 = vrcp.f32 %v1238_v28  ;;  %v1234_v31 = vpop.xlane.xlu0 %1233  ;;  %v1292_v47 = vmul.f32 %v3510_v29, %v4362_v34  ;;  %v3512_v5 = vpop.eup %3511 }
 0x33e   : > { %3515 = vrcp.f32 %v1236_v12  ;;  %1324 = vmatpush.xpose.msra.mxu3 %v1293_v11  ;;  %1343 = vmatpush.xpose.msra.mxu0 %v1310_v59  ;;  %v1291_v39 = vmul.f32 %v3512_v5, %v4375_v45 }
 0x33f   : > { %3517 = vrcp.f32 %v1234_v31 }
 0x340   : > { %3356 = vset.pattern.permute.xlu2 %v3995_v10 }
 0x342   : > { %1325 = vmatpush.xpose.msra.mxu3 %v1292_v47 }
 0x343   : > { %v3514_v51 = vpop.eup %3513 }
 0x344   : > { %v1198_v58 = vpop.xlane.xlu2 %1197  ;;  %v1200_v7 = vpop.xlane.xlu1 %1199  ;;  %v1309_v52 = vmul.f32 %v3514_v51, %v4384_v49 }
 0x345   : > { %v3516_v55 = vpop.eup %3515  ;;  %3519 = vrcp.f32 %v1200_v7 }
 0x346   : > { %1344 = vmatpush.xpose.msra.mxu0 %v1309_v52  ;;  %1326 = vmatpush.xpose.msra.mxu3 %v1291_v39  ;;  %3521 = vrcp.f32 %v1198_v58  ;;  %v1308_v13 = vmul.f32 %v3516_v55, %v4373_v63  ;;  %v3518_v6 = vpop.eup %3517 }
 0x347   : > { %v1307_v40 = vmul.f32 %v3518_v6, %v4382_v42 }
 0x34a   : > { %1345 = vmatpush.xpose.msra.mxu0 %v1308_v13 }
 0x34b   : > { %v3520_v34 = vpop.eup %3519 }
 0x34c   : > { %v1196_v30 = vpop.xlane.xlu0 %1195  ;;  %v1230_v43 = vpop.xlane.xlu2 %1229  ;;  %v1290_v41 = vmul.f32 %v3520_v34, %v4391_v53  ;;  %v621_v53 = vld [vmem:[%s5641_s6 + $0x8] sm:$0xff] }
 0x34d   : > { %v1232_v38 = vpop.xlane.xlu1 %1231  ;;  %v3522_v49 = vpop.eup %3521  ;;  %1364 = vperm.xlu0 %3353, %v621_v53  }
 0x34e   : > { %3523 = vrcp.f32 %v1232_v38  ;;  %1346 = vmatpush.xpose.msra.mxu0 %v1307_v40  ;;  %1327 = vmatpush.xpose.msra.mxu3 %v1290_v41  ;;  %v1289_v45 = vmul.f32 %v3522_v49, %v4393_v1  ;;  %v1382_v38 = vld [vmem:[%s5642_s7 + $0x8] sm:$0xff] }
 0x34f   : > { %3525 = vrcp.f32 %v1196_v30 }
 0x350   : > { %3527 = vrcp.f32 %v1230_v43 }
 0x352   : > { %1328 = vmatpush.xpose.msra.mxu3 %v1289_v45  ;;  %v1412_v45 = vld [vmem:[%s5643_s8] sm:$0x3] }
 0x354   : > { %v3524_v63 = vpop.eup %3523  ;;  %v1228_v61 = vpop.xlane.xlu0 %1227 }
 0x355   : > { %v3526_v54 = vpop.eup %3525  ;;  %v1194_v46 = vpop.xlane.xlu1 %1193  ;;  %3529 = vrcp.f32 %v1228_v61  ;;  %v1306_v42 = vmul.f32 %v3524_v63, %v4403_v37  ;;  %3359 = vset.pattern.permute.xlu0 %v4022_v17  ;;  %v1413_v63 = vld [vmem:[%s5644_s9] sm:$0x3] }
 0x356   : > { %v3528_v60 = vpop.eup %3527  ;;  %3531 = vrcp.f32 %v1194_v46  ;;  %v1288_v1 = vmul.f32 %v3526_v54, %v4401_v62 }
 0x357   : > { %1347 = vmatpush.xpose.msra.mxu0 %v1306_v42  ;;  %v1305_v37 = vmul.f32 %v3528_v60, %v4399_v36  ;;  %v5690_v42 = vld [vmem:[#allocation6_spill] sm:$0xff] }
 0x358   : > { %1329 = vmatpush.xpose.msra.mxu3 %v1288_v1 }
 0x35b   : > { %v3530_v57 = vpop.eup %3529  ;;  %1348 = vmatpush.xpose.msra.mxu0 %v1305_v37 }
 0x35c   : > { %v3532_v0 = vpop.eup %3531  ;;  %v1192_v56 = vpop.xlane.xlu2 %1191  ;;  %v1304_v14 = vmul.f32 %v3530_v57, %v4413_v50 }
 0x35d   : > { %v1190_v44 = vpop.xlane.xlu0 %1189  ;;  %3533 = vrcp.f32 %v1192_v56  ;;  %v1226_v62 = vpop.xlane.xlu1 %1225  ;;  %v1287_v12 = vmul.f32 %v3532_v0, %v4411_v33  ;;  %v4533_v56 = vld [vmem:[%s4104_s27 + $0x70] sm:$0xff] }
 0x35e   : > { %3535 = vrcp.f32 %v1226_v62 }
 0x35f   : > { %3537 = vrcp.f32 %v1190_v44  ;;  %1330 = vmatpush.xpose.msra.mxu3 %v1287_v12  ;;  %1349 = vmatpush.xpose.msra.mxu0 %v1304_v14 }
 0x363   : > { %v3534_v36 = vpop.eup %3533 }
 0x364   : > { %v3536_v28 = vpop.eup %3535  ;;  %v1224_v11 = vpop.xlane.xlu2 %1223  ;;  %v1286_v59 = vmul.f32 %v3534_v36, %v4421_v9 }
 0x365   : > { %v3538_v29 = vpop.eup %3537  ;;  %3539 = vrcp.f32 %v1224_v11  ;;  %v1222_v50 = vpop.xlane.xlu1 %1221  ;;  %v1303_v31 = vmul.f32 %v3536_v28, %v4423_v27  ;;  %v4541_v28 = vld [vmem:[%s4104_s27 + $0x60] sm:$0xff] }
 0x366   : > { %1331 = vmatpush.xpose.msra.mxu3 %v1286_v59  ;;  %3541 = vrcp.f32 %v1222_v50  ;;  %v1285_v33 = vmul.f32 %v3538_v29, %v4419_v48 }
 0x367   : > { %1350 = vmatpush.xpose.msra.mxu0 %v1303_v31 }
 0x36a   : > { %1332 = vmatpush.xpose.msra.mxu3 %v1285_v33  ;;  %v4549_v33 = vld [vmem:[%s4104_s27 + $0x78] sm:$0xff] }
 0x36b   : > { %v3540_v47 = vpop.eup %3539 }
 0x36c   : > { %v1302_v5 = vmul.f32 %v3540_v47, %v4431_v2  ;;  %v3542_v51 = vpop.eup %3541 }
 0x36d   : > { %1333 = vmatmul.f32.vlgmr.msra.gmra.mxu3 %v3973_v3  ;;  %v1301_v9 = vmul.f32 %v3542_v51, %v4429_v32 }
 0x36e   : > { %1351 = vmatpush.xpose.msra.mxu0 %v1302_v5 }
 0x372   : > { %1352 = vmatpush.xpose.msra.mxu0 %v1301_v9 }
 0x375   : > { %1353 = vmatmul.f32.vlgmr.msra.gmra.mxu0 %v3975_v4  ;;  %v1381_v4 = vld [vmem:[%s5642_s7] sm:$0xff] }
 0x392   : > { %v1360_v58 = vpop.permute.xlu2 %1359 }
 0x3bf   : > { %v1365_v7 = vpop.permute.xlu0 %1364 }
 0x3f0   : > { %v1334_v27 = vpop.f32.mrf.mxu3 }
 0x3f1   : > { %v1367_v52 = vadd.f32 %v1360_v58, %v1334_v27 }
 0x3f2   : > { %v1354_v55 = vpop.f32.mrf.mxu0 }
 0x3f3   : > { %v1371_v39 = vmin.f32 %v1367_v52, 0.0  ;;  %v1368_v48 = vadd.f32 %v1365_v7, %v1354_v55  ;;  %vm1369_vm5 = vcmp.gt.f32.partialorder %v1367_v52, 0.0 }
 0x3f5   : > { %v1373_v13 = vmul.f32 1.442695, %v1371_v39  ;;  %v1372_v6 = vmin.f32 %v1368_v48, 0.0  ;;  %vm1370_vm4 = vcmp.gt.f32.partialorder %v1368_v48, 0.0 }
 0x3f7   : > { %3543 = vpow2.f32 %v1373_v13  ;;  %v1375_v2 = vmul.f32 1.442695, %v1372_v6 }
 0x3f9   : > { %3545 = vpow2.f32 %v1375_v2  ;;  %v4566_v2 = vld [vmem:[%s4104_s27 + $0x58] sm:$0xff] }
 0x3fd   : > { %v3544_v34 = vpop.eup %3543 }
 0x3fe   : > { %v3249_v40 = vadd.f32 -1.0, %v3544_v34 }
 0x3ff   : > { %v3546_v3 = vpop.eup %3545 }
 0x400   : > { %v3250_v30 = vadd.f32 -1.0, %v3546_v3  ;;  %v4484_v43 = vsel %vm1369_vm5, %v1367_v52, %v3249_v40  ;;  %v4558_v52 = vld [vmem:[%s4104_s27 + $0x68] sm:$0xff] }
 0x402   : > { %v4478_v32 = vsel %vm1370_vm4, %v1368_v48, %v3250_v30 }
 0x403   : > { %1403 = vmatpush.msrb.mxu3 %v4478_v32 }
 0x405   : > { %1404 = vmatpush.msrb.mxu3 %v4484_v43 }
 0x406   : > { %3251 = vmatmul.msk.f32.vlgmr.msrb.gmra.mxu3 %vm622_vm1, %v1381_v4 }
 0x407   : > { %2184 = vmatpush.msra.mxu3 %v4478_v32 }
 0x409   : > { %2185 = vmatpush.msra.mxu3 %v4484_v43 }
 0x40e   : > { %3252 = vmatmul.msk.f32.gmra.mxu3 %vm622_vm1, %v1382_v38 }
 0x489   : > { %v4494_v41 = vpop.f32.mrf.mxu3 }
 0x48a   : > { %5689 = vst [vmem:[#allocation7_spill] sm:$0xff] %v4494_v41 }
 0x491   : > { %v4496_v49 = vpop.f32.mrf.mxu3 }
 0x492   : > { %1433 = vmatpush.msrb.mxu2 %v4496_v49 }
 0x494   : > { %1434 = vmatpush.msrb.mxu2 %v4494_v41 }
 0x495   : > { %3253 = vmatmul.msk.f32.vlgmr.msrb.gmra.mxu2 %vm622_vm1, %v1412_v45 }
 0x496   : > { %1456 = vmatpush.msra.mxu2 %v4496_v49 }
 0x498   : > { %1457 = vmatpush.msra.mxu2 %v4494_v41 }
 0x49d   : > { %3254 = vmatmul.msk.f32.vlgmr.msra.gmra.mxu2 %vm622_vm1, %v1413_v63  ;;  %v4574_v63 = vld [vmem:[%s4104_s27 + $0x48] sm:$0xff] }
 0x518   : > { %v4510_v61 = vpop.f32.mrf.mxu2 }
 0x519   : > { %v1657_v53 = vrot.slane %v4510_v61, 1 }
 0x51b   : > { %v4529_v60 = vperm.slane %v1657_v53, 0  ;;  %v4580_v53 = vld [vmem:[%s4104_s27 + $0x50] sm:$0xff] }
 0x520   : > { %v4512_v54 = vpop.f32.mrf.mxu2 }
 0x521   : > { %v1559_v46 = vperm.slane %v4512_v54, 1 }
 0x523   : > { %1630 = vperm.xlu0 %3359, %v1559_v46   ;;  %1648 = vperm.xlu2 %3356, %v1559_v46  }
 0x524   : > { %1654 = vperm.xlu1 %3355, %v1559_v46  }
 0x52b   : > { %3364 = vset.pattern.permute.xlu0 %v4061_v23  ;;  %3358 = vset.pattern.permute.xlu2 %v4010_v15 }
 0x52c   : > { %3357 = vset.pattern.permute.xlu1 %v4013_v16 }
 0x533   : > { %1600 = vperm.xlu0 %3364, %v1559_v46   ;;  %1636 = vperm.xlu2 %3358, %v1559_v46  }
 0x534   : > { %1642 = vperm.xlu1 %3357, %v1559_v46  }
 0x53b   : > { %3361 = vset.pattern.permute.xlu2 %v4040_v20  ;;  %3370 = vset.pattern.permute.xlu0 %v3989_v8 }
 0x53c   : > { %3360 = vset.pattern.permute.xlu1 %v4028_v18 }
 0x543   : > { %1618 = vperm.xlu2 %3361, %v1559_v46  }
 0x544   : > { %1624 = vperm.xlu1 %3360, %v1559_v46  }
 0x54b   : > { %3363 = vset.pattern.permute.xlu2 %v4046_v21 }
 0x54c   : > { %3362 = vset.pattern.permute.xlu1 %v4034_v19 }
 0x553   : > { %1606 = vperm.xlu2 %3363, %v1559_v46  }
 0x554   : > { %1612 = vperm.xlu1 %3362, %v1559_v46  }
 0x55b   : > { %3366 = vset.pattern.permute.xlu2 %v4076_v25 }
 0x55c   : > { %3365 = vset.pattern.permute.xlu1 %v4067_v24 }
 0x563   : > { %1588 = vperm.xlu2 %3366, %v1559_v46  }
 0x564   : > { %1594 = vperm.xlu1 %3365, %v1559_v46  }
 0x56b   : > { %3367 = vset.pattern.permute.xlu2 %v4083_v26 }
 0x56c   : > { %3369 = vset.pattern.permute.xlu1 %v5690_v42  ;;  %v4658_v42 = vld [vmem:[%s4104_s27] sm:$0xff] }
 0x573   : > { %1582 = vperm.xlu2 %3367, %v1559_v46  }
 0x574   : > { %1570 = vperm.xlu1 %3369, %v1559_v46  }
 0x57b   : > { %3368 = vset.pattern.permute.xlu2 %v5691_v22 }
 0x57d   : > { %v1649_v1 = vpop.permute.xlu2 %1648 }
 0x57e   : > { %v1692_v37 = vadd.f32 %v4529_v60, %v1649_v1 }
 0x580   : > { %v1756_v57 = vmul.f32 0.2, %v1692_v37  ;;  %vm1724_vm6 = vcmp.gt.f32.partialorder %v1692_v37, 0.0 }
 0x582   : > { %v1788_v0 = vsel %vm1724_vm6, %v1692_v37, %v1756_v57 }
 0x583   : > { %1576 = vperm.xlu2 %3368, %v1559_v46   ;;  %v4536_v44 = vadd.f32 %v4533_v56, %v1788_v0 }
 0x585   : > { %1882 = vmax.xlane.f32.xlu0 %v4536_v44 }
 0x58d   : > { %v1637_v14 = vpop.permute.xlu2 %1636 }
 0x58e   : > { %v1690_v62 = vadd.f32 %v4529_v60, %v1637_v14 }
 0x590   : > { %v1754_v12 = vmul.f32 0.2, %v1690_v62  ;;  %vm1722_vm7 = vcmp.gt.f32.partialorder %v1690_v62, 0.0 }
 0x592   : > { %v1786_v36 = vsel %vm1722_vm7, %v1690_v62, %v1754_v12 }
 0x593   : > { %v4544_v11 = vadd.f32 %v4541_v28, %v1786_v36 }
 0x595   : > { %1878 = vmax.xlane.f32.xlu0 %v4544_v11  ;;  %v1631_v5 = vpop.permute.xlu0 %1630 }
 0x596   : > { %v1655_v59 = vpop.permute.xlu1 %1654  ;;  %v1689_v58 = vadd.f32 %v4529_v60, %v1631_v5 }
 0x597   : > { %v1693_v29 = vadd.f32 %v4529_v60, %v1655_v59  ;;  %v4590_v59 = vld [vmem:[%s4104_s27 + $0x40] sm:$0xff] }
 0x598   : > { %v1753_v39 = vmul.f32 0.2, %v1689_v58  ;;  %vm1721_vm10 = vcmp.gt.f32.partialorder %v1689_v58, 0.0 }
 0x599   : > { %v1757_v50 = vmul.f32 0.2, %v1693_v29  ;;  %vm1725_vm8 = vcmp.gt.f32.partialorder %v1693_v29, 0.0 }
 0x59a   : > { %v1785_v6 = vsel %vm1721_vm10, %v1689_v58, %v1753_v39  ;;  %v4599_v39 = vld [vmem:[%s4104_s27 + $0x18] sm:$0xff] }
 0x59b   : > { %v1789_v31 = vsel %vm1725_vm8, %v1693_v29, %v1757_v50  ;;  %v4569_v34 = vadd.f32 %v4566_v2, %v1785_v6 }
 0x59c   : > { %v4552_v47 = vadd.f32 %v4549_v33, %v1789_v31 }
 0x59d   : > { %v1619_v48 = vpop.permute.xlu2 %1618 }
 0x59e   : > { %1884 = vmax.xlane.f32.xlu1 %v4552_v47  ;;  %v1687_v13 = vadd.f32 %v4529_v60, %v1619_v48 }
 0x5a0   : > { %v1751_v3 = vmul.f32 0.2, %v1687_v13  ;;  %vm1719_vm11 = vcmp.gt.f32.partialorder %v1687_v13, 0.0 }
 0x5a2   : > { %v1783_v38 = vsel %vm1719_vm11, %v1687_v13, %v1751_v3  ;;  %v4605_v13 = vld [vmem:[%s4104_s27 + $0x38] sm:$0xff] }
 0x5a5   : > { %v1601_v5 = vpop.permute.xlu0 %1600 }
 0x5a6   : > { %v1643_v51 = vpop.permute.xlu1 %1642  ;;  %v1684_v58 = vadd.f32 %v4529_v60, %v1601_v5 }
 0x5a7   : > { %v1691_v9 = vadd.f32 %v4529_v60, %v1643_v51 }
 0x5a8   : > { %v1748_v3 = vmul.f32 0.2, %v1684_v58  ;;  %vm1716_vm0 = vcmp.gt.f32.partialorder %v1684_v58, 0.0 }
 0x5a9   : > { %v1755_v27 = vmul.f32 0.2, %v1691_v9  ;;  %1564 = vperm.xlu0 %3370, %v1559_v46   ;;  %vm1723_vm9 = vcmp.gt.f32.partialorder %v1691_v9, 0.0  ;;  %v4577_v46 = vadd.f32 %v4574_v63, %v1783_v38 }
 0x5ab   : > { %v1787_v7 = vsel %vm1723_vm9, %v1691_v9, %v1755_v27 }
 0x5ac   : > { %v4561_v55 = vadd.f32 %v4558_v52, %v1787_v7 }
 0x5ad   : > { %v1607_v37 = vpop.permute.xlu2 %1606 }
 0x5ae   : > { %1880 = vmax.xlane.f32.xlu2 %v4561_v55  ;;  %v1685_v62 = vadd.f32 %v4529_v60, %v1607_v37 }
 0x5b0   : > { %v1749_v50 = vmul.f32 0.2, %v1685_v62  ;;  %vm1717_vm14 = vcmp.gt.f32.partialorder %v1685_v62, 0.0 }
 0x5b2   : > { %v1781_v27 = vsel %vm1717_vm14, %v1685_v62, %v1749_v50  ;;  %v4621_v62 = vld [vmem:[%s4104_s27 + $0x28] sm:$0xff] }
 0x5b3   : > { %v4608_v6 = vadd.f32 %v4605_v13, %v1781_v27  ;;  %v4636_v27 = vld [vmem:[%s4104_s27 + $0x20] sm:$0xff] }
 0x5b6   : > { %1876 = vmax.xlane.f32.xlu2 %v4569_v34  ;;  %v1625_v30 = vpop.permute.xlu1 %1624 }
 0x5b7   : > { %v1688_v40 = vadd.f32 %v4529_v60, %v1625_v30 }
 0x5b9   : > { %v1752_v4 = vmul.f32 0.2, %v1688_v40  ;;  %vm1720_vm12 = vcmp.gt.f32.partialorder %v1688_v40, 0.0 }
 0x5bb   : > { %v1784_v45 = vsel %vm1720_vm12, %v1688_v40, %v1752_v4 }
 0x5bc   : > { %v4583_v1 = vadd.f32 %v4580_v53, %v1784_v45  ;;  %v1780_v45 = vsel %vm1716_vm0, %v1684_v58, %v1748_v3 }
 0x5bd   : > { %v1589_v57 = vpop.permute.xlu2 %1588 }
 0x5be   : > { %1872 = vmax.xlane.f32.xlu2 %v4577_v46  ;;  %1874 = vmax.xlane.f32.xlu1 %v4583_v1  ;;  %v1682_v4 = vadd.f32 %v4529_v60, %v1589_v57 }
 0x5c0   : > { %vm1714_vm3 = vcmp.gt.f32.partialorder %v1682_v4, 0.0 }
 0x5c6   : > { %v1613_v0 = vpop.permute.xlu1 %1612 }
 0x5c7   : > { %v1686_v14 = vadd.f32 %v4529_v60, %v1613_v0  ;;  %v4615_v0 = vld [vmem:[%s4104_s27 + $0x30] sm:$0xff] }
 0x5c9   : > { %v1750_v12 = vmul.f32 0.2, %v1686_v14  ;;  %vm1718_vm13 = vcmp.gt.f32.partialorder %v1686_v14, 0.0 }
 0x5cb   : > { %v1782_v36 = vsel %vm1718_vm13, %v1686_v14, %v1750_v12  ;;  %v4618_v14 = vadd.f32 %v4615_v0, %v1780_v45 }
 0x5cc   : > { %v4593_v29 = vadd.f32 %v4590_v59, %v1782_v36  ;;  %v1746_v36 = vmul.f32 0.2, %v1682_v4 }
 0x5cd   : > { %v1583_v31 = vpop.permute.xlu2 %1582 }
 0x5ce   : > { %v1681_v51 = vadd.f32 %v4529_v60, %v1583_v31  ;;  %1870 = vmax.xlane.f32.xlu2 %v4593_v29  ;;  %v1778_v5 = vsel %vm1714_vm3, %v1682_v4, %v1746_v36 }
 0x5d0   : > { %v1745_v9 = vmul.f32 0.2, %v1681_v51  ;;  %vm1713_vm15 = vcmp.gt.f32.partialorder %v1681_v51, 0.0 }
 0x5d2   : > { %v1777_v7 = vsel %vm1713_vm15, %v1681_v51, %v1745_v9  ;;  %v4630_v9 = vld [vmem:[%s4104_s27 + $0x10] sm:$0xff] }
 0x5d3   : > { %v4602_v48 = vadd.f32 %v4599_v39, %v1777_v7  ;;  %v4639_v7 = vadd.f32 %v4636_v27, %v1778_v5 }
 0x5d5   : > { %1860 = vmax.xlane.f32.xlu1 %v4602_v48 }
 0x5d6   : > { %1868 = vmax.xlane.f32.xlu2 %v4608_v6  ;;  %v1595_v30 = vpop.permute.xlu1 %1594 }
 0x5d7   : > { %v1683_v40 = vadd.f32 %v4529_v60, %v1595_v30 }
 0x5d9   : > { %v1747_v38 = vmul.f32 0.2, %v1683_v40  ;;  %vm1715_vm2 = vcmp.gt.f32.partialorder %v1683_v40, 0.0 }
 0x5db   : > { %v1779_v37 = vsel %vm1715_vm2, %v1683_v40, %v1747_v38  ;;  %v4645_v38 = vld [vmem:[%s4104_s27 + $0x8] sm:$0xff]  ;;  %s3114_s27 = scalar_lea.vmem (%p3955_p4), %s5651_s16, %s3294_s30 }
 0x5dc   : > { %v4624_v12 = vadd.f32 %v4621_v62, %v1779_v37 }
 0x5dd   : > { %v1577_v50 = vpop.permute.xlu2 %1576 }
 0x5de   : > { %v1680_v57 = vadd.f32 %v4529_v60, %v1577_v50  ;;  %1866 = vmax.xlane.f32.xlu2 %v4618_v14  ;;  %1864 = vmax.xlane.f32.xlu0 %v4624_v12 }
 0x5e0   : > { %v1744_v31 = vmul.f32 0.2, %v1680_v57  ;;  %vm1712_vm4 = vcmp.gt.f32.partialorder %v1680_v57, 0.0 }
 0x5e2   : > { %v1776_v51 = vsel %vm1712_vm4, %v1680_v57, %v1744_v31 }
 0x5e3   : > { %v4633_v58 = vadd.f32 %v4630_v9, %v1776_v51 }
 0x5e5   : > { %1858 = vmax.xlane.f32.xlu1 %v4633_v58 }
 0x5e6   : > { %1862 = vmax.xlane.f32.xlu2 %v4639_v7  ;;  %v1571_v3 = vpop.permute.xlu1 %1570 }
 0x5e7   : > { %v1679_v30 = vadd.f32 %v4529_v60, %v1571_v3 }
 0x5e9   : > { %v1743_v40 = vmul.f32 0.2, %v1679_v30  ;;  %vm1711_vm5 = vcmp.gt.f32.partialorder %v1679_v30, 0.0 }
 0x5eb   : > { %v1775_v4 = vsel %vm1711_vm5, %v1679_v30, %v1743_v40 }
 0x5ec   : > { %v4648_v45 = vadd.f32 %v4645_v38, %v1775_v4 }
 0x5ee   : > { %1856 = vmax.xlane.f32.xlu1 %v4648_v45 }
 0x5f8   : > { %v1883_v37 = vpop.xlane.xlu0 %1882 }
 0x5f9   : > { %v1916_v5 = vsub.f32 %v4536_v44, %v1883_v37 }
 0x5fb   : > { %v1978_v51 = vmul.f32 1.442695, %v1916_v5 }
 0x608   : > { %v1879_v57 = vpop.xlane.xlu0 %1878 }
 0x611   : > { %v1885_v36 = vpop.xlane.xlu1 %1884 }
 0x612   : > { %v1917_v50 = vsub.f32 %v4552_v47, %v1885_v36 }
 0x614   : > { %v1980_v31 = vmul.f32 1.442695, %v1917_v50 }
 0x616   : > { %3547 = vpow2.f32 %v1980_v31 }
 0x617   : > { %3549 = vpow2.f32 %v1978_v51 }
 0x61b   : > { %v1565_v3 = vpop.permute.xlu0 %1564 }
 0x61c   : > { %v4653_v30 = vpop.eup %3547  ;;  %v1678_v40 = vadd.f32 %v4529_v60, %v1565_v3  ;;  %v1914_v60 = vsub.f32 %v4544_v11, %v1879_v57 }
 0x61d   : > { %2044 = vadd.xlane.f32.xlu2 %v4653_v30  ;;  %v4665_v37 = vpop.eup %3549 }
 0x61e   : > { %v1742_v4 = vmul.f32 0.2, %v1678_v40  ;;  %vm1710_vm6 = vcmp.gt.f32.partialorder %v1678_v40, 0.0  ;;  %v1974_v50 = vmul.f32 1.442695, %v1914_v60 }
 0x620   : > { %v1774_v35 = vsel %vm1710_vm6, %v1678_v40, %v1742_v4 }
 0x621   : > { %v1881_v41 = vpop.xlane.xlu2 %1880  ;;  %v4661_v47 = vadd.f32 %v4658_v42, %v1774_v35 }
 0x622   : > { %v1915_v44 = vsub.f32 %v4561_v55, %v1881_v41 }
 0x623   : > { %1854 = vmax.xlane.f32.xlu1 %v4661_v47 }
 0x624   : > { %v1976_v36 = vmul.f32 1.442695, %v1915_v44 }
 0x625   : > { %2042 = vadd.xlane.f32.xlu2 %v4665_v37 }
 0x626   : > { %3551 = vpow2.f32 %v1976_v36 }
 0x627   : > { %3553 = vpow2.f32 %v1974_v50 }
 0x629   : > { %v1877_v31 = vpop.xlane.xlu2 %1876 }
 0x62a   : > { %v1913_v5 = vsub.f32 %v4569_v34, %v1877_v31 }
 0x62c   : > { %v4670_v51 = vpop.eup %3551  ;;  %v1972_v35 = vmul.f32 1.442695, %v1913_v5 }
 0x62d   : > { %2040 = vadd.xlane.f32.xlu2 %v4670_v51  ;;  %v4675_v57 = vpop.eup %3553 }
 0x62e   : > { %3555 = vpow2.f32 %v1972_v35 }
 0x631   : > { %v1873_v41 = vpop.xlane.xlu2 %1872  ;;  %v1875_v55 = vpop.xlane.xlu1 %1874 }
 0x632   : > { %v1911_v3 = vsub.f32 %v4577_v46, %v1873_v41  ;;  %v1912_v11 = vsub.f32 %v4583_v1, %v1875_v55 }
 0x634   : > { %v4677_v40 = vpop.eup %3555  ;;  %v1968_v4 = vmul.f32 1.442695, %v1911_v3  ;;  %v1970_v44 = vmul.f32 1.442695, %v1912_v11 }
 0x635   : > { %2036 = vadd.xlane.f32.xlu0 %v4677_v40  ;;  %2038 = vadd.xlane.f32.xlu2 %v4675_v57 }
 0x636   : > { %3557 = vpow2.f32 %v1968_v4 }
 0x637   : > { %3559 = vpow2.f32 %v1970_v44 }
 0x63c   : > { %v4681_v34 = vpop.eup %3557 }
 0x63d   : > { %v4683_v36 = vpop.eup %3559  ;;  %2032 = vadd.xlane.f32.xlu2 %v4681_v34 }
 0x63e   : > { %2034 = vadd.xlane.f32.xlu1 %v4683_v36 }
 0x641   : > { %v1871_v46 = vpop.xlane.xlu2 %1870 }
 0x642   : > { %v1910_v1 = vsub.f32 %v4593_v29, %v1871_v46 }
 0x644   : > { %v1966_v60 = vmul.f32 1.442695, %v1910_v1 }
 0x646   : > { %3561 = vpow2.f32 %v1966_v60 }
 0x648   : > { %v1861_v41 = vpop.xlane.xlu1 %1860 }
 0x649   : > { %v1869_v50 = vpop.xlane.xlu2 %1868  ;;  %v1905_v29 = vsub.f32 %v4602_v48, %v1861_v41 }
 0x64a   : > { %v1909_v31 = vsub.f32 %v4608_v6, %v1869_v50 }
 0x64b   : > { %v1956_v6 = vmul.f32 1.442695, %v1905_v29 }
 0x64c   : > { %v4689_v5 = vpop.eup %3561  ;;  %v1964_v35 = vmul.f32 1.442695, %v1909_v31 }
 0x64d   : > { %2030 = vadd.xlane.f32.xlu0 %v4689_v5 }
 0x64e   : > { %3563 = vpow2.f32 %v1964_v35 }
 0x651   : > { %v1867_v55 = vpop.xlane.xlu2 %1866  ;;  %v1865_v3 = vpop.xlane.xlu0 %1864 }
 0x652   : > { %v1908_v11 = vsub.f32 %v4618_v14, %v1867_v55  ;;  %v1907_v4 = vsub.f32 %v4624_v12, %v1865_v3 }
 0x654   : > { %v4694_v44 = vpop.eup %3563  ;;  %v1962_v46 = vmul.f32 1.442695, %v1908_v11  ;;  %v1960_v1 = vmul.f32 1.442695, %v1907_v4 }
 0x655   : > { %2028 = vadd.xlane.f32.xlu1 %v4694_v44 }
 0x656   : > { %3565 = vpow2.f32 %v1962_v46  ;;  %v4720_v46 = vperm.slane %v4512_v54, 0 }
 0x657   : > { %3567 = vpow2.f32 %v1960_v1 }
 0x658   : > { %v1859_v60 = vpop.xlane.xlu1 %1858  ;;  %3569 = vpow2.f32 %v1956_v6 }
 0x659   : > { %v1863_v50 = vpop.xlane.xlu2 %1862  ;;  %v1904_v31 = vsub.f32 %v4633_v58, %v1859_v60 }
 0x65a   : > { %v1906_v35 = vsub.f32 %v4639_v7, %v1863_v50 }
 0x65b   : > { %v1954_v14 = vmul.f32 1.442695, %v1904_v31 }
 0x65c   : > { %v4700_v55 = vpop.eup %3565  ;;  %v1958_v12 = vmul.f32 1.442695, %v1906_v35 }
 0x65d   : > { %v4702_v3 = vpop.eup %3567  ;;  %3571 = vpow2.f32 %v1954_v14  ;;  %2026 = vadd.xlane.f32.xlu2 %v4700_v55 }
 0x65e   : > { %3573 = vpow2.f32 %v1958_v12  ;;  %2024 = vadd.xlane.f32.xlu0 %v4702_v3  ;;  %v4706_v41 = vpop.eup %3569 }
 0x661   : > { %v1857_v48 = vpop.xlane.xlu1 %1856 }
 0x662   : > { %v1903_v58 = vsub.f32 %v4648_v45, %v1857_v48 }
 0x663   : > { %v4709_v11 = vpop.eup %3571 }
 0x664   : > { %v4711_v7 = vpop.eup %3573  ;;  %v1952_v4 = vmul.f32 1.442695, %v1903_v58 }
 0x665   : > { %2022 = vadd.xlane.f32.xlu1 %v4711_v7  ;;  %2020 = vadd.xlane.f32.xlu2 %v4706_v41 }
 0x666   : > { %3575 = vpow2.f32 %v1952_v4  ;;  %2018 = vadd.xlane.f32.xlu0 %v4709_v11 }
 0x66c   : > { %v4716_v29 = vpop.eup %3575 }
 0x66d   : > { %2016 = vadd.xlane.f32.xlu1 %v4716_v29 }
 0x67a   : > { %1467 = vperm.xlu0 %3370, %v4720_v46  }
 0x682   : > { %3371 = vset.pattern.permute.xlu0 %v4083_v26 }
 0x686   : > { %1473 = vperm.xlu1 %3369, %v4720_v46  }
 0x68a   : > { %1485 = vperm.xlu0 %3371, %v4720_v46  }
 0x68e   : > { %3373 = vset.pattern.permute.xlu1 %v4067_v24 }
 0x690   : > { %v2045_v45 = vpop.xlane.xlu2 %2044 }
 0x691   : > { %3577 = vrcp.f32 %v2045_v45 }
 0x692   : > { %3376 = vset.pattern.permute.xlu0 %v4034_v19 }
 0x696   : > { %1497 = vperm.xlu1 %3373, %v4720_v46   ;;  %v1855_v1 = vpop.xlane.xlu1 %1854 }
 0x697   : > { %v3578_v6 = vpop.eup %3577  ;;  %v1902_v54 = vsub.f32 %v4661_v47, %v1855_v1 }
 0x698   : > { %v2043_v60 = vpop.xlane.xlu2 %2042  ;;  %v2109_v50 = vmul.f32 %v3578_v6, %v4653_v30 }
 0x699   : > { %v1950_v31 = vmul.f32 1.442695, %v1902_v54  ;;  %3579 = vrcp.f32 %v2043_v60  ;;  %v5692_v60 = vld [vmem:[#allocation4_spill] sm:$0xff] }
 0x69a   : > { %1515 = vperm.xlu0 %3376, %v4720_v46   ;;  %2130 = vmatpush.xpose.msrb.mxu2 %v2109_v50 }
 0x69b   : > { %3581 = vpow2.f32 %v1950_v31 }
 0x69e   : > { %3375 = vset.pattern.permute.xlu1 %v4046_v21 }
 0x69f   : > { %v3580_v35 = vpop.eup %3579 }
 0x6a0   : > { %v2041_v14 = vpop.xlane.xlu2 %2040  ;;  %v2108_v12 = vmul.f32 %v3580_v35, %v4665_v37 }
 0x6a1   : > { %v4734_v48 = vpop.eup %3581  ;;  %3583 = vrcp.f32 %v2041_v14 }
 0x6a2   : > { %3381 = vset.pattern.permute.xlu0 %v4013_v16  ;;  %2131 = vmatpush.xpose.msrb.mxu2 %v2108_v12 }
 0x6a3   : > { %2014 = vadd.xlane.f32.xlu2 %v4734_v48 }
 0x6a6   : > { %1509 = vperm.xlu1 %3375, %v4720_v46  }
 0x6a7   : > { %v3584_v30 = vpop.eup %3583 }
 0x6a8   : > { %v2039_v47 = vpop.xlane.xlu2 %2038  ;;  %v2107_v58 = vmul.f32 %v3584_v30, %v4670_v51  ;;  %v2037_v4 = vpop.xlane.xlu0 %2036 }
 0x6a9   : > { %3585 = vrcp.f32 %v2039_v47 }
 0x6aa   : > { %1545 = vperm.xlu0 %3381, %v4720_v46   ;;  %2132 = vmatpush.xpose.msrb.mxu2 %v2107_v58  ;;  %3587 = vrcp.f32 %v2037_v4 }
 0x6ae   : > { %3378 = vset.pattern.permute.xlu1 %v4028_v18 }
 0x6af   : > { %v3586_v37 = vpop.eup %3585 }
 0x6b0   : > { %v2033_v45 = vpop.xlane.xlu2 %2032  ;;  %v2106_v6 = vmul.f32 %v3586_v37, %v4675_v57  ;;  %v3588_v54 = vpop.eup %3587 }
 0x6b1   : > { %v2035_v1 = vpop.xlane.xlu1 %2034  ;;  %v2105_v51 = vmul.f32 %v3588_v54, %v4677_v40 }
 0x6b2   : > { %3589 = vrcp.f32 %v2035_v1  ;;  %3384 = vset.pattern.permute.xlu0 %v5692_v60  ;;  %2133 = vmatpush.xpose.msrb.mxu2 %v2106_v6 }
 0x6b3   : > { %3591 = vrcp.f32 %v2033_v45 }
 0x6b6   : > { %1527 = vperm.xlu1 %3378, %v4720_v46   ;;  %2134 = vmatpush.xpose.msrb.mxu2 %v2105_v51 }
 0x6b8   : > { %v3590_v50 = vpop.eup %3589 }
 0x6b9   : > { %v2104_v31 = vmul.f32 %v3590_v50, %v4683_v36  ;;  %v3592_v35 = vpop.eup %3591 }
 0x6ba   : > { %v2103_v57 = vmul.f32 %v3592_v35, %v4681_v34 }
 0x6bb   : > { %2135 = vmatpush.xpose.msrb.mxu2 %v2104_v31  ;;  %1479 = vperm.xlu2 %3368, %v4720_v46  }
 0x6be   : > { %3380 = vset.pattern.permute.xlu1 %v4010_v15 }
 0x6bf   : > { %2136 = vmatpush.xpose.msrb.mxu2 %v2103_v57 }
 0x6c0   : > { %v2031_v14 = vpop.xlane.xlu0 %2030 }
 0x6c1   : > { %3593 = vrcp.f32 %v2031_v14 }
 0x6c3   : > { %3372 = vset.pattern.permute.xlu2 %v4076_v25 }
 0x6c6   : > { %1539 = vperm.xlu1 %3380, %v4720_v46  }
 0x6c7   : > { %v3594_v40 = vpop.eup %3593 }
 0x6c8   : > { %v2029_v12 = vpop.xlane.xlu1 %2028  ;;  %v2102_v30 = vmul.f32 %v3594_v40, %v4689_v5 }
 0x6c9   : > { %3595 = vrcp.f32 %v2029_v12 }
 0x6ca   : > { %2137 = vmatpush.xpose.msrb.mxu2 %v2102_v30 }
 0x6cb   : > { %1491 = vperm.xlu2 %3372, %v4720_v46  }
 0x6ce   : > { %3383 = vset.pattern.permute.xlu1 %v5692_v60 }
 0x6cf   : > { %v3596_v34 = vpop.eup %3595 }
 0x6d0   : > { %v2027_v36 = vpop.xlane.xlu2 %2026  ;;  %v2101_v47 = vmul.f32 %v3596_v34, %v4694_v44 }
 0x6d1   : > { %v2025_v58 = vpop.xlane.xlu0 %2024  ;;  %3597 = vrcp.f32 %v2027_v36  ;;  %v2193_v36 = vld [vmem:[%s5647_s12] sm:$0xff] }
 0x6d2   : > { %2138 = vmatpush.xpose.msrb.mxu2 %v2101_v47  ;;  %3599 = vrcp.f32 %v2025_v58 }
 0x6d3   : > { %3374 = vset.pattern.permute.xlu2 %v4061_v23 }
 0x6d6   : > { %1557 = vperm.xlu1 %3383, %v4720_v46  }
 0x6d7   : > { %v3598_v4 = vpop.eup %3597 }
 0x6d8   : > { %v2023_v5 = vpop.xlane.xlu1 %2022  ;;  %v2100_v37 = vmul.f32 %v3598_v4, %v4700_v55  ;;  %v3600_v45 = vpop.eup %3599 }
 0x6d9   : > { %v2021_v1 = vpop.xlane.xlu2 %2020  ;;  %3601 = vrcp.f32 %v2023_v5  ;;  %v2099_v44 = vmul.f32 %v3600_v45, %v4702_v3  ;;  %v2019_v6 = vpop.xlane.xlu0 %2018 }
 0x6da   : > { %2139 = vmatpush.xpose.msrb.mxu2 %v2100_v37  ;;  %3603 = vrcp.f32 %v2021_v1 }
 0x6db   : > { %1503 = vperm.xlu2 %3374, %v4720_v46   ;;  %3605 = vrcp.f32 %v2019_v6 }
 0x6de   : > { %2140 = vmatpush.xpose.msrb.mxu2 %v2099_v44 }
 0x6df   : > { %v3602_v54 = vpop.eup %3601 }
 0x6e0   : > { %v2017_v60 = vpop.xlane.xlu1 %2016  ;;  %v2098_v51 = vmul.f32 %v3602_v54, %v4711_v7  ;;  %v3604_v50 = vpop.eup %3603  ;;  %v2162_v7 = vld [vmem:[%s5646_s11] sm:$0xff] }
 0x6e1   : > { %3607 = vrcp.f32 %v2017_v60  ;;  %v2097_v55 = vmul.f32 %v3604_v50, %v4706_v41  ;;  %v3606_v31 = vpop.eup %3605  ;;  %3255 = vmatmul.msk.f32.vlgmr.msra.gmra.mxu3 %vm622_vm1, %v2162_v7  ;;  %v2163_v41 = vld [vmem:[%s5646_s11 + $0x8] sm:$0xff] }
 0x6e2   : > { %2141 = vmatpush.xpose.msrb.mxu2 %v2098_v51  ;;  %v2096_v35 = vmul.f32 %v3606_v31, %v4709_v11 }
 0x6e3   : > { %3377 = vset.pattern.permute.xlu2 %v4040_v20 }
 0x6e6   : > { %2142 = vmatpush.xpose.msrb.mxu2 %v2097_v55 }
 0x6e7   : > { %v3608_v3 = vpop.eup %3607 }
 0x6e8   : > { %v2095_v57 = vmul.f32 %v3608_v3, %v4716_v29 }
 0x6e9   : > { %3256 = vmatmul.msk.f32.gmra.mxu3 %vm622_vm1, %v2163_v41 }
 0x6ea   : > { %2143 = vmatpush.xpose.msrb.mxu2 %v2096_v35 }
 0x6eb   : > { %1521 = vperm.xlu2 %3377, %v4720_v46  }
 0x6ec   : > { %v1468_v12 = vpop.permute.xlu0 %1467 }
 0x6ee   : > { %2144 = vmatpush.xpose.msrb.mxu2 %v2095_v57 }
 0x6f3   : > { %3379 = vset.pattern.permute.xlu2 %v4022_v17 }
 0x6f8   : > { %v1474_v29 = vpop.permute.xlu1 %1473 }
 0x6fb   : > { %1533 = vperm.xlu2 %3379, %v4720_v46  }
 0x6fc   : > { %v4804_v45 = vpop.permute.xlu0 %1485 }
 0x703   : > { %3382 = vset.pattern.permute.xlu2 %v3995_v10 }
 0x708   : > { %v4783_v30 = vpop.permute.xlu1 %1497 }
 0x70b   : > { %1551 = vperm.xlu2 %3382, %v4720_v46   ;;  %v4787_v46 = vperm.slane %v4510_v61, 0 }
 0x70c   : > { %v1516_v54 = vpop.permute.xlu0 %1515 }
 0x70d   : > { %v1662_v34 = vadd.f32 %v4787_v46, %v1468_v12 }
 0x70f   : > { %vm1694_vm7 = vcmp.gt.f32.partialorder %v1662_v34, 0.0 }
 0x713   : > { %3391 = vset.pattern.permute.xlu2 %v4022_v17 }
 0x716   : > { %v2015_v11 = vpop.xlane.xlu2 %2014 }
 0x717   : > { %3609 = vrcp.f32 %v2015_v11 }
 0x71c   : > { %v1546_v55 = vpop.permute.xlu0 %1545 }
 0x71d   : > { %v3610_v14 = vpop.eup %3609 }
 0x71e   : > { %v2094_v40 = vmul.f32 %v3610_v14, %v4734_v48  ;;  %v1726_v48 = vmul.f32 0.2, %v1662_v34  ;;  %v1480_v4 = vpop.permute.xlu2 %1479 }
 0x71f   : > { %v1664_v5 = vadd.f32 %v4787_v46, %v1480_v4 }
 0x720   : > { %2145 = vmatpush.xpose.msrb.mxu2 %v2094_v40  ;;  %v1758_v47 = vsel %vm1694_vm7, %v1662_v34, %v1726_v48 }
 0x721   : > { %v4799_v61 = vadd.f32 %v4658_v42, %v1758_v47  ;;  %v1728_v6 = vmul.f32 0.2, %v1664_v5  ;;  %vm1696_vm9 = vcmp.gt.f32.partialorder %v1664_v5, 0.0 }
 0x723   : > { %2146 = vmatmul.f32.vlgmr.msrb.gmra.mxu2 %v4496_v49  ;;  %v1760_v42 = vsel %vm1696_vm9, %v1664_v5, %v1728_v6 }
 0x724   : > { %2215 = vmatpush.msra.mxu2 %v4478_v32  ;;  %v1510_v32 = vpop.permute.xlu1 %1509  ;;  %v4811_v51 = vadd.f32 %v4630_v9, %v1760_v42 }
 0x725   : > { %v1669_v49 = vadd.f32 %v4787_v46, %v1510_v32 }
 0x726   : > { %2216 = vmatpush.msra.mxu2 %v4484_v43  ;;  %v2194_v43 = vld [vmem:[%s5647_s12 + $0x8] sm:$0xff]  ;;  %v4814_v50 = vpop.permute.xlu2 %1491 }
 0x727   : > { %v1733_v58 = vmul.f32 0.2, %v1669_v49  ;;  %vm1701_vm8 = vcmp.gt.f32.partialorder %v1669_v49, 0.0 }
 0x729   : > { %v1765_v37 = vsel %vm1701_vm8, %v1669_v49, %v1733_v58 }
 0x72a   : > { %v4807_v44 = vadd.f32 %v4605_v13, %v1765_v37  ;;  %v1675_v13 = vadd.f32 %v4787_v46, %v1546_v55 }
 0x72b   : > { %3257 = vmatmul.msk.f32.vlgmr.msra.gmra.mxu2 %vm622_vm1, %v2193_v36  ;;  %v1663_v36 = vadd.f32 %v4787_v46, %v1474_v29 }
 0x72c   : > { %v1528_v1 = vpop.permute.xlu1 %1527  ;;  %v1739_v11 = vmul.f32 0.2, %v1675_v13  ;;  %vm1707_vm11 = vcmp.gt.f32.partialorder %v1675_v13, 0.0 }
 0x72d   : > { %v1672_v9 = vadd.f32 %v4787_v46, %v1528_v1  ;;  %v1727_v49 = vmul.f32 0.2, %v1663_v36  ;;  %vm1695_vm13 = vcmp.gt.f32.partialorder %v1663_v36, 0.0 }
 0x72e   : > { %v1771_v14 = vsel %vm1707_vm11, %v1675_v13, %v1739_v11  ;;  %v1670_v13 = vadd.f32 %v4787_v46, %v1516_v54 }
 0x72f   : > { %v4824_v12 = vadd.f32 %v4558_v52, %v1771_v14  ;;  %v1736_v34 = vmul.f32 0.2, %v1672_v9  ;;  %vm1704_vm12 = vcmp.gt.f32.partialorder %v1672_v9, 0.0  ;;  %v1759_v47 = vsel %vm1695_vm13, %v1663_v36, %v1727_v49 }
 0x730   : > { %v4834_v58 = vadd.f32 %v4645_v38, %v1759_v47  ;;  %vm1702_vm3 = vcmp.gt.f32.partialorder %v1670_v13, 0.0 }
 0x731   : > { %v1768_v48 = vsel %vm1704_vm12, %v1672_v9, %v1736_v34 }
 0x732   : > { %v4829_v32 = vadd.f32 %v4580_v53, %v1768_v48 }
 0x733   : > { %3258 = vmatmul.msk.f32.gmra.mxu2 %vm622_vm1, %v2194_v43 }
 0x734   : > { %1822 = vmax.xlane.f32.xlu2 %v4799_v61 }
 0x735   : > { %v1504_v57 = vpop.permute.xlu2 %1503 }
 0x738   : > { %v1540_v60 = vpop.permute.xlu1 %1539 }
 0x739   : > { %v1674_v4 = vadd.f32 %v4787_v46, %v1540_v60 }
 0x73b   : > { %v1738_v37 = vmul.f32 0.2, %v1674_v4  ;;  %vm1706_vm15 = vcmp.gt.f32.partialorder %v1674_v4, 0.0 }
 0x73c   : > { %1836 = vmax.xlane.f32.xlu2 %v4807_v44 }
 0x73d   : > { %v1770_v6 = vsel %vm1706_vm15, %v1674_v4, %v1738_v37 }
 0x73e   : > { %v4844_v38 = vadd.f32 %v4541_v28, %v1770_v6 }
 0x744   : > { %1826 = vmax.xlane.f32.xlu2 %v4811_v51 }
 0x745   : > { %v1522_v40 = vpop.permute.xlu2 %1521 }
 0x746   : > { %v1671_v60 = vadd.f32 %v4787_v46, %v1522_v40 }
 0x748   : > { %v1558_v31 = vpop.permute.xlu1 %1557  ;;  %vm1703_vm2 = vcmp.gt.f32.partialorder %v1671_v60, 0.0 }
 0x749   : > { %v1677_v35 = vadd.f32 %v4787_v46, %v1558_v31  ;;  %v1735_v31 = vmul.f32 0.2, %v1671_v60 }
 0x74b   : > { %v1741_v3 = vmul.f32 0.2, %v1677_v35  ;;  %vm1709_vm10 = vcmp.gt.f32.partialorder %v1677_v35, 0.0  ;;  %v1767_v28 = vsel %vm1703_vm2, %v1671_v60, %v1735_v31 }
 0x74d   : > { %v1773_v7 = vsel %vm1709_vm10, %v1677_v35, %v1741_v3  ;;  %v4856_v3 = vadd.f32 %v4574_v63, %v1767_v28  ;;  %v1667_v63 = vadd.f32 %v4787_v46, %v4783_v30 }
 0x74e   : > { %v4819_v41 = vadd.f32 %v4549_v33, %v1773_v7  ;;  %v1734_v7 = vmul.f32 0.2, %v1670_v13 }
 0x74f   : > { %v1731_v36 = vmul.f32 0.2, %v1667_v63  ;;  %vm1699_vm5 = vcmp.gt.f32.partialorder %v1667_v63, 0.0 }
 0x750   : > { %1852 = vmax.xlane.f32.xlu0 %v4819_v41  ;;  %v1766_v9 = vsel %vm1702_vm3, %v1670_v13, %v1734_v7 }
 0x751   : > { %v4865_v14 = vadd.f32 %v4590_v59, %v1766_v9  ;;  %v1666_v59 = vadd.f32 %v4787_v46, %v4814_v50  ;;  %v1763_v48 = vsel %vm1699_vm5, %v1667_v63, %v1731_v36 }
 0x752   : > { %v4881_v30 = vadd.f32 %v4621_v62, %v1763_v48 }
 0x753   : > { %vm1698_vm6 = vcmp.gt.f32.partialorder %v1666_v59, 0.0 }
 0x755   : > { %v1534_v33 = vpop.permute.xlu2 %1533 }
 0x756   : > { %v1673_v1 = vadd.f32 %v4787_v46, %v1534_v33  ;;  %v1730_v33 = vmul.f32 0.2, %v1666_v59 }
 0x758   : > { %1848 = vmax.xlane.f32.xlu0 %v4824_v12  ;;  %v1737_v42 = vmul.f32 0.2, %v1673_v1  ;;  %vm1705_vm0 = vcmp.gt.f32.partialorder %v1673_v1, 0.0  ;;  %v1762_v49 = vsel %vm1698_vm6, %v1666_v59, %v1730_v33 }
 0x759   : > { %v4887_v47 = vadd.f32 %v4636_v27, %v1762_v49  ;;  %v2225_v27 = vld [vmem:[%s5649_s14] sm:$0x3] }
 0x75a   : > { %v1769_v55 = vsel %vm1705_vm0, %v1673_v1, %v1737_v42 }
 0x760   : > { %1842 = vmax.xlane.f32.xlu0 %v4829_v32 }
 0x764   : > { %v4852_v35 = vpop.f32.mrf.mxu3 }
 0x765   : > { %v1552_v43 = vpop.permute.xlu2 %1551  ;;  %5693 = vst [vmem:[#allocation5_spill] sm:$0xff] %v4852_v35 }
 0x766   : > { %v1676_v52 = vadd.f32 %v4787_v46, %v1552_v43 }
 0x768   : > { %vm1708_vm14 = vcmp.gt.f32.partialorder %v1676_v52, 0.0  ;;  %v1740_v29 = vmul.f32 0.2, %v1676_v52  ;;  %1824 = vmax.xlane.f32.xlu0 %v4834_v58 }
 0x76a   : > { %v1772_v5 = vsel %vm1708_vm14, %v1676_v52, %v1740_v29 }
 0x76b   : > { %v4839_v53 = vadd.f32 %v4533_v56, %v1772_v5  ;;  %v4849_v56 = vadd.f32 %v4566_v2, %v1769_v55  ;;  %v1668_v2 = vadd.f32 %v4787_v46, %v1504_v57  ;;  %v2224_v57 = vld [vmem:[%s5648_s13] sm:$0x3] }
 0x76c   : > { %v4859_v11 = vpop.f32.mrf.mxu3 }
 0x76d   : > { %1850 = vmax.xlane.f32.xlu1 %v4839_v53  ;;  %5694 = vst [vmem:[#allocation4_spill] sm:$0xff] %v4859_v11  ;;  %2245 = vmatpush.msrb.mxu3 %v4859_v11  ;;  %v1732_v54 = vmul.f32 0.2, %v1668_v2  ;;  %vm1700_vm4 = vcmp.gt.f32.partialorder %v1668_v2, 0.0 }
 0x76f   : > { %2246 = vmatpush.msrb.mxu3 %v4852_v35  ;;  %v1764_v40 = vsel %vm1700_vm4, %v1668_v2, %v1732_v54 }
 0x770   : > { %v4871_v34 = vadd.f32 %v4615_v0, %v1764_v40  ;;  %3259 = vmatmul.msk.f32.vlgmr.msrb.gmra.mxu3 %vm622_vm1, %v2224_v57  ;;  %v1665_v0 = vadd.f32 %v4787_v46, %v4804_v45 }
 0x772   : > { %v1729_v43 = vmul.f32 0.2, %v1665_v0  ;;  %vm1697_vm7 = vcmp.gt.f32.partialorder %v1665_v0, 0.0 }
 0x774   : > { %v1761_v52 = vsel %vm1697_vm7, %v1665_v0, %v1729_v43 }
 0x775   : > { %1846 = vmax.xlane.f32.xlu1 %v4844_v38  ;;  %v4893_v62 = vadd.f32 %v4599_v39, %v1761_v52 }
 0x77d   : > { %1844 = vmax.xlane.f32.xlu1 %v4849_v56 }
 0x785   : > { %1840 = vmax.xlane.f32.xlu1 %v4856_v3 }
 0x78d   : > { %1838 = vmax.xlane.f32.xlu1 %v4865_v14 }
 0x795   : > { %1834 = vmax.xlane.f32.xlu1 %v4871_v34 }
 0x79d   : > { %1832 = vmax.xlane.f32.xlu1 %v4881_v30 }
 0x7a5   : > { %1830 = vmax.xlane.f32.xlu1 %v4887_v47 }
 0x7a6   : > { %v4890_v50 = vpop.f32.mrf.mxu2 }
 0x7a7   : > { %5695 = vst [vmem:[#allocation8_spill] sm:$0xff] %v4890_v50  ;;  %v4922_v36 = vpop.xlane.xlu2 %1822 }
 0x7ad   : > { %1828 = vmax.xlane.f32.xlu1 %v4893_v62 }
 0x7ae   : > { %v2218_v4 = vpop.f32.mrf.mxu2 }
 0x7af   : > { %v1837_v49 = vpop.xlane.xlu2 %1836 }
 0x7b0   : > { %v1893_v52 = vsub.f32 %v4807_v44, %v1837_v49 }
 0x7b6   : > { %v2221_v29 = vpop.f32.mrf.mxu2 }
 0x7b7   : > { %2268 = vmatpush.msra.mxu3 %v2221_v29 }
 0x7b9   : > { %2269 = vmatpush.msra.mxu3 %v2218_v4 }
 0x7ba   : > { %3260 = vmatmul.msk.f32.vlgmr.msra.gmra.mxu3 %vm622_vm1, %v2225_v27 }
 0x7c3   : > { %v1853_v46 = vpop.xlane.xlu0 %1852 }
 0x7c4   : > { %v1901_v45 = vsub.f32 %v4819_v41, %v1853_v46 }
 0x7c6   : > { %v1948_v5 = vmul.f32 1.442695, %v1901_v45 }
 0x7c8   : > { %3611 = vpow2.f32 %v1948_v5 }
 0x7cb   : > { %v1849_v1 = vpop.xlane.xlu0 %1848 }
 0x7cc   : > { %v1899_v60 = vsub.f32 %v4824_v12, %v1849_v1 }
 0x7ce   : > { %v4901_v37 = vpop.eup %3611  ;;  %v1944_v55 = vmul.f32 1.442695, %v1899_v60 }
 0x7cf   : > { %2012 = vadd.xlane.f32.xlu1 %v4901_v37 }
 0x7e0   : > { %v1851_v39 = vpop.xlane.xlu1 %1850 }
 0x7e1   : > { %v1900_v6 = vsub.f32 %v4839_v53, %v1851_v39  ;;  %v1843_v53 = vpop.xlane.xlu0 %1842 }
 0x7e3   : > { %v1946_v42 = vmul.f32 1.442695, %v1900_v6 }
 0x7e5   : > { %3613 = vpow2.f32 %v1946_v42 }
 0x7e6   : > { %3615 = vpow2.f32 %v1944_v55 }
 0x7e8   : > { %v1847_v31 = vpop.xlane.xlu1 %1846 }
 0x7e9   : > { %v1898_v13 = vsub.f32 %v4844_v38, %v1847_v31  ;;  %v1896_v38 = vsub.f32 %v4829_v32, %v1843_v53 }
 0x7eb   : > { %v4907_v28 = vpop.eup %3613  ;;  %v1942_v41 = vmul.f32 1.442695, %v1898_v13  ;;  %v1938_v40 = vmul.f32 1.442695, %v1896_v38  ;;  %v4964_v13 = vpop.xlane.xlu2 %1826 }
 0x7ec   : > { %2010 = vadd.xlane.f32.xlu2 %v4907_v28  ;;  %v4911_v9 = vpop.eup %3615 }
 0x7ed   : > { %3617 = vpow2.f32 %v1942_v41  ;;  %v4972_v41 = vpop.xlane.xlu0 %1824 }
 0x7f0   : > { %v1845_v7 = vpop.xlane.xlu1 %1844 }
 0x7f1   : > { %v1897_v2 = vsub.f32 %v4849_v56, %v1845_v7 }
 0x7f3   : > { %v4913_v54 = vpop.eup %3617  ;;  %v1940_v12 = vmul.f32 1.442695, %v1897_v2  ;;  %v4946_v39 = vpop.f32.mrf.mxu3 }
 0x7f4   : > { %2006 = vadd.xlane.f32.xlu1 %v4913_v54  ;;  %2008 = vadd.xlane.f32.xlu2 %v4911_v9 }
 0x7f5   : > { %3619 = vpow2.f32 %v1940_v12 }
 0x7f6   : > { %3621 = vpow2.f32 %v1938_v40 }
 0x7f8   : > { %v1841_v63 = vpop.xlane.xlu1 %1840 }
 0x7f9   : > { %v1895_v56 = vsub.f32 %v4856_v3, %v1841_v63  ;;  %v1932_v3 = vmul.f32 1.442695, %v1893_v52  ;;  %v5696_v52 = vld [vmem:[#allocation6_spill] sm:$0xff] }
 0x7fb   : > { %v4918_v57 = vpop.eup %3619  ;;  %v1936_v59 = vmul.f32 1.442695, %v1895_v56 }
 0x7fc   : > { %2004 = vadd.xlane.f32.xlu0 %v4918_v57  ;;  %v4924_v33 = vpop.eup %3621 }
 0x7fd   : > { %3623 = vpow2.f32 %v1936_v59 }
 0x800   : > { %v1839_v48 = vpop.xlane.xlu1 %1838 }
 0x801   : > { %v1894_v32 = vsub.f32 %v4865_v14, %v1839_v48 }
 0x803   : > { %v1934_v0 = vmul.f32 1.442695, %v1894_v32  ;;  %v4928_v43 = vpop.eup %3623 }
 0x804   : > { %2002 = vadd.xlane.f32.xlu0 %v4924_v33 }
 0x805   : > { %3625 = vpow2.f32 %v1934_v0 }
 0x806   : > { %3627 = vpow2.f32 %v1932_v3  ;;  %v2469_v3 = vrot.slane %v4946_v39, 1 }
 0x808   : > { %v1835_v4 = vpop.xlane.xlu1 %1834 }
 0x809   : > { %v1892_v27 = vsub.f32 %v4871_v34, %v1835_v4 }
 0x80b   : > { %v4932_v29 = vpop.eup %3625  ;;  %v1930_v46 = vmul.f32 1.442695, %v1892_v27  ;;  %v5021_v27 = vperm.slane %v2469_v3, 0 }
 0x80c   : > { %2000 = vadd.xlane.f32.xlu0 %v4928_v43  ;;  %v4936_v14 = vpop.eup %3627 }
 0x80d   : > { %3629 = vpow2.f32 %v1930_v46 }
 0x810   : > { %v4942_v44 = vpop.xlane.xlu1 %1832 }
 0x813   : > { %v4939_v45 = vpop.eup %3629 }
 0x814   : > { %1998 = vadd.xlane.f32.xlu0 %v4932_v29 }
 0x818   : > { %v4944_v5 = vpop.xlane.xlu1 %1830 }
 0x81c   : > { %1996 = vadd.xlane.f32.xlu0 %v4936_v14 }
 0x820   : > { %v4948_v1 = vpop.xlane.xlu1 %1828 }
 0x824   : > { %1994 = vadd.xlane.f32.xlu0 %v4939_v45 }
 0x83d   : > { %v2271_v6 = vpop.f32.mrf.mxu3 }
 0x83e   : > { %v4950_v34 = vperm.slane %v2271_v6, 0  ;;  %v4952_v42 = vperm.slane %v2271_v6, 1 }
 0x840   : > { %2369 = vperm.xlu1 %3383, %v4950_v34   ;;  %2442 = vperm.xlu2 %3391, %v4952_v42  }
 0x841   : > { %2466 = vperm.xlu0 %3384, %v4952_v42  }
 0x842   : > { %v2013_v60 = vpop.xlane.xlu1 %2012 }
 0x843   : > { %3631 = vrcp.f32 %v2013_v60 }
 0x848   : > { %3385 = vset.pattern.permute.xlu1 %v3995_v10  ;;  %3395 = vset.pattern.permute.xlu2 %v4034_v19 }
 0x849   : > { %v3632_v55 = vpop.eup %3631  ;;  %3386 = vset.pattern.permute.xlu0 %v4013_v16 }
 0x84a   : > { %v2093_v31 = vmul.f32 %v3632_v55, %v4901_v37  ;;  %v583_v55 = vld [vmem:[%s5031_s28 + $0x68] sm:$0xff] }
 0x84c   : > { %2110 = vmatpush.xpose.msra.mxu1 %v2093_v31 }
 0x850   : > { %2363 = vperm.xlu1 %3385, %v4950_v34   ;;  %2327 = vperm.xlu2 %3395, %v4950_v34  }
 0x851   : > { %2357 = vperm.xlu0 %3386, %v4950_v34  }
 0x858   : > { %2460 = vperm.xlu1 %3385, %v4952_v42   ;;  %3398 = vset.pattern.permute.xlu2 %v4046_v21 }
 0x859   : > { %3389 = vset.pattern.permute.xlu0 %v4010_v15 }
 0x85f   : > { %v2011_v10 = vpop.xlane.xlu2 %2010 }
 0x860   : > { %3633 = vrcp.f32 %v2011_v10  ;;  %3387 = vset.pattern.permute.xlu1 %v4013_v16  ;;  %2418 = vperm.xlu2 %3398, %v4952_v42  }
 0x861   : > { %2448 = vperm.xlu0 %3389, %v4952_v42  }
 0x866   : > { %v3634_v37 = vpop.eup %3633 }
 0x867   : > { %v2009_v7 = vpop.xlane.xlu2 %2008  ;;  %v2092_v2 = vmul.f32 %v3634_v37, %v4907_v28  ;;  %v2007_v53 = vpop.xlane.xlu1 %2006  ;;  %v5044_v37 = vperm.slane %v4946_v39, 0  ;;  %v5054_v39 = vld [vmem:[%s5031_s28 + $0x60] sm:$0xff] }
 0x868   : > { %2454 = vperm.xlu1 %3387, %v4952_v42   ;;  %3400 = vset.pattern.permute.xlu2 %v4061_v23  ;;  %3635 = vrcp.f32 %v2009_v7 }
 0x869   : > { %3393 = vset.pattern.permute.xlu0 %v4028_v18  ;;  %2111 = vmatpush.xpose.msra.mxu1 %v2092_v2  ;;  %3637 = vrcp.f32 %v2007_v53 }
 0x86e   : > { %v3636_v16 = vpop.eup %3635 }
 0x86f   : > { %v2005_v12 = vpop.xlane.xlu0 %2004  ;;  %v2091_v38 = vmul.f32 %v3636_v16, %v4911_v9  ;;  %v3638_v28 = vpop.eup %3637 }
 0x870   : > { %3639 = vrcp.f32 %v2005_v12  ;;  %3388 = vset.pattern.permute.xlu1 %v4010_v15  ;;  %2412 = vperm.xlu2 %3400, %v4952_v42   ;;  %v2090_v63 = vmul.f32 %v3638_v28, %v4913_v54 }
 0x871   : > { %2436 = vperm.xlu0 %3393, %v4952_v42   ;;  %2112 = vmatpush.xpose.msra.mxu1 %v2091_v38 }
 0x875   : > { %2113 = vmatpush.xpose.msra.mxu1 %v2090_v63 }
 0x876   : > { %v3640_v40 = vpop.eup %3639 }
 0x877   : > { %v2003_v56 = vpop.xlane.xlu0 %2002  ;;  %v2089_v59 = vmul.f32 %v3640_v40, %v4918_v57 }
 0x878   : > { %3641 = vrcp.f32 %v2003_v56  ;;  %2351 = vperm.xlu1 %3388, %v4950_v34   ;;  %3402 = vset.pattern.permute.xlu2 %v4067_v24 }
 0x879   : > { %3396 = vset.pattern.permute.xlu0 %v4034_v19  ;;  %2114 = vmatpush.xpose.msra.mxu1 %v2089_v59 }
 0x87e   : > { %v3642_v15 = vpop.eup %3641 }
 0x87f   : > { %v2001_v9 = vpop.xlane.xlu0 %2000  ;;  %v2088_v48 = vmul.f32 %v3642_v15, %v4924_v33  ;;  %v584_v15 = vld [vmem:[%s5031_s28 + $0x70] sm:$0xff] }
 0x880   : > { %3643 = vrcp.f32 %v2001_v9  ;;  %3390 = vset.pattern.permute.xlu1 %v4022_v17  ;;  %2406 = vperm.xlu2 %3402, %v4952_v42  }
 0x881   : > { %2424 = vperm.xlu0 %3396, %v4952_v42   ;;  %2115 = vmatpush.xpose.msra.mxu1 %v2088_v48 }
 0x886   : > { %v3644_v54 = vpop.eup %3643 }
 0x887   : > { %v1999_v57 = vpop.xlane.xlu0 %1998  ;;  %v2087_v32 = vmul.f32 %v3644_v54, %v4928_v43 }
 0x888   : > { %3645 = vrcp.f32 %v1999_v57  ;;  %2345 = vperm.xlu1 %3390, %v4950_v34   ;;  %3403 = vset.pattern.permute.xlu2 %v4076_v25 }
 0x889   : > { %3405 = vset.pattern.permute.xlu0 %v4083_v26  ;;  %2116 = vmatpush.xpose.msra.mxu1 %v2087_v32 }
 0x88e   : > { %v3646_v19 = vpop.eup %3645 }
 0x88f   : > { %v1997_v33 = vpop.xlane.xlu0 %1996  ;;  %v2086_v17 = vmul.f32 %v3646_v19, %v4932_v29 }
 0x890   : > { %3647 = vrcp.f32 %v1997_v33  ;;  %3392 = vset.pattern.permute.xlu1 %v4028_v18  ;;  %2303 = vperm.xlu2 %3403, %v4950_v34  }
 0x891   : > { %2394 = vperm.xlu0 %3405, %v4952_v42   ;;  %2117 = vmatpush.xpose.msra.mxu1 %v2086_v17 }
 0x896   : > { %v3648_v0 = vpop.eup %3647 }
 0x897   : > { %v1995_v49 = vpop.xlane.xlu0 %1994  ;;  %v2085_v43 = vmul.f32 %v3648_v0, %v4936_v14 }
 0x898   : > { %3649 = vrcp.f32 %v1995_v49  ;;  %2339 = vperm.xlu1 %3392, %v4950_v34   ;;  %2400 = vperm.xlu2 %3403, %v4952_v42  }
 0x899   : > { %3407 = vset.pattern.permute.xlu0 %v5691_v22  ;;  %2118 = vmatpush.xpose.msra.mxu1 %v2085_v43 }
 0x89a   : > { %v5056_v40 = vpop.permute.xlu2 %2442 }
 0x89e   : > { %v3650_v25 = vpop.eup %3649 }
 0x89f   : > { %v2084_v18 = vmul.f32 %v3650_v25, %v4939_v45 }
 0x8a0   : > { %3394 = vset.pattern.permute.xlu1 %v4040_v20  ;;  %3406 = vset.pattern.permute.xlu2 %v5691_v22  ;;  %v5697_v20 = vmov 0  }
 0x8a1   : > { %2388 = vperm.xlu0 %3407, %v4952_v42   ;;  %2119 = vmatpush.xpose.msra.mxu1 %v2084_v18 }
 0x8a8   : > { %2333 = vperm.xlu1 %3394, %v4950_v34   ;;  %2291 = vperm.xlu2 %3406, %v4950_v34  }
 0x8a9   : > { %3410 = vset.pattern.permute.xlu0 %v3989_v8 }
 0x8aa   : > { %v5068_v54 = vpop.permute.xlu2 %2327 }
 0x8b0   : > { %2430 = vperm.xlu1 %3394, %v4952_v42   ;;  %3409 = vset.pattern.permute.xlu2 %v5696_v52 }
 0x8b1   : > { %2279 = vperm.xlu0 %3410, %v4950_v34  }
 0x8b2   : > { %v2370_v22 = vpop.permute.xlu1 %2369 }
 0x8b3   : > { %v2467_v29 = vpop.permute.xlu0 %2466 }
 0x8b8   : > { %3397 = vset.pattern.permute.xlu1 %v4046_v21  ;;  %2382 = vperm.xlu2 %3409, %v4952_v42   ;;  %v2505_v21 = vadd.f32 %v5021_v27, %v2467_v29 }
 0x8b9   : > { %3413 = vset.pattern.permute.xlu0 %v5697_v20 }
 0x8ba   : > { %v2569_v46 = vmul.f32 0.2, %v2505_v21  ;;  %vm2537_vm1 = vcmp.gt.f32.partialorder %v2505_v21, 0.0  ;;  %v2419_v0 = vpop.permute.xlu2 %2418 }
 0x8c0   : > { %2321 = vperm.xlu1 %3397, %v4950_v34   ;;  %3411 = vset.pattern.permute.xlu2 %v3989_v8  ;;  %v585_v8 = vld [vmem:[%s5031_s28 + $0x78] sm:$0xff] }
 0x8c2   : > { %v2364_v4 = vpop.permute.xlu1 %2363 }
 0x8c3   : > { %v2488_v16 = vadd.f32 %v5044_v37, %v2364_v4  ;;  %v2358_v32 = vpop.permute.xlu0 %2357 }
 0x8c4   : > { %v2487_v19 = vadd.f32 %v5044_v37, %v2358_v32  ;;  %v5112_v32 = vld [vmem:[%s5031_s28 + $0x30] sm:$0xff] }
 0x8c5   : > { %v2552_v56 = vmul.f32 0.2, %v2488_v16  ;;  %vm2520_vm11 = vcmp.gt.f32.partialorder %v2488_v16, 0.0 }
 0x8c6   : > { %v2551_v49 = vmul.f32 0.2, %v2487_v19  ;;  %vm2519_vm13 = vcmp.gt.f32.partialorder %v2487_v19, 0.0 }
 0x8c7   : > { %v2584_v9 = vsel %vm2520_vm11, %v2488_v16, %v2552_v56 }
 0x8c8   : > { %3399 = vset.pattern.permute.xlu1 %v4061_v23  ;;  %2376 = vperm.xlu2 %3411, %v4952_v42   ;;  %v2601_v23 = vsel %vm2537_vm1, %v2505_v21, %v2569_v46  ;;  %v5066_v48 = vadd.f32 %v2584_v9, %v584_v15  ;;  %v2583_v18 = vsel %vm2519_vm13, %v2487_v19, %v2551_v49  ;;  %v579_v19 = vld [vmem:[%s5031_s28 + $0x48] sm:$0xff] }
 0x8c9   : > { %v5035_v45 = vadd.f32 %v2601_v23, %v585_v8  ;;  %v2497_v46 = vadd.f32 %v5021_v27, %v2419_v0 }
 0x8ca   : > { %v2461_v14 = vpop.permute.xlu1 %2460 }
 0x8cb   : > { %v2504_v59 = vadd.f32 %v5021_v27, %v2461_v14  ;;  %vm2529_vm0 = vcmp.gt.f32.partialorder %v2497_v46, 0.0 }
 0x8cd   : > { %v2568_v57 = vmul.f32 0.2, %v2504_v59  ;;  %vm2536_vm12 = vcmp.gt.f32.partialorder %v2504_v59, 0.0 }
 0x8cf   : > { %v2600_v33 = vsel %vm2536_vm12, %v2504_v59, %v2568_v57 }
 0x8d0   : > { %2315 = vperm.xlu1 %3399, %v4950_v34   ;;  %3412 = vset.pattern.permute.xlu2 %v5697_v20  ;;  %v5073_v17 = vadd.f32 %v2600_v33, %v584_v15 }
 0x8d8   : > { %3401 = vset.pattern.permute.xlu1 %v4067_v24  ;;  %v2489_v24 = vadd.f32 %v5044_v37, %v2370_v22  ;;  %v2413_v22 = vpop.permute.xlu2 %2412 }
 0x8da   : > { %v2455_v6 = vpop.permute.xlu1 %2454  ;;  %v2553_v7 = vmul.f32 0.2, %v2489_v24  ;;  %vm2521_vm9 = vcmp.gt.f32.partialorder %v2489_v24, 0.0 }
 0x8db   : > { %v2503_v42 = vadd.f32 %v5021_v27, %v2455_v6  ;;  %2696 = vmax.xlane.f32.xlu0 %v5035_v45  ;;  %v5091_v6 = vld [vmem:[%s5031_s28 + $0x50] sm:$0xff] }
 0x8dc   : > { %v2585_v12 = vsel %vm2521_vm9, %v2489_v24, %v2553_v7  ;;  %v2496_v24 = vadd.f32 %v5021_v27, %v2413_v22  ;;  %v5100_v7 = vld [vmem:[%s5031_s28 + $0x38] sm:$0xff] }
 0x8dd   : > { %vm2535_vm8 = vcmp.gt.f32.partialorder %v2503_v42, 0.0  ;;  %v2567_v60 = vmul.f32 0.2, %v2503_v42  ;;  %v5051_v28 = vadd.f32 %v2585_v12, %v585_v8  ;;  %v5085_v8 = vld [vmem:[%s5031_s28 + $0x58] sm:$0xff] }
 0x8de   : > { %vm2528_vm2 = vcmp.gt.f32.partialorder %v2496_v24, 0.0 }
 0x8df   : > { %v2599_v31 = vsel %vm2535_vm8, %v2503_v42, %v2567_v60 }
 0x8e0   : > { %2309 = vperm.xlu1 %3401, %v4950_v34   ;;  %v5041_v10 = vadd.f32 %v2599_v31, %v583_v55  ;;  %v2407_v42 = vpop.permute.xlu2 %2406 }
 0x8e1   : > { %v2495_v9 = vadd.f32 %v5021_v27, %v2407_v42 }
 0x8e3   : > { %2692 = vmax.xlane.f32.xlu0 %v5041_v10  ;;  %vm2527_vm5 = vcmp.gt.f32.partialorder %v2495_v9, 0.0 }
 0x8e8   : > { %3404 = vset.pattern.permute.xlu1 %v4083_v26 }
 0x8ea   : > { %v2352_v2 = vpop.permute.xlu1 %2351  ;;  %v5102_v16 = vpop.permute.xlu2 %2303 }
 0x8eb   : > { %v2486_v53 = vadd.f32 %v5044_v37, %v2352_v2 }
 0x8ed   : > { %vm2518_vm10 = vcmp.gt.f32.partialorder %v2486_v53, 0.0  ;;  %v2550_v38 = vmul.f32 0.2, %v2486_v53 }
 0x8ef   : > { %v2582_v63 = vsel %vm2518_vm10, %v2486_v53, %v2550_v38  ;;  %v2560_v53 = vmul.f32 0.2, %v2496_v24 }
 0x8f0   : > { %2297 = vperm.xlu1 %3404, %v4950_v34   ;;  %v5060_v26 = vadd.f32 %v2582_v63, %v5054_v39 }
 0x8f1   : > { %2664 = vmax.xlane.f32.xlu2 %v5051_v28  ;;  %v2592_v59 = vsel %vm2528_vm2, %v2496_v24, %v2560_v53 }
 0x8f2   : > { %2658 = vmax.xlane.f32.xlu0 %v5060_v26  ;;  %v5117_v49 = vadd.f32 %v2592_v59, %v5112_v32  ;;  %v2401_v22 = vpop.permute.xlu2 %2400 }
 0x8f8   : > { %3408 = vset.pattern.permute.xlu1 %v5696_v52  ;;  %v5078_v52 = vadd.f32 %v2583_v18, %v583_v55  ;;  %v2561_v55 = vmul.f32 0.2, %v2497_v46  ;;  %v2559_v18 = vmul.f32 0.2, %v2495_v9 }
 0x8f9   : > { %2662 = vmax.xlane.f32.xlu2 %v5066_v48 }
 0x8fa   : > { %v2346_v43 = vpop.permute.xlu1 %2345  ;;  %v2593_v2 = vsel %vm2529_vm0, %v2497_v46, %v2561_v55  ;;  %v578_v55 = vld [vmem:[%s5031_s28 + $0x40] sm:$0xff] }
 0x8fb   : > { %v2485_v25 = vadd.f32 %v5044_v37, %v2346_v43  ;;  %v5105_v12 = vadd.f32 %v2593_v2, %v5100_v7 }
 0x8fd   : > { %v2549_v3 = vmul.f32 0.2, %v2485_v25  ;;  %vm2517_vm14 = vcmp.gt.f32.partialorder %v2485_v25, 0.0 }
 0x8ff   : > { %v2581_v21 = vsel %vm2517_vm14, %v2485_v25, %v2549_v3 }
 0x900   : > { %2285 = vperm.xlu1 %3408, %v4950_v34   ;;  %v2449_v34 = vpop.permute.xlu0 %2448  ;;  %v5088_v23 = vadd.f32 %v2581_v21, %v5085_v8  ;;  %v2591_v21 = vsel %vm2527_vm5, %v2495_v9, %v2559_v18 }
 0x901   : > { %2694 = vmax.xlane.f32.xlu2 %v5073_v17  ;;  %v2502_v15 = vadd.f32 %v5021_v27, %v2449_v34  ;;  %v2494_v34 = vadd.f32 %v5021_v27, %v2401_v22 }
 0x903   : > { %v2566_v25 = vmul.f32 0.2, %v2502_v15  ;;  %vm2534_vm4 = vcmp.gt.f32.partialorder %v2502_v15, 0.0  ;;  %v2558_v2 = vmul.f32 0.2, %v2494_v34  ;;  %vm2526_vm1 = vcmp.gt.f32.partialorder %v2494_v34, 0.0 }
 0x905   : > { %v2598_v46 = vsel %vm2534_vm4, %v2502_v15, %v2566_v25 }
 0x906   : > { %v5133_v42 = vadd.f32 %v2598_v46, %v5054_v39  ;;  %v5143_v39 = vld [vmem:[%s5031_s28 + $0x20] sm:$0xff] }
 0x908   : > { %3414 = vset.pattern.permute.xlu1 %v5697_v20  ;;  %v2437_v31 = vpop.permute.xlu0 %2436 }
 0x909   : > { %2660 = vmax.xlane.f32.xlu2 %v5078_v52 }
 0x90a   : > { %v2340_v4 = vpop.permute.xlu1 %2339 }
 0x90b   : > { %v2484_v29 = vadd.f32 %v5044_v37, %v2340_v4  ;;  %v2501_v4 = vadd.f32 %v5021_v27, %v5056_v40 }
 0x90d   : > { %vm2516_vm15 = vcmp.gt.f32.partialorder %v2484_v29, 0.0  ;;  %v2548_v14 = vmul.f32 0.2, %v2484_v29  ;;  %v2565_v24 = vmul.f32 0.2, %v2501_v4  ;;  %vm2533_vm7 = vcmp.gt.f32.partialorder %v2501_v4, 0.0 }
 0x90f   : > { %v2580_v20 = vsel %vm2516_vm15, %v2484_v29, %v2548_v14  ;;  %v5127_v29 = vld [vmem:[%s5031_s28 + $0x28] sm:$0xff] }
 0x910   : > { %v5094_v60 = vadd.f32 %v2580_v20, %v5091_v6  ;;  %v2425_v63 = vpop.permute.xlu0 %2424  ;;  %v5130_v20 = vadd.f32 %v2591_v21, %v5127_v29 }
 0x911   : > { %2656 = vmax.xlane.f32.xlu2 %v5088_v23  ;;  %v2498_v33 = vadd.f32 %v5021_v27, %v2425_v63  ;;  %v2590_v63 = vsel %vm2526_vm1, %v2494_v34, %v2558_v2 }
 0x912   : > { %2654 = vmax.xlane.f32.xlu0 %v5094_v60  ;;  %v5146_v59 = vadd.f32 %v2590_v63, %v5143_v39 }
 0x913   : > { %v2562_v3 = vmul.f32 0.2, %v2498_v33  ;;  %vm2530_vm6 = vcmp.gt.f32.partialorder %v2498_v33, 0.0 }
 0x915   : > { %v2594_v14 = vsel %vm2530_vm6, %v2498_v33, %v2562_v3 }
 0x916   : > { %v5136_v53 = vadd.f32 %v2594_v14, %v578_v55 }
 0x918   : > { %v2395_v14 = vpop.permute.xlu0 %2394 }
 0x91a   : > { %v2334_v38 = vpop.permute.xlu1 %2333  ;;  %2680 = vmax.xlane.f32.xlu0 %v5105_v12 }
 0x91b   : > { %v2483_v56 = vadd.f32 %v5044_v37, %v2334_v38  ;;  %v2500_v38 = vadd.f32 %v5021_v27, %v2437_v31 }
 0x91d   : > { %vm2515_vm3 = vcmp.gt.f32.partialorder %v2483_v56, 0.0  ;;  %v2547_v57 = vmul.f32 0.2, %v2483_v56  ;;  %v2564_v9 = vmul.f32 0.2, %v2500_v38  ;;  %vm2532_vm8 = vcmp.gt.f32.partialorder %v2500_v38, 0.0 }
 0x91f   : > { %v2579_v0 = vsel %vm2515_vm3, %v2483_v56, %v2547_v57  ;;  %v2597_v56 = vsel %vm2533_vm7, %v2501_v4, %v2565_v24  ;;  %v2596_v25 = vsel %vm2532_vm8, %v2500_v38, %v2564_v9  ;;  %v2482_v4 = vadd.f32 %v5044_v37, %v5068_v54  ;;  %v2292_v9 = vpop.permute.xlu2 %2291 }
 0x920   : > { %v5119_v43 = vadd.f32 %v2579_v0, %v579_v19  ;;  %v5149_v15 = vadd.f32 %v2597_v56, %v5085_v8  ;;  %v5156_v22 = vadd.f32 %v2596_v25, %v5091_v6  ;;  %v2493_v24 = vadd.f32 %v5021_v27, %v2395_v14  ;;  %v2389_v56 = vpop.permute.xlu0 %2388 }
 0x921   : > { %v2546_v46 = vmul.f32 0.2, %v2482_v4  ;;  %vm2514_vm11 = vcmp.gt.f32.partialorder %v2482_v4, 0.0 }
 0x922   : > { %2678 = vmax.xlane.f32.xlu0 %v5117_v49  ;;  %2652 = vmax.xlane.f32.xlu2 %v5119_v43  ;;  %v2431_v40 = vpop.permute.xlu1 %2430  ;;  %vm2525_vm13 = vcmp.gt.f32.partialorder %v2493_v24, 0.0 }
 0x923   : > { %v2499_v31 = vadd.f32 %v5021_v27, %v2431_v40  ;;  %v2578_v40 = vsel %vm2514_vm11, %v2482_v4, %v2546_v46 }
 0x924   : > { %v5170_v63 = vadd.f32 %v2578_v40, %v578_v55 }
 0x925   : > { %v2563_v3 = vmul.f32 0.2, %v2499_v31  ;;  %vm2531_vm10 = vcmp.gt.f32.partialorder %v2499_v31, 0.0 }
 0x927   : > { %v2595_v34 = vsel %vm2531_vm10, %v2499_v31, %v2563_v3  ;;  %v2478_v3 = vadd.f32 %v5044_v37, %v5102_v16  ;;  %v2383_v4 = vpop.permute.xlu2 %2382 }
 0x928   : > { %v5165_v21 = vadd.f32 %v2595_v34, %v579_v19  ;;  %v2557_v19 = vmul.f32 0.2, %v2493_v24  ;;  %v2280_v25 = vpop.permute.xlu0 %2279 }
 0x929   : > { %v2474_v34 = vadd.f32 %v5044_v37, %v2280_v25  ;;  %v2542_v40 = vmul.f32 0.2, %v2478_v3  ;;  %vm2510_vm0 = vcmp.gt.f32.partialorder %v2478_v3, 0.0 }
 0x92a   : > { %2676 = vmax.xlane.f32.xlu0 %v5130_v20  ;;  %2690 = vmax.xlane.f32.xlu1 %v5133_v42  ;;  %v2589_v31 = vsel %vm2525_vm13, %v2493_v24, %v2557_v19 }
 0x92b   : > { %2682 = vmax.xlane.f32.xlu2 %v5136_v53  ;;  %vm2506_vm2 = vcmp.gt.f32.partialorder %v2474_v34, 0.0  ;;  %v2574_v19 = vsel %vm2510_vm0, %v2478_v3, %v2542_v40  ;;  %v2476_v3 = vadd.f32 %v5044_v37, %v2292_v9 }
 0x92d   : > { %v2540_v40 = vmul.f32 0.2, %v2476_v3  ;;  %vm2508_vm4 = vcmp.gt.f32.partialorder %v2476_v3, 0.0 }
 0x92f   : > { %v2377_v16 = vpop.permute.xlu2 %2376 }
 0x932   : > { %v2322_v57 = vpop.permute.xlu1 %2321  ;;  %2674 = vmax.xlane.f32.xlu0 %v5146_v59  ;;  %2688 = vmax.xlane.f32.xlu1 %v5149_v15 }
 0x933   : > { %v2481_v33 = vadd.f32 %v5044_v37, %v2322_v57  ;;  %v2492_v57 = vadd.f32 %v5021_v27, %v2389_v56  ;;  %v5195_v56 = vld [vmem:[%s5031_s28] sm:$0xff] }
 0x935   : > { %vm2513_vm9 = vcmp.gt.f32.partialorder %v2481_v33, 0.0  ;;  %v2545_v0 = vmul.f32 0.2, %v2481_v33  ;;  %v2556_v55 = vmul.f32 0.2, %v2492_v57  ;;  %vm2524_vm14 = vcmp.gt.f32.partialorder %v2492_v57, 0.0 }
 0x937   : > { %v2577_v18 = vsel %vm2513_vm9, %v2481_v33, %v2545_v0  ;;  %v573_v33 = vld [vmem:[%s5031_s28 + $0x18] sm:$0xff]  ;;  %v2588_v14 = vsel %vm2524_vm14, %v2492_v57, %v2556_v55 }
 0x938   : > { %v5159_v8 = vadd.f32 %v2577_v18, %v5100_v7  ;;  %v5179_v0 = vadd.f32 %v2589_v31, %v573_v33  ;;  %v5198_v31 = vadd.f32 %v2574_v19, %v5143_v39 }
 0x93a   : > { %2686 = vmax.xlane.f32.xlu1 %v5156_v22  ;;  %2648 = vmax.xlane.f32.xlu2 %v5159_v8 }
 0x942   : > { %v2316_v6 = vpop.permute.xlu1 %2315  ;;  %2684 = vmax.xlane.f32.xlu1 %v5165_v21 }
 0x943   : > { %v2480_v7 = vadd.f32 %v5044_v37, %v2316_v6 }
 0x945   : > { %vm2512_vm12 = vcmp.gt.f32.partialorder %v2480_v7, 0.0  ;;  %v2544_v2 = vmul.f32 0.2, %v2480_v7 }
 0x947   : > { %v2576_v38 = vsel %vm2512_vm12, %v2480_v7, %v2544_v2  ;;  %v572_v7 = vld [vmem:[%s5031_s28 + $0x10] sm:$0xff] }
 0x948   : > { %v5173_v54 = vadd.f32 %v2576_v38, %v5112_v32  ;;  %v5190_v2 = vadd.f32 %v2588_v14, %v572_v7  ;;  %v2538_v38 = vmul.f32 0.2, %v2474_v34 }
 0x94a   : > { %2650 = vmax.xlane.f32.xlu1 %v5170_v63  ;;  %2646 = vmax.xlane.f32.xlu2 %v5173_v54  ;;  %v2570_v57 = vsel %vm2506_vm2, %v2474_v34, %v2538_v38  ;;  %v2491_v38 = vadd.f32 %v5021_v27, %v2383_v4 }
 0x94c   : > { %vm2523_vm5 = vcmp.gt.f32.partialorder %v2491_v38, 0.0 }
 0x952   : > { %v2310_v32 = vpop.permute.xlu1 %2309  ;;  %2672 = vmax.xlane.f32.xlu1 %v5179_v0 }
 0x953   : > { %v2479_v18 = vadd.f32 %v5044_v37, %v2310_v32  ;;  %v5206_v32 = vpop.xlane.xlu0 %2696 }
 0x954   : > { %vm2953_vm14 = vcmp.gt.f32.partialorder %v5206_v32, -5e+29 }
 0x955   : > { %vm2511_vm15 = vcmp.gt.f32.partialorder %v2479_v18, 0.0  ;;  %v2543_v46 = vmul.f32 0.2, %v2479_v18 }
 0x957   : > { %v2575_v6 = vsel %vm2511_vm15, %v2479_v18, %v2543_v46 }
 0x958   : > { %v5188_v24 = vadd.f32 %v2575_v6, %v5127_v29  ;;  %v5201_v29 = vadd.f32 %v2570_v57, %v5195_v56  ;;  %v2572_v57 = vsel %vm2508_vm4, %v2476_v3, %v2540_v40  ;;  %v571_v40 = vld [vmem:[%s5031_s28 + $0x8] sm:$0xff] }
 0x95a   : > { %2644 = vmax.xlane.f32.xlu2 %v5188_v24  ;;  %2670 = vmax.xlane.f32.xlu1 %v5190_v2 }
 0x95b   : > { %v5219_v9 = vpop.xlane.xlu0 %2692 }
 0x95c   : > { %vm2951_vm0 = vcmp.gt.f32.partialorder %v5219_v9, -5e+29 }
 0x962   : > { %v2298_v55 = vpop.permute.xlu1 %2297  ;;  %2642 = vmax.xlane.f32.xlu2 %v5198_v31  ;;  %2634 = vmax.xlane.f32.xlu1 %v5201_v29 }
 0x963   : > { %v2477_v25 = vadd.f32 %v5044_v37, %v2298_v55 }
 0x964   : > { %v5208_v18 = vpop.xlane.xlu2 %2664 }
 0x965   : > { %vm2509_vm3 = vcmp.gt.f32.partialorder %v2477_v25, 0.0  ;;  %v2541_v34 = vmul.f32 0.2, %v2477_v25  ;;  %v2713_v39 = vsub.f32 %v5051_v28, %v5208_v18  ;;  %v2555_v28 = vmul.f32 0.2, %v2491_v38 }
 0x966   : > { %vm2937_vm1 = vcmp.gt.f32.partialorder %v5208_v18, -5e+29 }
 0x967   : > { %v2760_v46 = vmul.f32 1.442695, %v2713_v39  ;;  %v2573_v14 = vsel %vm2509_vm3, %v2477_v25, %v2541_v34  ;;  %v2587_v39 = vsel %vm2523_vm5, %v2491_v38, %v2555_v28 }
 0x968   : > { %v5213_v6 = vadd.f32 %v2573_v14, %v573_v33  ;;  %v5224_v33 = vadd.f32 %v2572_v57, %v572_v7  ;;  %v5236_v57 = vpop.xlane.xlu0 %2658 }
 0x969   : > { %3651 = vpow2.f32 %v2760_v46  ;;  %v2490_v46 = vadd.f32 %v5021_v27, %v2377_v16  ;;  %v2710_v38 = vsub.f32 %v5060_v26, %v5236_v57  ;;  %v2729_v27 = vsub.f32 %v5035_v45, %v5206_v32 }
 0x96a   : > { %2640 = vmax.xlane.f32.xlu0 %v5213_v6  ;;  %vm2934_vm10 = vcmp.gt.f32.partialorder %v5236_v57, -5e+29 }
 0x96b   : > { %vm2522_vm7 = vcmp.gt.f32.partialorder %v2490_v46, 0.0 }
 0x96c   : > { %v5217_v19 = vpop.xlane.xlu2 %2662 }
 0x96d   : > { %v2712_v4 = vsub.f32 %v5066_v48, %v5217_v19  ;;  %vm2936_vm8 = vcmp.gt.f32.partialorder %v5217_v19, -5e+29 }
 0x96f   : > { %v5221_v55 = vpop.eup %3651  ;;  %v2758_v11 = vmul.f32 1.442695, %v2712_v4 }
 0x970   : > { %5698 = vst [vmem:[#allocation6_spill] sm:$0xff] %v5221_v55  ;;  %2824 = vadd.xlane.f32.xlu1 %v5221_v55  ;;  %v5238_v55 = vadd.f32 %v2587_v39, %v571_v40 }
 0x972   : > { %v2286_v25 = vpop.permute.xlu1 %2285  ;;  %2638 = vmax.xlane.f32.xlu0 %v5224_v33 }
 0x973   : > { %v2475_v34 = vadd.f32 %v5044_v37, %v2286_v25  ;;  %v2554_v37 = vmul.f32 0.2, %v2490_v46  ;;  %v2792_v25 = vmul.f32 1.442695, %v2729_v27 }
 0x974   : > { %v5230_v3 = vpop.xlane.xlu2 %2694 }
 0x975   : > { %vm2507_vm6 = vcmp.gt.f32.partialorder %v2475_v34, 0.0  ;;  %v2539_v14 = vmul.f32 0.2, %v2475_v34  ;;  %v2728_v7 = vsub.f32 %v5073_v17, %v5230_v3  ;;  %v2727_v17 = vsub.f32 %v5041_v10, %v5219_v9  ;;  %v1414_v9 = vld [vmem:[%s5645_s10] sm:$0xff] }
 0x976   : > { %v2586_v28 = vsel %vm2522_vm7, %v2490_v46, %v2554_v37  ;;  %v1891_v10 = vsub.f32 %v4881_v30, %v4942_v44  ;;  %vm2952_vm15 = vcmp.gt.f32.partialorder %v5230_v3, -5e+29 }
 0x977   : > { %v2790_v35 = vmul.f32 1.442695, %v2728_v7  ;;  %v2571_v50 = vsel %vm2507_vm6, %v2475_v34, %v2539_v14  ;;  %v5256_v45 = vadd.f32 %v2586_v28, %v5195_v56 }
 0x978   : > { %v5240_v48 = vadd.f32 %v2571_v50, %v571_v40  ;;  %v2754_v50 = vmul.f32 1.442695, %v2710_v38  ;;  %v1928_v39 = vmul.f32 1.442695, %v1891_v10 }
 0x979   : > { %3653 = vpow2.f32 %v2790_v35  ;;  %v2788_v35 = vmul.f32 1.442695, %v2727_v17 }
 0x97a   : > { %2668 = vmax.xlane.f32.xlu0 %v5238_v55  ;;  %2636 = vmax.xlane.f32.xlu2 %v5240_v48  ;;  %3655 = vpow2.f32 %v2758_v11 }
 0x97b   : > { %3657 = vpow2.f32 %v2754_v50 }
 0x97c   : > { %v5250_v16 = vpop.xlane.xlu2 %2660  ;;  %3659 = vpow2.f32 %v2792_v25 }
 0x97d   : > { %3661 = vpow2.f32 %v2788_v35  ;;  %v2711_v11 = vsub.f32 %v5078_v52, %v5250_v16  ;;  %vm2935_vm9 = vcmp.gt.f32.partialorder %v5250_v16, -5e+29 }
 0x97f   : > { %v5252_v4 = vpop.eup %3653  ;;  %v2756_v30 = vmul.f32 1.442695, %v2711_v11  ;;  %v1888_v11 = vsub.f32 %v4811_v51, %v4964_v13  ;;  %v1887_v51 = vsub.f32 %v4834_v58, %v4972_v41 }
 0x980   : > { %2854 = vadd.xlane.f32.xlu1 %v5252_v4  ;;  %v5258_v26 = vpop.eup %3655 }
 0x981   : > { %v5272_v14 = vpop.eup %3657 }
 0x982   : > { %2822 = vadd.xlane.f32.xlu0 %v5258_v26  ;;  %2666 = vmax.xlane.f32.xlu2 %v5256_v45  ;;  %v5274_v7 = vpop.eup %3659 }
 0x983   : > { %v5277_v40 = vpop.eup %3661 }
 0x984   : > { %v5266_v34 = vpop.xlane.xlu2 %2656 }
 0x985   : > { %v2709_v56 = vsub.f32 %v5088_v23, %v5266_v34  ;;  %v5270_v46 = vpop.xlane.xlu0 %2654  ;;  %v1890_v23 = vsub.f32 %v4887_v47, %v4944_v5  ;;  %v1889_v47 = vsub.f32 %v4893_v62, %v4948_v1  ;;  %vm2933_vm11 = vcmp.gt.f32.partialorder %v5266_v34, -5e+29 }
 0x986   : > { %v2708_v52 = vsub.f32 %v5094_v60, %v5270_v46  ;;  %vm2932_vm12 = vcmp.gt.f32.partialorder %v5270_v46, -5e+29 }
 0x987   : > { %v2752_v44 = vmul.f32 1.442695, %v2709_v56  ;;  %v1926_v27 = vmul.f32 1.442695, %v1890_v23  ;;  %v1924_v25 = vmul.f32 1.442695, %v1889_v47 }
 0x988   : > { %2818 = vadd.xlane.f32.xlu1 %v5272_v14  ;;  %v2750_v37 = vmul.f32 1.442695, %v2708_v52 }
 0x989   : > { %3663 = vpow2.f32 %v2752_v44  ;;  %v1920_v44 = vmul.f32 1.442695, %v1887_v51 }
 0x98a   : > { %3665 = vpow2.f32 %v1928_v39  ;;  %2856 = vadd.xlane.f32.xlu2 %v5274_v7  ;;  %2852 = vadd.xlane.f32.xlu0 %v5277_v40 }
 0x98b   : > { %3667 = vpow2.f32 %v2756_v30 }
 0x98c   : > { %3669 = vpow2.f32 %v2750_v37 }
 0x98d   : > { %3671 = vpow2.f32 %v1926_v27  ;;  %v1886_v27 = vsub.f32 %v4799_v61, %v4922_v36 }
 0x98f   : > { %v5285_v38 = vpop.eup %3663 }
 0x990   : > { %v5287_v17 = vpop.eup %3665  ;;  %2816 = vadd.xlane.f32.xlu1 %v5285_v38 }
 0x991   : > { %v5290_v50 = vpop.eup %3667 }
 0x992   : > { %2820 = vadd.xlane.f32.xlu2 %v5290_v50  ;;  %1992 = vadd.xlane.f32.xlu0 %v5287_v17  ;;  %v5300_v28 = vpop.eup %3669 }
 0x993   : > { %v5303_v10 = vpop.eup %3671 }
 0x995   : > { %v5296_v5 = vpop.xlane.xlu2 %2652 }
 0x996   : > { %v2707_v60 = vsub.f32 %v5119_v43, %v5296_v5  ;;  %v1922_v43 = vmul.f32 1.442695, %v1888_v11  ;;  %vm2931_vm13 = vcmp.gt.f32.partialorder %v5296_v5, -5e+29 }
 0x998   : > { %v2748_v35 = vmul.f32 1.442695, %v2707_v60  ;;  %2814 = vadd.xlane.f32.xlu1 %v5300_v28 }
 0x99a   : > { %3673 = vpow2.f32 %v2748_v35  ;;  %1990 = vadd.xlane.f32.xlu0 %v5303_v10 }
 0x99b   : > { %3675 = vpow2.f32 %v1924_v25 }
 0x99d   : > { %v5308_v62 = vpop.xlane.xlu1 %2690 }
 0x99e   : > { %v2726_v1 = vsub.f32 %v5133_v42, %v5308_v62  ;;  %v5342_v35 = vpop.xlane.xlu2 %2682  ;;  %vm2950_vm2 = vcmp.gt.f32.partialorder %v5308_v62, -5e+29 }
 0x99f   : > { %5699 = vst [vmem:[#allocation9_spill] sm:$0xff] %v5342_v35 }
 0x9a0   : > { %v5312_v56 = vpop.eup %3673  ;;  %v2786_v39 = vmul.f32 1.442695, %v2726_v1 }
 0x9a1   : > { %v5314_v30 = vpop.eup %3675  ;;  %2812 = vadd.xlane.f32.xlu1 %v5312_v56 }
 0x9a2   : > { %3677 = vpow2.f32 %v2786_v39  ;;  %1988 = vadd.xlane.f32.xlu0 %v5314_v30  ;;  %v2722_v39 = vsub.f32 %v5136_v53, %v5342_v35 }
 0x9a3   : > { %3679 = vpow2.f32 %v1922_v43 }
 0x9a4   : > { %v2778_v51 = vmul.f32 1.442695, %v2722_v39 }
 0x9a5   : > { %v5320_v13 = vpop.xlane.xlu1 %2688 }
 0x9a6   : > { %v2725_v42 = vsub.f32 %v5149_v15, %v5320_v13  ;;  %v1918_v15 = vmul.f32 1.442695, %v1886_v27  ;;  %vm2949_vm3 = vcmp.gt.f32.partialorder %v5320_v13, -5e+29 }
 0x9a8   : > { %v5324_v52 = vpop.eup %3677  ;;  %v2784_v23 = vmul.f32 1.442695, %v2725_v42 }
 0x9a9   : > { %v5326_v37 = vpop.eup %3679  ;;  %2850 = vadd.xlane.f32.xlu2 %v5324_v52 }
 0x9aa   : > { %3681 = vpow2.f32 %v2784_v23  ;;  %1986 = vadd.xlane.f32.xlu0 %v5326_v37 }
 0x9ab   : > { %3683 = vpow2.f32 %v1920_v44 }
 0x9ad   : > { %v5332_v58 = vpop.xlane.xlu1 %2686  ;;  %v5358_v42 = vpop.xlane.xlu2 %2648 }
 0x9ae   : > { %v2724_v41 = vsub.f32 %v5156_v22, %v5332_v58  ;;  %v5348_v22 = vpop.xlane.xlu0 %2680  ;;  %vm2948_vm5 = vcmp.gt.f32.partialorder %v5332_v58, -5e+29  ;;  %vm2929_vm6 = vcmp.gt.f32.partialorder %v5358_v42, -5e+29 }
 0x9af   : > { %5700 = vst [vmem:[#allocation10_spill] sm:$0xff] %v5348_v22 }
 0x9b0   : > { %v5336_v47 = vpop.eup %3681  ;;  %v2782_v60 = vmul.f32 1.442695, %v2724_v41  ;;  %v2721_v41 = vsub.f32 %v5105_v12, %v5348_v22 }
 0x9b1   : > { %v5338_v25 = vpop.eup %3683  ;;  %2848 = vadd.xlane.f32.xlu2 %v5336_v47 }
 0x9b2   : > { %3685 = vpow2.f32 %v2782_v60  ;;  %1984 = vadd.xlane.f32.xlu0 %v5338_v25  ;;  %v2776_v60 = vmul.f32 1.442695, %v2721_v41 }
 0x9b3   : > { %3687 = vpow2.f32 %v1918_v15  ;;  %v2705_v15 = vsub.f32 %v5159_v8, %v5358_v42 }
 0x9b5   : > { %v5344_v61 = vpop.xlane.xlu1 %2684 }
 0x9b6   : > { %v2723_v36 = vsub.f32 %v5165_v21, %v5344_v61  ;;  %v5368_v53 = vpop.xlane.xlu0 %2678  ;;  %vm2947_vm7 = vcmp.gt.f32.partialorder %v5344_v61, -5e+29 }
 0x9b7   : > { %5701 = vst [vmem:[#allocation11_spill] sm:$0xff] %v5368_v53  ;;  %v2720_v12 = vsub.f32 %v5117_v49, %v5368_v53 }
 0x9b8   : > { %v5350_v11 = vpop.eup %3685  ;;  %v2780_v1 = vmul.f32 1.442695, %v2723_v36 }
 0x9b9   : > { %v5352_v43 = vpop.eup %3687  ;;  %2846 = vadd.xlane.f32.xlu2 %v5350_v11 }
 0x9ba   : > { %3689 = vpow2.f32 %v2780_v1  ;;  %1982 = vadd.xlane.f32.xlu0 %v5352_v43 }
 0x9bb   : > { %3691 = vpow2.f32 %v2778_v51 }
 0x9bd   : > { %v5360_v44 = vpop.xlane.xlu1 %2650  ;;  %v5373_v36 = vpop.xlane.xlu2 %2646 }
 0x9be   : > { %v2706_v21 = vsub.f32 %v5170_v63, %v5360_v44  ;;  %5702 = vst [vmem:[#allocation12_spill] sm:$0xff] %v5373_v36  ;;  %v2744_v63 = vmul.f32 1.442695, %v2705_v15  ;;  %v2704_v8 = vsub.f32 %v5173_v54, %v5373_v36  ;;  %v5387_v51 = vpop.xlane.xlu0 %2676  ;;  %vm2930_vm4 = vcmp.gt.f32.partialorder %v5360_v44, -5e+29 }
 0x9bf   : > { %5704 = vst [vmem:[#allocation14_spill] sm:$0xff] %v5387_v51  ;;  %v2719_v49 = vsub.f32 %v5130_v20, %v5387_v51 }
 0x9c0   : > { %v5364_v23 = vpop.eup %3689  ;;  %v2746_v27 = vmul.f32 1.442695, %v2706_v21  ;;  %v2742_v22 = vmul.f32 1.442695, %v2704_v8 }
 0x9c1   : > { %2844 = vadd.xlane.f32.xlu2 %v5364_v23  ;;  %v5377_v39 = vpop.eup %3691 }
 0x9c2   : > { %3693 = vpow2.f32 %v2746_v27  ;;  %v2774_v27 = vmul.f32 1.442695, %v2720_v12 }
 0x9c3   : > { %3695 = vpow2.f32 %v2776_v60 }
 0x9c4   : > { %3697 = vpow2.f32 %v2744_v63  ;;  %v2772_v63 = vmul.f32 1.442695, %v2719_v49 }
 0x9c5   : > { %v5375_v1 = vpop.xlane.xlu1 %2672  ;;  %3699 = vpow2.f32 %v2774_v27 }
 0x9c6   : > { %5703 = vst [vmem:[#allocation13_spill] sm:$0xff] %v5375_v1  ;;  %3701 = vpow2.f32 %v2742_v22  ;;  %v5403_v12 = vpop.xlane.xlu0 %2674 }
 0x9c7   : > { %5707 = vst [vmem:[#allocation17_spill] sm:$0xff] %v5403_v12  ;;  %3703 = vpow2.f32 %v2772_v63 }
 0x9c8   : > { %v5379_v21 = vpop.eup %3693 }
 0x9c9   : > { %2842 = vadd.xlane.f32.xlu2 %v5377_v39  ;;  %2810 = vadd.xlane.f32.xlu1 %v5379_v21  ;;  %v5393_v60 = vpop.eup %3695 }
 0x9ca   : > { %5706 = vst [vmem:[#allocation16_spill] sm:$0xff] %v5393_v60  ;;  %v5395_v35 = vpop.eup %3697 }
 0x9cb   : > { %v5409_v36 = vpop.eup %3699 }
 0x9cc   : > { %v5413_v51 = vpop.eup %3701 }
 0x9cd   : > { %v5389_v41 = vpop.xlane.xlu2 %2644  ;;  %v5391_v15 = vpop.xlane.xlu1 %2670 }
 0x9ce   : > { %5705 = vst [vmem:[#allocation15_spill] sm:$0xff] %v5391_v15  ;;  %v2703_v54 = vsub.f32 %v5188_v24, %v5389_v41  ;;  %v2718_v24 = vsub.f32 %v5146_v59, %v5403_v12  ;;  %v2717_v59 = vsub.f32 %v5179_v0, %v5375_v1  ;;  %v2716_v0 = vsub.f32 %v5190_v2, %v5391_v15 }
 0x9d0   : > { %v2740_v53 = vmul.f32 1.442695, %v2703_v54 }
 0x9d1   : > { %2808 = vadd.xlane.f32.xlu1 %v5395_v35  ;;  %2840 = vadd.xlane.f32.xlu2 %v5393_v60 }
 0x9d2   : > { %3705 = vpow2.f32 %v2740_v53 }
 0x9d5   : > { %v5405_v8 = vpop.xlane.xlu1 %2634  ;;  %v5411_v20 = vpop.xlane.xlu2 %2642 }
 0x9d6   : > { %5708 = vst [vmem:[#allocation18_spill] sm:$0xff] %v5405_v8  ;;  %v2698_v27 = vsub.f32 %v5201_v29, %v5405_v8  ;;  %v2702_v22 = vsub.f32 %v5198_v31, %v5411_v20  ;;  %v2770_v29 = vmul.f32 1.442695, %v2718_v24  ;;  %v5423_v8 = vpop.eup %3703 }
 0x9d8   : > { %v2730_v60 = vmul.f32 1.442695, %v2698_v27  ;;  %v2738_v54 = vmul.f32 1.442695, %v2702_v22  ;;  %v5425_v27 = vpop.eup %3705 }
 0x9d9   : > { %2806 = vadd.xlane.f32.xlu1 %v5413_v51  ;;  %2838 = vadd.xlane.f32.xlu2 %v5409_v36 }
 0x9da   : > { %3707 = vpow2.f32 %v2730_v60  ;;  %v2768_v60 = vmul.f32 1.442695, %v2717_v59  ;;  %v5712_v59 = vld [vmem:[#allocation6_spill] sm:$0xff] }
 0x9db   : > { %3709 = vpow2.f32 %v2770_v29 }
 0x9dc   : > { %3711 = vpow2.f32 %v2738_v54 }
 0x9dd   : > { %v5421_v49 = vpop.xlane.xlu0 %2640 }
 0x9de   : > { %5709 = vst [vmem:[#allocation19_spill] sm:$0xff] %v5421_v49  ;;  %v2701_v31 = vsub.f32 %v5213_v6, %v5421_v49  ;;  %v2766_v49 = vmul.f32 1.442695, %v2716_v0 }
 0x9e0   : > { %v5427_v63 = vpop.eup %3707  ;;  %v2736_v22 = vmul.f32 1.442695, %v2701_v31 }
 0x9e1   : > { %5710 = vst [vmem:[#allocation20_spill] sm:$0xff] %v5427_v63  ;;  %2804 = vadd.xlane.f32.xlu1 %v5425_v27  ;;  %2836 = vadd.xlane.f32.xlu2 %v5423_v8  ;;  %v5438_v29 = vpop.eup %3709 }
 0x9e2   : > { %2794 = vadd.xlane.f32.xlu0 %v5427_v63  ;;  %5711 = vst [vmem:[#allocation21_spill] sm:$0xff] %v5438_v29  ;;  %v5440_v12 = vpop.eup %3711 }
 0x9e3   : > { %v2825_v53 = vpop.xlane.xlu1 %2824 }
 0x9e4   : > { %3713 = vrcp.f32 %v2825_v53  ;;  %v3844_v53 = vmov 0.0  }
 0x9e5   : > { %v5436_v24 = vpop.xlane.xlu0 %2638  ;;  %3715 = vpow2.f32 %v2768_v60  ;;  %v3276_v63 = vsel %vm2937_vm1, 1.0, %v3844_v53  ;;  %v3273_v16 = vsel %vm2934_vm10, 1.0, %v3844_v53  ;;  %v3271_v34 = vsel %vm2932_vm12, 1.0, %v3844_v53 }
 0x9e6   : > { %3717 = vpow2.f32 %v2736_v22  ;;  %v2700_v54 = vsub.f32 %v5224_v33, %v5436_v24  ;;  %v3270_v46 = vsel %vm2931_vm13, 1.0, %v3844_v53  ;;  %v3291_v32 = vsel %vm2952_vm15, 1.0, %v3844_v53 }
 0x9e7   : > { %3719 = vpow2.f32 %v2766_v49  ;;  %v3290_v3 = vsel %vm2951_vm0, 1.0, %v3844_v53  ;;  %v3269_v13 = vsel %vm2930_vm4, 1.0, %v3844_v53  ;;  %v3287_v44 = vsel %vm2948_vm5, 1.0, %v3844_v53 }
 0x9e8   : > { %v2734_v15 = vmul.f32 1.442695, %v2700_v54  ;;  %vm2926_vm13 = vcmp.gt.f32.partialorder %v5411_v20, -5e+29 }
 0x9e9   : > { %2802 = vadd.xlane.f32.xlu1 %v5440_v12  ;;  %2834 = vadd.xlane.f32.xlu2 %v5438_v29 }
 0x9ea   : > { %v3714_v6 = vpop.eup %3713  ;;  %3721 = vpow2.f32 %v2734_v15 }
 0x9eb   : > { %v2905_v31 = vmul.f32 %v3714_v6, %v5712_v59  ;;  %v5455_v1 = vpop.eup %3715 }
 0x9ec   : > { %v5457_v29 = vpop.eup %3717 }
 0x9ed   : > { %v5451_v18 = vpop.xlane.xlu2 %2636  ;;  %v5453_v60 = vpop.xlane.xlu0 %2668  ;;  %v3033_v2 = vmul.f32 %v3276_v63, %v2905_v31  ;;  %v1415_v63 = vld [vmem:[%s5645_s10 + $0x8] sm:$0xff] }
 0x9ee   : > { %5713 = vst [vmem:[#allocation6_spill] sm:$0xff] %v5451_v18  ;;  %v2699_v33 = vsub.f32 %v5240_v48, %v5451_v18  ;;  %v2715_v22 = vsub.f32 %v5238_v55, %v5453_v60  ;;  %v5472_v48 = vpop.eup %3719 }
 0x9ef   : > { %5714 = vst [vmem:[#allocation22_spill] sm:$0xff] %v5453_v60  ;;  %3050 = vmatpush.xpose.msrb.mxu0 %v3033_v2 }
 0x9f0   : > { %v2732_v6 = vmul.f32 1.442695, %v2699_v33  ;;  %v2764_v59 = vmul.f32 1.442695, %v2715_v22  ;;  %v5474_v31 = vpop.eup %3721 }
 0x9f1   : > { %2832 = vadd.xlane.f32.xlu2 %v5455_v1  ;;  %2800 = vadd.xlane.f32.xlu1 %v5457_v29 }
 0x9f3   : > { %v5465_v0 = vpop.xlane.xlu1 %2854 }
 0x9f5   : > { %v5470_v54 = vpop.xlane.xlu2 %2666  ;;  %v2823_v49 = vpop.xlane.xlu0 %2822 }
 0x9f6   : > { %5715 = vst [vmem:[#allocation23_spill] sm:$0xff] %v5470_v54  ;;  %2157 = vperm.xlu0 %3413, %v1415_v63   ;;  %3723 = vrcp.f32 %v2823_v49  ;;  %v2714_v55 = vsub.f32 %v5256_v45, %v5470_v54 }
 0x9f7   : > { %3725 = vpow2.f32 %v2732_v6  ;;  %v3275_v6 = vsel %vm2936_vm8, 1.0, %v3844_v53 }
 0x9f8   : > { %3727 = vpow2.f32 %v2764_v59  ;;  %v2762_v49 = vmul.f32 1.442695, %v2714_v55 }
 0x9f9   : > { %2830 = vadd.xlane.f32.xlu2 %v5472_v48  ;;  %2798 = vadd.xlane.f32.xlu1 %v5474_v31 }
 0x9fa   : > { %3729 = vpow2.f32 %v2762_v49 }
 0x9fb   : > { %v2819_v15 = vpop.xlane.xlu1 %2818 }
 0x9fc   : > { %v3724_v2 = vpop.eup %3723  ;;  %3731 = vrcp.f32 %v2819_v15 }
 0x9fd   : > { %v5481_v33 = vpop.xlane.xlu2 %2856  ;;  %v5483_v22 = vpop.xlane.xlu0 %2852  ;;  %v2904_v63 = vmul.f32 %v3724_v2, %v5258_v26 }
 0x9fe   : > { %v5487_v60 = vpop.eup %3725 }
 0x9ff   : > { %v3032_v18 = vmul.f32 %v3275_v6, %v2904_v63  ;;  %v5489_v59 = vpop.eup %3727 }
 0xa00   : > { %5716 = vst [vmem:[#allocation24_spill] sm:$0xff] %v5489_v59  ;;  %v5493_v26 = vpop.eup %3729 }
 0xa01   : > { %2796 = vadd.xlane.f32.xlu1 %v5487_v60  ;;  %2828 = vadd.xlane.f32.xlu2 %v5489_v59  ;;  %5717 = vst [vmem:[#allocation25_spill] sm:$0xff] %v5493_v26 }
 0xa02   : > { %3051 = vmatpush.xpose.msrb.mxu0 %v3032_v18  ;;  %v3732_v55 = vpop.eup %3731 }
 0xa03   : > { %v2817_v19 = vpop.xlane.xlu1 %2816 }
 0xa05   : > { %v2821_v45 = vpop.xlane.xlu2 %2820  ;;  %v1993_v54 = vpop.xlane.xlu0 %1992 }
 0xa06   : > { %3733 = vrcp.f32 %v2821_v45 }
 0xa07   : > { %3735 = vrcp.f32 %v1993_v54  ;;  %v3274_v54 = vsel %vm2935_vm9, 1.0, %v3844_v53 }
 0xa08   : > { %3737 = vrcp.f32 %v2817_v19  ;;  %v2902_v19 = vmul.f32 %v3732_v55, %v5272_v14  ;;  %v3272_v14 = vsel %vm2933_vm11, 1.0, %v3844_v53  ;;  %vm2927_vm11 = vcmp.gt.f32.partialorder %v5389_v41, -5e+29 }
 0xa09   : > { %2826 = vadd.xlane.f32.xlu1 %v5493_v26 }
 0xa0b   : > { %v2815_v2 = vpop.xlane.xlu1 %2814 }
 0xa0c   : > { %v3734_v63 = vpop.eup %3733  ;;  %3739 = vrcp.f32 %v2815_v2  ;;  %v3030_v2 = vmul.f32 %v3273_v16, %v2902_v19 }
 0xa0d   : > { %v3736_v6 = vpop.eup %3735  ;;  %v1991_v49 = vpop.xlane.xlu0 %1990  ;;  %v2903_v18 = vmul.f32 %v3734_v63, %v5290_v50 }
 0xa0e   : > { %3741 = vrcp.f32 %v1991_v49  ;;  %v2083_v15 = vmul.f32 %v3736_v6, %v5287_v17  ;;  %v3738_v26 = vpop.eup %3737 }
 0xa0f   : > { %v3031_v45 = vmul.f32 %v3274_v54, %v2903_v18  ;;  %v2901_v50 = vmul.f32 %v3738_v26, %v5285_v38 }
 0xa10   : > { %2120 = vmatpush.xpose.msra.mxu1 %v2083_v15 }
 0xa11   : > { %3052 = vmatpush.xpose.msrb.mxu0 %v3031_v45  ;;  %v3029_v55 = vmul.f32 %v3272_v14, %v2901_v50 }
 0xa12   : > { %v3740_v59 = vpop.eup %3739 }
 0xa13   : > { %v2900_v49 = vmul.f32 %v3740_v59, %v5300_v28 }
 0xa14   : > { %v3742_v63 = vpop.eup %3741  ;;  %v2813_v17 = vpop.xlane.xlu1 %2812 }
 0xa15   : > { %3743 = vrcp.f32 %v2813_v17  ;;  %3053 = vmatpush.xpose.msrb.mxu0 %v3030_v2  ;;  %v1989_v6 = vpop.xlane.xlu0 %1988  ;;  %v2082_v57 = vmul.f32 %v3742_v63, %v5303_v10  ;;  %v3028_v26 = vmul.f32 %v3271_v34, %v2900_v49 }
 0xa16   : > { %3745 = vrcp.f32 %v1989_v6 }
 0xa17   : > { %2121 = vmatpush.xpose.msra.mxu1 %v2082_v57 }
 0xa19   : > { %3054 = vmatpush.xpose.msrb.mxu0 %v3029_v55  ;;  %2152 = vperm.xlu2 %3412, %v1414_v9   ;;  %v5724_v9 = vld [vmem:[#allocation14_spill] sm:$0xff] }
 0xa1a   : > { %vm2943_vm12 = vcmp.gt.f32.partialorder %v5724_v9, -5e+29 }
 0xa1b   : > { %v3744_v38 = vpop.eup %3743  ;;  %v3282_v41 = vsel %vm2943_vm12, 1.0, %v3844_v53 }
 0xa1c   : > { %v3746_v18 = vpop.eup %3745  ;;  %v2851_v15 = vpop.xlane.xlu2 %2850  ;;  %v2899_v10 = vmul.f32 %v3744_v38, %v5312_v56 }
 0xa1d   : > { %3055 = vmatpush.xpose.msrb.mxu0 %v3028_v26  ;;  %v1987_v54 = vpop.xlane.xlu0 %1986  ;;  %v2081_v45 = vmul.f32 %v3746_v18, %v5314_v30 }
 0xa1e   : > { %3747 = vrcp.f32 %v1987_v54  ;;  %v3027_v19 = vmul.f32 %v3270_v46, %v2899_v10 }
 0xa1f   : > { %2122 = vmatpush.xpose.msra.mxu1 %v2081_v45 }
 0xa21   : > { %3056 = vmatpush.xpose.msrb.mxu0 %v3027_v19  ;;  %v3288_v19 = vsel %vm2949_vm3, 1.0, %v3844_v53  ;;  %vm2924_vm3 = vcmp.gt.f32.partialorder %v5436_v24, -5e+29  ;;  %v5731_v24 = vld [vmem:[#allocation6_spill] sm:$0xff] }
 0xa22   : > { %vm2923_vm4 = vcmp.gt.f32.partialorder %v5731_v24, -5e+29 }
 0xa24   : > { %v3748_v28 = vpop.eup %3747  ;;  %v2849_v5 = vpop.xlane.xlu2 %2848 }
 0xa25   : > { %v1985_v59 = vpop.xlane.xlu0 %1984  ;;  %v2080_v16 = vmul.f32 %v3748_v28, %v5326_v37 }
 0xa26   : > { %3749 = vrcp.f32 %v1985_v59 }
 0xa27   : > { %2123 = vmatpush.xpose.msra.mxu1 %v2080_v16  ;;  %3751 = vrcp.f32 %v5481_v33 }
 0xa28   : > { %3753 = vrcp.f32 %v5465_v0  ;;  %v3292_v0 = vsel %vm2953_vm14, 1.0, %v3844_v53 }
 0xa2c   : > { %v3750_v56 = vpop.eup %3749  ;;  %v2847_v2 = vpop.xlane.xlu2 %2846 }
 0xa2d   : > { %v1983_v30 = vpop.xlane.xlu0 %1982  ;;  %v2079_v50 = vmul.f32 %v3750_v56, %v5338_v25  ;;  %v3752_v63 = vpop.eup %3751 }
 0xa2e   : > { %3755 = vrcp.f32 %v1983_v30  ;;  %v2921_v37 = vmul.f32 %v3752_v63, %v5274_v7  ;;  %v3754_v17 = vpop.eup %3753  ;;  %v5718_v7 = vld [vmem:[#allocation7_spill] sm:$0xff]  ;;  %v3268_v63 = vsel %vm2929_vm6, 1.0, %v3844_v53 }
 0xa2f   : > { %2124 = vmatpush.xpose.msra.mxu1 %v2079_v50  ;;  %3757 = vrcp.f32 %v5483_v22  ;;  %v2920_v14 = vmul.f32 %v3754_v17, %v5252_v4  ;;  %v5719_v50 = vld [vmem:[#allocation9_spill] sm:$0xff] }
 0xa30   : > { %3759 = vrcp.f32 %v2851_v15  ;;  %v3049_v25 = vmul.f32 %v3292_v0, %v2921_v37  ;;  %vm2946_vm1 = vcmp.gt.f32.partialorder %v5719_v50, -5e+29  ;;  %v3286_v37 = vsel %vm2947_vm7, 1.0, %v3844_v53  ;;  %v5722_v0 = vld [vmem:[#allocation16_spill] sm:$0xff]  ;;  %v2227_v50 = vld [vmem:[%s5650_s15 + $0x8] sm:$0xff] }
 0xa31   : > { %3761 = vrcp.f32 %v2849_v5  ;;  %v3048_v22 = vmul.f32 %v3291_v32, %v2920_v14  ;;  %3097 = vperm.xlu2 %3412, %v2227_v50  }
 0xa32   : > { %3763 = vrcp.f32 %v2847_v2 }
 0xa34   : > { %v3756_v6 = vpop.eup %3755  ;;  %v2845_v57 = vpop.xlane.xlu2 %2844 }
 0xa35   : > { %v2078_v33 = vmul.f32 %v3756_v6, %v5352_v43  ;;  %v3758_v55 = vpop.eup %3757 }
 0xa36   : > { %v2919_v43 = vmul.f32 %v3758_v55, %v5277_v40  ;;  %v3760_v49 = vpop.eup %3759  ;;  %v3289_v40 = vsel %vm2950_vm2, 1.0, %v3844_v53 }
 0xa37   : > { %2125 = vmatpush.xpose.msra.mxu1 %v2078_v33  ;;  %v2918_v26 = vmul.f32 %v3760_v49, %v5324_v52  ;;  %v3762_v18 = vpop.eup %3761 }
 0xa38   : > { %v3047_v4 = vmul.f32 %v3290_v3, %v2919_v43  ;;  %v2917_v10 = vmul.f32 %v3762_v18, %v5336_v47  ;;  %v3764_v62 = vpop.eup %3763 }
 0xa39   : > { %v3046_v15 = vmul.f32 %v3289_v40, %v2918_v26  ;;  %v2916_v47 = vmul.f32 %v3764_v62, %v5350_v11 }
 0xa3a   : > { %2126 = vmatmul.f32.vlgmr.msra.gmra.mxu1 %v5718_v7  ;;  %v3045_v28 = vmul.f32 %v3288_v19, %v2917_v10  ;;  %v5725_v19 = vld [vmem:[#allocation17_spill] sm:$0xff] }
 0xa3b   : > { %3070 = vmatpush.xpose.msrb.mxu1 %v3049_v25  ;;  %vm2942_vm14 = vcmp.gt.f32.partialorder %v5725_v19, -5e+29  ;;  %v5738_v19 = vld [vmem:[#allocation5_spill] sm:$0xff] }
 0xa3c   : > { %v2843_v34 = vpop.xlane.xlu2 %2842  ;;  %v2811_v38 = vpop.xlane.xlu1 %2810 }
 0xa3d   : > { %3765 = vrcp.f32 %v2811_v38 }
 0xa3e   : > { %3767 = vrcp.f32 %v2845_v57  ;;  %v5720_v57 = vld [vmem:[#allocation10_spill] sm:$0xff] }
 0xa3f   : > { %3071 = vmatpush.xpose.msrb.mxu1 %v3048_v22  ;;  %3769 = vrcp.f32 %v2843_v34  ;;  %vm2945_vm8 = vcmp.gt.f32.partialorder %v5720_v57, -5e+29 }
 0xa40   : > { %v3284_v49 = vsel %vm2945_vm8, 1.0, %v3844_v53 }
 0xa43   : > { %3072 = vmatpush.xpose.msrb.mxu1 %v3047_v4  ;;  %v3766_v54 = vpop.eup %3765 }
 0xa44   : > { %v2809_v52 = vpop.xlane.xlu1 %2808  ;;  %v2841_v45 = vpop.xlane.xlu2 %2840  ;;  %v2898_v46 = vmul.f32 %v3766_v54, %v5379_v21  ;;  %v3044_v21 = vmul.f32 %v3287_v44, %v2916_v47 }
 0xa45   : > { %3771 = vrcp.f32 %v2809_v52  ;;  %v3768_v5 = vpop.eup %3767 }
 0xa46   : > { %v3026_v59 = vmul.f32 %v3269_v13, %v2898_v46  ;;  %3773 = vrcp.f32 %v2841_v45  ;;  %v3770_v16 = vpop.eup %3769  ;;  %v2915_v58 = vmul.f32 %v3768_v5, %v5364_v23  ;;  %v3285_v23 = vsel %vm2946_vm1, 1.0, %v3844_v53  ;;  %v5726_v5 = vld [vmem:[#allocation21_spill] sm:$0xff] }
 0xa47   : > { %3073 = vmatpush.xpose.msrb.mxu1 %v3046_v15  ;;  %v2914_v61 = vmul.f32 %v3770_v16, %v5377_v39  ;;  %v5723_v39 = vld [vmem:[#allocation11_spill] sm:$0xff]  ;;  %v3281_v16 = vsel %vm2942_vm14, 1.0, %v3844_v53 }
 0xa48   : > { %3057 = vmatpush.xpose.msrb.mxu0 %v3026_v59  ;;  %v3043_v17 = vmul.f32 %v3286_v37, %v2915_v58  ;;  %vm2944_vm10 = vcmp.gt.f32.partialorder %v5723_v39, -5e+29  ;;  %v5727_v58 = vld [vmem:[#allocation8_spill] sm:$0xff] }
 0xa49   : > { %v3042_v33 = vmul.f32 %v3285_v23, %v2914_v61  ;;  %v3283_v4 = vsel %vm2944_vm10, 1.0, %v3844_v53 }
 0xa4b   : > { %3074 = vmatpush.xpose.msrb.mxu1 %v3045_v28  ;;  %v3772_v56 = vpop.eup %3771 }
 0xa4c   : > { %v2807_v2 = vpop.xlane.xlu1 %2806  ;;  %v2839_v30 = vpop.xlane.xlu2 %2838  ;;  %v2897_v11 = vmul.f32 %v3772_v56, %v5395_v35  ;;  %v5721_v35 = vld [vmem:[#allocation12_spill] sm:$0xff] }
 0xa4d   : > { %3775 = vrcp.f32 %v2807_v2  ;;  %v3774_v6 = vpop.eup %3773  ;;  %vm2928_vm9 = vcmp.gt.f32.partialorder %v5721_v35, -5e+29  ;;  %v5728_v2 = vld [vmem:[#allocation13_spill] sm:$0xff] }
 0xa4e   : > { %3777 = vrcp.f32 %v2839_v30  ;;  %v3025_v42 = vmul.f32 %v3268_v63, %v2897_v11  ;;  %v2913_v25 = vmul.f32 %v3774_v6, %v5722_v0  ;;  %v3267_v43 = vsel %vm2928_vm9, 1.0, %v3844_v53  ;;  %v2226_v11 = vld [vmem:[%s5650_s15] sm:$0xff] }
 0xa4f   : > { %3075 = vmatpush.xpose.msrb.mxu1 %v3044_v21  ;;  %vm2941_vm15 = vcmp.gt.f32.partialorder %v5728_v2, -5e+29  ;;  %3092 = vperm.xlu1 %3414, %v2226_v11  }
 0xa50   : > { %3058 = vmatpush.xpose.msrb.mxu0 %v3025_v42  ;;  %v3041_v38 = vmul.f32 %v3284_v49, %v2913_v25  ;;  %v3280_v6 = vsel %vm2941_vm15, 1.0, %v3844_v53 }
 0xa53   : > { %3076 = vmatpush.xpose.msrb.mxu1 %v3043_v17  ;;  %v3776_v14 = vpop.eup %3775 }
 0xa54   : > { %v3778_v55 = vpop.eup %3777  ;;  %v2805_v32 = vpop.xlane.xlu1 %2804  ;;  %v2896_v22 = vmul.f32 %v3776_v14, %v5413_v51 }
 0xa55   : > { %v2837_v7 = vpop.xlane.xlu2 %2836  ;;  %3779 = vrcp.f32 %v2805_v32  ;;  %v2912_v3 = vmul.f32 %v3778_v55, %v5409_v36  ;;  %v3266_v36 = vsel %vm2927_vm11, 1.0, %v3844_v53  ;;  %v2795_v45 = vpop.xlane.xlu0 %2794 }
 0xa56   : > { %3781 = vrcp.f32 %v2837_v7  ;;  %v3024_v34 = vmul.f32 %v3267_v43, %v2896_v22  ;;  %v3263_v7 = vsel %vm2924_vm3, 1.0, %v3844_v53 }
 0xa57   : > { %3077 = vmatpush.xpose.msrb.mxu1 %v3042_v33  ;;  %v3040_v26 = vmul.f32 %v3283_v4, %v2912_v3  ;;  %v5730_v33 = vld [vmem:[#allocation15_spill] sm:$0xff]  ;;  %v5733_v4 = vld [vmem:[#allocation24_spill] sm:$0xff] }
 0xa58   : > { %3059 = vmatpush.xpose.msrb.mxu0 %v3024_v34  ;;  %vm2940_vm2 = vcmp.gt.f32.partialorder %v5730_v33, -5e+29  ;;  %v5732_v34 = vld [vmem:[#allocation22_spill] sm:$0xff] }
 0xa59   : > { %v3279_v32 = vsel %vm2940_vm2, 1.0, %v3844_v53  ;;  %vm2939_vm5 = vcmp.gt.f32.partialorder %v5732_v34, -5e+29 }
 0xa5b   : > { %3078 = vmatpush.xpose.msrb.mxu1 %v3041_v38  ;;  %v3780_v51 = vpop.eup %3779 }
 0xa5c   : > { %v3782_v18 = vpop.eup %3781  ;;  %v2803_v40 = vpop.xlane.xlu1 %2802  ;;  %v2895_v10 = vmul.f32 %v3780_v51, %v5425_v27  ;;  %v5734_v51 = vld [vmem:[#allocation18_spill] sm:$0xff] }
 0xa5d   : > { %v2835_v15 = vpop.xlane.xlu2 %2834  ;;  %3783 = vrcp.f32 %v2803_v40  ;;  %v2911_v62 = vmul.f32 %v3782_v18, %v5423_v8  ;;  %v3265_v8 = vsel %vm2926_vm13, 1.0, %v3844_v53  ;;  %vm2922_vm6 = vcmp.gt.f32.partialorder %v5734_v51, -5e+29  ;;  %v5735_v40 = vld [vmem:[#allocation20_spill] sm:$0xff] }
 0xa5e   : > { %3785 = vrcp.f32 %v2835_v15  ;;  %v3023_v54 = vmul.f32 %v3266_v36, %v2895_v10  ;;  %v3278_v18 = vsel %vm2939_vm5, 1.0, %v3844_v53  ;;  %v3261_v36 = vsel %vm2922_vm6, 1.0, %v3844_v53 }
 0xa5f   : > { %3079 = vmatpush.xpose.msrb.mxu1 %v3040_v26  ;;  %v3039_v52 = vmul.f32 %v3282_v41, %v2911_v62  ;;  %v5736_v62 = vld [vmem:[#allocation23_spill] sm:$0xff]  ;;  %v5737_v41 = vld [vmem:[#allocation25_spill] sm:$0xff] }
 0xa60   : > { %3060 = vmatpush.xpose.msrb.mxu0 %v3023_v54  ;;  %vm2938_vm7 = vcmp.gt.f32.partialorder %v5736_v62, -5e+29 }
 0xa63   : > { %3080 = vmatpush.xpose.msrb.mxu1 %v3039_v52  ;;  %v3784_v46 = vpop.eup %3783 }
 0xa64   : > { %v3786_v27 = vpop.eup %3785  ;;  %v2801_v28 = vpop.xlane.xlu1 %2800  ;;  %v2894_v47 = vmul.f32 %v3784_v46, %v5440_v12  ;;  %v5729_v12 = vld [vmem:[#allocation19_spill] sm:$0xff] }
 0xa65   : > { %v2833_v13 = vpop.xlane.xlu2 %2832  ;;  %v2910_v59 = vmul.f32 %v3786_v27, %v5726_v5  ;;  %vm2925_vm0 = vcmp.gt.f32.partialorder %v5729_v12, -5e+29  ;;  %v5739_v27 = vld [vmem:[#allocation4_spill] sm:$0xff] }
 0xa66   : > { %3787 = vrcp.f32 %v2833_v13  ;;  %v3022_v44 = vmul.f32 %v3265_v8, %v2894_v47  ;;  %v3264_v23 = vsel %vm2925_vm0, 1.0, %v3844_v53 }
 0xa67   : > { %3789 = vrcp.f32 %v2801_v28  ;;  %v3038_v20 = vmul.f32 %v3281_v16, %v2910_v59 }
 0xa68   : > { %v2158_v21 = vpop.permute.xlu0 %2157  ;;  %3061 = vmatpush.xpose.msrb.mxu0 %v3022_v44 }
 0xa69   : > { %v2161_v56 = vadd.f32 %v2158_v21, %v5727_v58  ;;  %3081 = vmatpush.xpose.msrb.mxu1 %v3038_v20 }
 0xa6b   : > { %3103 = vst [vmem:[%s5579_s21 + $0x8] sm:$0xff] %v2161_v56 }
 0xa6c   : > { %v3788_v30 = vpop.eup %3787  ;;  %v2799_v42 = vpop.xlane.xlu1 %2798 }
 0xa6d   : > { %v3790_v63 = vpop.eup %3789  ;;  %v2831_v37 = vpop.xlane.xlu2 %2830  ;;  %v2909_v17 = vmul.f32 %v3788_v30, %v5455_v1 }
 0xa6e   : > { %3791 = vrcp.f32 %v2831_v37  ;;  %v2893_v61 = vmul.f32 %v3790_v63, %v5457_v29 }
 0xa6f   : > { %3793 = vrcp.f32 %v2799_v42  ;;  %v3037_v57 = vmul.f32 %v3280_v6, %v2909_v17 }
 0xa70   : > { %v3021_v35 = vmul.f32 %v3264_v23, %v2893_v61  ;;  %3795 = vrcp.f32 %v2795_v45  ;;  %v3277_v45 = vsel %vm2938_vm7, 1.0, %v3844_v53 }
 0xa71   : > { %3082 = vmatpush.xpose.msrb.mxu1 %v3037_v57 }
 0xa72   : > { %3062 = vmatpush.xpose.msrb.mxu0 %v3021_v35  ;;  %v3151_v21 = vld [vmem:[%s5579_s21 + $0x8] sm:$0xff] (%p3955_p4) }
 0xa73   : > { %3152 = vst [vmem:[%s3114_s27 + $0x10] sm:$0xff] (%p3955_p4), %v3151_v21 }
 0xa74   : > { %v3792_v0 = vpop.eup %3791  ;;  %v2797_v25 = vpop.xlane.xlu1 %2796 }
 0xa75   : > { %v3794_v1 = vpop.eup %3793  ;;  %v2829_v14 = vpop.xlane.xlu2 %2828  ;;  %v2908_v29 = vmul.f32 %v3792_v0, %v5472_v48  ;;  %3797 = vrcp.f32 %v2797_v25 }
 0xa76   : > { %v2892_v55 = vmul.f32 %v3794_v1, %v5474_v31  ;;  %3799 = vrcp.f32 %v2829_v14  ;;  %v3796_v43 = vpop.eup %3795  ;;  %v3262_v31 = vsel %vm2923_vm4, 1.0, %v3844_v53 }
 0xa77   : > { %v3036_v22 = vmul.f32 %v3279_v32, %v2908_v29  ;;  %v2890_v15 = vmul.f32 %v3796_v43, %v5735_v40 }
 0xa78   : > { %v3020_v39 = vmul.f32 %v3263_v7, %v2892_v55 }
 0xa79   : > { %3083 = vmatpush.xpose.msrb.mxu1 %v3036_v22 }
 0xa7a   : > { %3063 = vmatpush.xpose.msrb.mxu0 %v3020_v39 }
 0xa7b   : > { %v3798_v49 = vpop.eup %3797 }
 0xa7c   : > { %v3800_v38 = vpop.eup %3799  ;;  %v2827_v48 = vpop.xlane.xlu1 %2826  ;;  %v2891_v3 = vmul.f32 %v3798_v49, %v5487_v60  ;;  %v3018_v60 = vmul.f32 %v3261_v36, %v2890_v15 }
 0xa7d   : > { %3801 = vrcp.f32 %v2827_v48  ;;  %v2907_v26 = vmul.f32 %v3800_v38, %v5733_v4  ;;  %v2153_v13 = vpop.permute.xlu2 %2152 }
 0xa7e   : > { %v3019_v9 = vmul.f32 %v3262_v31, %v2891_v3 }
 0xa7f   : > { %v3035_v10 = vmul.f32 %v3278_v18, %v2907_v26 }
 0xa80   : > { %3064 = vmatpush.xpose.msrb.mxu0 %v3019_v9 }
 0xa81   : > { %3084 = vmatpush.xpose.msrb.mxu1 %v3035_v10 }
 0xa83   : > { %v3802_v54 = vpop.eup %3801 }
 0xa84   : > { %3065 = vmatpush.xpose.msrb.mxu0 %v3018_v60  ;;  %v2906_v52 = vmul.f32 %v3802_v54, %v5737_v41 }
 0xa86   : > { %v3034_v46 = vmul.f32 %v3277_v45, %v2906_v52 }
 0xa87   : > { %3066 = vmatmul.f32.vlgmr.msrb.gmra.mxu0 %v5738_v19 }
 0xa88   : > { %3085 = vmatpush.xpose.msrb.mxu1 %v3034_v46 }
 0xa8b   : > { %3086 = vmatmul.f32.vlgmr.msrb.gmra.mxu1 %v5739_v27  ;;  %v3098_v44 = vpop.permute.xlu2 %3097 }
 0xab7   : > { %v2127_v28 = vpop.f32.mrf.mxu1 }
 0xab8   : > { %v2160_v47 = vadd.f32 %v2153_v13, %v2127_v28 }
 0xaba   : > { %3102 = vst [vmem:[%s5579_s21] sm:$0xff] %v2160_v47 }
 0xac1   : > { %v3093_v8 = vpop.permute.xlu1 %3092  ;;  %v3149_v53 = vld [vmem:[%s5579_s21] sm:$0xff] (%p3955_p4) }
 0xac2   : > { %3150 = vst [vmem:[%s3114_s27] sm:$0xff] (%p3955_p4), %v3149_v53 }
 0xb04   : > { %v3067_v5 = vpop.f32.mrf.mxu0 }
 0xb05   : > { %v3100_v59 = vadd.f32 %v3093_v8, %v3067_v5 }
 0xb07   : > { %3104 = vst [vmem:[%s5579_s21 + $0x10] sm:$0xff] %v3100_v59  ;;  %3112 = sbr.rel (!%p3955_p4) target bundleno = 2836 (0xb14), region = 88 }
 0xb08   : > { %v3087_v16 = vpop.f32.mrf.mxu1 }
 0xb09   : > { %v3101_v20 = vadd.f32 %v3098_v44, %v3087_v16 }
 0xb0b   : > { %3105 = vst [vmem:[%s5579_s21 + $0x18] sm:$0xff] %v3101_v20 }
 0xb0e   : > { %v3153_v58 = vld [vmem:[%s5579_s21 + $0x10] sm:$0xff] }
 0xb0f   : > { %3154 = vst [vmem:[%s3114_s27 + $0x20] sm:$0xff] %v3153_v58 }
 0xb12   : > { %v3155_v56 = vld [vmem:[%s5579_s21 + $0x18] sm:$0xff] }
 0xb13   : > { %3156 = vst [vmem:[%s3114_s27 + $0x30] sm:$0xff] %v3155_v56 }
 0xb14 PF: > { %s5740_s29 = sld [smem:[#allocation3_spill]]  ;;  %p23_p8 = scmp.ge.s32.totalorder %s3945_s25, 4  }
 0xb15   : > { %s5741_s21 = smov %s3837_s22  ;;  %s5743_s23 = smov %s3945_s25 }
 0xb16   :  { %25 = sbr.rel (!%p23_p8) target bundleno = 4 (0x4), region = 158 }
 0xb1a   : > { %s5742_s22 = smov %s5740_s29 }

// kernel: dvrl_block_forward.3
= control target key start
LH: loop header
LB: loop body
LE: loop exit
PB: predicated region body
PF: predicated region fallthrough
CT: control target
= control target key end

     0   :  { %s4291_s24 = smov 0   ;;  %s4293_s25 = smov 0   ;;  %s6702_s0 = inlined_call_operand.vmem [shape: f32[32,256], index: 0, kind: input, shape index: {}]   ;;  %s6703_s1 = inlined_call_operand.vmem [shape: f32[2,1,128], index: 1, kind: input, shape index: {}]   ;;  %s6704_s2 = inlined_call_operand.vmem [shape: f32[2,128,128], index: 2, kind: input, shape index: {}]   ;;  %s6705_s3 = inlined_call_operand.vmem [shape: f32[32,32], index: 3, kind: input, shape index: {}]   ;;  %s6706_s4 = inlined_call_operand.vmem [shape: f32[32,32], index: 4, kind: input, shape index: {}]   ;;  %s6707_s5 = inlined_call_operand.vmem [shape: f32[32,32], index: 5, kind: input, shape index: {}]   ;;  %s6708_s6 = inlined_call_operand.vmem [shape: f32[32,32], index: 6, kind: input, shape index: {}]   ;;  %s6709_s7 = inlined_call_operand.vmem [shape: f32[32,256], index: 7, kind: output, shape index: {}]  }
   0x1   :  { %s4295_s26 = smov 0  }
   0x2 LB: > { %s4307_s27 = sadd.s32 4294967295, %s4249_s26   ;;  %s4310_s28 = sadd.s32 1, %s4249_s26   ;;  %s4249_s26 = sphi %s4295_s26, %s7402_s26   ;;  %s4245_s25 = sphi %s4293_s25, %s7401_s25   ;;  %s4241_s24 = sphi %s4291_s24, %s7400_s24  }
   0x3   : > { %s21_s29 = ssub.s32 %s4249_s26, %s4310_s28  ;;  %s24_s30 = sadd.s32 1, %s4245_s25 }
   0x4   : > { %p22_p0 = scmp.eq.s32.totalorder %s21_s29, 0  ;;  %p31_p1 = scmp.ne.s32.totalorder %s4245_s25, %s4241_s24 }
   0x5   : > { %p32_p2 = scmp.eq.s32.totalorder %s4249_s26, 0  ;;  %p197_p3 = scmp.eq.s32.totalorder %s4307_s27, 1 }
   0x6   : > { %s4320_s8 = scalar_select %p22_p0, %s4245_s25, %s24_s30  }
   0x7   : > { %p33_p4 = por %p32_p2, %p31_p1  ;;  %p4322_p5 = por %p197_p3, %p31_p1 }
   0x8   : > { %p3510_p6 = scmp.ge.s32.totalorder %s4249_s26, 2 }
   0xa   : > { %231 = sbr.rel (%p3510_p6) target bundleno = 23 (0x17), region = 32 }
   0xf   : > { %234 = sbr.rel (!%p33_p4) target bundleno = 23 (0x17), region = 36  ;;  %s236_s10 = sand.u32 (%p33_p4), 1, %s4245_s25  }
  0x10   : > { %s3512_s11 = sshll.u32 (%p33_p4), %s4249_s26, 3  ;;  %s3511_s12 = sshll.u32 (%p33_p4), %s236_s10, 5 }
  0x11   : > { %s240_s15 = scalar_lea.vmem (%p33_p4), %s6702_s0, %s3512_s11  ;;  %s238_s16 = scalar_lea.vmem (%p33_p4), [#allocation2], %s3511_s12 }
  0x12   : > { %v275_v0 = vld [vmem:[%s240_s15] sm:$0xff] (%p33_p4)  ;;  %v277_v1 = vld [vmem:[%s240_s15 + $0x10] sm:$0xff] (%p33_p4) }
  0x13   : > { %v279_v2 = vld [vmem:[%s240_s15 + $0x20] sm:$0xff] (%p33_p4)  ;;  %276 = vst [vmem:[%s238_s16] sm:$0xff] (%p33_p4), %v275_v0  ;;  %v281_v3 = vld [vmem:[%s240_s15 + $0x30] sm:$0xff] (%p33_p4) }
  0x14   : > { %278 = vst [vmem:[%s238_s16 + $0x8] sm:$0xff] %v277_v1 }
  0x15   : > { %280 = vst [vmem:[%s238_s16 + $0x10] sm:$0xff] %v279_v2 }
  0x16   : > { %282 = vst [vmem:[%s238_s16 + $0x18] sm:$0xff] %v281_v3 }
  0x17 PF: > { %p3513_p7 = scmp.ge.s32.totalorder %s4249_s26, 1  ;;  %p301_p8 = scmp.lt.s32.totalorder %s4249_s26, 3 }
  0x19   : > { %p302_p9 = pnand %p3513_p7, %p301_p8 }
  0x1b   : > { %305 = sbr.rel (%p302_p9) target bundleno = 1797 (0x705), region = 82 }
  0x20   : > { %s308_s17 = sand.u32 1, %s4241_s24   ;;  %p346_p10 = scmp.lt.s32.totalorder %s4307_s27, 1  ;;  %v366_v13 = vld [vmem:[%s6705_s3] sm:$0xff]  ;;  %vm370_vm0 = vcmask 261120   ;;  %v367_v14 = vld [vmem:[%s6705_s3 + $0x8] sm:$0xff]  ;;  %v368_v15 = vld [vmem:[%s6705_s3 + $0x10] sm:$0xff] }
  0x21   : > { %s4336_s18 = sshll.u32 %s308_s17, 5  ;;  %v412_v16 = vld [vmem:[%s6706_s4] sm:$0xff]  ;;  %v413_v17 = vld [vmem:[%s6706_s4 + $0x8] sm:$0xff]  ;;  %v369_v21 = vld [vmem:[%s6705_s3 + $0x18] sm:$0xff]  ;;  %vm615_vm1 = vcmask 1043456   ;;  %vm566_vm2 = vcmask 31744  }
  0x22   : > { %s4339_s19 = scalar_select %p346_p10, %s4307_s27, 1  ;;  %v414_v25 = vld [vmem:[%s6706_s4 + $0x10] sm:$0xff]  ;;  %v415_v29 = vld [vmem:[%s6706_s4 + $0x18] sm:$0xff] }
  0x23   : > { %s310_s23 = scalar_lea.vmem [#allocation2], %s4336_s18  ;;  %s345_s30 = scalar_lea.vmem [#allocation3], %s4336_s18 }
  0x24   : > { %s348_s22 = scalar_lea.vmem %s6703_s1, %s4339_s19  ;;  %v357_v4 = vld [vmem:[%s310_s23 + $0x18] sm:$0xff]  ;;  %v356_v5 = vld [vmem:[%s310_s23 + $0x10] sm:$0xff]  ;;  %v355_v7 = vld [vmem:[%s310_s23 + $0x8] sm:$0xff]  ;;  %s3674_s14 = sshll.u32 %s4339_s19, 7 }
  0x25   : > { %v3700_v6 = vld [vmem:[%s348_s22] ss:$0 sm:$0xff]  ;;  %v354_v10 = vld [vmem:[%s310_s23] sm:$0xff]  ;;  %s4520_s17 = scalar_lea.vmem %s6704_s2, %s3674_s14  ;;  %s3671_s10 = sshll.u32 (%p4322_p5), %s4307_s27, 3 }
  0x26   : > { %v365_v8 = vmul.f32 %v3700_v6, %v357_v4  ;;  %v364_v9 = vmul.f32 %v3700_v6, %v356_v5  ;;  %v363_v11 = vmul.f32 %v3700_v6, %v355_v7  ;;  %v362_v12 = vmul.f32 %v3700_v6, %v354_v10  ;;  %v457_v7 = vld [vmem:[%s6707_s5] sm:$0xff]  ;;  %s3384_s13 = scalar_lea.vmem (%p4322_p5), %s6709_s7, %s3671_s10 }
  0x28   : > { %395 = vmatpush.msra.mxu0 %v365_v8  ;;  %440 = vmatpush.msra.mxu1 %v365_v8 }
  0x29   : > { %485 = vmatpush.msra.mxu2 %v365_v8 }
  0x2a   : > { %396 = vmatpush.msra.mxu0 %v364_v9  ;;  %441 = vmatpush.msra.mxu1 %v364_v9 }
  0x2b   : > { %486 = vmatpush.msra.mxu2 %v364_v9 }
  0x2c   : > { %397 = vmatpush.msra.mxu0 %v363_v11  ;;  %442 = vmatpush.msra.mxu1 %v363_v11 }
  0x2d   : > { %487 = vmatpush.msra.mxu2 %v363_v11  ;;  %v458_v11 = vld [vmem:[%s6707_s5 + $0x8] sm:$0xff] }
  0x2e   : > { %398 = vmatpush.msra.mxu0 %v362_v12  ;;  %443 = vmatpush.msra.mxu1 %v362_v12 }
  0x2f   : > { %3518 = vmatmul.msk.f32.vlgmr.msra.gmra.mxu0 %vm370_vm0, %v366_v13  ;;  %488 = vmatpush.msra.mxu2 %v362_v12 }
  0x30   : > { %3522 = vmatmul.msk.f32.vlgmr.msra.gmra.mxu1 %vm370_vm0, %v412_v16  ;;  %3526 = vmatmul.msk.f32.vlgmr.msra.gmra.mxu2 %vm370_vm0, %v457_v7 }
  0x37   : > { %3519 = vmatmul.msk.f32.gmra.mxu0 %vm370_vm0, %v367_v14 }
  0x38   : > { %3523 = vmatmul.msk.f32.gmra.mxu1 %vm370_vm0, %v413_v17  ;;  %3527 = vmatmul.msk.f32.gmra.mxu2 %vm370_vm0, %v458_v11  ;;  %v4563_v11 = vld [vmem:[%s4520_s17 + $0x28] sm:$0xff] }
  0x3f   : > { %3520 = vmatmul.msk.f32.gmra.mxu0 %vm370_vm0, %v368_v15  ;;  %v459_v15 = vld [vmem:[%s6707_s5 + $0x10] sm:$0xff] }
  0x40   : > { %3524 = vmatmul.msk.f32.gmra.mxu1 %vm370_vm0, %v414_v25  ;;  %3528 = vmatmul.msk.f32.gmra.mxu2 %vm370_vm0, %v459_v15 }
  0x47   : > { %3521 = vmatmul.msk.f32.gmra.mxu0 %vm370_vm0, %v369_v21  ;;  %v460_v21 = vld [vmem:[%s6707_s5 + $0x18] sm:$0xff] }
  0x48   : > { %3525 = vmatmul.msk.f32.gmra.mxu1 %vm370_vm0, %v415_v29  ;;  %3529 = vmatmul.msk.f32.gmra.mxu2 %vm370_vm0, %v460_v21 }
  0xac   : > { %v400_v18 = vpop.f32.mrf.mxu0 }
  0xad   : > { %534 = vxpose.xlu0.b32.start.end [1/1] (short) %v400_v18, 128  ;;  %v445_v22 = vpop.f32.mrf.mxu1  ;;  %v506_v24 = vrot.slane %v400_v18, 4 }
  0xae   : > { %v518_v23 = vrot.slane %v445_v22, 4  ;;  %3530 = vmatpush.msk.msra.mxu3 %vm615_vm1, %v445_v22 }
  0xb0   : > { %3547 = vmatpush.msk.msrb.mxu0 %vm615_vm1, %v518_v23 }
  0xb4   : > { %v403_v19 = vpop.f32.mrf.mxu0 }
  0xb5   : > { %830 = vxpose.xlu1.b32.start.end [1/1] (short) %v403_v19, 128  ;;  %v507_v26 = vrot.slane %v403_v19, 4  ;;  %v448_v31 = vpop.f32.mrf.mxu1 }
  0xb6   : > { %v519_v33 = vrot.slane %v448_v31, 4  ;;  %3564 = vmatpush.msk.msrb.mxu1 %vm615_vm1, %v448_v31 }
  0xb8   : > { %3581 = vmatpush.msk.msrb.mxu2 %vm615_vm1, %v519_v33 }
  0xbc   : > { %v406_v20 = vpop.f32.mrf.mxu0 }
  0xbd   : > { %1124 = vxpose.xlu2.b32.start.end [1/1] (short) %v406_v20, 128  ;;  %v508_v27 = vrot.slane %v406_v20, 4  ;;  %v451_v62 = vpop.f32.mrf.mxu1 }
  0xbe   : > { %v520_v1 = vrot.slane %v451_v62, 4  ;;  %3598 = vmatpush.msk.msrb.mxu3 %vm615_vm1, %v451_v62 }
  0xc0   : > { %3615 = vmatpush.msk.msra.mxu0 %vm615_vm1, %v520_v1 }
  0xc4   : > { %v409_v60 = vpop.f32.mrf.mxu0 }
  0xc5   : > { %v509_v0 = vrot.slane %v409_v60, 4  ;;  %v454_v18 = vpop.f32.mrf.mxu1 }
  0xc6   : > { %v521_v19 = vrot.slane %v454_v18, 4  ;;  %3632 = vmatpush.msk.msra.mxu1 %vm615_vm1, %v454_v18  ;;  %v4576_v18 = vld [vmem:[%s4520_s17 + $0x30] sm:$0xff] }
  0xc8   : > { %3649 = vmatpush.msk.msra.mxu2 %vm615_vm1, %v521_v19 }
 0x12d   : > { %683 = vxpose.xlu0.b32.start.end [1/1] (short) %v506_v24, 128 }
 0x135   : > { %977 = vxpose.xlu1.b32.start.end [1/1] (short) %v507_v26, 128 }
 0x13d   : > { %1271 = vxpose.xlu2.b32.start.end [1/1] (short) %v508_v27, 128 }
 0x151   : > { %v550_v28 = vpop.trf.xlu0 }
 0x152   : > { %3531 = vmatmul.msk.f32.vlgmr.msra.gmra.mxu3 %vm566_vm2, %v550_v28 }
 0x156   : > { %v4391_v41 = vpop.trf.xlu2 }
 0x159   : > { %v551_v30 = vpop.trf.xlu0  ;;  %v846_v32 = vpop.trf.xlu1 }
 0x15a   : > { %3532 = vmatmul.msk.f32.gmra.mxu3 %vm566_vm2, %v551_v30  ;;  %3565 = vmatmul.msk.f32.vlgmr.msrb.gmra.mxu1 %vm566_vm2, %v846_v32 }
 0x15e   : > { %v4395_v44 = vpop.trf.xlu2 }
 0x161   : > { %v552_v34 = vpop.trf.xlu0  ;;  %v847_v35 = vpop.trf.xlu1 }
 0x162   : > { %3533 = vmatmul.msk.f32.gmra.mxu3 %vm566_vm2, %v552_v34  ;;  %3566 = vmatmul.msk.f32.gmra.mxu1 %vm566_vm2, %v847_v35 }
 0x166   : > { %v4399_v47 = vpop.trf.xlu2 }
 0x169   : > { %v553_v36 = vpop.trf.xlu0  ;;  %v848_v37 = vpop.trf.xlu1 }
 0x16a   : > { %3534 = vmatmul.msk.f32.gmra.mxu3 %vm566_vm2, %v553_v36  ;;  %3567 = vmatmul.msk.f32.gmra.mxu1 %vm566_vm2, %v848_v37 }
 0x16e   : > { %v4403_v50 = vpop.trf.xlu2 }
 0x171   : > { %v554_v38 = vpop.trf.xlu0  ;;  %v849_v39 = vpop.trf.xlu1 }
 0x172   : > { %3535 = vmatmul.msk.f32.gmra.mxu3 %vm566_vm2, %v554_v38  ;;  %3568 = vmatmul.msk.f32.gmra.mxu1 %vm566_vm2, %v849_v39 }
 0x176   : > { %v4407_v53 = vpop.trf.xlu2 }
 0x179   : > { %v555_v40 = vpop.trf.xlu0  ;;  %v850_v42 = vpop.trf.xlu1 }
 0x17a   : > { %3536 = vmatmul.msk.f32.gmra.mxu3 %vm566_vm2, %v555_v40  ;;  %3569 = vmatmul.msk.f32.gmra.mxu1 %vm566_vm2, %v850_v42 }
 0x17e   : > { %v4411_v56 = vpop.trf.xlu2 }
 0x181   : > { %v556_v43 = vpop.trf.xlu0  ;;  %v851_v45 = vpop.trf.xlu1 }
 0x182   : > { %3537 = vmatmul.msk.f32.gmra.mxu3 %vm566_vm2, %v556_v43  ;;  %3570 = vmatmul.msk.f32.gmra.mxu1 %vm566_vm2, %v851_v45 }
 0x186   : > { %v4415_v59 = vpop.trf.xlu2 }
 0x189   : > { %v557_v46 = vpop.trf.xlu0  ;;  %v852_v48 = vpop.trf.xlu1 }
 0x18a   : > { %3538 = vmatmul.msk.f32.gmra.mxu3 %vm566_vm2, %v557_v46  ;;  %3571 = vmatmul.msk.f32.gmra.mxu1 %vm566_vm2, %v852_v48 }
 0x18e   : > { %v4420_v2 = vpop.trf.xlu2 }
 0x191   : > { %v558_v49 = vpop.trf.xlu0  ;;  %v853_v51 = vpop.trf.xlu1 }
 0x192   : > { %3539 = vmatmul.msk.f32.gmra.mxu3 %vm566_vm2, %v558_v49  ;;  %3572 = vmatmul.msk.f32.gmra.mxu1 %vm566_vm2, %v853_v51 }
 0x196   : > { %v4425_v5 = vpop.trf.xlu2 }
 0x199   : > { %v559_v52 = vpop.trf.xlu0  ;;  %v854_v54 = vpop.trf.xlu1 }
 0x19a   : > { %3540 = vmatmul.msk.f32.gmra.mxu3 %vm566_vm2, %v559_v52  ;;  %3573 = vmatmul.msk.f32.gmra.mxu1 %vm566_vm2, %v854_v54 }
 0x19e   : > { %v4433_v9 = vpop.trf.xlu2 }
 0x1a1   : > { %v560_v55 = vpop.trf.xlu0  ;;  %v855_v57 = vpop.trf.xlu1 }
 0x1a2   : > { %3541 = vmatmul.msk.f32.gmra.mxu3 %vm566_vm2, %v560_v55  ;;  %3574 = vmatmul.msk.f32.gmra.mxu1 %vm566_vm2, %v855_v57  ;;  %v4526_v55 = vld [vmem:[%s4520_s17] sm:$0xff] }
 0x1a6   : > { %v4441_v13 = vpop.trf.xlu2 }
 0x1a9   : > { %v561_v58 = vpop.trf.xlu0  ;;  %v856_v61 = vpop.trf.xlu1 }
 0x1aa   : > { %3542 = vmatmul.msk.f32.gmra.mxu3 %vm566_vm2, %v561_v58  ;;  %3575 = vmatmul.msk.f32.gmra.mxu1 %vm566_vm2, %v856_v61  ;;  %v4537_v61 = vld [vmem:[%s4520_s17 + $0x18] sm:$0xff] }
 0x1ad   : > { %1418 = vxpose.xlu0.b32.start.end [1/1] (short) %v409_v60, 128 }
 0x1ae   : > { %v4449_v17 = vpop.trf.xlu2 }
 0x1b1   : > { %v562_v63 = vpop.trf.xlu0  ;;  %v857_v3 = vpop.trf.xlu1 }
 0x1b2   : > { %3543 = vmatmul.msk.f32.gmra.mxu3 %vm566_vm2, %v562_v63  ;;  %3576 = vmatmul.msk.f32.gmra.mxu1 %vm566_vm2, %v857_v3 }
 0x1b5   : > { %1565 = vxpose.xlu1.b32.start.end [1/1] (short) %v509_v0, 128 }
 0x1b6   : > { %v4461_v23 = vpop.trf.xlu2 }
 0x1b9   : > { %v563_v4 = vpop.trf.xlu0  ;;  %v858_v6 = vpop.trf.xlu1 }
 0x1ba   : > { %3544 = vmatmul.msk.f32.gmra.mxu3 %vm566_vm2, %v563_v4  ;;  %3577 = vmatmul.msk.f32.gmra.mxu1 %vm566_vm2, %v858_v6  ;;  %v4550_v4 = vld [vmem:[%s4520_s17 + $0x20] sm:$0xff] }
 0x1be   : > { %v4467_v26 = vpop.trf.xlu2 }
 0x1c1   : > { %v564_v8 = vpop.trf.xlu0  ;;  %v859_v10 = vpop.trf.xlu1 }
 0x1c2   : > { %3545 = vmatmul.msk.f32.gmra.mxu3 %vm566_vm2, %v564_v8  ;;  %3578 = vmatmul.msk.f32.gmra.mxu1 %vm566_vm2, %v859_v10 }
 0x1c6   : > { %v4473_v29 = vpop.trf.xlu2 }
 0x1c9   : > { %v565_v12 = vpop.trf.xlu0  ;;  %v860_v14 = vpop.trf.xlu1 }
 0x1ca   : > { %3546 = vmatmul.msk.f32.gmra.mxu3 %vm566_vm2, %v565_v12  ;;  %3579 = vmatmul.msk.f32.gmra.mxu1 %vm566_vm2, %v860_v14 }
 0x1ce   : > { %v4479_v33 = vpop.trf.xlu2 }
 0x1d1   : > { %v699_v16 = vpop.trf.xlu0  ;;  %v861_v20 = vpop.trf.xlu1 }
 0x1d2   : > { %3548 = vmatmul.msk.f32.vlgmr.msrb.gmra.mxu0 %vm566_vm2, %v699_v16  ;;  %3599 = vmatmul.msk.f32.vlgmr.msrb.gmra.mxu3 %vm566_vm2, %v4391_v41 }
 0x1d3   : > { %3580 = vmatmul.msk.f32.gmra.mxu1 %vm566_vm2, %v861_v20  ;;  %v4578_v20 = vpop.f32.mrf.mxu2 }
 0x1d4   : > { %6886 = vst [vmem:[#allocation8_spill] sm:$0xff] %v4578_v20  ;;  %v4734_v20 = vld [vmem:[%s4520_s17 + $0x78] sm:$0xff] }
 0x1d5   : > { %v635_v31 = vpop.f32.mrf.mxu3 }
 0x1d6   : > { %v4485_v36 = vpop.trf.xlu2 }
 0x1d9   : > { %v700_v22 = vpop.trf.xlu0  ;;  %v993_v24 = vpop.trf.xlu1 }
 0x1da   : > { %3549 = vmatmul.msk.f32.gmra.mxu0 %vm566_vm2, %v700_v22  ;;  %3600 = vmatmul.msk.f32.gmra.mxu3 %vm566_vm2, %v4395_v44 }
 0x1db   : > { %3582 = vmatmul.msk.f32.vlgmr.msrb.gmra.mxu2 %vm566_vm2, %v993_v24 }
 0x1dd   : > { %v4487_v37 = vpop.f32.mrf.mxu3 }
 0x1de   : > { %v4496_v40 = vpop.trf.xlu2 }
 0x1e1   : > { %v701_v25 = vpop.trf.xlu0  ;;  %v994_v27 = vpop.trf.xlu1 }
 0x1e2   : > { %3550 = vmatmul.msk.f32.gmra.mxu0 %vm566_vm2, %v701_v25  ;;  %3601 = vmatmul.msk.f32.gmra.mxu3 %vm566_vm2, %v4399_v47  ;;  %v4591_v25 = vld [vmem:[%s4520_s17 + $0x38] sm:$0xff] }
 0x1e3   : > { %3583 = vmatmul.msk.f32.gmra.mxu2 %vm566_vm2, %v994_v27  ;;  %v4593_v27 = vpop.f32.mrf.mxu2 }
 0x1e4   : > { %6888 = vst [vmem:[#allocation10_spill] sm:$0xff] %v4593_v27 }
 0x1e5   : > { %v4498_v41 = vpop.f32.mrf.mxu3 }
 0x1e6   : > { %v4504_v44 = vpop.trf.xlu2 }
 0x1e9   : > { %v702_v28 = vpop.trf.xlu0  ;;  %v995_v30 = vpop.trf.xlu1 }
 0x1ea   : > { %3551 = vmatmul.msk.f32.gmra.mxu0 %vm566_vm2, %v702_v28  ;;  %3602 = vmatmul.msk.f32.gmra.mxu3 %vm566_vm2, %v4403_v50 }
 0x1eb   : > { %3584 = vmatmul.msk.f32.gmra.mxu2 %vm566_vm2, %v995_v30 }
 0x1ed   : > { %v644_v46 = vpop.f32.mrf.mxu3 }
 0x1ee   : > { %v4510_v49 = vpop.trf.xlu2  ;;  %v1715_v60 = vmul.f32 0.5, %v644_v46 }
 0x1f0   : > { %v4545_v1 = vadd.f32 %v4537_v61, %v1715_v60 }
 0x1f1   : > { %v703_v32 = vpop.trf.xlu0  ;;  %v996_v34 = vpop.trf.xlu1 }
 0x1f2   : > { %3552 = vmatmul.msk.f32.gmra.mxu0 %vm566_vm2, %v703_v32  ;;  %3603 = vmatmul.msk.f32.gmra.mxu3 %vm566_vm2, %v4407_v53  ;;  %v1712_v53 = vmul.f32 0.5, %v635_v31  ;;  %6883 = vst [vmem:[#allocation5_spill] sm:$0xff] %v4545_v1  ;;  %v4601_v31 = vpop.f32.mrf.mxu1 }
 0x1f3   : > { %3585 = vmatmul.msk.f32.gmra.mxu2 %vm566_vm2, %v996_v34 }
 0x1f4   : > { %v4532_v58 = vadd.f32 %v4526_v55, %v1712_v53 }
 0x1f5   : > { %v647_v50 = vpop.f32.mrf.mxu3 }
 0x1f6   : > { %v4523_v54 = vpop.trf.xlu2  ;;  %6882 = vst [vmem:[#allocation4_spill] sm:$0xff] %v4532_v58  ;;  %v1716_v3 = vmul.f32 0.5, %v647_v50 }
 0x1f8   : > { %v4556_v6 = vadd.f32 %v4550_v4, %v1716_v3 }
 0x1f9   : > { %v704_v35 = vpop.trf.xlu0  ;;  %v997_v38 = vpop.trf.xlu1 }
 0x1fa   : > { %3553 = vmatmul.msk.f32.gmra.mxu0 %vm566_vm2, %v704_v35  ;;  %3604 = vmatmul.msk.f32.gmra.mxu3 %vm566_vm2, %v4411_v56  ;;  %6884 = vst [vmem:[#allocation6_spill] sm:$0xff] %v4556_v6  ;;  %v4608_v35 = vld [vmem:[%s4520_s17 + $0x40] sm:$0xff]  ;;  %v4623_v46 = vpop.f32.mrf.mxu1 }
 0x1fb   : > { %3586 = vmatmul.msk.f32.gmra.mxu2 %vm566_vm2, %v997_v38  ;;  %v4610_v38 = vpop.f32.mrf.mxu2 }
 0x1fc   : > { %6890 = vst [vmem:[#allocation12_spill] sm:$0xff] %v4610_v38 }
 0x1fd   : > { %v650_v57 = vpop.f32.mrf.mxu3 }
 0x1fe   : > { %v4542_v63 = vpop.trf.xlu2  ;;  %v1717_v10 = vmul.f32 0.5, %v650_v57 }
 0x201   : > { %v705_v39 = vpop.trf.xlu0  ;;  %v998_v42 = vpop.trf.xlu1 }
 0x202   : > { %3554 = vmatmul.msk.f32.gmra.mxu0 %vm566_vm2, %v705_v39  ;;  %3605 = vmatmul.msk.f32.gmra.mxu3 %vm566_vm2, %v4415_v59 }
 0x203   : > { %3587 = vmatmul.msk.f32.gmra.mxu2 %vm566_vm2, %v998_v42 }
 0x205   : > { %v653_v0 = vpop.f32.mrf.mxu3 }
 0x206   : > { %v4558_v7 = vpop.trf.xlu2  ;;  %v1718_v16 = vmul.f32 0.5, %v653_v0 }
 0x208   : > { %v4584_v21 = vadd.f32 %v4576_v18, %v1718_v16 }
 0x209   : > { %v706_v43 = vpop.trf.xlu0  ;;  %v999_v45 = vpop.trf.xlu1 }
 0x20a   : > { %3555 = vmatmul.msk.f32.gmra.mxu0 %vm566_vm2, %v706_v43  ;;  %3606 = vmatmul.msk.f32.gmra.mxu3 %vm566_vm2, %v4420_v2  ;;  %6887 = vst [vmem:[#allocation9_spill] sm:$0xff] %v4584_v21 }
 0x20b   : > { %3588 = vmatmul.msk.f32.gmra.mxu2 %vm566_vm2, %v999_v45 }
 0x20e   : > { %v4572_v15 = vpop.trf.xlu2 }
 0x211   : > { %v707_v47 = vpop.trf.xlu0  ;;  %v1000_v48 = vpop.trf.xlu1 }
 0x212   : > { %3556 = vmatmul.msk.f32.gmra.mxu0 %vm566_vm2, %v707_v47  ;;  %3607 = vmatmul.msk.f32.gmra.mxu3 %vm566_vm2, %v4425_v5 }
 0x213   : > { %3589 = vmatmul.msk.f32.gmra.mxu2 %vm566_vm2, %v1000_v48  ;;  %v4626_v48 = vld [vmem:[%s4520_s17 + $0x48] sm:$0xff] }
 0x216   : > { %v4588_v24 = vpop.trf.xlu2 }
 0x219   : > { %v708_v51 = vpop.trf.xlu0  ;;  %v1001_v52 = vpop.trf.xlu1 }
 0x21a   : > { %3557 = vmatmul.msk.f32.gmra.mxu0 %vm566_vm2, %v708_v51  ;;  %3608 = vmatmul.msk.f32.gmra.mxu3 %vm566_vm2, %v4433_v9  ;;  %v656_v9 = vpop.f32.mrf.mxu3 }
 0x21b   : > { %3590 = vmatmul.msk.f32.gmra.mxu2 %vm566_vm2, %v1001_v52 }
 0x221   : > { %v709_v56 = vpop.trf.xlu0  ;;  %v1002_v59 = vpop.trf.xlu1 }
 0x222   : > { %3558 = vmatmul.msk.f32.gmra.mxu0 %vm566_vm2, %v709_v56  ;;  %3609 = vmatmul.msk.f32.gmra.mxu3 %vm566_vm2, %v4441_v13  ;;  %v4569_v13 = vadd.f32 %v4563_v11, %v1717_v10 }
 0x223   : > { %3591 = vmatmul.msk.f32.gmra.mxu2 %vm566_vm2, %v1002_v59  ;;  %v4642_v59 = vld [vmem:[%s4520_s17 + $0x50] sm:$0xff] }
 0x224   : > { %6885 = vst [vmem:[#allocation7_spill] sm:$0xff] %v4569_v13 }
 0x226   : > { %1984 = vmax.xlane.f32.xlu2 %v4532_v58 }
 0x229   : > { %v710_v62 = vpop.trf.xlu0  ;;  %v1003_v2 = vpop.trf.xlu1 }
 0x22a   : > { %3559 = vmatmul.msk.f32.gmra.mxu0 %vm566_vm2, %v710_v62  ;;  %3610 = vmatmul.msk.f32.gmra.mxu3 %vm566_vm2, %v4449_v17  ;;  %v659_v17 = vpop.f32.mrf.mxu3 }
 0x22b   : > { %3592 = vmatmul.msk.f32.gmra.mxu2 %vm566_vm2, %v1003_v2  ;;  %v1720_v34 = vmul.f32 0.5, %v659_v17 }
 0x22d   : > { %v4617_v42 = vadd.f32 %v4608_v35, %v1720_v34 }
 0x22e   : > { %1990 = vmax.xlane.f32.xlu2 %v4545_v1 }
 0x22f   : > { %6891 = vst [vmem:[#allocation13_spill] sm:$0xff] %v4617_v42 }
 0x231   : > { %v711_v5 = vpop.trf.xlu0  ;;  %v1004_v8 = vpop.trf.xlu1 }
 0x232   : > { %3560 = vmatmul.msk.f32.gmra.mxu0 %vm566_vm2, %v711_v5  ;;  %3611 = vmatmul.msk.f32.gmra.mxu3 %vm566_vm2, %v4461_v23  ;;  %v1719_v23 = vmul.f32 0.5, %v656_v9  ;;  %v662_v28 = vpop.f32.mrf.mxu3  ;;  %v4660_v9 = vld [vmem:[%s4520_s17 + $0x58] sm:$0xff] }
 0x233   : > { %3593 = vmatmul.msk.f32.gmra.mxu2 %vm566_vm2, %v1004_v8  ;;  %v1721_v47 = vmul.f32 0.5, %v662_v28 }
 0x235   : > { %v4633_v50 = vadd.f32 %v4626_v48, %v1721_v47 }
 0x236   : > { %1992 = vmax.xlane.f32.xlu2 %v4556_v6 }
 0x237   : > { %6893 = vst [vmem:[#allocation15_spill] sm:$0xff] %v4633_v50 }
 0x239   : > { %v712_v12 = vpop.trf.xlu0  ;;  %v1005_v14 = vpop.trf.xlu1 }
 0x23a   : > { %3561 = vmatmul.msk.f32.gmra.mxu0 %vm566_vm2, %v712_v12  ;;  %3612 = vmatmul.msk.f32.gmra.mxu3 %vm566_vm2, %v4467_v26  ;;  %v665_v39 = vpop.f32.mrf.mxu3 }
 0x23b   : > { %3594 = vmatmul.msk.f32.gmra.mxu2 %vm566_vm2, %v1005_v14  ;;  %v1722_v57 = vmul.f32 0.5, %v665_v39 }
 0x23d   : > { %v4651_v62 = vadd.f32 %v4642_v59, %v1722_v57 }
 0x23e   : > { %1994 = vmax.xlane.f32.xlu2 %v4569_v13 }
 0x23f   : > { %6894 = vst [vmem:[#allocation16_spill] sm:$0xff] %v4651_v62 }
 0x241   : > { %v713_v19 = vpop.trf.xlu0  ;;  %v1006_v22 = vpop.trf.xlu1 }
 0x242   : > { %3562 = vmatmul.msk.f32.gmra.mxu0 %vm566_vm2, %v713_v19  ;;  %3613 = vmatmul.msk.f32.gmra.mxu3 %vm566_vm2, %v4473_v29  ;;  %v4599_v29 = vadd.f32 %v4591_v25, %v1719_v23  ;;  %v668_v53 = vpop.f32.mrf.mxu3  ;;  %v4679_v23 = vld [vmem:[%s4520_s17 + $0x60] sm:$0xff] }
 0x243   : > { %3595 = vmatmul.msk.f32.gmra.mxu2 %vm566_vm2, %v1006_v22  ;;  %v1723_v5 = vmul.f32 0.5, %v668_v53 }
 0x244   : > { %6889 = vst [vmem:[#allocation11_spill] sm:$0xff] %v4599_v29 }
 0x245   : > { %v4670_v14 = vadd.f32 %v4660_v9, %v1723_v5 }
 0x246   : > { %1996 = vmax.xlane.f32.xlu2 %v4584_v21 }
 0x247   : > { %6895 = vst [vmem:[#allocation17_spill] sm:$0xff] %v4670_v14 }
 0x249   : > { %v714_v26 = vpop.trf.xlu0  ;;  %v1007_v30 = vpop.trf.xlu1 }
 0x24a   : > { %3563 = vmatmul.msk.f32.gmra.mxu0 %vm566_vm2, %v714_v26  ;;  %3614 = vmatmul.msk.f32.gmra.mxu3 %vm566_vm2, %v4479_v33  ;;  %v4614_v33 = vpop.trf.xlu2  ;;  %v671_v8 = vpop.f32.mrf.mxu3 }
 0x24b   : > { %3596 = vmatmul.msk.f32.gmra.mxu2 %vm566_vm2, %v1007_v30  ;;  %v1724_v19 = vmul.f32 0.5, %v671_v8 }
 0x24d   : > { %v4687_v30 = vadd.f32 %v4679_v23, %v1724_v19 }
 0x24e   : > { %1998 = vmax.xlane.f32.xlu2 %v4599_v29 }
 0x24f   : > { %v4605_v32 = vpop.f32.mrf.mxu0  ;;  %6896 = vst [vmem:[#allocation18_spill] sm:$0xff] %v4687_v30 }
 0x251   : > { %v1008_v43 = vpop.trf.xlu1 }
 0x252   : > { %3616 = vmatmul.msk.f32.vlgmr.msra.gmra.mxu0 %vm566_vm2, %v4485_v36  ;;  %v4628_v36 = vpop.f32.mrf.mxu2  ;;  %v4635_v51 = vpop.trf.xlu2 }
 0x253   : > { %3597 = vmatmul.msk.f32.gmra.mxu2 %vm566_vm2, %v1008_v43  ;;  %6892 = vst [vmem:[#allocation14_spill] sm:$0xff] %v4628_v36  ;;  %v674_v28 = vpop.f32.mrf.mxu3  ;;  %v4731_v36 = vld [vmem:[%s4520_s17 + $0x10] sm:$0xff] }
 0x254   : > { %v1725_v47 = vmul.f32 0.5, %v674_v28 }
 0x256   : > { %2000 = vmax.xlane.f32.xlu2 %v4617_v42 }
 0x257   : > { %v4621_v45 = vpop.f32.mrf.mxu0 }
 0x258   : > { %v1729_v58 = vmul.f32 0.5, %v4621_v45 }
 0x259   : > { %v1581_v52 = vpop.trf.xlu1 }
 0x25a   : > { %3617 = vmatmul.msk.f32.gmra.mxu0 %vm566_vm2, %v4496_v40  ;;  %v4646_v40 = vpop.f32.mrf.mxu1  ;;  %v4654_v2 = vpop.trf.xlu2 }
 0x25b   : > { %3650 = vmatmul.msk.f32.vlgmr.msra.gmra.mxu2 %vm566_vm2, %v1581_v52  ;;  %v4696_v52 = vld [vmem:[%s4520_s17 + $0x68] sm:$0xff]  ;;  %v677_v5 = vpop.f32.mrf.mxu3 }
 0x25c   : > { %v1726_v19 = vmul.f32 0.5, %v677_v5  ;;  %v1714_v5 = vmul.f32 0.5, %v4498_v41 }
 0x25e   : > { %2002 = vmax.xlane.f32.xlu2 %v4633_v50  ;;  %v4644_v60 = vpop.f32.mrf.mxu2  ;;  %v4744_v41 = vadd.f32 %v4731_v36, %v1714_v5  ;;  %v1728_v5 = vmul.f32 0.5, %v4605_v32 }
 0x25f   : > { %v4639_v56 = vpop.f32.mrf.mxu0 }
 0x260   : > { %6898 = vst [vmem:[#allocation20_spill] sm:$0xff] %v4744_v41 }
 0x261   : > { %v1582_v0 = vpop.trf.xlu1 }
 0x262   : > { %3618 = vmatmul.msk.f32.gmra.mxu0 %vm566_vm2, %v4504_v44  ;;  %v1434_v44 = vpop.trf.xlu0  ;;  %v4667_v12 = vpop.f32.mrf.mxu1 }
 0x263   : > { %3651 = vmatmul.msk.f32.gmra.mxu2 %vm566_vm2, %v1582_v0  ;;  %3633 = vmatmul.msk.f32.vlgmr.msra.gmra.mxu1 %vm566_vm2, %v1434_v44  ;;  %v4676_v22 = vpop.trf.xlu2  ;;  %v4706_v0 = vadd.f32 %v4696_v52, %v1725_v47 }
 0x265   : > { %6897 = vst [vmem:[#allocation19_spill] sm:$0xff] %v4706_v0 }
 0x266   : > { %2004 = vmax.xlane.f32.xlu2 %v4651_v62  ;;  %v4662_v10 = vpop.f32.mrf.mxu2 }
 0x267   : > { %v4657_v3 = vpop.f32.mrf.mxu0 }
 0x269   : > { %v1583_v16 = vpop.trf.xlu1 }
 0x26a   : > { %3619 = vmatmul.msk.f32.gmra.mxu0 %vm566_vm2, %v4510_v49  ;;  %v1435_v26 = vpop.trf.xlu0  ;;  %v4689_v39 = vpop.f32.mrf.mxu1 }
 0x26b   : > { %3652 = vmatmul.msk.f32.gmra.mxu2 %vm566_vm2, %v1583_v16  ;;  %3634 = vmatmul.msk.f32.gmra.mxu1 %vm566_vm2, %v1435_v26  ;;  %v4703_v57 = vpop.trf.xlu2 }
 0x26e   : > { %2006 = vmax.xlane.f32.xlu2 %v4670_v14  ;;  %v4681_v49 = vpop.f32.mrf.mxu2 }
 0x26f   : > { %v4674_v17 = vpop.f32.mrf.mxu0 }
 0x271   : > { %v1584_v34 = vpop.trf.xlu1 }
 0x272   : > { %3620 = vmatmul.msk.f32.gmra.mxu0 %vm566_vm2, %v4523_v54  ;;  %v1436_v53 = vpop.trf.xlu0  ;;  %v4710_v16 = vpop.f32.mrf.mxu1 }
 0x273   : > { %3653 = vmatmul.msk.f32.gmra.mxu2 %vm566_vm2, %v1584_v34  ;;  %3635 = vmatmul.msk.f32.gmra.mxu1 %vm566_vm2, %v1436_v53  ;;  %v4723_v47 = vpop.trf.xlu2 }
 0x276   : > { %2008 = vmax.xlane.f32.xlu2 %v4687_v30  ;;  %v4698_v54 = vpop.f32.mrf.mxu2 }
 0x277   : > { %v4693_v43 = vpop.f32.mrf.mxu0 }
 0x279   : > { %v1585_v8 = vpop.trf.xlu1 }
 0x27a   : > { %3621 = vmatmul.msk.f32.gmra.mxu0 %vm566_vm2, %v4542_v63  ;;  %v4713_v63 = vld [vmem:[%s4520_s17 + $0x70] sm:$0xff]  ;;  %v1437_v28 = vpop.trf.xlu0  ;;  %v4738_v27 = vpop.f32.mrf.mxu1 }
 0x27b   : > { %3654 = vmatmul.msk.f32.gmra.mxu2 %vm566_vm2, %v1585_v8  ;;  %3636 = vmatmul.msk.f32.gmra.mxu1 %vm566_vm2, %v1437_v28  ;;  %v4721_v34 = vadd.f32 %v4713_v63, %v1726_v19  ;;  %v680_v8 = vpop.f32.mrf.mxu3  ;;  %v4753_v13 = vpop.trf.xlu2 }
 0x27e   : > { %2010 = vmax.xlane.f32.xlu2 %v4706_v0  ;;  %v4715_v26 = vpop.f32.mrf.mxu2 }
 0x27f   : > { %v800_v44 = vpop.f32.mrf.mxu0 }
 0x280   : > { %v1734_v21 = vmul.f32 0.5, %v800_v44 }
 0x281   : > { %v1586_v53 = vpop.trf.xlu1 }
 0x282   : > { %3622 = vmatmul.msk.f32.gmra.mxu0 %vm566_vm2, %v4558_v7  ;;  %v1727_v7 = vmul.f32 0.5, %v680_v8  ;;  %v1438_v19 = vpop.trf.xlu0  ;;  %v4768_v45 = vpop.f32.mrf.mxu1 }
 0x283   : > { %3655 = vmatmul.msk.f32.gmra.mxu2 %vm566_vm2, %v1586_v53  ;;  %3637 = vmatmul.msk.f32.gmra.mxu1 %vm566_vm2, %v1438_v19  ;;  %v4758_v19 = vld [vmem:[%s4520_s17 + $0x8] sm:$0xff] }
 0x284   : > { %v4747_v53 = vadd.f32 %v4734_v20, %v1727_v7 }
 0x286   : > { %2012 = vmax.xlane.f32.xlu2 %v4721_v34  ;;  %v4736_v28 = vpop.f32.mrf.mxu2 }
 0x287   : > { %v4728_v38 = vpop.f32.mrf.mxu0 }
 0x289   : > { %v1587_v8 = vpop.trf.xlu1 }
 0x28a   : > { %3623 = vmatmul.msk.f32.gmra.mxu0 %vm566_vm2, %v4572_v15  ;;  %v1713_v15 = vmul.f32 0.5, %v4487_v37  ;;  %v1439_v6 = vpop.trf.xlu0  ;;  %v4774_v37 = vadd.f32 %v4526_v55, %v1728_v5  ;;  %v4799_v44 = vpop.f32.mrf.mxu1 }
 0x28b   : > { %3656 = vmatmul.msk.f32.gmra.mxu2 %vm566_vm2, %v1587_v8  ;;  %3638 = vmatmul.msk.f32.gmra.mxu1 %vm566_vm2, %v1439_v6  ;;  %v4766_v8 = vadd.f32 %v4758_v19, %v1729_v58  ;;  %v1731_v6 = vmul.f32 0.5, %v4657_v3  ;;  %v1730_v58 = vmul.f32 0.5, %v4639_v56  ;;  %v4793_v3 = vadd.f32 %v4576_v18, %v1734_v21 }
 0x28c   : > { %6901 = vst [vmem:[#allocation23_spill] sm:$0xff] %v4774_v37  ;;  %v1732_v21 = vmul.f32 0.5, %v4674_v17 }
 0x28d   : > { %1988 = vmax.xlane.f32.xlu1 %v4744_v41  ;;  %6899 = vst [vmem:[#allocation21_spill] sm:$0xff] %v4766_v8  ;;  %v4771_v41 = vadd.f32 %v4758_v19, %v1713_v15 }
 0x28e   : > { %2014 = vmax.xlane.f32.xlu2 %v4747_v53  ;;  %v4760_v7 = vpop.f32.mrf.mxu2  ;;  %6904 = vst [vmem:[#allocation26_spill] sm:$0xff] %v4793_v3 }
 0x28f   : > { %v806_v1 = vpop.f32.mrf.mxu0  ;;  %6900 = vst [vmem:[#allocation22_spill] sm:$0xff] %v4771_v41 }
 0x291   : > { %v1588_v32 = vpop.trf.xlu1 }
 0x292   : > { %3624 = vmatmul.msk.f32.gmra.mxu0 %vm566_vm2, %v4588_v24  ;;  %v1440_v5 = vpop.trf.xlu0 }
 0x293   : > { %3657 = vmatmul.msk.f32.gmra.mxu2 %vm566_vm2, %v1588_v32  ;;  %3639 = vmatmul.msk.f32.gmra.mxu1 %vm566_vm2, %v1440_v5  ;;  %v4796_v32 = vadd.f32 %v4731_v36, %v1730_v58 }
 0x295   : > { %2018 = vmax.xlane.f32.xlu1 %v4766_v8  ;;  %v4789_v8 = vadd.f32 %v4537_v61, %v1731_v6  ;;  %6905 = vst [vmem:[#allocation27_spill] sm:$0xff] %v4796_v32 }
 0x296   : > { %1986 = vmax.xlane.f32.xlu0 %v4771_v41  ;;  %2016 = vmax.xlane.f32.xlu2 %v4774_v37  ;;  %v4784_v42 = vpop.f32.mrf.mxu2 }
 0x297   : > { %v809_v24 = vpop.f32.mrf.mxu0  ;;  %6903 = vst [vmem:[#allocation25_spill] sm:$0xff] %v4789_v8 }
 0x298   : > { %v1737_v5 = vmul.f32 0.5, %v809_v24 }
 0x299   : > { %v4782_v15 = vpop.xlane.xlu2 %1984  ;;  %v1589_v56 = vpop.trf.xlu1 }
 0x29a   : > { %6902 = vst [vmem:[#allocation24_spill] sm:$0xff] %v4782_v15  ;;  %3625 = vmatmul.msk.f32.gmra.mxu0 %vm566_vm2, %v4614_v33  ;;  %v1733_v33 = vmul.f32 0.5, %v4693_v43  ;;  %v1441_v37 = vpop.trf.xlu0  ;;  %v4817_v43 = vadd.f32 %v4626_v48, %v1737_v5 }
 0x29b   : > { %3658 = vmatmul.msk.f32.gmra.mxu2 %vm566_vm2, %v1589_v56  ;;  %3640 = vmatmul.msk.f32.gmra.mxu1 %vm566_vm2, %v1441_v37  ;;  %v4820_v56 = vadd.f32 %v4550_v4, %v1732_v21  ;;  %v1735_v37 = vmul.f32 0.5, %v4728_v38 }
 0x29c   : > { %6908 = vst [vmem:[#allocation30_spill] sm:$0xff] %v4817_v43 }
 0x29d   : > { %2022 = vmax.xlane.f32.xlu1 %v4789_v8  ;;  %6909 = vst [vmem:[#allocation31_spill] sm:$0xff] %v4820_v56 }
 0x29e   : > { %2020 = vmax.xlane.f32.xlu2 %v4796_v32  ;;  %2028 = vmax.xlane.f32.xlu0 %v4793_v3  ;;  %v4808_v58 = vpop.f32.mrf.mxu2  ;;  %v4813_v32 = vadd.f32 %v4563_v11, %v1733_v33  ;;  %v4826_v33 = vpop.f32.mrf.mxu1 }
 0x29f   : > { %v812_v6 = vpop.f32.mrf.mxu0 }
 0x2a0   : > { %6907 = vst [vmem:[#allocation29_spill] sm:$0xff] %v4813_v32 }
 0x2a1   : > { %v4806_v15 = vpop.xlane.xlu2 %1990  ;;  %v1590_v17 = vpop.trf.xlu1 }
 0x2a2   : > { %6906 = vst [vmem:[#allocation28_spill] sm:$0xff] %v4806_v15  ;;  %3626 = vmatmul.msk.f32.gmra.mxu0 %vm566_vm2, %v4635_v51  ;;  %v1736_v51 = vmul.f32 0.5, %v806_v1  ;;  %v1442_v21 = vpop.trf.xlu0  ;;  %v4839_v1 = vpop.f32.mrf.mxu3 }
 0x2a3   : > { %3659 = vmatmul.msk.f32.gmra.mxu2 %vm566_vm2, %v1590_v17  ;;  %3641 = vmatmul.msk.f32.gmra.mxu1 %vm566_vm2, %v1442_v21  ;;  %v4842_v17 = vadd.f32 %v4591_v25, %v1735_v37 }
 0x2a4   : > { %v4836_v41 = vadd.f32 %v4608_v35, %v1736_v51 }
 0x2a5   : > { %2026 = vmax.xlane.f32.xlu1 %v4813_v32  ;;  %6912 = vst [vmem:[#allocation34_spill] sm:$0xff] %v4842_v17 }
 0x2a6   : > { %2024 = vmax.xlane.f32.xlu2 %v4820_v56  ;;  %2034 = vmax.xlane.f32.xlu0 %v4817_v43  ;;  %v4831_v8 = vpop.f32.mrf.mxu2  ;;  %6911 = vst [vmem:[#allocation33_spill] sm:$0xff] %v4836_v41  ;;  %v4851_v21 = vpop.f32.mrf.mxu1 }
 0x2a7   : > { %v815_v24 = vpop.f32.mrf.mxu0 }
 0x2a8   : > { %v1739_v32 = vmul.f32 0.5, %v815_v24 }
 0x2a9   : > { %v4829_v5 = vpop.xlane.xlu2 %1992  ;;  %v1591_v38 = vpop.trf.xlu1 }
 0x2aa   : > { %6910 = vst [vmem:[#allocation32_spill] sm:$0xff] %v4829_v5  ;;  %3627 = vmatmul.msk.f32.gmra.mxu0 %vm566_vm2, %v4654_v2  ;;  %v1738_v2 = vmul.f32 0.5, %v812_v6  ;;  %v1443_v5 = vpop.trf.xlu0  ;;  %v4859_v24 = vadd.f32 %v4660_v9, %v1739_v32 }
 0x2ab   : > { %3660 = vmatmul.msk.f32.gmra.mxu2 %vm566_vm2, %v1591_v38  ;;  %3642 = vmatmul.msk.f32.gmra.mxu1 %vm566_vm2, %v1443_v5  ;;  %v4867_v38 = vpop.f32.mrf.mxu3 }
 0x2ac   : > { %6915 = vst [vmem:[#allocation37_spill] sm:$0xff] %v4859_v24 }
 0x2ad   : > { %2032 = vmax.xlane.f32.xlu1 %v4836_v41 }
 0x2ae   : > { %2030 = vmax.xlane.f32.xlu2 %v4842_v17  ;;  %v4849_v3 = vpop.f32.mrf.mxu2  ;;  %v4881_v41 = vpop.f32.mrf.mxu1 }
 0x2af   : > { %v818_v15 = vpop.f32.mrf.mxu0 }
 0x2b0   : > { %v1740_v56 = vmul.f32 0.5, %v818_v15  ;;  %v4863_v15 = vadd.f32 %v4642_v59, %v1738_v2 }
 0x2b1   : > { %v4847_v51 = vpop.xlane.xlu2 %1994  ;;  %v1592_v6 = vpop.trf.xlu1 }
 0x2b2   : > { %6913 = vst [vmem:[#allocation35_spill] sm:$0xff] %v4847_v51  ;;  %v4854_v37 = vadd.f32 %v4679_v23, %v1740_v56  ;;  %3628 = vmatmul.msk.f32.gmra.mxu0 %vm566_vm2, %v4676_v22  ;;  %v1444_v2 = vpop.trf.xlu0 }
 0x2b3   : > { %6916 = vst [vmem:[#allocation38_spill] sm:$0xff] %v4863_v15  ;;  %3661 = vmatmul.msk.f32.gmra.mxu2 %vm566_vm2, %v1592_v6  ;;  %3643 = vmatmul.msk.f32.gmra.mxu1 %vm566_vm2, %v1444_v2 }
 0x2b4   : > { %6914 = vst [vmem:[#allocation36_spill] sm:$0xff] %v4854_v37  ;;  %2040 = vmax.xlane.f32.xlu0 %v4854_v37 }
 0x2b5   : > { %2038 = vmax.xlane.f32.xlu1 %v4859_v24 }
 0x2b6   : > { %2036 = vmax.xlane.f32.xlu2 %v4863_v15  ;;  %v4873_v51 = vpop.f32.mrf.mxu2 }
 0x2b7   : > { %v821_v56 = vpop.f32.mrf.mxu0 }
 0x2b8   : > { %v1741_v22 = vmul.f32 0.5, %v821_v56  ;;  %v1744_v56 = vmul.f32 0.5, %v4601_v31 }
 0x2b9   : > { %v4871_v32 = vpop.xlane.xlu2 %1996  ;;  %v1593_v17 = vpop.trf.xlu1 }
 0x2ba   : > { %6917 = vst [vmem:[#allocation39_spill] sm:$0xff] %v4871_v32  ;;  %v4876_v5 = vadd.f32 %v4696_v52, %v1741_v22  ;;  %3629 = vmatmul.msk.f32.gmra.mxu0 %vm566_vm2, %v4703_v57  ;;  %v4886_v32 = vpop.f32.mrf.mxu3  ;;  %v1445_v2 = vpop.trf.xlu0 }
 0x2bb   : > { %3662 = vmatmul.msk.f32.gmra.mxu2 %vm566_vm2, %v1593_v17  ;;  %3644 = vmatmul.msk.f32.gmra.mxu1 %vm566_vm2, %v1445_v2  ;;  %v4899_v17 = vadd.f32 %v4526_v55, %v1744_v56 }
 0x2bc   : > { %6918 = vst [vmem:[#allocation40_spill] sm:$0xff] %v4876_v5 }
 0x2bd   : > { %6921 = vst [vmem:[#allocation43_spill] sm:$0xff] %v4899_v17 }
 0x2be   : > { %2042 = vmax.xlane.f32.xlu2 %v4876_v5  ;;  %v4890_v29 = vpop.f32.mrf.mxu2 }
 0x2bf   : > { %v824_v6 = vpop.f32.mrf.mxu0 }
 0x2c0   : > { %v1742_v22 = vmul.f32 0.5, %v824_v6  ;;  %v1745_v6 = vmul.f32 0.5, %v4623_v46 }
 0x2c1   : > { %v4888_v43 = vpop.xlane.xlu2 %1998  ;;  %v1594_v31 = vpop.trf.xlu1 }
 0x2c2   : > { %6919 = vst [vmem:[#allocation41_spill] sm:$0xff] %v4888_v43  ;;  %v4893_v57 = vadd.f32 %v4713_v63, %v1742_v22  ;;  %3630 = vmatmul.msk.f32.gmra.mxu0 %vm566_vm2, %v4723_v47  ;;  %v965_v43 = vpop.f32.mrf.mxu1  ;;  %v1747_v22 = vmul.f32 0.5, %v4667_v12  ;;  %v4911_v56 = vadd.f32 %v4758_v19, %v1745_v6  ;;  %v4913_v15 = vpop.f32.mrf.mxu3  ;;  %v1748_v6 = vmul.f32 0.5, %v4689_v39 }
 0x2c3   : > { %3663 = vmatmul.msk.f32.gmra.mxu2 %vm566_vm2, %v1594_v31  ;;  %v1746_v31 = vmul.f32 0.5, %v4646_v40 }
 0x2c4   : > { %6920 = vst [vmem:[#allocation42_spill] sm:$0xff] %v4893_v57  ;;  %2044 = vmax.xlane.f32.xlu1 %v4893_v57  ;;  %v4922_v12 = vadd.f32 %v4537_v61, %v1747_v22  ;;  %v4941_v40 = vadd.f32 %v4550_v4, %v1748_v6  ;;  %v1753_v6 = vmul.f32 0.5, %v4826_v33  ;;  %v1752_v33 = vmul.f32 0.5, %v4799_v44 }
 0x2c5   : > { %6923 = vst [vmem:[#allocation45_spill] sm:$0xff] %v4911_v56 }
 0x2c6   : > { %2048 = vmax.xlane.f32.xlu2 %v4899_v17  ;;  %v4908_v2 = vpop.f32.mrf.mxu2  ;;  %v1446_v17 = vpop.trf.xlu0  ;;  %6924 = vst [vmem:[#allocation46_spill] sm:$0xff] %v4922_v12 }
 0x2c7   : > { %v827_v24 = vpop.f32.mrf.mxu0  ;;  %3645 = vmatmul.msk.f32.gmra.mxu1 %vm566_vm2, %v1446_v17  ;;  %6927 = vst [vmem:[#allocation49_spill] sm:$0xff] %v4941_v40 }
 0x2c8   : > { %v1743_v47 = vmul.f32 0.5, %v827_v24 }
 0x2c9   : > { %v4906_v50 = vpop.xlane.xlu2 %2000  ;;  %v1595_v24 = vpop.trf.xlu1 }
 0x2ca   : > { %6922 = vst [vmem:[#allocation44_spill] sm:$0xff] %v4906_v50  ;;  %v4916_v46 = vadd.f32 %v4734_v20, %v1743_v47  ;;  %3631 = vmatmul.msk.f32.gmra.mxu0 %vm566_vm2, %v4753_v13  ;;  %v1750_v13 = vmul.f32 0.5, %v4738_v27  ;;  %v968_v17 = vpop.f32.mrf.mxu1 }
 0x2cb   : > { %3664 = vmatmul.msk.f32.gmra.mxu2 %vm566_vm2, %v1595_v24  ;;  %v4947_v24 = vpop.f32.mrf.mxu3 }
 0x2cc   : > { %2046 = vmax.xlane.f32.xlu0 %v4916_v46  ;;  %2050 = vmax.xlane.f32.xlu1 %v4911_v56  ;;  %v4938_v56 = vadd.f32 %v4731_v36, %v1746_v31  ;;  %v1751_v31 = vmul.f32 0.5, %v4768_v45 }
 0x2ce   : > { %2054 = vmax.xlane.f32.xlu2 %v4922_v12  ;;  %v4935_v50 = vpop.f32.mrf.mxu2  ;;  %6926 = vst [vmem:[#allocation48_spill] sm:$0xff] %v4938_v56  ;;  %v1447_v39 = vpop.trf.xlu0  ;;  %v4945_v12 = vadd.f32 %v4576_v18, %v1750_v13 }
 0x2cf   : > { %v4929_v47 = vpop.f32.mrf.mxu0  ;;  %3646 = vmatmul.msk.f32.gmra.mxu1 %vm566_vm2, %v1447_v39 }
 0x2d0   : > { %6928 = vst [vmem:[#allocation50_spill] sm:$0xff] %v4945_v12 }
 0x2d1   : > { %v4933_v22 = vpop.xlane.xlu2 %2002  ;;  %v1596_v27 = vpop.trf.xlu1 }
 0x2d2   : > { %6925 = vst [vmem:[#allocation47_spill] sm:$0xff] %v4933_v22  ;;  %v1749_v22 = vmul.f32 0.5, %v4710_v16  ;;  %v971_v45 = vpop.f32.mrf.mxu1 }
 0x2d3   : > { %3665 = vmatmul.msk.f32.gmra.mxu2 %vm566_vm2, %v1596_v27  ;;  %v4970_v27 = vadd.f32 %v4626_v48, %v1753_v6  ;;  %v4984_v6 = vadd.f32 %v4608_v35, %v1752_v33  ;;  %v1757_v33 = vmul.f32 0.5, %v968_v17  ;;  %v1758_v17 = vmul.f32 0.5, %v971_v45 }
 0x2d4   : > { %2052 = vmax.xlane.f32.xlu0 %v4938_v56  ;;  %2056 = vmax.xlane.f32.xlu1 %v4941_v40  ;;  %v4963_v56 = vadd.f32 %v4563_v11, %v1749_v22  ;;  %v4966_v40 = vadd.f32 %v4591_v25, %v1751_v31  ;;  %v4976_v22 = vpop.f32.mrf.mxu3  ;;  %v1756_v31 = vmul.f32 0.5, %v965_v43  ;;  %v1763_v45 = vmul.f32 0.5, %v4698_v54 }
 0x2d5   : > { %6932 = vst [vmem:[#allocation54_spill] sm:$0xff] %v4970_v27 }
 0x2d6   : > { %2060 = vmax.xlane.f32.xlu2 %v4945_v12  ;;  %v4960_v14 = vpop.f32.mrf.mxu2  ;;  %6930 = vst [vmem:[#allocation52_spill] sm:$0xff] %v4963_v56  ;;  %v1448_v16 = vpop.trf.xlu0  ;;  %v1754_v12 = vmul.f32 0.5, %v4851_v21  ;;  %v4993_v44 = vadd.f32 %v4679_v23, %v1756_v31  ;;  %v1755_v21 = vmul.f32 0.5, %v4881_v41  ;;  %v5007_v31 = vadd.f32 %v4696_v52, %v1757_v33 }
 0x2d7   : > { %v4956_v39 = vpop.f32.mrf.mxu0  ;;  %6931 = vst [vmem:[#allocation53_spill] sm:$0xff] %v4966_v40  ;;  %3647 = vmatmul.msk.f32.gmra.mxu1 %vm566_vm2, %v1448_v16 }
 0x2d8   : > { %6935 = vst [vmem:[#allocation57_spill] sm:$0xff] %v4984_v6  ;;  %v4987_v16 = vadd.f32 %v4642_v59, %v1754_v12 }
 0x2d9   : > { %v4958_v13 = vpop.xlane.xlu2 %2004  ;;  %6937 = vst [vmem:[#allocation59_spill] sm:$0xff] %v4993_v44 }
 0x2da   : > { %6929 = vst [vmem:[#allocation51_spill] sm:$0xff] %v4958_v13  ;;  %v974_v43 = vpop.f32.mrf.mxu1 }
 0x2db   : > { %6936 = vst [vmem:[#allocation58_spill] sm:$0xff] %v4987_v16  ;;  %v1759_v12 = vmul.f32 0.5, %v974_v43  ;;  %v1760_v43 = vmul.f32 0.5, %v4644_v60 }
 0x2dc   : > { %2058 = vmax.xlane.f32.xlu0 %v4963_v56  ;;  %2062 = vmax.xlane.f32.xlu1 %v4966_v40  ;;  %6940 = vst [vmem:[#allocation62_spill] sm:$0xff] %v5007_v31 }
 0x2de   : > { %2066 = vmax.xlane.f32.xlu2 %v4970_v27  ;;  %v4981_v62 = vpop.f32.mrf.mxu2  ;;  %v1449_v56 = vpop.trf.xlu0 }
 0x2df   : > { %6934 = vst [vmem:[#allocation56_spill] sm:$0xff] %v4981_v62  ;;  %v4989_v40 = vpop.f32.mrf.mxu0  ;;  %3648 = vmatmul.msk.f32.gmra.mxu1 %vm566_vm2, %v1449_v56  ;;  %v4999_v27 = vpop.f32.mrf.mxu3  ;;  %v5004_v56 = vadd.f32 %v4660_v9, %v1755_v21  ;;  %v1762_v21 = vmul.f32 0.5, %v4681_v49  ;;  %v1761_v49 = vmul.f32 0.5, %v4662_v10 }
 0x2e1   : > { %v4979_v37 = vpop.xlane.xlu2 %2006  ;;  %6939 = vst [vmem:[#allocation61_spill] sm:$0xff] %v5004_v56  ;;  %v5036_v60 = vadd.f32 %v4731_v36, %v1762_v21  ;;  %v5051_v21 = vadd.f32 %v4758_v19, %v1761_v49  ;;  %v1768_v49 = vmul.f32 0.5, %v4808_v58 }
 0x2e2   : > { %6933 = vst [vmem:[#allocation55_spill] sm:$0xff] %v4979_v37  ;;  %v5021_v33 = vpop.f32.mrf.mxu1 }
 0x2e3   : > { %6946 = vst [vmem:[#allocation68_spill] sm:$0xff] %v5036_v60 }
 0x2e4   : > { %2064 = vmax.xlane.f32.xlu0 %v4984_v6  ;;  %2068 = vmax.xlane.f32.xlu1 %v4987_v16  ;;  %v5012_v16 = vadd.f32 %v4734_v20, %v1759_v12  ;;  %v5026_v12 = vadd.f32 %v4713_v63, %v1758_v17  ;;  %6947 = vst [vmem:[#allocation69_spill] sm:$0xff] %v5051_v21 }
 0x2e6   : > { %2072 = vmax.xlane.f32.xlu2 %v4993_v44  ;;  %v5009_v6 = vpop.f32.mrf.mxu2  ;;  %6943 = vst [vmem:[#allocation65_spill] sm:$0xff] %v5026_v12 }
 0x2e7   : > { %6941 = vst [vmem:[#allocation63_spill] sm:$0xff] %v5009_v6  ;;  %v5016_v41 = vpop.f32.mrf.mxu0  ;;  %v5031_v13 = vpop.f32.mrf.mxu3 }
 0x2e9   : > { %v5001_v37 = vpop.xlane.xlu2 %2008 }
 0x2ea   : > { %6938 = vst [vmem:[#allocation60_spill] sm:$0xff] %v5001_v37  ;;  %v5046_v37 = vpop.f32.mrf.mxu1 }
 0x2ec   : > { %2070 = vmax.xlane.f32.xlu0 %v5004_v56  ;;  %2074 = vmax.xlane.f32.xlu1 %v5007_v31  ;;  %v5029_v56 = vadd.f32 %v4526_v55, %v1760_v43  ;;  %v1765_v43 = vmul.f32 0.5, %v4736_v28  ;;  %v5054_v31 = vadd.f32 %v4537_v61, %v1763_v45  ;;  %v1764_v28 = vmul.f32 0.5, %v4715_v26 }
 0x2ed   : > { %v5084_v26 = vadd.f32 %v4608_v35, %v1768_v49 }
 0x2ee   : > { %2078 = vmax.xlane.f32.xlu2 %v5012_v16  ;;  %6944 = vst [vmem:[#allocation66_spill] sm:$0xff] %v5029_v56  ;;  %v5033_v30 = vpop.f32.mrf.mxu2  ;;  %v5061_v54 = vadd.f32 %v4563_v11, %v1765_v43 }
 0x2ef   : > { %6945 = vst [vmem:[#allocation67_spill] sm:$0xff] %v5033_v30  ;;  %v5043_v17 = vpop.f32.mrf.mxu0  ;;  %v5058_v10 = vpop.f32.mrf.mxu3 }
 0x2f0   : > { %6948 = vst [vmem:[#allocation70_spill] sm:$0xff] %v5054_v31 }
 0x2f1   : > { %v5023_v44 = vpop.xlane.xlu2 %2010  ;;  %6949 = vst [vmem:[#allocation71_spill] sm:$0xff] %v5061_v54 }
 0x2f2   : > { %6942 = vst [vmem:[#allocation64_spill] sm:$0xff] %v5023_v44  ;;  %v5071_v62 = vpop.f32.mrf.mxu1 }
 0x2f3   : > { %6953 = vst [vmem:[#allocation75_spill] sm:$0xff] %v5084_v26 }
 0x2f4   : > { %2076 = vmax.xlane.f32.xlu0 %v5026_v12  ;;  %2080 = vmax.xlane.f32.xlu1 %v5029_v56 }
 0x2f6   : > { %2084 = vmax.xlane.f32.xlu2 %v5036_v60  ;;  %v5056_v56 = vpop.f32.mrf.mxu2  ;;  %v1766_v60 = vmul.f32 0.5, %v4760_v7 }
 0x2f7   : > { %v5073_v12 = vpop.f32.mrf.mxu0  ;;  %v5090_v58 = vpop.f32.mrf.mxu3 }
 0x2f9   : > { %v5048_v5 = vpop.xlane.xlu2 %2012 }
 0x2fa   : > { %v5100_v6 = vpop.f32.mrf.mxu1 }
 0x2fc   : > { %2082 = vmax.xlane.f32.xlu0 %v5051_v21  ;;  %2086 = vmax.xlane.f32.xlu1 %v5054_v31  ;;  %v5078_v21 = vadd.f32 %v4550_v4, %v1764_v28  ;;  %v5081_v31 = vadd.f32 %v4576_v18, %v1766_v60  ;;  %v1771_v60 = vmul.f32 0.5, %v4873_v51  ;;  %v1772_v51 = vmul.f32 0.5, %v4890_v29 }
 0x2fe   : > { %2090 = vmax.xlane.f32.xlu2 %v5061_v54  ;;  %6951 = vst [vmem:[#allocation73_spill] sm:$0xff] %v5078_v21  ;;  %v5088_v7 = vpop.f32.mrf.mxu2  ;;  %v1769_v54 = vmul.f32 0.5, %v4831_v8  ;;  %v1770_v8 = vmul.f32 0.5, %v4849_v3 }
 0x2ff   : > { %6952 = vst [vmem:[#allocation74_spill] sm:$0xff] %v5081_v31  ;;  %v5108_v30 = vpop.f32.mrf.mxu0 }
 0x300   : > { %v5069_v45 = vpop.xlane.xlu1 %1988 }
 0x301   : > { %6950 = vst [vmem:[#allocation72_spill] sm:$0xff] %v5069_v45  ;;  %v5075_v43 = vpop.xlane.xlu2 %2014  ;;  %v1767_v45 = vmul.f32 0.5, %v4784_v42  ;;  %v5111_v42 = vadd.f32 %v4660_v9, %v1771_v60  ;;  %v5126_v60 = vadd.f32 %v4642_v59, %v1770_v8  ;;  %v1777_v8 = vmul.f32 0.5, %v4867_v38 }
 0x302   : > { %v5131_v3 = vpop.f32.mrf.mxu1 }
 0x303   : > { %6958 = vst [vmem:[#allocation80_spill] sm:$0xff] %v5111_v42 }
 0x304   : > { %2088 = vmax.xlane.f32.xlu0 %v5078_v21  ;;  %2092 = vmax.xlane.f32.xlu1 %v5081_v31  ;;  %v5103_v21 = vadd.f32 %v4591_v25, %v1767_v45  ;;  %v5106_v31 = vadd.f32 %v4626_v48, %v1769_v54  ;;  %v1774_v54 = vmul.f32 0.5, %v4935_v50  ;;  %6961 = vst [vmem:[#allocation83_spill] sm:$0xff] %v5126_v60 }
 0x306   : > { %2096 = vmax.xlane.f32.xlu2 %v5084_v26  ;;  %6956 = vst [vmem:[#allocation78_spill] sm:$0xff] %v5103_v21  ;;  %v5118_v45 = vpop.f32.mrf.mxu2  ;;  %v5134_v29 = vadd.f32 %v4713_v63, %v1774_v54 }
 0x307   : > { %6957 = vst [vmem:[#allocation79_spill] sm:$0xff] %v5106_v31  ;;  %v5138_v50 = vpop.f32.mrf.mxu0 }
 0x308   : > { %v5096_v28 = vpop.xlane.xlu1 %2018 }
 0x309   : > { %6954 = vst [vmem:[#allocation76_spill] sm:$0xff] %v5096_v28  ;;  %v5098_v49 = vpop.xlane.xlu2 %2016 }
 0x30a   : > { %6955 = vst [vmem:[#allocation77_spill] sm:$0xff] %v5098_v49  ;;  %v1253_v49 = vpop.f32.mrf.mxu3  ;;  %v5163_v38 = vpop.f32.mrf.mxu1 }
 0x30c   : > { %2094 = vmax.xlane.f32.xlu0 %v5103_v21  ;;  %2098 = vmax.xlane.f32.xlu1 %v5106_v31  ;;  %v5129_v21 = vadd.f32 %v4679_v23, %v1772_v51 }
 0x30e   : > { %2102 = vmax.xlane.f32.xlu2 %v5111_v42  ;;  %6962 = vst [vmem:[#allocation84_spill] sm:$0xff] %v5129_v21  ;;  %v5146_v31 = vpop.f32.mrf.mxu2 }
 0x310   : > { %v5121_v28 = vpop.xlane.xlu1 %2022 }
 0x311   : > { %6959 = vst [vmem:[#allocation81_spill] sm:$0xff] %v5121_v28  ;;  %v5123_v26 = vpop.xlane.xlu2 %2020  ;;  %v1773_v28 = vmul.f32 0.5, %v4908_v2 }
 0x312   : > { %6960 = vst [vmem:[#allocation82_spill] sm:$0xff] %v5123_v26  ;;  %v1775_v26 = vmul.f32 0.5, %v4960_v14  ;;  %v1256_v42 = vpop.f32.mrf.mxu3  ;;  %v5159_v14 = vadd.f32 %v4758_v19, %v1777_v8 }
 0x313   : > { %v5149_v54 = vadd.f32 %v4696_v52, %v1773_v28  ;;  %v1776_v28 = vmul.f32 0.5, %v4839_v1 }
 0x314   : > { %2100 = vmax.xlane.f32.xlu0 %v5126_v60  ;;  %2104 = vmax.xlane.f32.xlu1 %v5129_v21  ;;  %v5152_v60 = vadd.f32 %v4734_v20, %v1775_v26  ;;  %v5154_v21 = vpop.xlane.xlu0 %1986  ;;  %6966 = vst [vmem:[#allocation88_spill] sm:$0xff] %v5159_v14  ;;  %v5168_v26 = vpop.f32.mrf.mxu0 }
 0x315   : > { %6964 = vst [vmem:[#allocation86_spill] sm:$0xff] %v5154_v21  ;;  %v1780_v21 = vmul.f32 0.5, %v4947_v24  ;;  %v5174_v8 = vadd.f32 %v4526_v55, %v1776_v28  ;;  %v1779_v55 = vmul.f32 0.5, %v4913_v15  ;;  %v1781_v28 = vmul.f32 0.5, %v4976_v22 }
 0x316   : > { %2108 = vmax.xlane.f32.xlu2 %v5134_v29  ;;  %v5179_v0 = vpop.f32.mrf.mxu2 }
 0x317   : > { %6968 = vst [vmem:[#allocation90_spill] sm:$0xff] %v5174_v8  ;;  %v5182_v1 = vadd.f32 %v4550_v4, %v1780_v21  ;;  %v1783_v4 = vmul.f32 0.5, %v5031_v13  ;;  %v1782_v13 = vmul.f32 0.5, %v4999_v27 }
 0x318   : > { %v5156_v2 = vpop.xlane.xlu1 %2026 }
 0x319   : > { %v5144_v51 = vpop.xlane.xlu2 %2024  ;;  %6965 = vst [vmem:[#allocation87_spill] sm:$0xff] %v5156_v2  ;;  %v5207_v15 = vadd.f32 %v4591_v25, %v1783_v4 }
 0x31a   : > { %6963 = vst [vmem:[#allocation85_spill] sm:$0xff] %v5144_v51  ;;  %v1778_v51 = vmul.f32 0.5, %v4886_v32  ;;  %v1259_v24 = vpop.f32.mrf.mxu3 }
 0x31b   : > { %6970 = vst [vmem:[#allocation92_spill] sm:$0xff] %v5182_v1 }
 0x31c   : > { %2106 = vmax.xlane.f32.xlu0 %v5149_v54  ;;  %2110 = vmax.xlane.f32.xlu1 %v5152_v60  ;;  %v5177_v57 = vadd.f32 %v4731_v36, %v1778_v51  ;;  %v5184_v32 = vpop.xlane.xlu0 %2028  ;;  %v5193_v51 = vpop.f32.mrf.mxu1  ;;  %6976 = vst [vmem:[#allocation98_spill] sm:$0xff] %v5207_v15 }
 0x31d   : > { %6971 = vst [vmem:[#allocation93_spill] sm:$0xff] %v5184_v32  ;;  %v5196_v21 = vpop.f32.mrf.mxu0 }
 0x31e   : > { %2114 = vmax.xlane.f32.xlu2 %v5159_v14  ;;  %6969 = vst [vmem:[#allocation91_spill] sm:$0xff] %v5177_v57  ;;  %v5211_v22 = vpop.f32.mrf.mxu2 }
 0x320   : > { %v5188_v14 = vpop.xlane.xlu1 %2032 }
 0x321   : > { %v5171_v2 = vpop.xlane.xlu2 %2030  ;;  %6972 = vst [vmem:[#allocation94_spill] sm:$0xff] %v5188_v14 }
 0x322   : > { %6967 = vst [vmem:[#allocation89_spill] sm:$0xff] %v5171_v2 }
 0x324   : > { %2112 = vmax.xlane.f32.xlu0 %v5174_v8  ;;  %2116 = vmax.xlane.f32.xlu1 %v5177_v57  ;;  %v5201_v8 = vadd.f32 %v4537_v61, %v1779_v55  ;;  %v5204_v57 = vadd.f32 %v4563_v11, %v1781_v28  ;;  %v5215_v14 = vpop.xlane.xlu0 %2034  ;;  %v1262_v61 = vpop.f32.mrf.mxu3  ;;  %v1786_v55 = vmul.f32 0.5, %v1253_v49  ;;  %v1785_v49 = vmul.f32 0.5, %v5090_v58 }
 0x325   : > { %6977 = vst [vmem:[#allocation99_spill] sm:$0xff] %v5215_v14  ;;  %v5222_v4 = vpop.f32.mrf.mxu1  ;;  %v5230_v27 = vpop.f32.mrf.mxu0  ;;  %v1789_v14 = vmul.f32 0.5, %v1262_v61 }
 0x326   : > { %2120 = vmax.xlane.f32.xlu2 %v5182_v1  ;;  %6974 = vst [vmem:[#allocation96_spill] sm:$0xff] %v5201_v8  ;;  %v1784_v1 = vmul.f32 0.5, %v5058_v10  ;;  %v5233_v10 = vadd.f32 %v4642_v59, %v1786_v55  ;;  %v5248_v55 = vadd.f32 %v4626_v48, %v1785_v49 }
 0x327   : > { %6975 = vst [vmem:[#allocation97_spill] sm:$0xff] %v5204_v57 }
 0x328   : > { %v5218_v11 = vpop.xlane.xlu1 %2038  ;;  %6982 = vst [vmem:[#allocation104_spill] sm:$0xff] %v5233_v10 }
 0x329   : > { %v5198_v32 = vpop.xlane.xlu2 %2036  ;;  %6978 = vst [vmem:[#allocation100_spill] sm:$0xff] %v5218_v11 }
 0x32a   : > { %6973 = vst [vmem:[#allocation95_spill] sm:$0xff] %v5198_v32 }
 0x32b   : > { %6986 = vst [vmem:[#allocation108_spill] sm:$0xff] %v5248_v55 }
 0x32c   : > { %2118 = vmax.xlane.f32.xlu0 %v5201_v8  ;;  %2122 = vmax.xlane.f32.xlu1 %v5204_v57  ;;  %v5225_v8 = vadd.f32 %v4576_v18, %v1782_v13  ;;  %v5228_v57 = vadd.f32 %v4608_v35, %v1784_v1  ;;  %v5238_v2 = vpop.xlane.xlu0 %2040  ;;  %v5243_v1 = vpop.f32.mrf.mxu2 }
 0x32d   : > { %6983 = vst [vmem:[#allocation105_spill] sm:$0xff] %v5238_v2  ;;  %v1265_v11 = vpop.f32.mrf.mxu3  ;;  %v5253_v58 = vpop.f32.mrf.mxu1 }
 0x32e   : > { %2126 = vmax.xlane.f32.xlu2 %v5207_v15  ;;  %6980 = vst [vmem:[#allocation102_spill] sm:$0xff] %v5225_v8  ;;  %v1787_v15 = vmul.f32 0.5, %v1256_v42  ;;  %v5256_v42 = vadd.f32 %v4696_v52, %v1789_v14  ;;  %v5260_v61 = vpop.f32.mrf.mxu0 }
 0x32f   : > { %6981 = vst [vmem:[#allocation103_spill] sm:$0xff] %v5228_v57 }
 0x330   : > { %6988 = vst [vmem:[#allocation110_spill] sm:$0xff] %v5256_v42 }
 0x331   : > { %v5220_v28 = vpop.xlane.xlu2 %2042 }
 0x332   : > { %6979 = vst [vmem:[#allocation101_spill] sm:$0xff] %v5220_v28 }
 0x334   : > { %2124 = vmax.xlane.f32.xlu0 %v5225_v8  ;;  %2128 = vmax.xlane.f32.xlu1 %v5228_v57  ;;  %v5251_v8 = vadd.f32 %v4660_v9, %v1787_v15  ;;  %v1788_v57 = vmul.f32 0.5, %v1259_v24  ;;  %v1792_v15 = vmul.f32 0.5, %v4929_v47  ;;  %v5270_v14 = vpop.f32.mrf.mxu2 }
 0x335   : > { %v1268_v24 = vpop.f32.mrf.mxu3  ;;  %v5286_v47 = vpop.f32.mrf.mxu1 }
 0x336   : > { %2132 = vmax.xlane.f32.xlu2 %v5233_v10  ;;  %6987 = vst [vmem:[#allocation109_spill] sm:$0xff] %v5251_v8 }
 0x337   : > { %v5241_v13 = vpop.xlane.xlu1 %2044 }
 0x338   : > { %6984 = vst [vmem:[#allocation106_spill] sm:$0xff] %v5241_v13 }
 0x339   : > { %v5245_v32 = vpop.xlane.xlu2 %2048 }
 0x33a   : > { %6985 = vst [vmem:[#allocation107_spill] sm:$0xff] %v5245_v32  ;;  %v1790_v32 = vmul.f32 0.5, %v1265_v11  ;;  %v5279_v11 = vld [vmem:[%s4520_s17] sm:$0xff] }
 0x33b   : > { %v5282_v28 = vadd.f32 %v5279_v11, %v1792_v15 }
 0x33c   : > { %2130 = vmax.xlane.f32.xlu0 %v5248_v55  ;;  %2134 = vmax.xlane.f32.xlu1 %v5251_v8  ;;  %v5273_v55 = vadd.f32 %v4679_v23, %v1788_v57  ;;  %v5276_v8 = vadd.f32 %v4713_v63, %v1790_v32  ;;  %v1793_v57 = vmul.f32 0.5, %v4956_v39  ;;  %v1406_v32 = vpop.f32.mrf.mxu0  ;;  %v5306_v39 = vld [vmem:[%s4520_s17 + $0x18] sm:$0xff] }
 0x33d   : > { %6993 = vst [vmem:[#allocation115_spill] sm:$0xff] %v5282_v28 }
 0x33e   : > { %2138 = vmax.xlane.f32.xlu2 %v5256_v42  ;;  %6991 = vst [vmem:[#allocation113_spill] sm:$0xff] %v5273_v55  ;;  %v1795_v42 = vmul.f32 0.5, %v5016_v41  ;;  %v1794_v41 = vmul.f32 0.5, %v4989_v40  ;;  %v5329_v40 = vld [vmem:[%s4520_s17 + $0x20] sm:$0xff] }
 0x33f   : > { %v5263_v49 = vpop.xlane.xlu0 %2046  ;;  %v5266_v10 = vpop.xlane.xlu1 %2050  ;;  %6992 = vst [vmem:[#allocation114_spill] sm:$0xff] %v5276_v8 }
 0x340   : > { %6989 = vst [vmem:[#allocation111_spill] sm:$0xff] %v5266_v10  ;;  %v1791_v10 = vmul.f32 0.5, %v1268_v24  ;;  %v5303_v24 = vpop.f32.mrf.mxu2 }
 0x341   : > { %v5268_v2 = vpop.xlane.xlu2 %2054 }
 0x342   : > { %6990 = vst [vmem:[#allocation112_spill] sm:$0xff] %v5268_v2 }
 0x344   : > { %2136 = vmax.xlane.f32.xlu0 %v5273_v55  ;;  %2140 = vmax.xlane.f32.xlu1 %v5276_v8  ;;  %v5298_v55 = vadd.f32 %v4734_v20, %v1791_v10  ;;  %v5301_v8 = vadd.f32 %v4758_v19, %v1793_v57  ;;  %v1796_v10 = vmul.f32 0.5, %v5043_v17 }
 0x346   : > { %2144 = vmax.xlane.f32.xlu2 %v5282_v28  ;;  %6997 = vst [vmem:[#allocation119_spill] sm:$0xff] %v5301_v8  ;;  %v5309_v28 = vadd.f32 %v5306_v39, %v1795_v42  ;;  %v1409_v42 = vpop.f32.mrf.mxu0  ;;  %v5332_v17 = vadd.f32 %v5329_v40, %v1796_v10  ;;  %v1801_v10 = vmul.f32 0.5, %v5196_v21  ;;  %v1800_v21 = vmul.f32 0.5, %v5168_v26 }
 0x347   : > { %v5290_v2 = vpop.xlane.xlu0 %2052  ;;  %v5293_v13 = vpop.xlane.xlu1 %2056 }
 0x348   : > { %6994 = vst [vmem:[#allocation116_spill] sm:$0xff] %v5290_v2  ;;  %v5318_v2 = vpop.f32.mrf.mxu1 }
 0x349   : > { %6995 = vst [vmem:[#allocation117_spill] sm:$0xff] %v5293_v13  ;;  %v5295_v15 = vpop.xlane.xlu2 %2060  ;;  %v1798_v13 = vmul.f32 0.5, %v5108_v30  ;;  %v5339_v30 = vpop.f32.mrf.mxu2 }
 0x34a   : > { %6996 = vst [vmem:[#allocation118_spill] sm:$0xff] %v5295_v15 }
 0x34b   : > { %6998 = vst [vmem:[#allocation120_spill] sm:$0xff] %v5309_v28 }
 0x34c   : > { %2142 = vmax.xlane.f32.xlu0 %v5298_v55  ;;  %2146 = vmax.xlane.f32.xlu1 %v5301_v8  ;;  %v5326_v8 = vadd.f32 %v4731_v36, %v1794_v41  ;;  %7003 = vst [vmem:[#allocation125_spill] sm:$0xff] %v5332_v17 }
 0x34e   : > { %2150 = vmax.xlane.f32.xlu2 %v5309_v28  ;;  %7002 = vst [vmem:[#allocation124_spill] sm:$0xff] %v5326_v8  ;;  %v5335_v28 = vadd.f32 %v4576_v18, %v1798_v13 }
 0x34f   : > { %v5316_v57 = vpop.xlane.xlu0 %2058  ;;  %v5321_v15 = vpop.xlane.xlu1 %2062 }
 0x350   : > { %6999 = vst [vmem:[#allocation121_spill] sm:$0xff] %v5316_v57  ;;  %v1797_v57 = vmul.f32 0.5, %v5073_v12  ;;  %v5351_v13 = vpop.f32.mrf.mxu1 }
 0x351   : > { %7000 = vst [vmem:[#allocation122_spill] sm:$0xff] %v5321_v15  ;;  %v5323_v44 = vpop.xlane.xlu2 %2066  ;;  %v1799_v15 = vmul.f32 0.5, %v5138_v50  ;;  %v1412_v50 = vpop.f32.mrf.mxu0 }
 0x352   : > { %7001 = vst [vmem:[#allocation123_spill] sm:$0xff] %v5323_v44 }
 0x353   : > { %7004 = vst [vmem:[#allocation126_spill] sm:$0xff] %v5335_v28  ;;  %v5360_v12 = vadd.f32 %v4591_v25, %v1799_v15 }
 0x354   : > { %2148 = vmax.xlane.f32.xlu0 %v5326_v8  ;;  %2152 = vmax.xlane.f32.xlu1 %v5332_v17  ;;  %v5354_v8 = vld [vmem:[%s4520_s17 + $0x28] sm:$0xff] }
 0x355   : > { %v5357_v17 = vadd.f32 %v5354_v8, %v1797_v57  ;;  %7009 = vst [vmem:[#allocation131_spill] sm:$0xff] %v5360_v12  ;;  %v1703_v57 = vpop.f32.mrf.mxu2 }
 0x356   : > { %2156 = vmax.xlane.f32.xlu2 %v5335_v28  ;;  %v5363_v28 = vadd.f32 %v4626_v48, %v1801_v10  ;;  %v5377_v48 = vadd.f32 %v4608_v35, %v1800_v21 }
 0x357   : > { %v5344_v41 = vpop.xlane.xlu0 %2064  ;;  %v5347_v44 = vpop.xlane.xlu1 %2068  ;;  %7008 = vst [vmem:[#allocation130_spill] sm:$0xff] %v5357_v17 }
 0x358   : > { %7005 = vst [vmem:[#allocation127_spill] sm:$0xff] %v5344_v41  ;;  %v1802_v41 = vmul.f32 0.5, %v5230_v27 }
 0x359   : > { %7006 = vst [vmem:[#allocation128_spill] sm:$0xff] %v5347_v44  ;;  %v5349_v18 = vpop.xlane.xlu2 %2072  ;;  %v1415_v27 = vpop.f32.mrf.mxu0 }
 0x35a   : > { %7007 = vst [vmem:[#allocation129_spill] sm:$0xff] %v5349_v18  ;;  %v1804_v18 = vmul.f32 0.5, %v1406_v32  ;;  %v5380_v10 = vadd.f32 %v4642_v59, %v1802_v41  ;;  %v1803_v32 = vmul.f32 0.5, %v5260_v61  ;;  %v1807_v21 = vmul.f32 0.5, %v1415_v27 }
 0x35b   : > { %7010 = vst [vmem:[#allocation132_spill] sm:$0xff] %v5363_v28  ;;  %v1806_v27 = vmul.f32 0.5, %v1412_v50  ;;  %v1811_v50 = vmul.f32 0.5, %v5100_v6  ;;  %v1812_v6 = vmul.f32 0.5, %v5131_v3 }
 0x35c   : > { %2154 = vmax.xlane.f32.xlu0 %v5357_v17  ;;  %2158 = vmax.xlane.f32.xlu1 %v5360_v12  ;;  %7011 = vst [vmem:[#allocation133_spill] sm:$0xff] %v5377_v48  ;;  %v5382_v17 = vpop.f32.mrf.mxu1  ;;  %v5385_v26 = vadd.f32 %v4679_v23, %v1804_v18  ;;  %v1805_v12 = vmul.f32 0.5, %v1409_v42  ;;  %v5398_v23 = vadd.f32 %v4660_v9, %v1803_v32  ;;  %v1808_v42 = vmul.f32 0.5, %v5021_v33 }
 0x35d   : > { %7012 = vst [vmem:[#allocation134_spill] sm:$0xff] %v5380_v10  ;;  %v1810_v9 = vmul.f32 0.5, %v5071_v62  ;;  %v1809_v62 = vmul.f32 0.5, %v5046_v37 }
 0x35e   : > { %2162 = vmax.xlane.f32.xlu2 %v5363_v28  ;;  %7013 = vst [vmem:[#allocation135_spill] sm:$0xff] %v5385_v26  ;;  %v1706_v28 = vpop.f32.mrf.mxu2  ;;  %v5401_v18 = vadd.f32 %v4696_v52, %v1805_v12 }
 0x35f   : > { %v5370_v44 = vpop.xlane.xlu0 %2070  ;;  %v5372_v25 = vpop.xlane.xlu1 %2074  ;;  %7016 = vst [vmem:[#allocation138_spill] sm:$0xff] %v5398_v23  ;;  %v5424_v33 = vadd.f32 %v4731_v36, %v1810_v9  ;;  %v5438_v36 = vadd.f32 %v4758_v19, %v1809_v62  ;;  %v5441_v9 = vadd.f32 %v5306_v39, %v1811_v50 }
 0x361   : > { %v5374_v15 = vpop.xlane.xlu2 %2078  ;;  %7021 = vst [vmem:[#allocation143_spill] sm:$0xff] %v5424_v33 }
 0x362   : > { %7025 = vst [vmem:[#allocation147_spill] sm:$0xff] %v5438_v36 }
 0x363   : > { %7026 = vst [vmem:[#allocation148_spill] sm:$0xff] %v5441_v9 }
 0x364   : > { %2160 = vmax.xlane.f32.xlu0 %v5377_v48  ;;  %2164 = vmax.xlane.f32.xlu1 %v5380_v10  ;;  %v5404_v48 = vadd.f32 %v4734_v20, %v1807_v21  ;;  %v1556_v61 = vpop.f32.mrf.mxu1  ;;  %v5418_v21 = vadd.f32 %v5279_v11, %v1808_v42 }
 0x366   : > { %2168 = vmax.xlane.f32.xlu2 %v5385_v26  ;;  %7020 = vst [vmem:[#allocation142_spill] sm:$0xff] %v5418_v21 }
 0x367   : > { %v5391_v35 = vpop.xlane.xlu0 %2076  ;;  %v5393_v59 = vpop.xlane.xlu1 %2080 }
 0x368   : > { %7014 = vst [vmem:[#allocation136_spill] sm:$0xff] %v5393_v59 }
 0x369   : > { %v5395_v41 = vpop.xlane.xlu2 %2084 }
 0x36a   : > { %7015 = vst [vmem:[#allocation137_spill] sm:$0xff] %v5395_v41  ;;  %v5421_v41 = vadd.f32 %v4713_v63, %v1806_v27 }
 0x36c   : > { %2166 = vmax.xlane.f32.xlu0 %v5398_v23  ;;  %2170 = vmax.xlane.f32.xlu1 %v5401_v18  ;;  %v1709_v23 = vpop.f32.mrf.mxu2 }
 0x36e   : > { %2174 = vmax.xlane.f32.xlu2 %v5404_v48 }
 0x36f   : > { %v5410_v59 = vpop.xlane.xlu0 %2082  ;;  %v5413_v32 = vpop.xlane.xlu1 %2086 }
 0x370   : > { %7017 = vst [vmem:[#allocation139_spill] sm:$0xff] %v5410_v59  ;;  %v1839_v59 = vmul.f32 0.5, %v1709_v23  ;;  %v1838_v23 = vmul.f32 0.5, %v1706_v28 }
 0x371   : > { %7018 = vst [vmem:[#allocation140_spill] sm:$0xff] %v5413_v32  ;;  %v5415_v12 = vpop.xlane.xlu2 %2090  ;;  %v1559_v32 = vpop.f32.mrf.mxu1 }
 0x372   : > { %7019 = vst [vmem:[#allocation141_spill] sm:$0xff] %v5415_v12  ;;  %v5444_v37 = vadd.f32 %v4734_v20, %v1839_v59  ;;  %v5457_v59 = vadd.f32 %v5329_v40, %v1812_v6  ;;  %v1822_v28 = vmul.f32 0.5, %v1559_v32 }
 0x374   : > { %2172 = vmax.xlane.f32.xlu0 %v5421_v41  ;;  %2176 = vmax.xlane.f32.xlu1 %v5418_v21  ;;  %v1837_v21 = vmul.f32 0.5, %v1703_v57  ;;  %7027 = vst [vmem:[#allocation149_spill] sm:$0xff] %v5457_v59  ;;  %v5471_v6 = vadd.f32 %v4713_v63, %v1822_v28  ;;  %v1834_v28 = vmul.f32 0.5, %v5270_v14  ;;  %v1820_v14 = vmul.f32 0.5, %v5382_v17 }
 0x375   : > { %v1832_v17 = vmul.f32 0.5, %v5211_v22 }
 0x376   : > { %2180 = vmax.xlane.f32.xlu2 %v5424_v33  ;;  %v5463_v3 = vadd.f32 %v4696_v52, %v1837_v21  ;;  %v4217_v21 = vld [vmem:[%s4520_s17 + $0x68] sm:$0xff] }
 0x377   : > { %v5431_v42 = vpop.xlane.xlu0 %2088  ;;  %v5433_v27 = vpop.xlane.xlu1 %2092 }
 0x378   : > { %7022 = vst [vmem:[#allocation144_spill] sm:$0xff] %v5431_v42 }
 0x379   : > { %7023 = vst [vmem:[#allocation145_spill] sm:$0xff] %v5433_v27  ;;  %v5435_v12 = vpop.xlane.xlu2 %2096  ;;  %v1562_v50 = vpop.f32.mrf.mxu1  ;;  %v4218_v27 = vld [vmem:[%s4520_s17 + $0x58] sm:$0xff] }
 0x37a   : > { %7024 = vst [vmem:[#allocation146_spill] sm:$0xff] %v5435_v12  ;;  %v1823_v57 = vmul.f32 0.5, %v1562_v50  ;;  %v4220_v12 = vld [vmem:[%s4520_s17 + $0x50] sm:$0xff] }
 0x37b   : > { %v5500_v26 = vadd.f32 %v4220_v12, %v1834_v28 }
 0x37c   : > { %2178 = vmax.xlane.f32.xlu0 %v5438_v36  ;;  %2182 = vmax.xlane.f32.xlu1 %v5441_v9  ;;  %v5460_v36 = vadd.f32 %v4713_v63, %v1838_v23  ;;  %v1821_v9 = vmul.f32 0.5, %v1556_v61  ;;  %v5474_v23 = vadd.f32 %v4734_v20, %v1823_v57  ;;  %v1835_v61 = vmul.f32 0.5, %v5303_v24 }
 0x37d   : > { %v1836_v63 = vmul.f32 0.5, %v5339_v30  ;;  %v1819_v24 = vmul.f32 0.5, %v5351_v13 }
 0x37e   : > { %2238 = vmax.xlane.f32.xlu2 %v5444_v37  ;;  %v5481_v50 = vadd.f32 %v4217_v21, %v1821_v9  ;;  %v5494_v9 = vadd.f32 %v4218_v27, %v1835_v61  ;;  %v4219_v21 = vld [vmem:[%s4520_s17 + $0x60] sm:$0xff]  ;;  %v1818_v61 = vmul.f32 0.5, %v5318_v2  ;;  %v1833_v2 = vmul.f32 0.5, %v5243_v1 }
 0x37f   : > { %v5450_v33 = vpop.xlane.xlu0 %2094  ;;  %v5452_v19 = vpop.xlane.xlu1 %2098  ;;  %v5497_v10 = vadd.f32 %v4219_v21, %v1836_v63  ;;  %v1816_v1 = vmul.f32 0.5, %v5253_v58 }
 0x380   : > { %7029 = vst [vmem:[#allocation151_spill] sm:$0xff] %v5494_v9  ;;  %v5518_v13 = vadd.f32 %v4220_v12, %v1818_v61  ;;  %v4221_v12 = vld [vmem:[%s4520_s17 + $0x40] sm:$0xff]  ;;  %v4222_v61 = vld [vmem:[%s4520_s17 + $0x48] sm:$0xff] }
 0x381   : > { %v5454_v62 = vpop.xlane.xlu2 %2102 }
 0x384   : > { %2184 = vmax.xlane.f32.xlu0 %v5457_v59  ;;  %2236 = vmax.xlane.f32.xlu1 %v5460_v36 }
 0x386   : > { %2234 = vmax.xlane.f32.xlu2 %v5463_v3 }
 0x387   : > { %v5468_v42 = vpop.xlane.xlu0 %2100  ;;  %v5476_v52 = vpop.xlane.xlu1 %2104 }
 0x389   : > { %v5478_v32 = vpop.xlane.xlu2 %2108 }
 0x38c   : > { %2206 = vmax.xlane.f32.xlu0 %v5474_v23  ;;  %2204 = vmax.xlane.f32.xlu1 %v5471_v6 }
 0x38e   : > { %2202 = vmax.xlane.f32.xlu2 %v5481_v50 }
 0x38f   : > { %v5488_v20 = vpop.xlane.xlu0 %2106  ;;  %v2111_v57 = vpop.xlane.xlu1 %2110 }
 0x391   : > { %v5491_v59 = vpop.xlane.xlu2 %2114 }
 0x392   : > { %7028 = vst [vmem:[#allocation150_spill] sm:$0xff] %v5491_v59  ;;  %v5514_v59 = vadd.f32 %v4218_v27, %v1819_v24  ;;  %v1831_v27 = vmul.f32 0.5, %v5179_v0  ;;  %v1817_v0 = vmul.f32 0.5, %v5286_v47 }
 0x394   : > { %2232 = vmax.xlane.f32.xlu0 %v5497_v10  ;;  %2230 = vmax.xlane.f32.xlu1 %v5494_v9  ;;  %7033 = vst [vmem:[#allocation155_spill] sm:$0xff] %v5514_v59  ;;  %v5516_v9 = vadd.f32 %v4219_v21, %v1820_v14  ;;  %v5533_v14 = vadd.f32 %v4221_v12, %v1832_v17 }
 0x396   : > { %2228 = vmax.xlane.f32.xlu2 %v5500_v26  ;;  %7037 = vst [vmem:[#allocation159_spill] sm:$0xff] %v5533_v14 }
 0x397   : > { %v5507_v30 = vpop.xlane.xlu0 %2112  ;;  %v5510_v63 = vpop.xlane.xlu1 %2116 }
 0x398   : > { %7030 = vst [vmem:[#allocation152_spill] sm:$0xff] %v5507_v30  ;;  %v5536_v30 = vadd.f32 %v4222_v61, %v1833_v2  ;;  %v1815_v2 = vmul.f32 0.5, %v5222_v4  ;;  %v1830_v4 = vmul.f32 0.5, %v5146_v31 }
 0x399   : > { %7031 = vst [vmem:[#allocation153_spill] sm:$0xff] %v5510_v63  ;;  %v5512_v28 = vpop.xlane.xlu2 %2120 }
 0x39a   : > { %7032 = vst [vmem:[#allocation154_spill] sm:$0xff] %v5512_v28  ;;  %v4223_v28 = vld [vmem:[%s4520_s17 + $0x38] sm:$0xff] }
 0x39b   : > { %v5539_v22 = vadd.f32 %v4223_v28, %v1831_v27 }
 0x39c   : > { %2200 = vmax.xlane.f32.xlu0 %v5516_v9  ;;  %2198 = vmax.xlane.f32.xlu1 %v5514_v59  ;;  %v5558_v59 = vadd.f32 %v4223_v28, %v1815_v2  ;;  %v4224_v28 = vld [vmem:[%s4520_s17 + $0x30] sm:$0xff]  ;;  %v1814_v2 = vmul.f32 0.5, %v5193_v51 }
 0x39e   : > { %2196 = vmax.xlane.f32.xlu2 %v5518_v13 }
 0x39f   : > { %v5525_v63 = vpop.xlane.xlu0 %2118  ;;  %v5528_v24 = vpop.xlane.xlu1 %2122 }
 0x3a0   : > { %7034 = vst [vmem:[#allocation156_spill] sm:$0xff] %v5525_v63  ;;  %v2303_v63 = vsub.f32 %v5152_v60, %v2111_v57  ;;  %v1829_v60 = vmul.f32 0.5, %v5118_v45  ;;  %v2255_v45 = vsub.f32 %v4747_v53, %v5075_v43  ;;  %v1813_v43 = vmul.f32 0.5, %v5163_v38 }
 0x3a1   : > { %7035 = vst [vmem:[#allocation157_spill] sm:$0xff] %v5528_v24  ;;  %v5530_v21 = vpop.xlane.xlu2 %2126 }
 0x3a2   : > { %7036 = vst [vmem:[#allocation158_spill] sm:$0xff] %v5530_v21  ;;  %v5554_v21 = vadd.f32 %v4221_v12, %v1816_v1  ;;  %v2494_v58 = vmul.f32 1.442695, %v2303_v63  ;;  %v5572_v63 = vadd.f32 %v5354_v8, %v1829_v60  ;;  %v2302_v1 = vsub.f32 %v5134_v29, %v5478_v32 }
 0x3a3   : > { %v2398_v53 = vmul.f32 1.442695, %v2255_v45  ;;  %v5603_v32 = vadd.f32 %v5354_v8, %v1813_v43 }
 0x3a4   : > { %2226 = vmax.xlane.f32.xlu0 %v5536_v30  ;;  %2224 = vmax.xlane.f32.xlu1 %v5533_v14  ;;  %7039 = vst [vmem:[#allocation161_spill] sm:$0xff] %v5554_v21  ;;  %v5556_v14 = vadd.f32 %v4222_v61, %v1817_v0  ;;  %3701 = vpow2.f32 %v2494_v58  ;;  %v5575_v61 = vadd.f32 %v4224_v28, %v1830_v4  ;;  %v1828_v0 = vmul.f32 0.5, %v5088_v7 }
 0x3a5   : > { %7040 = vst [vmem:[#allocation162_spill] sm:$0xff] %v5572_v63  ;;  %v2254_v58 = vsub.f32 %v4721_v34, %v5048_v5  ;;  %v5600_v7 = vadd.f32 %v4224_v28, %v1814_v2  ;;  %3703 = vpow2.f32 %v2398_v53  ;;  %v2287_v34 = vsub.f32 %v5012_v16, %v5374_v15 }
 0x3a6   : > { %2222 = vmax.xlane.f32.xlu2 %v5539_v22  ;;  %7041 = vst [vmem:[#allocation163_spill] sm:$0xff] %v5575_v61  ;;  %v5598_v29 = vadd.f32 %v5329_v40, %v1828_v0  ;;  %v2301_v5 = vsub.f32 %v5149_v54, %v5488_v20  ;;  %v2271_v54 = vsub.f32 %v4916_v46, %v5263_v49  ;;  %v1827_v15 = vmul.f32 0.5, %v5056_v56  ;;  %v7048_v20 = vld [vmem:[#allocation64_spill] sm:$0xff] }
 0x3a7   : > { %v5547_v17 = vpop.xlane.xlu0 %2124  ;;  %v5550_v24 = vpop.xlane.xlu1 %2128  ;;  %7044 = vst [vmem:[#allocation166_spill] sm:$0xff] %v5600_v7  ;;  %v2396_v51 = vmul.f32 1.442695, %v2254_v58  ;;  %v2462_v28 = vmul.f32 1.442695, %v2287_v34 }
 0x3a8   : > { %7038 = vst [vmem:[#allocation160_spill] sm:$0xff] %v5547_v17  ;;  %v2490_v0 = vmul.f32 1.442695, %v2301_v5  ;;  %v2430_v43 = vmul.f32 1.442695, %v2271_v54  ;;  %v5637_v34 = vadd.f32 %v5306_v39, %v1827_v15  ;;  %v7054_v5 = vld [vmem:[#allocation106_spill] sm:$0xff] }
 0x3a9   : > { %v5552_v27 = vpop.xlane.xlu2 %2132  ;;  %7043 = vst [vmem:[#allocation165_spill] sm:$0xff] %v5598_v29 }
 0x3aa   : > { %v5581_v31 = vpop.eup %3701  ;;  %7045 = vst [vmem:[#allocation167_spill] sm:$0xff] %v5603_v32 }
 0x3ab   : > { %v5616_v45 = vpop.eup %3703  ;;  %7053 = vst [vmem:[#allocation171_spill] sm:$0xff] %v5637_v34 }
 0x3ac   : > { %2194 = vmax.xlane.f32.xlu0 %v5556_v14  ;;  %2192 = vmax.xlane.f32.xlu1 %v5554_v21 }
 0x3ae   : > { %2190 = vmax.xlane.f32.xlu2 %v5558_v59 }
 0x3af   : > { %v5565_v47 = vpop.xlane.xlu0 %2130  ;;  %v5567_v57 = vpop.xlane.xlu1 %2134 }
 0x3b1   : > { %v5569_v12 = vpop.xlane.xlu2 %2138 }
 0x3b4   : > { %2220 = vmax.xlane.f32.xlu0 %v5575_v61  ;;  %2218 = vmax.xlane.f32.xlu1 %v5572_v63  ;;  %v2492_v63 = vmul.f32 1.442695, %v2302_v1 }
 0x3b6   : > { %2750 = vadd.xlane.f32.xlu2 %v5581_v31  ;;  %3705 = vpow2.f32 %v2492_v63  ;;  %v7049_v63 = vld [vmem:[#allocation19_spill] sm:$0xff] }
 0x3b7   : > { %v5590_v60 = vpop.xlane.xlu0 %2136  ;;  %v5593_v4 = vpop.xlane.xlu1 %2140  ;;  %3707 = vpow2.f32 %v2396_v51  ;;  %v2253_v2 = vsub.f32 %v7049_v63, %v7048_v20 }
 0x3b8   : > { %3709 = vpow2.f32 %v2462_v28  ;;  %v7055_v28 = vld [vmem:[#allocation42_spill] sm:$0xff] }
 0x3b9   : > { %v5595_v17 = vpop.xlane.xlu2 %2144  ;;  %3711 = vpow2.f32 %v2490_v0  ;;  %v2394_v49 = vmul.f32 1.442695, %v2253_v2  ;;  %v2270_v0 = vsub.f32 %v7055_v28, %v7054_v5 }
 0x3ba   : > { %7042 = vst [vmem:[#allocation164_spill] sm:$0xff] %v5595_v17  ;;  %3713 = vpow2.f32 %v2430_v43 }
 0x3bb   : > { %3715 = vpow2.f32 %v2394_v49  ;;  %v2428_v63 = vmul.f32 1.442695, %v2270_v0  ;;  %v7058_v49 = vld [vmem:[#allocation67_spill] sm:$0xff]  ;;  %v4225_v0 = vld [vmem:[%s4520_s17 + $0x10] sm:$0xff] }
 0x3bc   : > { %2188 = vmax.xlane.f32.xlu0 %v5600_v7  ;;  %2216 = vmax.xlane.f32.xlu1 %v5598_v29  ;;  %v5618_v1 = vpop.eup %3705  ;;  %v1826_v17 = vmul.f32 0.5, %v7058_v49  ;;  %v7062_v49 = vld [vmem:[#allocation63_spill] sm:$0xff] }
 0x3bd   : > { %v5622_v16 = vpop.eup %3707  ;;  %3717 = vpow2.f32 %v2428_v63 }
 0x3be   : > { %2186 = vmax.xlane.f32.xlu2 %v5603_v32  ;;  %v5639_v46 = vpop.eup %3709  ;;  %v1825_v32 = vmul.f32 0.5, %v7062_v49 }
 0x3bf   : > { %v2143_v38 = vpop.xlane.xlu0 %2142  ;;  %v5612_v40 = vpop.xlane.xlu1 %2146 }
 0x3c0   : > { %7046 = vst [vmem:[#allocation168_spill] sm:$0xff] %v5612_v40  ;;  %v5643_v56 = vpop.eup %3711  ;;  %v2319_v43 = vsub.f32 %v5298_v55, %v2143_v38  ;;  %v7061_v55 = vld [vmem:[#allocation114_spill] sm:$0xff] }
 0x3c1   : > { %v5614_v8 = vpop.xlane.xlu2 %2150  ;;  %v5654_v20 = vpop.eup %3713  ;;  %v2318_v38 = vsub.f32 %v7061_v55, %v5593_v4  ;;  %v7065_v4 = vld [vmem:[#allocation80_spill] sm:$0xff] }
 0x3c2   : > { %7047 = vst [vmem:[#allocation169_spill] sm:$0xff] %v5614_v8  ;;  %v5657_v2 = vpop.eup %3715  ;;  %v5669_v8 = vadd.f32 %v4225_v0, %v1826_v17 }
 0x3c3   : > { %v2524_v0 = vmul.f32 1.442695, %v2318_v38 }
 0x3c4   : > { %2654 = vadd.xlane.f32.xlu0 %v5616_v45  ;;  %2748 = vadd.xlane.f32.xlu1 %v5618_v1  ;;  %7060 = vst [vmem:[#allocation172_spill] sm:$0xff] %v5669_v8 }
 0x3c6   : > { %2652 = vadd.xlane.f32.xlu2 %v5622_v16 }
 0x3c7   : > { %v5630_v58 = vpop.xlane.xlu0 %2148  ;;  %v5632_v53 = vpop.xlane.xlu1 %2152 }
 0x3c8   : > { %7050 = vst [vmem:[#allocation64_spill] sm:$0xff] %v5630_v58  ;;  %v2526_v58 = vmul.f32 1.442695, %v2319_v43 }
 0x3c9   : > { %7051 = vst [vmem:[#allocation19_spill] sm:$0xff] %v5632_v53  ;;  %v5634_v51 = vpop.xlane.xlu2 %2156 }
 0x3ca   : > { %7052 = vst [vmem:[#allocation170_spill] sm:$0xff] %v5634_v51  ;;  %3719 = vpow2.f32 %v2526_v58  ;;  %v2299_v58 = vsub.f32 %v7065_v4, %v5454_v62 }
 0x3cb   : > { %3721 = vpow2.f32 %v2524_v0 }
 0x3cc   : > { %2214 = vmax.xlane.f32.xlu0 %v5637_v34  ;;  %2718 = vadd.xlane.f32.xlu1 %v5639_v46  ;;  %v2486_v7 = vmul.f32 1.442695, %v2299_v58  ;;  %v7072_v58 = vld [vmem:[#allocation110_spill] sm:$0xff] }
 0x3ce   : > { %2746 = vadd.xlane.f32.xlu2 %v5643_v56  ;;  %3723 = vpow2.f32 %v2486_v7 }
 0x3cf   : > { %v5648_v54 = vpop.xlane.xlu0 %2154  ;;  %v5650_v39 = vpop.xlane.xlu1 %2158 }
 0x3d0   : > { %7056 = vst [vmem:[#allocation106_spill] sm:$0xff] %v5648_v54  ;;  %v5672_v54 = vpop.eup %3717 }
 0x3d1   : > { %7057 = vst [vmem:[#allocation42_spill] sm:$0xff] %v5650_v39  ;;  %v5652_v15 = vpop.xlane.xlu2 %2162  ;;  %v5684_v17 = vpop.eup %3719 }
 0x3d2   : > { %7063 = vst [vmem:[#allocation114_spill] sm:$0xff] %v5684_v17  ;;  %v5699_v29 = vpop.eup %3721 }
 0x3d3   : > { %7068 = vst [vmem:[#allocation174_spill] sm:$0xff] %v5699_v29 }
 0x3d4   : > { %2686 = vadd.xlane.f32.xlu0 %v5654_v20  ;;  %v5707_v4 = vpop.eup %3723 }
 0x3d6   : > { %2650 = vadd.xlane.f32.xlu2 %v5657_v2 }
 0x3d7   : > { %v5662_v5 = vpop.xlane.xlu0 %2160  ;;  %v5664_v28 = vpop.xlane.xlu1 %2164 }
 0x3d8   : > { %7059 = vst [vmem:[#allocation67_spill] sm:$0xff] %v5662_v5 }
 0x3d9   : > { %v5666_v40 = vpop.xlane.xlu2 %2168 }
 0x3dc   : > { %2212 = vmax.xlane.f32.xlu0 %v5669_v8  ;;  %v4226_v8 = vld [vmem:[%s4520_s17 + $0x8] sm:$0xff] }
 0x3dd   : > { %v5687_v53 = vadd.f32 %v4226_v8, %v1825_v32 }
 0x3de   : > { %2684 = vadd.xlane.f32.xlu2 %v5672_v54 }
 0x3df   : > { %v5677_v63 = vpop.xlane.xlu0 %2166  ;;  %v5680_v43 = vpop.xlane.xlu1 %2170  ;;  %7064 = vst [vmem:[#allocation63_spill] sm:$0xff] %v5687_v53 }
 0x3e1   : > { %v5682_v34 = vpop.xlane.xlu2 %2174 }
 0x3e4   : > { %2782 = vadd.xlane.f32.xlu0 %v5684_v17  ;;  %v7071_v17 = vld [vmem:[#allocation65_spill] sm:$0xff] }
 0x3e6   : > { %2210 = vmax.xlane.f32.xlu2 %v5687_v53  ;;  %v2286_v53 = vsub.f32 %v7071_v17, %v5391_v35  ;;  %v7077_v17 = vld [vmem:[#allocation62_spill] sm:$0xff] }
 0x3e7   : > { %v5693_v55 = vpop.xlane.xlu0 %2172  ;;  %v5695_v49 = vpop.xlane.xlu1 %2176 }
 0x3e8   : > { %7066 = vst [vmem:[#allocation80_spill] sm:$0xff] %v5695_v49 }
 0x3e9   : > { %v5697_v51 = vpop.xlane.xlu2 %2180 }
 0x3ea   : > { %7067 = vst [vmem:[#allocation173_spill] sm:$0xff] %v5697_v51 }
 0x3ee   : > { %2780 = vadd.xlane.f32.xlu2 %v5699_v29  ;;  %v2317_v29 = vsub.f32 %v7072_v58, %v5569_v12  ;;  %v7078_v12 = vld [vmem:[#allocation84_spill] sm:$0xff] }
 0x3ef   : > { %v5702_v32 = vpop.xlane.xlu0 %2178  ;;  %v5704_v8 = vpop.xlane.xlu1 %2182 }
 0x3f0   : > { %7069 = vst [vmem:[#allocation175_spill] sm:$0xff] %v5702_v32  ;;  %v7074_v32 = vld [vmem:[#allocation56_spill] sm:$0xff] }
 0x3f1   : > { %7070 = vst [vmem:[#allocation176_spill] sm:$0xff] %v5704_v8  ;;  %v2239_v38 = vpop.xlane.xlu2 %2238  ;;  %v1824_v51 = vmul.f32 0.5, %v7074_v32  ;;  %v2300_v32 = vsub.f32 %v7078_v12, %v5476_v52 }
 0x3f2   : > { %v2367_v62 = vsub.f32 %v5444_v37, %v2239_v38  ;;  %v2460_v38 = vmul.f32 1.442695, %v2286_v53 }
 0x3f3   : > { %v5721_v35 = vadd.f32 %v5279_v11, %v1824_v51 }
 0x3f4   : > { %v2622_v0 = vmul.f32 1.442695, %v2367_v62  ;;  %v2522_v62 = vmul.f32 1.442695, %v2317_v29 }
 0x3f5   : > { %7076 = vst [vmem:[#allocation56_spill] sm:$0xff] %v5721_v35 }
 0x3f6   : > { %3725 = vpow2.f32 %v2622_v0  ;;  %2742 = vadd.xlane.f32.xlu2 %v5707_v4  ;;  %v2285_v0 = vsub.f32 %v7077_v17, %v5372_v25  ;;  %v7083_v17 = vld [vmem:[#allocation40_spill] sm:$0xff] }
 0x3f7   : > { %v5714_v7 = vpop.xlane.xlu0 %2184  ;;  %v2237_v49 = vpop.xlane.xlu1 %2236 }
 0x3f8   : > { %7073 = vst [vmem:[#allocation65_spill] sm:$0xff] %v5714_v7  ;;  %v2366_v8 = vsub.f32 %v5460_v36, %v2237_v49  ;;  %v7079_v36 = vld [vmem:[#allocation83_spill] sm:$0xff]  ;;  %v2458_v11 = vmul.f32 1.442695, %v2285_v0 }
 0x3f9   : > { %v2235_v37 = vpop.xlane.xlu2 %2234  ;;  %v2298_v29 = vsub.f32 %v7079_v36, %v5468_v42  ;;  %v7084_v42 = vld [vmem:[#allocation60_spill] sm:$0xff] }
 0x3fa   : > { %v2620_v5 = vmul.f32 1.442695, %v2366_v8  ;;  %v2488_v8 = vmul.f32 1.442695, %v2300_v32  ;;  %v7086_v32 = vld [vmem:[#allocation51_spill] sm:$0xff]  ;;  %v7087_v36 = vld [vmem:[#allocation16_spill] sm:$0xff] }
 0x3fc   : > { %v5718_v21 = vpop.eup %3725  ;;  %3727 = vpow2.f32 %v2620_v5  ;;  %v2484_v5 = vmul.f32 1.442695, %v2298_v29  ;;  %v2250_v29 = vsub.f32 %v7087_v36, %v7086_v32 }
 0x3fd   : > { %7075 = vst [vmem:[#allocation110_spill] sm:$0xff] %v5718_v21  ;;  %2878 = vadd.xlane.f32.xlu1 %v5718_v21  ;;  %3729 = vpow2.f32 %v2460_v38  ;;  %v7082_v38 = vld [vmem:[#allocation101_spill] sm:$0xff] }
 0x3fe   : > { %2208 = vmax.xlane.f32.xlu2 %v5721_v35  ;;  %3731 = vpow2.f32 %v2522_v62  ;;  %v2269_v12 = vsub.f32 %v7083_v17, %v7082_v38  ;;  %v7085_v62 = vld [vmem:[#allocation18_spill] sm:$0xff]  ;;  %v2388_v17 = vmul.f32 1.442695, %v2250_v29 }
 0x3ff   : > { %v2207_v53 = vpop.xlane.xlu0 %2206  ;;  %v5731_v49 = vpop.xlane.xlu1 %2204  ;;  %3733 = vpow2.f32 %v2458_v11  ;;  %v2252_v0 = vsub.f32 %v7085_v62, %v7084_v42 }
 0x400   : > { %3735 = vpow2.f32 %v2488_v8  ;;  %v2426_v35 = vmul.f32 1.442695, %v2269_v12  ;;  %v2351_v12 = vsub.f32 %v5474_v23, %v2207_v53  ;;  %v7092_v53 = vld [vmem:[#allocation129_spill] sm:$0xff] }
 0x401   : > { %v2203_v51 = vpop.xlane.xlu2 %2202  ;;  %3737 = vpow2.f32 %v2484_v5  ;;  %v2392_v11 = vmul.f32 1.442695, %v2252_v0  ;;  %v2365_v5 = vsub.f32 %v5463_v3, %v2235_v37 }
 0x402   : > { %v5733_v25 = vpop.eup %3727  ;;  %3739 = vpow2.f32 %v2426_v35  ;;  %v2349_v42 = vsub.f32 %v5481_v50, %v2203_v51  ;;  %v2590_v35 = vmul.f32 1.442695, %v2351_v12  ;;  %v2335_v51 = vsub.f32 %v5404_v48, %v5682_v34  ;;  %v7097_v34 = vld [vmem:[#allocation105_spill] sm:$0xff] }
 0x403   : > { %7080 = vst [vmem:[#allocation62_spill] sm:$0xff] %v5733_v25  ;;  %v5735_v58 = vpop.eup %3729  ;;  %2876 = vadd.xlane.f32.xlu0 %v5733_v25  ;;  %3741 = vpow2.f32 %v2392_v11  ;;  %v2618_v32 = vmul.f32 1.442695, %v2365_v5  ;;  %v7093_v11 = vld [vmem:[#allocation59_spill] sm:$0xff] }
 0x404   : > { %v5738_v52 = vpop.eup %3731  ;;  %3743 = vpow2.f32 %v2388_v17  ;;  %v2586_v3 = vmul.f32 1.442695, %v2349_v42  ;;  %v2284_v50 = vsub.f32 %v7093_v11, %v7092_v53  ;;  %v2333_v17 = vsub.f32 %v5401_v18, %v5680_v43  ;;  %v7098_v18 = vld [vmem:[#allocation36_spill] sm:$0xff] }
 0x405   : > { %7081 = vst [vmem:[#allocation84_spill] sm:$0xff] %v5738_v52  ;;  %2716 = vadd.xlane.f32.xlu1 %v5735_v58  ;;  %v5754_v38 = vpop.eup %3733  ;;  %3745 = vpow2.f32 %v2618_v32  ;;  %v2558_v32 = vmul.f32 1.442695, %v2335_v51  ;;  %v2268_v43 = vsub.f32 %v7098_v18, %v7097_v34  ;;  %v7101_v51 = vld [vmem:[#allocation128_spill] sm:$0xff] }
 0x406   : > { %2778 = vadd.xlane.f32.xlu2 %v5738_v52  ;;  %v5756_v61 = vpop.eup %3735  ;;  %3747 = vpow2.f32 %v2590_v35  ;;  %v2456_v42 = vmul.f32 1.442695, %v2284_v50  ;;  %v2554_v11 = vmul.f32 1.442695, %v2333_v17  ;;  %v7099_v35 = vld [vmem:[#allocation55_spill] sm:$0xff]  ;;  %v7102_v17 = vld [vmem:[#allocation58_spill] sm:$0xff] }
 0x407   : > { %v5748_v21 = vpop.xlane.xlu0 %2232  ;;  %v5750_v25 = vpop.xlane.xlu1 %2230  ;;  %3749 = vpow2.f32 %v2586_v3  ;;  %v7100_v3 = vld [vmem:[#allocation17_spill] sm:$0xff] }
 0x408   : > { %v5759_v8 = vpop.eup %3737  ;;  %3751 = vpow2.f32 %v2456_v42  ;;  %v2251_v50 = vsub.f32 %v7100_v3, %v7099_v35  ;;  %v7105_v35 = vld [vmem:[#allocation95_spill] sm:$0xff] }
 0x409   : > { %v5752_v7 = vpop.xlane.xlu2 %2228  ;;  %7088 = vst [vmem:[#allocation83_spill] sm:$0xff] %v5759_v8  ;;  %v5772_v29 = vpop.eup %3739  ;;  %3753 = vpow2.f32 %v2558_v32 }
 0x40a   : > { %7089 = vst [vmem:[#allocation101_spill] sm:$0xff] %v5772_v29  ;;  %v5774_v37 = vpop.eup %3741  ;;  %3755 = vpow2.f32 %v2554_v11  ;;  %v2390_v42 = vmul.f32 1.442695, %v2251_v50  ;;  %v2364_v11 = vsub.f32 %v5497_v10, %v5748_v21 }
 0x40b   : > { %2714 = vadd.xlane.f32.xlu0 %v5754_v38  ;;  %7090 = vst [vmem:[#allocation40_spill] sm:$0xff] %v5774_v37  ;;  %v5777_v23 = vpop.eup %3743 }
 0x40c   : > { %7091 = vst [vmem:[#allocation60_spill] sm:$0xff] %v5777_v23  ;;  %v5793_v53 = vpop.eup %3745 }
 0x40d   : > { %2744 = vadd.xlane.f32.xlu1 %v5756_v61  ;;  %7094 = vst [vmem:[#allocation18_spill] sm:$0xff] %v5793_v53  ;;  %v5795_v39 = vpop.eup %3747 }
 0x40e   : > { %2740 = vadd.xlane.f32.xlu2 %v5759_v8  ;;  %7095 = vst [vmem:[#allocation51_spill] sm:$0xff] %v5795_v39  ;;  %v5798_v48 = vpop.eup %3749 }
 0x40f   : > { %v5766_v62 = vpop.xlane.xlu0 %2200  ;;  %v5768_v0 = vpop.xlane.xlu1 %2198  ;;  %7096 = vst [vmem:[#allocation16_spill] sm:$0xff] %v5798_v48 }
 0x410   : > { %v5814_v34 = vpop.eup %3751 }
 0x411   : > { %v5770_v36 = vpop.xlane.xlu2 %2196 }
 0x413   : > { %2682 = vadd.xlane.f32.xlu0 %v5772_v29 }
 0x415   : > { %2648 = vadd.xlane.f32.xlu1 %v5774_v37  ;;  %v2424_v37 = vmul.f32 1.442695, %v2268_v43  ;;  %v2350_v43 = vsub.f32 %v5471_v6, %v5731_v49  ;;  %v7107_v49 = vld [vmem:[#allocation113_spill] sm:$0xff] }
 0x416   : > { %2644 = vadd.xlane.f32.xlu2 %v5777_v23  ;;  %v2282_v23 = vsub.f32 %v7102_v17, %v7101_v51 }
 0x417   : > { %v5787_v5 = vpop.xlane.xlu0 %2226  ;;  %v5789_v12 = vpop.xlane.xlu1 %2224  ;;  %3757 = vpow2.f32 %v2424_v37  ;;  %v2616_v37 = vmul.f32 1.442695, %v2364_v11  ;;  %v2334_v11 = vsub.f32 %v5421_v41, %v5693_v55 }
 0x418   : > { %v2452_v18 = vmul.f32 1.442695, %v2282_v23  ;;  %3759 = vpow2.f32 %v2390_v42  ;;  %v7106_v23 = vld [vmem:[#allocation38_spill] sm:$0xff] }
 0x419   : > { %v5791_v52 = vpop.xlane.xlu2 %2222  ;;  %v2266_v3 = vsub.f32 %v7106_v23, %v7105_v35 }
 0x41a   : > { %3761 = vpow2.f32 %v2452_v18  ;;  %v2316_v18 = vsub.f32 %v7107_v49, %v5590_v60  ;;  %v2556_v49 = vmul.f32 1.442695, %v2334_v11 }
 0x41b   : > { %2874 = vadd.xlane.f32.xlu0 %v5793_v53  ;;  %v2420_v21 = vmul.f32 1.442695, %v2266_v3 }
 0x41d   : > { %2846 = vadd.xlane.f32.xlu1 %v5795_v39  ;;  %v5816_v39 = vpop.eup %3753 }
 0x41e   : > { %2842 = vadd.xlane.f32.xlu2 %v5798_v48  ;;  %7103 = vst [vmem:[#allocation129_spill] sm:$0xff] %v5816_v39  ;;  %v5819_v32 = vpop.eup %3755  ;;  %v2588_v48 = vmul.f32 1.442695, %v2350_v43  ;;  %v2362_v43 = vsub.f32 %v5500_v26, %v5752_v7  ;;  %v7110_v7 = vld [vmem:[#allocation79_spill] sm:$0xff] }
 0x41f   : > { %v5808_v8 = vpop.xlane.xlu0 %2194  ;;  %v5810_v53 = vpop.xlane.xlu1 %2192  ;;  %7104 = vst [vmem:[#allocation59_spill] sm:$0xff] %v5819_v32 }
 0x420   : > { %v5833_v10 = vpop.eup %3757  ;;  %v2612_v41 = vmul.f32 1.442695, %v2362_v43 }
 0x421   : > { %v5812_v29 = vpop.xlane.xlu2 %2190  ;;  %v5835_v42 = vpop.eup %3759 }
 0x422   : > { %v5838_v6 = vpop.eup %3761 }
 0x423   : > { %2712 = vadd.xlane.f32.xlu0 %v5814_v34 }
 0x425   : > { %2814 = vadd.xlane.f32.xlu1 %v5816_v39 }
 0x426   : > { %2810 = vadd.xlane.f32.xlu2 %v5819_v32 }
 0x427   : > { %v5829_v50 = vpop.xlane.xlu0 %2220  ;;  %v5831_v51 = vpop.xlane.xlu1 %2218 }
 0x429   : > { %v2751_v17 = vpop.xlane.xlu2 %2750 }
 0x42a   : > { %3763 = vrcp.f32 %v2751_v17  ;;  %v2520_v17 = vmul.f32 1.442695, %v2316_v18  ;;  %v7112_v18 = vld [vmem:[#allocation104_spill] sm:$0xff] }
 0x42b   : > { %2680 = vadd.xlane.f32.xlu0 %v5833_v10  ;;  %3765 = vpow2.f32 %v2616_v37  ;;  %v2314_v11 = vsub.f32 %v7112_v18, %v5552_v27  ;;  %v7117_v27 = vld [vmem:[#allocation15_spill] sm:$0xff]  ;;  %v7119_v18 = vld [vmem:[#allocation37_spill] sm:$0xff] }
 0x42c   : > { %3767 = vpow2.f32 %v2588_v48  ;;  %v2297_v48 = vsub.f32 %v7110_v7, %v5452_v19 }
 0x42d   : > { %2646 = vadd.xlane.f32.xlu1 %v5835_v42  ;;  %3769 = vpow2.f32 %v2420_v21  ;;  %v7111_v21 = vld [vmem:[#allocation61_spill] sm:$0xff]  ;;  %v2516_v7 = vmul.f32 1.442695, %v2314_v11  ;;  %v7120_v11 = vld [vmem:[#allocation78_spill] sm:$0xff] }
 0x42e   : > { %2708 = vadd.xlane.f32.xlu2 %v5838_v6  ;;  %3771 = vpow2.f32 %v2520_v17 }
 0x42f   : > { %v5848_v35 = vpop.xlane.xlu0 %2188  ;;  %v5850_v3 = vpop.xlane.xlu1 %2216  ;;  %3773 = vpow2.f32 %v2556_v49  ;;  %v7116_v49 = vld [vmem:[#allocation47_spill] sm:$0xff] }
 0x430   : > { %v3764_v23 = vpop.eup %3763  ;;  %3775 = vpow2.f32 %v2612_v41  ;;  %v2249_v41 = vsub.f32 %v7117_v27, %v7116_v49 }
 0x431   : > { %v5852_v60 = vpop.xlane.xlu2 %2186  ;;  %v3071_v37 = vmul.f32 %v3764_v23, %v5581_v31  ;;  %v5855_v32 = vpop.eup %3765  ;;  %v2283_v31 = vsub.f32 %v7111_v21, %v5370_v44  ;;  %v7118_v21 = vld [vmem:[#allocation100_spill] sm:$0xff] }
 0x432   : > { %7108 = vst [vmem:[#allocation105_spill] sm:$0xff] %v5855_v32  ;;  %v5857_v55 = vpop.eup %3767 }
 0x433   : > { %3196 = vmatpush.xpose.msrb.mxu2 %v3071_v37  ;;  %7109 = vst [vmem:[#allocation36_spill] sm:$0xff] %v5857_v55  ;;  %2872 = vadd.xlane.f32.xlu0 %v5855_v32  ;;  %v5860_v26 = vpop.eup %3769  ;;  %v2482_v37 = vmul.f32 1.442695, %v2297_v48  ;;  %v2454_v19 = vmul.f32 1.442695, %v2283_v31  ;;  %v2267_v31 = vsub.f32 %v7119_v18, %v7118_v21 }
 0x434   : > { %v5870_v17 = vpop.eup %3771 }
 0x435   : > { %2844 = vadd.xlane.f32.xlu1 %v5857_v55  ;;  %7113 = vst [vmem:[#allocation55_spill] sm:$0xff] %v5870_v17  ;;  %v5872_v55 = vpop.eup %3773 }
 0x436   : > { %2676 = vadd.xlane.f32.xlu2 %v5860_v26  ;;  %7114 = vst [vmem:[#allocation17_spill] sm:$0xff] %v5872_v55  ;;  %v5875_v44 = vpop.eup %3775 }
 0x437   : > { %v2655_v43 = vpop.xlane.xlu0 %2654  ;;  %v2749_v23 = vpop.xlane.xlu1 %2748  ;;  %7115 = vst [vmem:[#allocation128_spill] sm:$0xff] %v5875_v44 }
 0x438   : > { %3777 = vrcp.f32 %v2655_v43  ;;  %v2295_v43 = vsub.f32 %v7120_v11, %v5450_v33 }
 0x439   : > { %3779 = vrcp.f32 %v2749_v23  ;;  %v2653_v39 = vpop.xlane.xlu2 %2652 }
 0x43a   : > { %3781 = vrcp.f32 %v2653_v39 }
 0x43b   : > { %2776 = vadd.xlane.f32.xlu0 %v5870_v17  ;;  %3783 = vpow2.f32 %v2482_v37 }
 0x43c   : > { %3785 = vpow2.f32 %v2454_v19  ;;  %v2422_v19 = vmul.f32 1.442695, %v2267_v31  ;;  %v7124_v31 = vld [vmem:[#allocation11_spill] sm:$0xff] }
 0x43d   : > { %2812 = vadd.xlane.f32.xlu1 %v5872_v55  ;;  %3787 = vpow2.f32 %v2516_v7  ;;  %v2386_v55 = vmul.f32 1.442695, %v2249_v41 }
 0x43e   : > { %v3778_v48 = vpop.eup %3777  ;;  %2868 = vadd.xlane.f32.xlu2 %v5875_v44  ;;  %v2478_v44 = vmul.f32 1.442695, %v2295_v43 }
 0x43f   : > { %v3780_v39 = vpop.eup %3779  ;;  %v5885_v23 = vpop.xlane.xlu0 %2214  ;;  %v3023_v17 = vmul.f32 %v3778_v48, %v5616_v45  ;;  %v7123_v48 = vld [vmem:[#allocation41_spill] sm:$0xff] }
 0x440   : > { %v3782_v49 = vpop.eup %3781  ;;  %v2719_v37 = vpop.xlane.xlu1 %2718  ;;  %v3070_v27 = vmul.f32 %v3780_v39, %v5618_v1  ;;  %v2348_v1 = vsub.f32 %v5516_v9, %v5766_v62  ;;  %v2247_v39 = vsub.f32 %v7124_v31, %v7123_v48 }
 0x441   : > { %3789 = vrcp.f32 %v2719_v37  ;;  %3136 = vmatpush.xpose.msra.mxu3 %v3023_v17  ;;  %v2747_v21 = vpop.xlane.xlu2 %2746  ;;  %v5889_v18 = vpop.eup %3783  ;;  %v3022_v33 = vmul.f32 %v3782_v49, %v5622_v16  ;;  %v7122_v17 = vld [vmem:[#allocation151_spill] sm:$0xff] }
 0x442   : > { %3791 = vrcp.f32 %v2747_v21  ;;  %3197 = vmatpush.xpose.msrb.mxu2 %v3070_v27  ;;  %v5892_v7 = vpop.eup %3785  ;;  %v2363_v41 = vsub.f32 %v7122_v17, %v5750_v25  ;;  %v2584_v9 = vmul.f32 1.442695, %v2348_v1  ;;  %v2382_v27 = vmul.f32 1.442695, %v2247_v39 }
 0x443   : > { %2738 = vadd.xlane.f32.xlu0 %v5889_v18  ;;  %v5895_v45 = vpop.eup %3787  ;;  %3793 = vpow2.f32 %v2386_v55  ;;  %v2346_v17 = vsub.f32 %v5518_v13, %v5770_v36  ;;  %v7129_v13 = vld [vmem:[#allocation123_spill] sm:$0xff] }
 0x444   : > { %7121 = vst [vmem:[#allocation58_spill] sm:$0xff] %v5895_v45  ;;  %3795 = vpow2.f32 %v2422_v19  ;;  %v2614_v37 = vmul.f32 1.442695, %v2363_v41  ;;  %v7125_v19 = vld [vmem:[#allocation135_spill] sm:$0xff] }
 0x445   : > { %3137 = vmatpush.xpose.msra.mxu3 %v3022_v33  ;;  %2710 = vadd.xlane.f32.xlu1 %v5892_v7  ;;  %3797 = vpow2.f32 %v2478_v44  ;;  %v7126_v33 = vld [vmem:[#allocation109_spill] sm:$0xff] }
 0x446   : > { %2772 = vadd.xlane.f32.xlu2 %v5895_v45  ;;  %v2315_v1 = vsub.f32 %v7126_v33, %v5567_v57  ;;  %v2580_v57 = vmul.f32 1.442695, %v2346_v17 }
 0x447   : > { %v3790_v16 = vpop.eup %3789  ;;  %v2687_v11 = vpop.xlane.xlu0 %2686 }
 0x448   : > { %v3792_v43 = vpop.eup %3791  ;;  %3799 = vrcp.f32 %v2687_v11  ;;  %v3055_v55 = vmul.f32 %v3790_v16, %v5639_v46  ;;  %v2332_v46 = vsub.f32 %v7125_v19, %v5666_v40  ;;  %v2518_v39 = vmul.f32 1.442695, %v2315_v1 }
 0x449   : > { %v2651_v62 = vpop.xlane.xlu2 %2650  ;;  %v3069_v49 = vmul.f32 %v3792_v43, %v5643_v56  ;;  %v5907_v25 = vpop.eup %3793 }
 0x44a   : > { %3801 = vrcp.f32 %v2651_v62  ;;  %3176 = vmatpush.xpose.msrb.mxu1 %v3055_v55  ;;  %v5909_v21 = vpop.eup %3795  ;;  %v2552_v48 = vmul.f32 1.442695, %v2332_v46 }
 0x44b   : > { %3198 = vmatpush.xpose.msrb.mxu2 %v3069_v49  ;;  %2642 = vadd.xlane.f32.xlu0 %v5907_v25  ;;  %v5912_v44 = vpop.eup %3797  ;;  %3803 = vpow2.f32 %v2584_v9  ;;  %v7131_v9 = vld [vmem:[#allocation146_spill] sm:$0xff] }
 0x44c   : > { %3805 = vpow2.f32 %v2614_v37  ;;  %v7133_v49 = vld [vmem:[#allocation134_spill] sm:$0xff] }
 0x44d   : > { %2678 = vadd.xlane.f32.xlu1 %v5909_v21  ;;  %3807 = vpow2.f32 %v2382_v27  ;;  %v2330_v37 = vsub.f32 %v7133_v49, %v5664_v28  ;;  %v7138_v28 = vld [vmem:[#allocation30_spill] sm:$0xff] }
 0x44e   : > { %v3800_v56 = vpop.eup %3799  ;;  %2734 = vadd.xlane.f32.xlu2 %v5912_v44 }
 0x44f   : > { %v3039_v41 = vmul.f32 %v3800_v56, %v5654_v20  ;;  %v7130_v20 = vld [vmem:[#allocation54_spill] sm:$0xff]  ;;  %v2548_v17 = vmul.f32 1.442695, %v2330_v37 }
 0x450   : > { %v3802_v16 = vpop.eup %3801  ;;  %v2281_v36 = vsub.f32 %v7130_v20, %v7129_v13  ;;  %v7142_v13 = vld [vmem:[#allocation53_spill] sm:$0xff] }
 0x451   : > { %3156 = vmatpush.xpose.msrb.mxu0 %v3039_v41  ;;  %v2685_v40 = vpop.xlane.xlu2 %2684  ;;  %v3021_v31 = vmul.f32 %v3802_v16, %v5657_v2  ;;  %v5924_v11 = vpop.eup %3803  ;;  %v7132_v2 = vld [vmem:[#allocation75_spill] sm:$0xff] }
 0x452   : > { %3809 = vrcp.f32 %v2685_v40  ;;  %7127 = vst [vmem:[#allocation95_spill] sm:$0xff] %v5924_v11  ;;  %v5926_v43 = vpop.eup %3805  ;;  %v2296_v62 = vsub.f32 %v7132_v2, %v7131_v9  ;;  %v2450_v19 = vmul.f32 1.442695, %v2281_v36 }
 0x453   : > { %3138 = vmatpush.xpose.msra.mxu3 %v3021_v31  ;;  %7128 = vst [vmem:[#allocation38_spill] sm:$0xff] %v5926_v43  ;;  %2840 = vadd.xlane.f32.xlu0 %v5924_v11  ;;  %v5929_v55 = vpop.eup %3807  ;;  %3811 = vpow2.f32 %v2552_v48  ;;  %v7137_v48 = vld [vmem:[#allocation99_spill] sm:$0xff]  ;;  %v7139_v31 = vld [vmem:[#allocation44_spill] sm:$0xff] }
 0x454   : > { %3813 = vpow2.f32 %v2518_v39  ;;  %v2480_v33 = vmul.f32 1.442695, %v2296_v62  ;;  %v2265_v40 = vsub.f32 %v7138_v28, %v7137_v48  ;;  %v7140_v39 = vld [vmem:[#allocation13_spill] sm:$0xff]  ;;  %v7146_v28 = vld [vmem:[#allocation34_spill] sm:$0xff] }
 0x455   : > { %2870 = vadd.xlane.f32.xlu1 %v5926_v43  ;;  %3815 = vpow2.f32 %v2580_v57  ;;  %v7141_v57 = vld [vmem:[#allocation122_spill] sm:$0xff]  ;;  %v7145_v48 = vld [vmem:[#allocation89_spill] sm:$0xff] }
 0x456   : > { %2638 = vadd.xlane.f32.xlu2 %v5929_v55  ;;  %3817 = vpow2.f32 %v2450_v19  ;;  %v2279_v20 = vsub.f32 %v7142_v13, %v7141_v57  ;;  %v2418_v36 = vmul.f32 1.442695, %v2265_v40  ;;  %v2361_v19 = vsub.f32 %v5536_v30, %v5787_v5 }
 0x457   : > { %3819 = vpow2.f32 %v2480_v33  ;;  %v7144_v33 = vld [vmem:[#allocation155_spill] sm:$0xff]  ;;  %v2263_v40 = vsub.f32 %v7146_v28, %v7145_v48 }
 0x458   : > { %v3810_v27 = vpop.eup %3809  ;;  %3821 = vpow2.f32 %v2548_v17  ;;  %v2446_v49 = vmul.f32 1.442695, %v2279_v20  ;;  %v2347_v17 = vsub.f32 %v7144_v33, %v5768_v0  ;;  %v7147_v0 = vld [vmem:[#allocation108_spill] sm:$0xff] }
 0x459   : > { %v5939_v46 = vpop.xlane.xlu2 %2210  ;;  %v3038_v56 = vmul.f32 %v3810_v27, %v5672_v54  ;;  %v5942_v1 = vpop.eup %3811  ;;  %v2248_v54 = vsub.f32 %v7140_v39, %v7139_v31  ;;  %3823 = vpow2.f32 %v2418_v36  ;;  %v2610_v31 = vmul.f32 1.442695, %v2361_v19  ;;  %v7148_v36 = vld [vmem:[#allocation138_spill] sm:$0xff] }
 0x45a   : > { %7134 = vst [vmem:[#allocation113_spill] sm:$0xff] %v5942_v1  ;;  %v5944_v41 = vpop.eup %3813  ;;  %v2414_v30 = vmul.f32 1.442695, %v2263_v40  ;;  %v2313_v20 = vsub.f32 %v7147_v0, %v5565_v47  ;;  %v7154_v0 = vld [vmem:[#allocation57_spill] sm:$0xff] }
 0x45b   : > { %3157 = vmatpush.xpose.msrb.mxu0 %v3038_v56  ;;  %7135 = vst [vmem:[#allocation79_spill] sm:$0xff] %v5944_v41  ;;  %2808 = vadd.xlane.f32.xlu0 %v5942_v1  ;;  %v5947_v16 = vpop.eup %3815  ;;  %v2384_v2 = vmul.f32 1.442695, %v2248_v54  ;;  %v5968_v56 = vpop.xlane.xlu0 %2212  ;;  %v2582_v54 = vmul.f32 1.442695, %v2347_v17 }
 0x45c   : > { %7136 = vst [vmem:[#allocation61_spill] sm:$0xff] %v5947_v16  ;;  %v5959_v62 = vpop.eup %3817  ;;  %v2514_v17 = vmul.f32 1.442695, %v2313_v20 }
 0x45d   : > { %2774 = vadd.xlane.f32.xlu1 %v5944_v41  ;;  %v5961_v37 = vpop.eup %3819  ;;  %3825 = vpow2.f32 %v2384_v2  ;;  %v2331_v2 = vsub.f32 %v7148_v36, %v5677_v63  ;;  %v7155_v36 = vld [vmem:[#allocation158_spill] sm:$0xff] }
 0x45e   : > { %2836 = vadd.xlane.f32.xlu2 %v5947_v16  ;;  %v5964_v27 = vpop.eup %3821  ;;  %3827 = vpow2.f32 %v2446_v49  ;;  %v2359_v49 = vsub.f32 %v5539_v22, %v5791_v52  ;;  %v7153_v52 = vld [vmem:[#allocation127_spill] sm:$0xff] }
 0x45f   : > { %7143 = vst [vmem:[#allocation104_spill] sm:$0xff] %v5964_v27  ;;  %v5978_v57 = vpop.eup %3823  ;;  %3829 = vpow2.f32 %v2610_v31  ;;  %v2550_v47 = vmul.f32 1.442695, %v2331_v2  ;;  %v2280_v20 = vsub.f32 %v7154_v0, %v7153_v52  ;;  %v7156_v2 = vld [vmem:[#allocation98_spill] sm:$0xff]  ;;  %v7160_v52 = vld [vmem:[#allocation9_spill] sm:$0xff] }
 0x460   : > { %3831 = vpow2.f32 %v2582_v54  ;;  %v2606_v40 = vmul.f32 1.442695, %v2359_v49  ;;  %v7151_v54 = vld [vmem:[#allocation145_spill] sm:$0xff]  ;;  %v2311_v49 = vsub.f32 %v7156_v2, %v7155_v36 }
 0x461   : > { %v5957_v9 = vpop.xlane.xlu2 %2780  ;;  %3833 = vpow2.f32 %v2414_v30  ;;  %v7152_v30 = vld [vmem:[#allocation74_spill] sm:$0xff]  ;;  %v7163_v2 = vld [vmem:[#allocation33_spill] sm:$0xff] }
 0x462   : > { %v2294_v22 = vsub.f32 %v7152_v30, %v7151_v54  ;;  %3835 = vpow2.f32 %v2514_v17  ;;  %v2448_v17 = vmul.f32 1.442695, %v2280_v20  ;;  %v2510_v30 = vmul.f32 1.442695, %v2311_v49 }
 0x463   : > { %2706 = vadd.xlane.f32.xlu0 %v5959_v62  ;;  %v5980_v5 = vpop.eup %3825  ;;  %v5993_v19 = vpop.xlane.xlu0 %2782  ;;  %3837 = vpow2.f32 %v2550_v47  ;;  %v7159_v47 = vld [vmem:[#allocation39_spill] sm:$0xff] }
 0x464   : > { %v5983_v13 = vpop.eup %3827  ;;  %3839 = vpow2.f32 %v2606_v40  ;;  %v2476_v1 = vmul.f32 1.442695, %v2294_v22  ;;  %v2246_v0 = vsub.f32 %v7160_v52, %v7159_v47  ;;  %v7162_v40 = vld [vmem:[#allocation94_spill] sm:$0xff]  ;;  %v7165_v22 = vld [vmem:[#allocation73_spill] sm:$0xff] }
 0x465   : > { %2736 = vadd.xlane.f32.xlu1 %v5961_v37  ;;  %v5999_v28 = vpop.eup %3829 }
 0x466   : > { %2804 = vadd.xlane.f32.xlu2 %v5964_v27  ;;  %7149 = vst [vmem:[#allocation47_spill] sm:$0xff] %v5999_v28  ;;  %v6001_v31 = vpop.eup %3831  ;;  %v2380_v47 = vmul.f32 1.442695, %v2246_v0  ;;  %v7168_v0 = vld [vmem:[#allocation32_spill] sm:$0xff] }
 0x467   : > { %7150 = vst [vmem:[#allocation15_spill] sm:$0xff] %v6001_v31  ;;  %v6004_v63 = vpop.eup %3833 }
 0x468   : > { %v6018_v54 = vpop.eup %3835 }
 0x469   : > { %v5976_v39 = vpop.xlane.xlu2 %2742  ;;  %7157 = vst [vmem:[#allocation100_spill] sm:$0xff] %v6018_v54 }
 0x46b   : > { %2674 = vadd.xlane.f32.xlu0 %v5978_v57 }
 0x46d   : > { %2640 = vadd.xlane.f32.xlu1 %v5980_v5 }
 0x46e   : > { %2702 = vadd.xlane.f32.xlu2 %v5983_v13 }
 0x470   : > { %v5995_v33 = vpop.xlane.xlu1 %2878 }
 0x471   : > { %v5997_v48 = vpop.xlane.xlu2 %2208 }
 0x473   : > { %2866 = vadd.xlane.f32.xlu0 %v5999_v28  ;;  %v2264_v28 = vsub.f32 %v7163_v2, %v7162_v40 }
 0x475   : > { %2838 = vadd.xlane.f32.xlu1 %v6001_v31  ;;  %v6020_v31 = vpop.eup %3837  ;;  %v2416_v11 = vmul.f32 1.442695, %v2264_v28  ;;  %v7167_v28 = vld [vmem:[#allocation159_spill] sm:$0xff] }
 0x476   : > { %2670 = vadd.xlane.f32.xlu2 %v6004_v63  ;;  %v6014_v27 = vpop.xlane.xlu0 %2876  ;;  %7158 = vst [vmem:[#allocation37_spill] sm:$0xff] %v6020_v31  ;;  %v6025_v36 = vpop.eup %3839 }
 0x477   : > { %7161 = vst [vmem:[#allocation78_spill] sm:$0xff] %v6025_v36 }
 0x478   : > { %v2717_v16 = vpop.xlane.xlu1 %2716 }
 0x479   : > { %3841 = vrcp.f32 %v2717_v16  ;;  %v6016_v45 = vpop.xlane.xlu2 %2778  ;;  %v7164_v16 = vld [vmem:[#allocation144_spill] sm:$0xff] }
 0x47a   : > { %3843 = vpow2.f32 %v2476_v1  ;;  %v2292_v20 = vsub.f32 %v7165_v22, %v7164_v16  ;;  %v7169_v16 = vld [vmem:[#allocation6_spill] sm:$0xff] }
 0x47b   : > { %2770 = vadd.xlane.f32.xlu0 %v6018_v54  ;;  %3845 = vpow2.f32 %v2448_v17  ;;  %v2244_v22 = vsub.f32 %v7169_v16, %v7168_v0 }
 0x47c   : > { %3847 = vpow2.f32 %v2510_v30  ;;  %v2472_v1 = vmul.f32 1.442695, %v2292_v20 }
 0x47d   : > { %2806 = vadd.xlane.f32.xlu1 %v6020_v31 }
 0x47e   : > { %2862 = vadd.xlane.f32.xlu2 %v6025_v36  ;;  %v2715_v41 = vpop.xlane.xlu0 %2714 }
 0x47f   : > { %v3842_v49 = vpop.eup %3841  ;;  %3849 = vrcp.f32 %v2715_v41 }
 0x480   : > { %v2745_v52 = vpop.xlane.xlu1 %2744  ;;  %v3054_v54 = vmul.f32 %v3842_v49, %v5735_v58  ;;  %v6034_v2 = vpop.eup %3843  ;;  %v2345_v58 = vsub.f32 %v5556_v14, %v5808_v8 }
 0x481   : > { %3851 = vrcp.f32 %v2745_v52  ;;  %v2741_v40 = vpop.xlane.xlu2 %2740  ;;  %v6037_v17 = vpop.eup %3845 }
 0x482   : > { %3177 = vmatpush.xpose.msrb.mxu1 %v3054_v54  ;;  %3853 = vrcp.f32 %v5976_v39  ;;  %v6040_v30 = vpop.eup %3847  ;;  %v2360_v54 = vsub.f32 %v7167_v28, %v5789_v12 }
 0x483   : > { %3855 = vpow2.f32 %v2380_v47  ;;  %2732 = vadd.xlane.f32.xlu0 %v6034_v2  ;;  %7166 = vst [vmem:[#allocation151_spill] sm:$0xff] %v6040_v30  ;;  %v2578_v47 = vmul.f32 1.442695, %v2345_v58  ;;  %v7170_v58 = vld [vmem:[#allocation132_spill] sm:$0xff] }
 0x484   : > { %3857 = vpow2.f32 %v2416_v11 }
 0x485   : > { %2704 = vadd.xlane.f32.xlu1 %v6037_v17  ;;  %v3850_v41 = vpop.eup %3849  ;;  %3859 = vpow2.f32 %v2472_v1  ;;  %v2608_v1 = vmul.f32 1.442695, %v2360_v54  ;;  %v7171_v54 = vld [vmem:[#allocation103_spill] sm:$0xff] }
 0x486   : > { %2766 = vadd.xlane.f32.xlu2 %v6040_v30  ;;  %3861 = vrcp.f32 %v2741_v40  ;;  %v2683_v20 = vpop.xlane.xlu0 %2682  ;;  %v3053_v11 = vmul.f32 %v3850_v41, %v5754_v38  ;;  %v2376_v40 = vmul.f32 1.442695, %v2244_v22  ;;  %v2329_v41 = vsub.f32 %v7170_v58, %v5652_v15 }
 0x487   : > { %v3852_v39 = vpop.eup %3851  ;;  %3863 = vrcp.f32 %v2683_v20  ;;  %v2312_v16 = vsub.f32 %v7171_v54, %v5550_v24  ;;  %v7177_v54 = vld [vmem:[#allocation118_spill] sm:$0xff] }
 0x488   : > { %v2649_v49 = vpop.xlane.xlu1 %2648  ;;  %v3068_v14 = vmul.f32 %v3852_v39, %v5756_v61  ;;  %v3854_v8 = vpop.eup %3853  ;;  %3178 = vmatpush.xpose.msrb.mxu1 %v3053_v11  ;;  %v7172_v11 = vld [vmem:[#allocation101_spill] sm:$0xff]  ;;  %v2546_v24 = vmul.f32 1.442695, %v2329_v41  ;;  %v7180_v41 = vld [vmem:[#allocation71_spill] sm:$0xff] }
 0x489   : > { %3865 = vrcp.f32 %v2649_v49  ;;  %v6052_v52 = vpop.xlane.xlu2 %2644  ;;  %v6054_v12 = vpop.eup %3855  ;;  %v3067_v38 = vmul.f32 %v3854_v8, %v5707_v4  ;;  %v2343_v4 = vsub.f32 %v5558_v59, %v5812_v29 }
 0x48a   : > { %3199 = vmatpush.xpose.msrb.mxu2 %v3068_v14  ;;  %v6056_v28 = vpop.eup %3857  ;;  %3867 = vpow2.f32 %v2578_v47  ;;  %v7173_v14 = vld [vmem:[#allocation40_spill] sm:$0xff]  ;;  %v7174_v47 = vld [vmem:[#allocation83_spill] sm:$0xff] }
 0x48b   : > { %v6058_v0 = vpop.eup %3859  ;;  %2636 = vadd.xlane.f32.xlu0 %v6054_v12  ;;  %3869 = vpow2.f32 %v2608_v1  ;;  %v2574_v59 = vmul.f32 1.442695, %v2343_v4  ;;  %v7182_v4 = vld [vmem:[#allocation131_spill] sm:$0xff] }
 0x48c   : > { %v3862_v61 = vpop.eup %3861  ;;  %3871 = vpow2.f32 %v2376_v40 }
 0x48d   : > { %2672 = vadd.xlane.f32.xlu1 %v6056_v28  ;;  %v3864_v39 = vpop.eup %3863  ;;  %v3066_v58 = vmul.f32 %v3862_v61, %v7174_v47  ;;  %3873 = vpow2.f32 %v2546_v24  ;;  %v7179_v61 = vld [vmem:[#allocation141_spill] sm:$0xff] }
 0x48e   : > { %2728 = vadd.xlane.f32.xlu2 %v6058_v0  ;;  %3200 = vmatpush.xpose.msrb.mxu2 %v3067_v38  ;;  %v6070_v20 = vpop.xlane.xlu0 %2874  ;;  %v3037_v15 = vmul.f32 %v3864_v39, %v7172_v11  ;;  %v2512_v38 = vmul.f32 1.442695, %v2312_v16  ;;  %v2293_v16 = vsub.f32 %v7180_v41, %v7179_v61  ;;  %v7187_v61 = vld [vmem:[#allocation93_spill] sm:$0xff]  ;;  %v7188_v41 = vld [vmem:[#allocation26_spill] sm:$0xff] }
 0x48f   : > { %v3866_v22 = vpop.eup %3865 }
 0x490   : > { %v6073_v49 = vpop.xlane.xlu1 %2846  ;;  %v3020_v8 = vmul.f32 %v3866_v22, %v7173_v14  ;;  %3158 = vmatpush.xpose.msrb.mxu0 %v3037_v15  ;;  %v6079_v40 = vpop.eup %3867  ;;  %v7178_v22 = vld [vmem:[#allocation50_spill] sm:$0xff]  ;;  %3875 = vpow2.f32 %v2512_v38  ;;  %v2474_v24 = vmul.f32 1.442695, %v2293_v16  ;;  %v7191_v16 = vld [vmem:[#allocation117_spill] sm:$0xff] }
 0x491   : > { %v6077_v1 = vpop.xlane.xlu2 %2842  ;;  %7175 = vst [vmem:[#allocation41_spill] sm:$0xff] %v6079_v40  ;;  %v6081_v29 = vpop.eup %3869  ;;  %v2278_v11 = vsub.f32 %v7178_v22, %v7177_v54  ;;  %v7181_v15 = vld [vmem:[#allocation42_spill] sm:$0xff]  ;;  %3877 = vpow2.f32 %v2574_v59  ;;  %v2262_v59 = vsub.f32 %v7188_v41, %v7187_v61 }
 0x492   : > { %3139 = vmatpush.xpose.msra.mxu3 %v3020_v8  ;;  %3201 = vmatpush.xpose.msrb.mxu2 %v3066_v58  ;;  %7176 = vst [vmem:[#allocation11_spill] sm:$0xff] %v6081_v29  ;;  %v6084_v39 = vpop.eup %3871  ;;  %v2327_v14 = vsub.f32 %v7182_v4, %v7181_v15  ;;  %v7190_v4 = vld [vmem:[#allocation7_spill] sm:$0xff] }
 0x493   : > { %2834 = vadd.xlane.f32.xlu0 %v6079_v40  ;;  %v2444_v58 = vmul.f32 1.442695, %v2278_v11  ;;  %v6098_v54 = vpop.eup %3873  ;;  %v7189_v11 = vld [vmem:[#allocation35_spill] sm:$0xff]  ;;  %v2412_v61 = vmul.f32 1.442695, %v2262_v59 }
 0x494   : > { %7184 = vst [vmem:[#allocation109_spill] sm:$0xff] %v6098_v54  ;;  %v2542_v22 = vmul.f32 1.442695, %v2327_v14  ;;  %v7192_v14 = vld [vmem:[#allocation49_spill] sm:$0xff] }
 0x495   : > { %2864 = vadd.xlane.f32.xlu1 %v6081_v29  ;;  %v2276_v31 = vsub.f32 %v7192_v14, %v7191_v16 }
 0x496   : > { %2632 = vadd.xlane.f32.xlu2 %v6084_v39  ;;  %v2713_v8 = vpop.xlane.xlu0 %2712  ;;  %v6100_v40 = vpop.eup %3875 }
 0x497   : > { %3879 = vrcp.f32 %v2713_v8  ;;  %7185 = vst [vmem:[#allocation123_spill] sm:$0xff] %v6100_v40  ;;  %v6103_v38 = vpop.eup %3877  ;;  %v2245_v8 = vsub.f32 %v7190_v4, %v7189_v11 }
 0x498   : > { %v6094_v47 = vpop.xlane.xlu1 %2814  ;;  %7186 = vst [vmem:[#allocation54_spill] sm:$0xff] %v6103_v38  ;;  %3881 = vpow2.f32 %v2444_v58 }
 0x499   : > { %v6096_v30 = vpop.xlane.xlu2 %2810  ;;  %3883 = vpow2.f32 %v2474_v24  ;;  %v2378_v41 = vmul.f32 1.442695, %v2245_v8  ;;  %v2440_v24 = vmul.f32 1.442695, %v2276_v31 }
 0x49a   : > { %7183 = vst [vmem:[#allocation135_spill] sm:$0xff] %v6096_v30  ;;  %3885 = vpow2.f32 %v2542_v22 }
 0x49b   : > { %2802 = vadd.xlane.f32.xlu0 %v6098_v54 }
 0x49d   : > { %2768 = vadd.xlane.f32.xlu1 %v6100_v40  ;;  %v3880_v15 = vpop.eup %3879 }
 0x49e   : > { %2830 = vadd.xlane.f32.xlu2 %v6103_v38  ;;  %v2681_v54 = vpop.xlane.xlu0 %2680  ;;  %v3052_v36 = vmul.f32 %v3880_v15, %v5814_v34  ;;  %v6116_v40 = vpop.eup %3881  ;;  %v7194_v34 = vld [vmem:[#allocation163_spill] sm:$0xff] }
 0x49f   : > { %3887 = vrcp.f32 %v2681_v54  ;;  %v6119_v11 = vpop.eup %3883  ;;  %v2358_v54 = vsub.f32 %v7194_v34, %v5829_v50  ;;  %v7197_v15 = vld [vmem:[#allocation31_spill] sm:$0xff] }
 0x4a0   : > { %v2647_v29 = vpop.xlane.xlu1 %2646  ;;  %3179 = vmatpush.xpose.msrb.mxu1 %v3052_v36  ;;  %v6122_v22 = vpop.eup %3885 }
 0x4a1   : > { %3889 = vrcp.f32 %v2647_v29  ;;  %v6114_v58 = vpop.xlane.xlu2 %2708  ;;  %7193 = vst [vmem:[#allocation146_spill] sm:$0xff] %v6122_v22  ;;  %v7195_v29 = vld [vmem:[#allocation161_spill] sm:$0xff] }
 0x4a2   : > { %3891 = vrcp.f32 %v6052_v52  ;;  %v2344_v59 = vsub.f32 %v7195_v29, %v5810_v53  ;;  %v7196_v52 = vld [vmem:[#allocation85_spill] sm:$0xff] }
 0x4a3   : > { %2700 = vadd.xlane.f32.xlu0 %v6116_v40  ;;  %3893 = vpow2.f32 %v2412_v61  ;;  %v2260_v4 = vsub.f32 %v7197_v15, %v7196_v52  ;;  %v7199_v15 = vld [vmem:[#allocation160_spill] sm:$0xff] }
 0x4a4   : > { %3895 = vpow2.f32 %v2378_v41  ;;  %v2604_v41 = vmul.f32 1.442695, %v2358_v54  ;;  %v2576_v53 = vmul.f32 1.442695, %v2344_v59  ;;  %v7201_v54 = vld [vmem:[#allocation67_spill] sm:$0xff]  ;;  %v7202_v59 = vld [vmem:[#allocation133_spill] sm:$0xff] }
 0x4a5   : > { %2730 = vadd.xlane.f32.xlu1 %v6119_v11  ;;  %v3888_v36 = vpop.eup %3887  ;;  %3897 = vpow2.f32 %v2440_v24  ;;  %v7198_v24 = vld [vmem:[#allocation60_spill] sm:$0xff] }
 0x4a6   : > { %2798 = vadd.xlane.f32.xlu2 %v6122_v22  ;;  %v6132_v8 = vpop.xlane.xlu0 %2872  ;;  %v3036_v16 = vmul.f32 %v3888_v36, %v5833_v10  ;;  %v2408_v22 = vmul.f32 1.442695, %v2260_v4  ;;  %3899 = vpow2.f32 %v2604_v41  ;;  %v7203_v4 = vld [vmem:[#allocation165_spill] sm:$0xff] }
 0x4a7   : > { %v3890_v31 = vpop.eup %3889  ;;  %3901 = vpow2.f32 %v2576_v53 }
 0x4a8   : > { %v6135_v14 = vpop.xlane.xlu1 %2844  ;;  %v3019_v50 = vmul.f32 %v3890_v31, %v5835_v42  ;;  %v3892_v61 = vpop.eup %3891  ;;  %3159 = vmatpush.xpose.msrb.mxu0 %v3036_v16  ;;  %v7200_v42 = vld [vmem:[#allocation102_spill] sm:$0xff]  ;;  %v2328_v16 = vsub.f32 %v7202_v59, %v7201_v54  ;;  %3903 = vpow2.f32 %v2408_v22  ;;  %v7208_v22 = vld [vmem:[#allocation140_spill] sm:$0xff]  ;;  %v7210_v59 = vld [vmem:[#allocation121_spill] sm:$0xff] }
 0x4a9   : > { %v6138_v34 = vpop.xlane.xlu2 %2676  ;;  %v6140_v29 = vpop.eup %3893  ;;  %v3018_v10 = vmul.f32 %v3892_v61, %v7198_v24  ;;  %v2310_v31 = vsub.f32 %v7200_v42, %v7199_v15 }
 0x4aa   : > { %3140 = vmatpush.xpose.msra.mxu3 %v3019_v50  ;;  %v6142_v52 = vpop.eup %3895  ;;  %v2356_v50 = vsub.f32 %v7203_v4, %v5850_v3  ;;  %v2544_v41 = vmul.f32 1.442695, %v2328_v16  ;;  %v7212_v16 = vld [vmem:[#allocation154_spill] sm:$0xff] }
 0x4ab   : > { %2668 = vadd.xlane.f32.xlu0 %v6140_v29  ;;  %v6146_v36 = vpop.eup %3897  ;;  %v2508_v38 = vmul.f32 1.442695, %v2310_v31  ;;  %v7211_v31 = vld [vmem:[#allocation52_spill] sm:$0xff] }
 0x4ac   : > { %v6162_v42 = vpop.eup %3899  ;;  %v2600_v43 = vmul.f32 1.442695, %v2356_v50  ;;  %v2277_v4 = vsub.f32 %v7211_v31, %v7210_v59  ;;  %v7213_v50 = vld [vmem:[#allocation92_spill] sm:$0xff]  ;;  %v7219_v31 = vld [vmem:[#allocation5_spill] sm:$0xff] }
 0x4ad   : > { %2634 = vadd.xlane.f32.xlu1 %v6142_v52  ;;  %7206 = vst [vmem:[#allocation99_spill] sm:$0xff] %v6162_v42  ;;  %v6164_v54 = vpop.eup %3901  ;;  %3905 = vpow2.f32 %v2508_v38  ;;  %v2308_v30 = vsub.f32 %v7213_v50, %v7212_v16  ;;  %v7223_v50 = vld [vmem:[#allocation69_spill] sm:$0xff] }
 0x4ae   : > { %2696 = vadd.xlane.f32.xlu2 %v6146_v36  ;;  %3141 = vmatpush.xpose.msra.mxu3 %v3018_v10  ;;  %v6156_v61 = vpop.xlane.xlu0 %2776  ;;  %7207 = vst [vmem:[#allocation30_spill] sm:$0xff] %v6164_v54  ;;  %v6167_v53 = vpop.eup %3903  ;;  %v7209_v10 = vld [vmem:[#allocation70_spill] sm:$0xff]  ;;  %3907 = vpow2.f32 %v2544_v41  ;;  %v2442_v38 = vmul.f32 1.442695, %v2277_v4  ;;  %v7221_v4 = vld [vmem:[#allocation29_spill] sm:$0xff] }
 0x4af   : > { %v2291_v3 = vsub.f32 %v7209_v10, %v7208_v22  ;;  %3909 = vpow2.f32 %v2600_v43  ;;  %v2504_v10 = vmul.f32 1.442695, %v2308_v30  ;;  %v7218_v43 = vld [vmem:[#allocation28_spill] sm:$0xff] }
 0x4b0   : > { %v6158_v24 = vpop.xlane.xlu1 %2812 }
 0x4b1   : > { %7204 = vst [vmem:[#allocation75_spill] sm:$0xff] %v6158_v24  ;;  %v6160_v15 = vpop.xlane.xlu2 %2868 }
 0x4b2   : > { %7205 = vst [vmem:[#allocation134_spill] sm:$0xff] %v6160_v15  ;;  %v2470_v15 = vmul.f32 1.442695, %v2291_v3  ;;  %v7220_v3 = vld [vmem:[#allocation87_spill] sm:$0xff] }
 0x4b3   : > { %2860 = vadd.xlane.f32.xlu0 %v6162_v42  ;;  %v6179_v22 = vpop.eup %3905  ;;  %v2261_v16 = vsub.f32 %v7221_v4, %v7220_v3 }
 0x4b4   : > { %7215 = vst [vmem:[#allocation13_spill] sm:$0xff] %v6179_v22  ;;  %v6182_v41 = vpop.eup %3907 }
 0x4b5   : > { %2832 = vadd.xlane.f32.xlu1 %v6164_v54  ;;  %7216 = vst [vmem:[#allocation122_spill] sm:$0xff] %v6182_v41  ;;  %v6185_v59 = vpop.eup %3909 }
 0x4b6   : > { %2664 = vadd.xlane.f32.xlu2 %v6167_v53  ;;  %v2739_v32 = vpop.xlane.xlu0 %2738  ;;  %7217 = vst [vmem:[#allocation53_spill] sm:$0xff] %v6185_v59 }
 0x4b7   : > { %3911 = vrcp.f32 %v2739_v32  ;;  %v2243_v32 = vsub.f32 %v7219_v31, %v7218_v43 }
 0x4b8   : > { %v2711_v42 = vpop.xlane.xlu1 %2710 }
 0x4b9   : > { %3913 = vrcp.f32 %v2711_v42  ;;  %v6177_v24 = vpop.xlane.xlu2 %2772 }
 0x4ba   : > { %7214 = vst [vmem:[#allocation44_spill] sm:$0xff] %v6177_v24  ;;  %3915 = vrcp.f32 %v6114_v58  ;;  %v7222_v58 = vld [vmem:[#allocation139_spill] sm:$0xff] }
 0x4bb   : > { %2764 = vadd.xlane.f32.xlu0 %v6179_v22  ;;  %3917 = vpow2.f32 %v2470_v15  ;;  %v2289_v54 = vsub.f32 %v7223_v50, %v7222_v58 }
 0x4bc   : > { %3919 = vpow2.f32 %v2442_v38  ;;  %v2410_v38 = vmul.f32 1.442695, %v2261_v16  ;;  %v7227_v16 = vld [vmem:[#allocation86_spill] sm:$0xff] }
 0x4bd   : > { %2800 = vadd.xlane.f32.xlu1 %v6182_v41  ;;  %v3912_v42 = vpop.eup %3911  ;;  %3921 = vpow2.f32 %v2504_v10  ;;  %v2374_v41 = vmul.f32 1.442695, %v2243_v32 }
 0x4be   : > { %2856 = vadd.xlane.f32.xlu2 %v6185_v59  ;;  %v2643_v22 = vpop.xlane.xlu0 %2642  ;;  %v3065_v24 = vmul.f32 %v3912_v42, %v5889_v18  ;;  %v2466_v59 = vmul.f32 1.442695, %v2289_v54  ;;  %v7226_v54 = vld [vmem:[#allocation162_spill] sm:$0xff] }
 0x4bf   : > { %v3914_v30 = vpop.eup %3913  ;;  %3923 = vrcp.f32 %v2643_v22  ;;  %v2357_v42 = vsub.f32 %v7226_v54, %v5831_v51 }
 0x4c0   : > { %v2679_v43 = vpop.xlane.xlu1 %2678  ;;  %v3051_v15 = vmul.f32 %v3914_v30, %v5892_v7  ;;  %v3916_v31 = vpop.eup %3915  ;;  %3202 = vmatpush.xpose.msrb.mxu2 %v3065_v24  ;;  %v7225_v24 = vld [vmem:[#allocation166_spill] sm:$0xff] }
 0x4c1   : > { %3925 = vrcp.f32 %v2679_v43  ;;  %v6197_v3 = vpop.xlane.xlu2 %2734  ;;  %v6199_v4 = vpop.eup %3917  ;;  %v3050_v18 = vmul.f32 %v3916_v31, %v5838_v6  ;;  %v2342_v22 = vsub.f32 %v7225_v24, %v5848_v35  ;;  %v7228_v30 = vld [vmem:[#allocation22_spill] sm:$0xff]  ;;  %v2602_v31 = vmul.f32 1.442695, %v2357_v42  ;;  %v7232_v42 = vld [vmem:[#allocation97_spill] sm:$0xff] }
 0x4c2   : > { %3180 = vmatpush.xpose.msrb.mxu1 %v3051_v15  ;;  %3927 = vrcp.f32 %v6138_v34  ;;  %v6202_v10 = vpop.eup %3919  ;;  %v2241_v6 = vsub.f32 %v7228_v30, %v7227_v16  ;;  %v7233_v16 = vld [vmem:[#allocation65_spill] sm:$0xff] }
 0x4c3   : > { %2726 = vadd.xlane.f32.xlu0 %v6199_v4  ;;  %v6206_v7 = vpop.eup %3921  ;;  %3929 = vpow2.f32 %v2374_v41  ;;  %v2572_v15 = vmul.f32 1.442695, %v2342_v22  ;;  %v7231_v22 = vld [vmem:[#allocation157_spill] sm:$0xff] }
 0x4c4   : > { %7224 = vst [vmem:[#allocation155_spill] sm:$0xff] %v6206_v7  ;;  %3931 = vpow2.f32 %v2410_v38  ;;  %v7234_v30 = vld [vmem:[#allocation149_spill] sm:$0xff] }
 0x4c5   : > { %2698 = vadd.xlane.f32.xlu1 %v6202_v10  ;;  %v3924_v32 = vpop.eup %3923  ;;  %3933 = vpow2.f32 %v2466_v59 }
 0x4c6   : > { %2760 = vadd.xlane.f32.xlu2 %v6206_v7  ;;  %3181 = vmatpush.xpose.msrb.mxu1 %v3050_v18  ;;  %v6216_v58 = vpop.xlane.xlu0 %2840  ;;  %v3017_v41 = vmul.f32 %v3924_v32, %v5907_v25  ;;  %v2370_v18 = vmul.f32 1.442695, %v2241_v6  ;;  %v7229_v32 = vld [vmem:[#allocation170_spill] sm:$0xff]  ;;  %3935 = vpow2.f32 %v2572_v15  ;;  %v2340_v6 = vsub.f32 %v7234_v30, %v7233_v16  ;;  %v7242_v16 = vld [vmem:[#allocation137_spill] sm:$0xff] }
 0x4c7   : > { %v3926_v34 = vpop.eup %3925  ;;  %3937 = vpow2.f32 %v2602_v31 }
 0x4c8   : > { %v6219_v35 = vpop.xlane.xlu1 %2870  ;;  %v3035_v50 = vmul.f32 %v3926_v34, %v5909_v21  ;;  %v3928_v43 = vpop.eup %3927  ;;  %3142 = vmatpush.xpose.msra.mxu3 %v3017_v41  ;;  %v7230_v21 = vld [vmem:[#allocation126_spill] sm:$0xff]  ;;  %v2309_v34 = vsub.f32 %v7232_v42, %v7231_v22  ;;  %3939 = vpow2.f32 %v2370_v18  ;;  %v7240_v18 = vld [vmem:[#allocation112_spill] sm:$0xff] }
 0x4c9   : > { %v6222_v51 = vpop.xlane.xlu2 %2638  ;;  %v6224_v38 = vpop.eup %3929  ;;  %v3034_v25 = vmul.f32 %v3928_v43, %v5860_v26  ;;  %v2326_v54 = vsub.f32 %v7230_v21, %v7229_v32  ;;  %v2568_v21 = vmul.f32 1.442695, %v2340_v6  ;;  %v7245_v6 = vld [vmem:[#allocation125_spill] sm:$0xff] }
 0x4ca   : > { %3160 = vmatpush.xpose.msrb.mxu0 %v3035_v50  ;;  %v6226_v24 = vpop.eup %3931  ;;  %v2506_v15 = vmul.f32 1.442695, %v2309_v34  ;;  %v7244_v34 = vld [vmem:[#allocation19_spill] sm:$0xff] }
 0x4cb   : > { %2630 = vadd.xlane.f32.xlu0 %v6224_v38  ;;  %v6230_v59 = vpop.eup %3933  ;;  %v2540_v50 = vmul.f32 1.442695, %v2326_v54  ;;  %v7243_v54 = vld [vmem:[#allocation68_spill] sm:$0xff]  ;;  %v2324_v7 = vsub.f32 %v7245_v6, %v7244_v34  ;;  %v7255_v6 = vld [vmem:[#allocation45_spill] sm:$0xff] }
 0x4cc   : > { %v6246_v32 = vpop.eup %3935  ;;  %v2290_v30 = vsub.f32 %v7243_v54, %v7242_v16  ;;  %v7251_v54 = vld [vmem:[#allocation25_spill] sm:$0xff] }
 0x4cd   : > { %2666 = vadd.xlane.f32.xlu1 %v6226_v24  ;;  %7238 = vst [vmem:[#allocation138_spill] sm:$0xff] %v6246_v32  ;;  %v6248_v22 = vpop.eup %3937  ;;  %3941 = vpow2.f32 %v2540_v50 }
 0x4ce   : > { %2722 = vadd.xlane.f32.xlu2 %v6230_v59  ;;  %3161 = vmatpush.xpose.msrb.mxu0 %v3034_v25  ;;  %v6240_v26 = vpop.xlane.xlu0 %2808  ;;  %7239 = vst [vmem:[#allocation145_spill] sm:$0xff] %v6248_v22  ;;  %v6251_v31 = vpop.eup %3939  ;;  %v7241_v25 = vld [vmem:[#allocation46_spill] sm:$0xff]  ;;  %3943 = vpow2.f32 %v2506_v15  ;;  %v2468_v50 = vmul.f32 1.442695, %v2290_v30  ;;  %v7253_v30 = vld [vmem:[#allocation20_spill] sm:$0xff] }
 0x4cf   : > { %7235 = vst [vmem:[#allocation89_spill] sm:$0xff] %v6240_v26  ;;  %v2275_v42 = vsub.f32 %v7241_v25, %v7240_v18  ;;  %3945 = vpow2.f32 %v2568_v21  ;;  %v2536_v25 = vmul.f32 1.442695, %v2324_v7  ;;  %v7250_v21 = vld [vmem:[#allocation81_spill] sm:$0xff]  ;;  %v7254_v7 = vld [vmem:[#allocation111_spill] sm:$0xff] }
 0x4d0   : > { %v6242_v41 = vpop.xlane.xlu1 %2774 }
 0x4d1   : > { %7236 = vst [vmem:[#allocation34_spill] sm:$0xff] %v6242_v41  ;;  %v6244_v43 = vpop.xlane.xlu2 %2836  ;;  %v2438_v26 = vmul.f32 1.442695, %v2275_v42  ;;  %v7252_v42 = vld [vmem:[#allocation72_spill] sm:$0xff] }
 0x4d2   : > { %7237 = vst [vmem:[#allocation108_spill] sm:$0xff] %v6244_v43  ;;  %v2242_v34 = vsub.f32 %v7253_v30, %v7252_v42 }
 0x4d3   : > { %2828 = vadd.xlane.f32.xlu0 %v6246_v32  ;;  %v6263_v18 = vpop.eup %3941 }
 0x4d4   : > { %7247 = vst [vmem:[#allocation127_spill] sm:$0xff] %v6263_v18  ;;  %v6266_v15 = vpop.eup %3943 }
 0x4d5   : > { %2858 = vadd.xlane.f32.xlu1 %v6248_v22  ;;  %7248 = vst [vmem:[#allocation57_spill] sm:$0xff] %v6266_v15  ;;  %v6269_v16 = vpop.eup %3945  ;;  %v2273_v22 = vsub.f32 %v7255_v6, %v7254_v7 }
 0x4d6   : > { %2626 = vadd.xlane.f32.xlu2 %v6251_v31  ;;  %v2707_v43 = vpop.xlane.xlu0 %2706  ;;  %7249 = vst [vmem:[#allocation158_spill] sm:$0xff] %v6269_v16 }
 0x4d7   : > { %3947 = vrcp.f32 %v2707_v43  ;;  %v2259_v43 = vsub.f32 %v7251_v54, %v7250_v21 }
 0x4d8   : > { %v2737_v32 = vpop.xlane.xlu1 %2736 }
 0x4d9   : > { %3949 = vrcp.f32 %v2737_v32  ;;  %v6261_v41 = vpop.xlane.xlu2 %2804 }
 0x4da   : > { %7246 = vst [vmem:[#allocation74_spill] sm:$0xff] %v6261_v41  ;;  %3951 = vrcp.f32 %v6197_v3 }
 0x4db   : > { %2796 = vadd.xlane.f32.xlu0 %v6263_v18  ;;  %3953 = vpow2.f32 %v2438_v26 }
 0x4dc   : > { %3955 = vpow2.f32 %v2468_v50  ;;  %v2372_v50 = vmul.f32 1.442695, %v2242_v34  ;;  %v7259_v34 = vld [vmem:[#allocation76_spill] sm:$0xff] }
 0x4dd   : > { %2762 = vadd.xlane.f32.xlu1 %v6266_v15  ;;  %v3948_v32 = vpop.eup %3947  ;;  %3957 = vpow2.f32 %v2536_v25  ;;  %v2406_v15 = vmul.f32 1.442695, %v2259_v43 }
 0x4de   : > { %2824 = vadd.xlane.f32.xlu2 %v6269_v16  ;;  %v2675_v18 = vpop.xlane.xlu0 %2674  ;;  %v3049_v41 = vmul.f32 %v3948_v32, %v5959_v62  ;;  %v2434_v16 = vmul.f32 1.442695, %v2273_v22  ;;  %v7258_v22 = vld [vmem:[#allocation167_spill] sm:$0xff] }
 0x4df   : > { %v3950_v3 = vpop.eup %3949  ;;  %3959 = vrcp.f32 %v2675_v18  ;;  %v2341_v32 = vsub.f32 %v7258_v22, %v5852_v60 }
 0x4e0   : > { %v2641_v21 = vpop.xlane.xlu1 %2640  ;;  %v3064_v26 = vmul.f32 %v3950_v3, %v5961_v37  ;;  %v3952_v54 = vpop.eup %3951  ;;  %3182 = vmatpush.xpose.msrb.mxu1 %v3049_v41  ;;  %v7257_v41 = vld [vmem:[#allocation171_spill] sm:$0xff]  ;;  %v7260_v3 = vld [vmem:[#allocation21_spill] sm:$0xff] }
 0x4e1   : > { %3961 = vrcp.f32 %v2641_v21  ;;  %v6281_v42 = vpop.xlane.xlu2 %2702  ;;  %v6283_v30 = vpop.eup %3953  ;;  %v3063_v62 = vmul.f32 %v3952_v54, %v5912_v44  ;;  %v2355_v18 = vsub.f32 %v7257_v41, %v5885_v23  ;;  %v2257_v44 = vsub.f32 %v7260_v3, %v7259_v34  ;;  %v7265_v34 = vld [vmem:[#allocation107_spill] sm:$0xff] }
 0x4e2   : > { %3203 = vmatpush.xpose.msrb.mxu2 %v3064_v26  ;;  %3963 = vrcp.f32 %v6222_v51  ;;  %v6286_v25 = vpop.eup %3955  ;;  %v2570_v54 = vmul.f32 1.442695, %v2341_v32  ;;  %v7264_v32 = vld [vmem:[#allocation130_spill] sm:$0xff]  ;;  %v7266_v3 = vld [vmem:[#allocation43_spill] sm:$0xff] }
 0x4e3   : > { %2694 = vadd.xlane.f32.xlu0 %v6283_v30  ;;  %v6290_v37 = vpop.eup %3957  ;;  %3965 = vpow2.f32 %v2406_v15  ;;  %v2598_v26 = vmul.f32 1.442695, %v2355_v18  ;;  %v7263_v18 = vld [vmem:[#allocation106_spill] sm:$0xff] }
 0x4e4   : > { %7256 = vst [vmem:[#allocation98_spill] sm:$0xff] %v6290_v37  ;;  %3967 = vpow2.f32 %v2372_v50 }
 0x4e5   : > { %2724 = vadd.xlane.f32.xlu1 %v6286_v25  ;;  %v3960_v43 = vpop.eup %3959  ;;  %3969 = vpow2.f32 %v2434_v16 }
 0x4e6   : > { %2792 = vadd.xlane.f32.xlu2 %v6290_v37  ;;  %3204 = vmatpush.xpose.msrb.mxu2 %v3063_v62  ;;  %v6300_v7 = vpop.xlane.xlu0 %2866  ;;  %v3033_v15 = vmul.f32 %v3960_v43, %v5978_v57  ;;  %v2402_v62 = vmul.f32 1.442695, %v2257_v44  ;;  %v7261_v43 = vld [vmem:[#allocation156_spill] sm:$0xff]  ;;  %3971 = vpow2.f32 %v2598_v26  ;;  %v2272_v44 = vsub.f32 %v7266_v3, %v7265_v34 }
 0x4e7   : > { %v3962_v51 = vpop.eup %3961  ;;  %3973 = vpow2.f32 %v2570_v54  ;;  %v7274_v34 = vld [vmem:[#allocation116_spill] sm:$0xff] }
 0x4e8   : > { %v6303_v23 = vpop.xlane.xlu1 %2838  ;;  %v3016_v6 = vmul.f32 %v3962_v51, %v5980_v5  ;;  %v3964_v21 = vpop.eup %3963  ;;  %3162 = vmatpush.xpose.msrb.mxu0 %v3033_v15  ;;  %v7262_v5 = vld [vmem:[#allocation96_spill] sm:$0xff]  ;;  %v2325_v51 = vsub.f32 %v7264_v32, %v7263_v18  ;;  %3975 = vpow2.f32 %v2402_v62 }
 0x4e9   : > { %v6306_v60 = vpop.xlane.xlu2 %2670  ;;  %v6308_v50 = vpop.eup %3965  ;;  %v3015_v57 = vmul.f32 %v3964_v21, %v5929_v55  ;;  %v2307_v22 = vsub.f32 %v7262_v5, %v7261_v43  ;;  %v2432_v5 = vmul.f32 1.442695, %v2272_v44  ;;  %v7272_v62 = vld [vmem:[#allocation136_spill] sm:$0xff]  ;;  %v7277_v44 = vld [vmem:[#allocation23_spill] sm:$0xff] }
 0x4ea   : > { %3143 = vmatpush.xpose.msra.mxu3 %v3016_v6  ;;  %v6310_v41 = vpop.eup %3967  ;;  %v2538_v26 = vmul.f32 1.442695, %v2325_v51  ;;  %v7276_v51 = vld [vmem:[#allocation77_spill] sm:$0xff] }
 0x4eb   : > { %2662 = vadd.xlane.f32.xlu0 %v6308_v50  ;;  %v6314_v16 = vpop.eup %3969  ;;  %v2502_v6 = vmul.f32 1.442695, %v2307_v22  ;;  %v7275_v22 = vld [vmem:[#allocation48_spill] sm:$0xff]  ;;  %v2256_v37 = vsub.f32 %v7277_v44, %v7276_v51  ;;  %v7286_v44 = vld [vmem:[#allocation90_spill] sm:$0xff] }
 0x4ec   : > { %v6330_v43 = vpop.eup %3971  ;;  %v2274_v3 = vsub.f32 %v7275_v22, %v7274_v34  ;;  %v7282_v22 = vld [vmem:[#allocation4_spill] sm:$0xff] }
 0x4ed   : > { %2628 = vadd.xlane.f32.xlu1 %v6310_v41  ;;  %7270 = vst [vmem:[#allocation33_spill] sm:$0xff] %v6330_v43  ;;  %v6332_v18 = vpop.eup %3973  ;;  %3977 = vpow2.f32 %v2502_v6 }
 0x4ee   : > { %2690 = vadd.xlane.f32.xlu2 %v6314_v16  ;;  %3144 = vmatpush.xpose.msra.mxu3 %v3015_v57  ;;  %v6324_v55 = vpop.xlane.xlu0 %2770  ;;  %7271 = vst [vmem:[#allocation144_spill] sm:$0xff] %v6332_v18  ;;  %v6335_v54 = vpop.eup %3975  ;;  %v7273_v57 = vld [vmem:[#allocation66_spill] sm:$0xff]  ;;  %3979 = vpow2.f32 %v2538_v26  ;;  %v2436_v6 = vmul.f32 1.442695, %v2274_v3  ;;  %v7284_v3 = vld [vmem:[#allocation27_spill] sm:$0xff] }
 0x4ef   : > { %7267 = vst [vmem:[#allocation39_spill] sm:$0xff] %v6324_v55  ;;  %v2288_v32 = vsub.f32 %v7273_v57, %v7272_v62  ;;  %3981 = vpow2.f32 %v2432_v5  ;;  %v2400_v57 = vmul.f32 1.442695, %v2256_v37  ;;  %v7281_v5 = vld [vmem:[#allocation24_spill] sm:$0xff] }
 0x4f0   : > { %v6326_v15 = vpop.xlane.xlu1 %2806  ;;  %v7285_v37 = vld [vmem:[#allocation152_spill] sm:$0xff] }
 0x4f1   : > { %7268 = vst [vmem:[#allocation9_spill] sm:$0xff] %v6326_v15  ;;  %v6328_v21 = vpop.xlane.xlu2 %2862  ;;  %v2464_v15 = vmul.f32 1.442695, %v2288_v32  ;;  %v7283_v32 = vld [vmem:[#allocation82_spill] sm:$0xff] }
 0x4f2   : > { %7269 = vst [vmem:[#allocation94_spill] sm:$0xff] %v6328_v21  ;;  %v2258_v51 = vsub.f32 %v7284_v3, %v7283_v32 }
 0x4f3   : > { %2854 = vadd.xlane.f32.xlu0 %v6330_v43  ;;  %v6347_v62 = vpop.eup %3977 }
 0x4f4   : > { %7279 = vst [vmem:[#allocation159_spill] sm:$0xff] %v6347_v62  ;;  %v6350_v26 = vpop.eup %3979 }
 0x4f5   : > { %2826 = vadd.xlane.f32.xlu1 %v6332_v18  ;;  %7280 = vst [vmem:[#allocation32_spill] sm:$0xff] %v6350_v26  ;;  %v6353_v34 = vpop.eup %3981 }
 0x4f6   : > { %2658 = vadd.xlane.f32.xlu2 %v6335_v54  ;;  %v2733_v21 = vpop.xlane.xlu0 %2732 }
 0x4f7   : > { %3983 = vrcp.f32 %v2733_v21  ;;  %v2240_v21 = vsub.f32 %v7282_v22, %v7281_v5 }
 0x4f8   : > { %v2705_v43 = vpop.xlane.xlu1 %2704 }
 0x4f9   : > { %3985 = vrcp.f32 %v2705_v43  ;;  %v6345_v55 = vpop.xlane.xlu2 %2766 }
 0x4fa   : > { %7278 = vst [vmem:[#allocation73_spill] sm:$0xff] %v6345_v55  ;;  %3987 = vrcp.f32 %v6281_v42 }
 0x4fb   : > { %2758 = vadd.xlane.f32.xlu0 %v6347_v62  ;;  %3989 = vpow2.f32 %v2464_v15  ;;  %v2304_v62 = vsub.f32 %v7286_v44, %v7285_v37 }
 0x4fc   : > { %3991 = vpow2.f32 %v2436_v6  ;;  %v2404_v6 = vmul.f32 1.442695, %v2258_v51 }
 0x4fd   : > { %2794 = vadd.xlane.f32.xlu1 %v6350_v26  ;;  %v3984_v43 = vpop.eup %3983  ;;  %3993 = vpow2.f32 %v2400_v57  ;;  %v2368_v26 = vmul.f32 1.442695, %v2240_v21  ;;  %v2496_v57 = vmul.f32 1.442695, %v2304_v62  ;;  %v7289_v62 = vld [vmem:[#allocation172_spill] sm:$0xff] }
 0x4fe   : > { %2688 = vadd.xlane.f32.xlu2 %v6353_v34  ;;  %v2637_v18 = vpop.xlane.xlu0 %2636  ;;  %v3062_v55 = vmul.f32 %v3984_v43, %v6034_v2  ;;  %v2354_v51 = vsub.f32 %v7289_v62, %v5968_v56 }
 0x4ff   : > { %v3986_v42 = vpop.eup %3985  ;;  %3995 = vrcp.f32 %v2637_v18  ;;  %v7288_v18 = vld [vmem:[#allocation148_spill] sm:$0xff] }
 0x500   : > { %v2673_v5 = vpop.xlane.xlu1 %2672  ;;  %v3048_v15 = vmul.f32 %v3986_v42, %v6037_v17  ;;  %v3988_v22 = vpop.eup %3987  ;;  %3205 = vmatpush.xpose.msrb.mxu2 %v3062_v55  ;;  %v7287_v55 = vld [vmem:[#allocation176_spill] sm:$0xff] }
 0x501   : > { %3997 = vrcp.f32 %v2673_v5  ;;  %v6365_v32 = vpop.xlane.xlu2 %2728  ;;  %v6367_v3 = vpop.eup %3989  ;;  %v3047_v2 = vmul.f32 %v3988_v22, %v5983_v13  ;;  %v2339_v21 = vsub.f32 %v7288_v18, %v7287_v55  ;;  %v7290_v42 = vld [vmem:[#allocation80_spill] sm:$0xff]  ;;  %v7291_v13 = vld [vmem:[#allocation142_spill] sm:$0xff]  ;;  %v2596_v18 = vmul.f32 1.442695, %v2354_v51  ;;  %v7295_v51 = vld [vmem:[#allocation91_spill] sm:$0xff] }
 0x502   : > { %3183 = vmatpush.xpose.msrb.mxu1 %v3048_v15  ;;  %3999 = vrcp.f32 %v6306_v60  ;;  %v6370_v37 = vpop.eup %3991  ;;  %v2336_v44 = vsub.f32 %v7291_v13, %v7290_v42 }
 0x503   : > { %2720 = vadd.xlane.f32.xlu0 %v6367_v3  ;;  %v6374_v17 = vpop.eup %3993  ;;  %4001 = vpow2.f32 %v2368_v26  ;;  %v2566_v55 = vmul.f32 1.442695, %v2339_v21  ;;  %v7294_v21 = vld [vmem:[#allocation153_spill] sm:$0xff] }
 0x504   : > { %4003 = vpow2.f32 %v2404_v6 }
 0x505   : > { %2692 = vadd.xlane.f32.xlu1 %v6370_v37  ;;  %v3996_v43 = vpop.eup %3995  ;;  %4005 = vpow2.f32 %v2496_v57  ;;  %v2560_v57 = vmul.f32 1.442695, %v2336_v44 }
 0x506   : > { %2656 = vadd.xlane.f32.xlu2 %v6374_v17  ;;  %3184 = vmatpush.xpose.msrb.mxu1 %v3047_v2  ;;  %v6384_v5 = vpop.xlane.xlu0 %2834  ;;  %v3014_v26 = vmul.f32 %v3996_v43, %v6054_v12  ;;  %4007 = vpow2.f32 %v2566_v55 }
 0x507   : > { %v3998_v60 = vpop.eup %3997  ;;  %4009 = vpow2.f32 %v2596_v18  ;;  %v7300_v18 = vld [vmem:[#allocation173_spill] sm:$0xff] }
 0x508   : > { %v6387_v15 = vpop.xlane.xlu1 %2864  ;;  %v3032_v22 = vmul.f32 %v3998_v60, %v6056_v28  ;;  %v4000_v6 = vpop.eup %3999  ;;  %3145 = vmatpush.xpose.msra.mxu3 %v3014_v26  ;;  %v7293_v28 = vld [vmem:[#allocation63_spill] sm:$0xff]  ;;  %v2306_v60 = vsub.f32 %v7295_v51, %v7294_v21  ;;  %4011 = vpow2.f32 %v2560_v57  ;;  %v7302_v57 = vld [vmem:[#allocation169_spill] sm:$0xff] }
 0x509   : > { %v2633_v56 = vpop.xlane.xlu2 %2632  ;;  %v6390_v2 = vpop.eup %4001  ;;  %v3031_v42 = vmul.f32 %v4000_v6, %v6004_v63  ;;  %v2353_v43 = vsub.f32 %v7293_v28, %v5939_v46  ;;  %v7301_v28 = vld [vmem:[#allocation143_spill] sm:$0xff] }
 0x50a   : > { %3163 = vmatpush.xpose.msrb.mxu0 %v3032_v22  ;;  %v6392_v62 = vpop.eup %4003  ;;  %v2500_v22 = vmul.f32 1.442695, %v2306_v60 }
 0x50b   : > { %2624 = vadd.xlane.f32.xlu0 %v6390_v2  ;;  %v6396_v12 = vpop.eup %4005  ;;  %v2594_v63 = vmul.f32 1.442695, %v2353_v43  ;;  %v7303_v43 = vld [vmem:[#allocation120_spill] sm:$0xff] }
 0x50c   : > { %7292 = vst [vmem:[#allocation6_spill] sm:$0xff] %v6396_v12  ;;  %v6410_v6 = vpop.eup %4007  ;;  %v2323_v21 = vsub.f32 %v7303_v43, %v7302_v57  ;;  %v7308_v57 = vld [vmem:[#allocation88_spill] sm:$0xff] }
 0x50d   : > { %2660 = vadd.xlane.f32.xlu1 %v6392_v62  ;;  %7298 = vst [vmem:[#allocation101_spill] sm:$0xff] %v6410_v6  ;;  %v6412_v46 = vpop.eup %4009  ;;  %4013 = vpow2.f32 %v2594_v63 }
 0x50e   : > { %2752 = vadd.xlane.f32.xlu2 %v6396_v12  ;;  %3164 = vmatpush.xpose.msrb.mxu0 %v3031_v42  ;;  %v6404_v13 = vpop.xlane.xlu0 %2802  ;;  %v6415_v55 = vpop.eup %4011  ;;  %v2338_v42 = vsub.f32 %v7301_v28, %v7300_v18  ;;  %4015 = vpow2.f32 %v2500_v22  ;;  %v7306_v22 = vld [vmem:[#allocation56_spill] sm:$0xff] }
 0x50f   : > { %7296 = vst [vmem:[#allocation132_spill] sm:$0xff] %v6404_v13  ;;  %v2352_v18 = vsub.f32 %v7306_v22, %v5997_v48 }
 0x510   : > { %v6406_v44 = vpop.xlane.xlu1 %2768  ;;  %7299 = vst [vmem:[#allocation40_spill] sm:$0xff] %v6415_v55  ;;  %v2564_v12 = vmul.f32 1.442695, %v2338_v42  ;;  %v7307_v42 = vld [vmem:[#allocation150_spill] sm:$0xff] }
 0x511   : > { %v6408_v26 = vpop.xlane.xlu2 %2830  ;;  %v2305_v43 = vsub.f32 %v7308_v57, %v7307_v42 }
 0x512   : > { %7297 = vst [vmem:[#allocation103_spill] sm:$0xff] %v6408_v26  ;;  %v2534_v26 = vmul.f32 1.442695, %v2323_v21 }
 0x513   : > { %2822 = vadd.xlane.f32.xlu0 %v6410_v6  ;;  %v6425_v13 = vpop.eup %4013  ;;  %v2498_v22 = vmul.f32 1.442695, %v2305_v43  ;;  %v7313_v43 = vld [vmem:[#allocation124_spill] sm:$0xff] }
 0x514   : > { %7304 = vst [vmem:[#allocation83_spill] sm:$0xff] %v6425_v13  ;;  %v6428_v63 = vpop.eup %4015 }
 0x515   : > { %2852 = vadd.xlane.f32.xlu1 %v6412_v46  ;;  %7305 = vst [vmem:[#allocation118_spill] sm:$0xff] %v6428_v63 }
 0x516   : > { %2816 = vadd.xlane.f32.xlu2 %v6415_v55  ;;  %v2701_v51 = vpop.xlane.xlu0 %2700 }
 0x517   : > { %4017 = vrcp.f32 %v2701_v51 }
 0x518   : > { %v2731_v60 = vpop.xlane.xlu1 %2730 }
 0x519   : > { %4019 = vrcp.f32 %v2731_v60  ;;  %v6423_v6 = vpop.xlane.xlu2 %2798 }
 0x51a   : > { %4021 = vrcp.f32 %v6365_v32 }
 0x51b   : > { %2850 = vadd.xlane.f32.xlu0 %v6425_v13  ;;  %4023 = vpow2.f32 %v2564_v12  ;;  %v2592_v12 = vmul.f32 1.442695, %v2352_v18  ;;  %v7312_v18 = vld [vmem:[#allocation64_spill] sm:$0xff] }
 0x51c   : > { %4025 = vpow2.f32 %v2534_v26  ;;  %v7310_v26 = vld [vmem:[#allocation168_spill] sm:$0xff] }
 0x51d   : > { %2756 = vadd.xlane.f32.xlu1 %v6428_v63  ;;  %v4018_v28 = vpop.eup %4017 }
 0x51e   : > { %v2669_v51 = vpop.xlane.xlu0 %2668  ;;  %v3046_v60 = vmul.f32 %v4018_v28, %v6116_v40  ;;  %v7311_v28 = vld [vmem:[#allocation119_spill] sm:$0xff] }
 0x51f   : > { %v4020_v21 = vpop.eup %4019  ;;  %4027 = vrcp.f32 %v2669_v51  ;;  %v2321_v57 = vsub.f32 %v7311_v28, %v7310_v26 }
 0x520   : > { %v2635_v32 = vpop.xlane.xlu1 %2634  ;;  %v3061_v55 = vmul.f32 %v4020_v21, %v6119_v11  ;;  %v4022_v13 = vpop.eup %4021  ;;  %3185 = vmatpush.xpose.msrb.mxu1 %v3046_v60 }
 0x521   : > { %4029 = vrcp.f32 %v2635_v32  ;;  %v2697_v48 = vpop.xlane.xlu2 %2696  ;;  %v6438_v63 = vpop.eup %4023  ;;  %v3060_v40 = vmul.f32 %v4022_v13, %v6058_v0  ;;  %v2530_v32 = vmul.f32 1.442695, %v2321_v57 }
 0x522   : > { %3206 = vmatpush.xpose.msrb.mxu2 %v3061_v55  ;;  %4031 = vrcp.f32 %v2633_v56  ;;  %v6440_v42 = vpop.eup %4025  ;;  %v2322_v55 = vsub.f32 %v7313_v43, %v7312_v18 }
 0x523   : > { %7309 = vst [vmem:[#allocation50_spill] sm:$0xff] %v6440_v42  ;;  %2820 = vadd.xlane.f32.xlu0 %v6438_v63  ;;  %4033 = vpow2.f32 %v2592_v12 }
 0x524   : > { %4035 = vpow2.f32 %v2498_v22  ;;  %v2532_v26 = vmul.f32 1.442695, %v2322_v55 }
 0x525   : > { %2790 = vadd.xlane.f32.xlu1 %v6440_v42  ;;  %v4028_v11 = vpop.eup %4027  ;;  %4037 = vpow2.f32 %v2530_v32 }
 0x526   : > { %3207 = vmatpush.xpose.msrb.mxu2 %v3060_v40  ;;  %v6449_v56 = vpop.xlane.xlu0 %2860  ;;  %v3030_v51 = vmul.f32 %v4028_v11, %v6140_v29  ;;  %4039 = vpow2.f32 %v2532_v26  ;;  %v7314_v29 = vld [vmem:[#allocation175_spill] sm:$0xff] }
 0x527   : > { %v4030_v21 = vpop.eup %4029 }
 0x528   : > { %v6452_v60 = vpop.xlane.xlu1 %2832  ;;  %v3013_v0 = vmul.f32 %v4030_v21, %v6142_v52  ;;  %v4032_v13 = vpop.eup %4031  ;;  %3165 = vmatpush.xpose.msrb.mxu0 %v3030_v51  ;;  %v7315_v52 = vld [vmem:[#allocation147_spill] sm:$0xff] }
 0x529   : > { %v2665_v12 = vpop.xlane.xlu2 %2664  ;;  %v6455_v22 = vpop.eup %4033  ;;  %v3012_v40 = vmul.f32 %v4032_v13, %v6084_v39  ;;  %v2337_v11 = vsub.f32 %v7315_v52, %v7314_v29  ;;  %v7318_v39 = vld [vmem:[#allocation164_spill] sm:$0xff] }
 0x52a   : > { %3146 = vmatpush.xpose.msra.mxu3 %v3013_v0  ;;  %v6457_v28 = vpop.eup %4035  ;;  %v7319_v0 = vld [vmem:[#allocation115_spill] sm:$0xff] }
 0x52b   : > { %2848 = vadd.xlane.f32.xlu0 %v6455_v22  ;;  %v2562_v55 = vmul.f32 1.442695, %v2337_v11  ;;  %v6470_v21 = vpop.eup %4037  ;;  %v2320_v13 = vsub.f32 %v7319_v0, %v7318_v39 }
 0x52c   : > { %7316 = vst [vmem:[#allocation141_spill] sm:$0xff] %v6470_v21  ;;  %v6472_v51 = vpop.eup %4039 }
 0x52d   : > { %2754 = vadd.xlane.f32.xlu1 %v6457_v28  ;;  %7317 = vst [vmem:[#allocation71_spill] sm:$0xff] %v6472_v51  ;;  %4041 = vpow2.f32 %v2562_v55  ;;  %v2528_v29 = vmul.f32 1.442695, %v2320_v13 }
 0x52e   : > { %3147 = vmatpush.xpose.msra.mxu3 %v3012_v40  ;;  %v6464_v57 = vpop.xlane.xlu0 %2764 }
 0x530   : > { %v6466_v18 = vpop.xlane.xlu1 %2800 }
 0x531   : > { %v6468_v43 = vpop.xlane.xlu2 %2856 }
 0x533   : > { %2786 = vadd.xlane.f32.xlu0 %v6470_v21  ;;  %v6480_v52 = vpop.eup %4041 }
 0x534   : > { %7320 = vst [vmem:[#allocation42_spill] sm:$0xff] %v6480_v52 }
 0x535   : > { %2788 = vadd.xlane.f32.xlu1 %v6472_v51 }
 0x536   : > { %v2727_v32 = vpop.xlane.xlu0 %2726 }
 0x537   : > { %4043 = vrcp.f32 %v2727_v32 }
 0x538   : > { %v2699_v26 = vpop.xlane.xlu1 %2698 }
 0x539   : > { %4045 = vrcp.f32 %v2699_v26  ;;  %v6478_v40 = vpop.xlane.xlu2 %2760 }
 0x53a   : > { %4047 = vrcp.f32 %v2697_v48 }
 0x53b   : > { %4049 = vpow2.f32 %v2528_v29 }
 0x53d   : > { %2818 = vadd.xlane.f32.xlu1 %v6480_v52  ;;  %v4044_v11 = vpop.eup %4043 }
 0x53e   : > { %v2631_v51 = vpop.xlane.xlu0 %2630  ;;  %v3059_v42 = vmul.f32 %v4044_v11, %v6199_v4 }
 0x53f   : > { %v4046_v21 = vpop.eup %4045  ;;  %4051 = vrcp.f32 %v2631_v51 }
 0x540   : > { %v2667_v55 = vpop.xlane.xlu1 %2666  ;;  %v3045_v39 = vmul.f32 %v4046_v21, %v6202_v10  ;;  %v4048_v0 = vpop.eup %4047  ;;  %3208 = vmatpush.xpose.msrb.mxu2 %v3059_v42 }
 0x541   : > { %4053 = vrcp.f32 %v2667_v55  ;;  %v2723_v32 = vpop.xlane.xlu2 %2722  ;;  %v6485_v48 = vpop.eup %4049  ;;  %v3044_v13 = vmul.f32 %v4048_v0, %v6146_v36 }
 0x542   : > { %3186 = vmatpush.xpose.msrb.mxu1 %v3045_v39  ;;  %4055 = vrcp.f32 %v2665_v12  ;;  %7321 = vst [vmem:[#allocation131_spill] sm:$0xff] %v6485_v48 }
 0x545   : > { %2784 = vadd.xlane.f32.xlu1 %v6485_v48  ;;  %v4052_v26 = vpop.eup %4051 }
 0x546   : > { %3187 = vmatpush.xpose.msrb.mxu1 %v3044_v13  ;;  %v6489_v4 = vpop.xlane.xlu0 %2828  ;;  %v3011_v51 = vmul.f32 %v4052_v26, %v6224_v38 }
 0x547   : > { %v4054_v29 = vpop.eup %4053 }
 0x548   : > { %v6492_v10 = vpop.xlane.xlu1 %2858  ;;  %v3029_v42 = vmul.f32 %v4054_v29, %v6226_v24  ;;  %v4056_v21 = vpop.eup %4055  ;;  %3148 = vmatpush.xpose.msra.mxu3 %v3011_v51 }
 0x549   : > { %v2627_v12 = vpop.xlane.xlu2 %2626  ;;  %v3028_v11 = vmul.f32 %v4056_v21, %v6167_v53 }
 0x54a   : > { %3166 = vmatpush.xpose.msrb.mxu0 %v3029_v42 }
 0x54e   : > { %3167 = vmatpush.xpose.msrb.mxu0 %v3028_v11  ;;  %v6496_v36 = vpop.xlane.xlu0 %2796 }
 0x550   : > { %v6498_v55 = vpop.xlane.xlu1 %2762 }
 0x551   : > { %v6500_v39 = vpop.xlane.xlu2 %2824 }
 0x556   : > { %v2695_v0 = vpop.xlane.xlu0 %2694 }
 0x557   : > { %4057 = vrcp.f32 %v2695_v0 }
 0x558   : > { %v2725_v38 = vpop.xlane.xlu1 %2724 }
 0x559   : > { %4059 = vrcp.f32 %v2725_v38  ;;  %v6502_v13 = vpop.xlane.xlu2 %2792 }
 0x55a   : > { %4061 = vrcp.f32 %v2723_v32 }
 0x55d   : > { %v4058_v24 = vpop.eup %4057 }
 0x55e   : > { %v2663_v29 = vpop.xlane.xlu0 %2662  ;;  %v3043_v51 = vmul.f32 %v4058_v24, %v6283_v30 }
 0x55f   : > { %v4060_v26 = vpop.eup %4059  ;;  %4063 = vrcp.f32 %v2663_v29 }
 0x560   : > { %v2629_v53 = vpop.xlane.xlu1 %2628  ;;  %v3058_v42 = vmul.f32 %v4060_v26, %v6286_v25  ;;  %v4062_v21 = vpop.eup %4061  ;;  %3188 = vmatpush.xpose.msrb.mxu1 %v3043_v51 }
 0x561   : > { %4065 = vrcp.f32 %v2629_v53  ;;  %v3057_v11 = vmul.f32 %v4062_v21, %v6230_v59  ;;  %v2691_v38 = vpop.xlane.xlu2 %2690 }
 0x562   : > { %3209 = vmatpush.xpose.msrb.mxu2 %v3058_v42  ;;  %4067 = vrcp.f32 %v2627_v12 }
 0x563   : > { %4069 = vrcp.f32 %v5993_v19 }
 0x564   : > { %4071 = vrcp.f32 %v5995_v33 }
 0x565   : > { %v4064_v0 = vpop.eup %4063 }
 0x566   : > { %3210 = vmatpush.xpose.msrb.mxu2 %v3057_v11  ;;  %v6507_v48 = vpop.xlane.xlu0 %2854  ;;  %v3027_v52 = vmul.f32 %v4064_v0, %v6308_v50 }
 0x567   : > { %v4066_v32 = vpop.eup %4065 }
 0x568   : > { %v6510_v30 = vpop.xlane.xlu1 %2826  ;;  %v3010_v24 = vmul.f32 %v4066_v32, %v6310_v41  ;;  %v4068_v25 = vpop.eup %4067  ;;  %3168 = vmatpush.xpose.msrb.mxu0 %v3027_v52 }
 0x569   : > { %v3009_v26 = vmul.f32 %v4068_v25, %v6251_v31  ;;  %v2659_v29 = vpop.xlane.xlu2 %2658  ;;  %v4070_v52 = vpop.eup %4069  ;;  %v7324_v25 = vld [vmem:[#allocation62_spill] sm:$0xff] }
 0x56a   : > { %3149 = vmatpush.xpose.msra.mxu3 %v3010_v24  ;;  %v4072_v31 = vpop.eup %4071 }
 0x56e   : > { %3150 = vmatpush.xpose.msra.mxu3 %v3009_v26  ;;  %v6514_v12 = vpop.xlane.xlu0 %2758 }
 0x570   : > { %v6516_v59 = vpop.xlane.xlu1 %2794 }
 0x571   : > { %v2689_v41 = vpop.xlane.xlu2 %2688 }
 0x576   : > { %v2721_v50 = vpop.xlane.xlu0 %2720 }
 0x577   : > { %4073 = vrcp.f32 %v2721_v50 }
 0x578   : > { %v2693_v51 = vpop.xlane.xlu1 %2692 }
 0x579   : > { %4075 = vrcp.f32 %v2693_v51  ;;  %v2657_v51 = vpop.xlane.xlu2 %2656 }
 0x57a   : > { %4077 = vrcp.f32 %v6014_v27  ;;  %v7322_v27 = vld [vmem:[#allocation110_spill] sm:$0xff] }
 0x57b   : > { %4079 = vrcp.f32 %v2691_v38  ;;  %v3135_v0 = vmul.f32 %v4072_v31, %v7322_v27  ;;  %v7328_v27 = vld [vmem:[#allocation75_spill] sm:$0xff] }
 0x57c   : > { %4081 = vrcp.f32 %v5957_v9 }
 0x57d   : > { %4083 = vrcp.f32 %v6070_v20  ;;  %v4074_v53 = vpop.eup %4073  ;;  %v7323_v20 = vld [vmem:[#allocation10_spill] sm:$0xff] }
 0x57e   : > { %4085 = vrcp.f32 %v6073_v49  ;;  %v2625_v33 = vpop.xlane.xlu0 %2624  ;;  %v3056_v42 = vmul.f32 %v4074_v53, %v6367_v3  ;;  %v527_v24 = vrot.slane %v7323_v20, 4  ;;  %v7325_v53 = vld [vmem:[#allocation114_spill] sm:$0xff] }
 0x57f   : > { %v4076_v19 = vpop.eup %4075  ;;  %4087 = vrcp.f32 %v2689_v41 }
 0x580   : > { %v4078_v21 = vpop.eup %4077  ;;  %4089 = vrcp.f32 %v2625_v33  ;;  %v2661_v11 = vpop.xlane.xlu1 %2660  ;;  %v3042_v32 = vmul.f32 %v4076_v19, %v6370_v37  ;;  %3211 = vmatpush.xpose.msrb.mxu2 %v3056_v42  ;;  %v7326_v19 = vld [vmem:[#allocation18_spill] sm:$0xff] }
 0x581   : > { %v4080_v38 = vpop.eup %4079  ;;  %4091 = vrcp.f32 %v2661_v11  ;;  %v3134_v26 = vmul.f32 %v4078_v21, %v7324_v25  ;;  %v7334_v25 = vld [vmem:[#allocation36_spill] sm:$0xff] }
 0x582   : > { %v4082_v9 = vpop.eup %4081  ;;  %4093 = vrcp.f32 %v6016_v45  ;;  %3189 = vmatpush.xpose.msrb.mxu1 %v3042_v32  ;;  %v3041_v37 = vmul.f32 %v4080_v38, %v6314_v16  ;;  %v3087_v16 = vmul.f32 %v4070_v52, %v7325_v53 }
 0x583   : > { %v4084_v49 = vpop.eup %4083  ;;  %4095 = vrcp.f32 %v6132_v8  ;;  %3212 = vmatmul.f32.vlgmr.msrb.gmra.mxu2 %v527_v24 }
 0x584   : > { %3276 = vmatpush.xpose.msra.mxu2 %v3135_v0  ;;  %v4086_v3 = vpop.eup %4085  ;;  %4097 = vrcp.f32 %v2659_v29  ;;  %v3133_v33 = vmul.f32 %v4084_v49, %v7326_v19  ;;  %v7330_v0 = vld [vmem:[#allocation8_spill] sm:$0xff]  ;;  %v7339_v19 = vld [vmem:[#allocation129_spill] sm:$0xff] }
 0x585   : > { %v4088_v50 = vpop.eup %4087  ;;  %4099 = vrcp.f32 %v6135_v14 }
 0x586   : > { %v4090_v41 = vpop.eup %4089  ;;  %4101 = vrcp.f32 %v6077_v1  ;;  %3190 = vmatpush.xpose.msrb.mxu1 %v3041_v37  ;;  %v3040_v1 = vmul.f32 %v4088_v50, %v6353_v34  ;;  %v7335_v50 = vld [vmem:[#allocation34_spill] sm:$0xff] }
 0x587   : > { %v4092_v45 = vpop.eup %4091  ;;  %4103 = vrcp.f32 %v6219_v35  ;;  %v3008_v8 = vmul.f32 %v4090_v41, %v6390_v2  ;;  %v7327_v35 = vld [vmem:[#allocation51_spill] sm:$0xff] }
 0x588   : > { %3277 = vmatpush.xpose.msra.mxu2 %v3134_v26  ;;  %v4094_v29 = vpop.eup %4093  ;;  %4105 = vrcp.f32 %v2657_v51  ;;  %v6536_v31 = vpop.xlane.xlu1 %2852  ;;  %v3026_v14 = vmul.f32 %v4092_v45, %v6392_v62  ;;  %v3119_v2 = vmul.f32 %v4086_v3, %v7327_v35  ;;  %v7329_v62 = vld [vmem:[#allocation134_spill] sm:$0xff]  ;;  %v7333_v3 = vld [vmem:[#allocation135_spill] sm:$0xff] }
 0x589   : > { %v4096_v42 = vpop.eup %4095  ;;  %4107 = vrcp.f32 %v6094_v47  ;;  %3151 = vmatpush.xpose.msra.mxu3 %v3008_v8  ;;  %v7331_v47 = vld [vmem:[#allocation174_spill] sm:$0xff] }
 0x58a   : > { %v4098_v21 = vpop.eup %4097  ;;  %4109 = vrcp.f32 %v6156_v61  ;;  %3169 = vmatpush.xpose.msrb.mxu0 %v3026_v14  ;;  %3191 = vmatpush.xpose.msrb.mxu1 %v3040_v1  ;;  %v3086_v34 = vmul.f32 %v4082_v9, %v7331_v47  ;;  %v7332_v61 = vld [vmem:[#allocation105_spill] sm:$0xff]  ;;  %v7340_v14 = vld [vmem:[#allocation16_spill] sm:$0xff]  ;;  %v7345_v47 = vld [vmem:[#allocation39_spill] sm:$0xff] }
 0x58b   : > { %v4100_v11 = vpop.eup %4099  ;;  %4111 = vrcp.f32 %v7328_v27  ;;  %v3132_v38 = vmul.f32 %v4096_v42, %v7332_v61  ;;  %v3025_v24 = vmul.f32 %v4098_v21, %v6335_v54  ;;  %v7336_v54 = vld [vmem:[#allocation84_spill] sm:$0xff]  ;;  %v7341_v1 = vld [vmem:[#allocation89_spill] sm:$0xff]  ;;  %v6567_v21 = vpop.xlane.xlu0 %2822  ;;  %v7347_v61 = vld [vmem:[#allocation95_spill] sm:$0xff] }
 0x58c   : > { %3278 = vmatpush.xpose.msra.mxu2 %v3133_v33  ;;  %v4102_v52 = vpop.eup %4101  ;;  %4113 = vrcp.f32 %v7329_v62  ;;  %3152 = vmatmul.f32.vlgmr.msra.gmra.mxu3 %v7330_v0  ;;  %v3118_v26 = vmul.f32 %v4100_v11, %v7334_v25  ;;  %v3085_v51 = vmul.f32 %v4094_v29, %v7336_v54  ;;  %v526_v29 = vrot.slane %v7330_v0, 4  ;;  %v7343_v11 = vld [vmem:[#allocation108_spill] sm:$0xff]  ;;  %v7350_v25 = vld [vmem:[#allocation79_spill] sm:$0xff] }
 0x58d   : > { %3216 = vmatpush.xpose.msrb.mxu3 %v3087_v16  ;;  %v4104_v32 = vpop.eup %4103  ;;  %4115 = vrcp.f32 %v6216_v58  ;;  %3192 = vmatmul.f32.vlgmr.msrb.gmra.mxu1 %v7323_v20  ;;  %v7337_v20 = vld [vmem:[#allocation38_spill] sm:$0xff]  ;;  %v7338_v16 = vld [vmem:[#allocation44_spill] sm:$0xff] }
 0x58e   : > { %3256 = vmatpush.xpose.msra.mxu1 %v3119_v2  ;;  %v4106_v49 = vpop.eup %4105  ;;  %4117 = vrcp.f32 %v7333_v3  ;;  %3170 = vmatpush.xpose.msrb.mxu0 %v3025_v24  ;;  %v3131_v45 = vmul.f32 %v4104_v32, %v7337_v20  ;;  %v7344_v27 = vld [vmem:[#allocation128_spill] sm:$0xff] }
 0x58f   : > { %v4108_v37 = vpop.eup %4107  ;;  %4119 = vrcp.f32 %v7335_v50  ;;  %v3024_v8 = vmul.f32 %v4106_v49, %v6374_v17  ;;  %v7342_v17 = vld [vmem:[#allocation55_spill] sm:$0xff]  ;;  %v7349_v49 = vld [vmem:[#allocation94_spill] sm:$0xff] }
 0x590   : > { %3279 = vmatpush.xpose.msra.mxu2 %v3132_v38  ;;  %v4110_v9 = vpop.eup %4109  ;;  %4121 = vrcp.f32 %v6300_v7  ;;  %v6557_v58 = vpop.xlane.xlu1 %2756  ;;  %v3103_v33 = vmul.f32 %v4108_v37, %v7339_v19  ;;  %v3117_v7 = vmul.f32 %v4102_v52, %v7340_v14  ;;  %v7351_v50 = vld [vmem:[#allocation47_spill] sm:$0xff] }
 0x591   : > { %3217 = vmatpush.xpose.msrb.mxu3 %v3086_v34  ;;  %v4112_v41 = vpop.eup %4111  ;;  %4123 = vrcp.f32 %v6303_v23  ;;  %v3084_v35 = vmul.f32 %v4110_v9, %v7342_v17  ;;  %v7346_v34 = vld [vmem:[#allocation17_spill] sm:$0xff] }
 0x592   : > { %3257 = vmatpush.xpose.msra.mxu1 %v3118_v26  ;;  %v4114_v53 = vpop.eup %4113  ;;  %4125 = vrcp.f32 %v7338_v16  ;;  %3171 = vmatpush.xpose.msrb.mxu0 %v3024_v8  ;;  %v3102_v32 = vmul.f32 %v4112_v41, %v7346_v34  ;;  %v7353_v41 = vld [vmem:[#allocation59_spill] sm:$0xff]  ;;  %v7359_v17 = vld [vmem:[#allocation61_spill] sm:$0xff] }
 0x593   : > { %v4116_v42 = vpop.eup %4115  ;;  %4127 = vrcp.f32 %v7341_v1  ;;  %v3130_v52 = vmul.f32 %v4114_v53, %v7344_v27  ;;  %v6591_v14 = vpop.xlane.xlu0 %2850 }
 0x594   : > { %3280 = vmatpush.xpose.msra.mxu2 %v3131_v45  ;;  %v4118_v23 = vpop.eup %4117  ;;  %4129 = vrcp.f32 %v6387_v15  ;;  %v3116_v0 = vmul.f32 %v4116_v42, %v7347_v61  ;;  %v7348_v15 = vld [vmem:[#allocation9_spill] sm:$0xff]  ;;  %v7354_v45 = vld [vmem:[#allocation15_spill] sm:$0xff] }
 0x595   : > { %3218 = vmatpush.xpose.msrb.mxu3 %v3085_v51  ;;  %v4120_v2 = vpop.eup %4119  ;;  %4131 = vrcp.f32 %v7343_v11  ;;  %3172 = vmatmul.f32.vlgmr.msrb.gmra.mxu0 %v526_v29  ;;  %v7352_v51 = vld [vmem:[#allocation74_spill] sm:$0xff]  ;;  %v3101_v20 = vmul.f32 %v4118_v23, %v7353_v41  ;;  %v7357_v23 = vld [vmem:[#allocation73_spill] sm:$0xff] }
 0x596   : > { %3236 = vmatpush.xpose.msra.mxu0 %v3103_v33  ;;  %3258 = vmatpush.xpose.msra.mxu1 %v3117_v7  ;;  %v4122_v62 = vpop.eup %4121  ;;  %4133 = vrcp.f32 %v7345_v47  ;;  %v3083_v26 = vmul.f32 %v4120_v2, %v7350_v25  ;;  %v7356_v7 = vld [vmem:[#allocation11_spill] sm:$0xff]  ;;  %v7360_v2 = vld [vmem:[#allocation132_spill] sm:$0xff]  ;;  %v7363_v47 = vld [vmem:[#allocation78_spill] sm:$0xff] }
 0x597   : > { %v4124_v38 = vpop.eup %4123  ;;  %4135 = vrcp.f32 %v7348_v15  ;;  %v3129_v9 = vmul.f32 %v4122_v62, %v7351_v50  ;;  %v7362_v62 = vld [vmem:[#allocation103_spill] sm:$0xff]  ;;  %v7365_v15 = vld [vmem:[#allocation41_spill] sm:$0xff] }
 0x598   : > { %3281 = vmatpush.xpose.msra.mxu2 %v3130_v52  ;;  %v4126_v24 = vpop.eup %4125  ;;  %4137 = vrcp.f32 %v7349_v49  ;;  %v6579_v3 = vpop.xlane.xlu1 %2790  ;;  %v3115_v8 = vmul.f32 %v4124_v38, %v7354_v45  ;;  %v7366_v25 = vld [vmem:[#allocation123_spill] sm:$0xff] }
 0x599   : > { %3219 = vmatpush.xpose.msrb.mxu3 %v3084_v35  ;;  %v4128_v37 = vpop.eup %4127  ;;  %4139 = vrcp.f32 %v6384_v5  ;;  %v7355_v5 = vld [vmem:[#allocation58_spill] sm:$0xff] }
 0x59a   : > { %3237 = vmatpush.xpose.msra.mxu0 %v3102_v32  ;;  %3259 = vmatpush.xpose.msra.mxu1 %v3116_v0  ;;  %v4130_v54 = vpop.eup %4129  ;;  %4141 = vrcp.f32 %v7352_v51  ;;  %v3082_v19 = vmul.f32 %v4126_v24, %v7355_v5  ;;  %v7364_v0 = vld [vmem:[#allocation37_spill] sm:$0xff] }
 0x59b   : > { %v4132_v53 = vpop.eup %4131  ;;  %4143 = vrcp.f32 %v6406_v44  ;;  %v3128_v42 = vmul.f32 %v4130_v54, %v7356_v7  ;;  %v7358_v44 = vld [vmem:[#allocation113_spill] sm:$0xff]  ;;  %v7368_v54 = vld [vmem:[#allocation104_spill] sm:$0xff] }
 0x59c   : > { %3282 = vmatpush.xpose.msra.mxu2 %v3129_v9  ;;  %v4134_v16 = vpop.eup %4133  ;;  %4145 = vrcp.f32 %v6449_v56  ;;  %v3100_v29 = vmul.f32 %v4128_v37, %v7358_v44  ;;  %v3114_v35 = vmul.f32 %v4132_v53, %v7359_v17 }
 0x59d   : > { %3220 = vmatpush.xpose.msrb.mxu3 %v3083_v26  ;;  %v4136_v33 = vpop.eup %4135  ;;  %4147 = vrcp.f32 %v6452_v60  ;;  %v7361_v60 = vld [vmem:[#allocation100_spill] sm:$0xff] }
 0x59e   : > { %3238 = vmatpush.xpose.msra.mxu0 %v3101_v20  ;;  %3260 = vmatpush.xpose.msra.mxu1 %v3115_v8  ;;  %v4138_v1 = vpop.eup %4137  ;;  %4149 = vrcp.f32 %v7357_v23  ;;  %v3081_v27 = vmul.f32 %v4134_v16, %v7361_v60  ;;  %v3099_v38 = vmul.f32 %v4136_v33, %v7364_v0  ;;  %v7373_v33 = vld [vmem:[#allocation54_spill] sm:$0xff]  ;;  %v7381_v0 = vld [vmem:[#allocation144_spill] sm:$0xff] }
 0x59f   : > { %v4140_v56 = vpop.eup %4139  ;;  %4151 = vrcp.f32 %v7360_v2  ;;  %v3127_v34 = vmul.f32 %v4138_v1, %v7363_v47 }
 0x5a0   : > { %3283 = vmatpush.xpose.msra.mxu2 %v3128_v42  ;;  %v4142_v11 = vpop.eup %4141  ;;  %4153 = vrcp.f32 %v6492_v10  ;;  %v6603_v61 = vpop.xlane.xlu1 %2754  ;;  %v3113_v24 = vmul.f32 %v4140_v56, %v7365_v15  ;;  %v7377_v56 = vld [vmem:[#allocation138_spill] sm:$0xff] }
 0x5a1   : > { %3221 = vmatpush.xpose.msrb.mxu3 %v3082_v19  ;;  %v4144_v52 = vpop.eup %4143  ;;  %4155 = vrcp.f32 %v7362_v62  ;;  %v3098_v51 = vmul.f32 %v4142_v11, %v7368_v54  ;;  %v7372_v19 = vld [vmem:[#allocation109_spill] sm:$0xff]  ;;  %v2753_v11 = vpop.xlane.xlu2 %2752  ;;  %v7385_v54 = vld [vmem:[#allocation159_spill] sm:$0xff] }
 0x5a2   : > { %3239 = vmatpush.xpose.msra.mxu0 %v3100_v29  ;;  %3261 = vmatpush.xpose.msra.mxu1 %v3114_v35  ;;  %v4146_v32 = vpop.eup %4145  ;;  %4157 = vrcp.f32 %v6464_v57  ;;  %v3080_v26 = vmul.f32 %v4144_v52, %v7366_v25  ;;  %v7367_v57 = vld [vmem:[#allocation99_spill] sm:$0xff]  ;;  %v7379_v62 = vld [vmem:[#allocation33_spill] sm:$0xff] }
 0x5a3   : > { %v4148_v10 = vpop.eup %4147  ;;  %4159 = vrcp.f32 %v6466_v18  ;;  %v3126_v50 = vmul.f32 %v4146_v32, %v7367_v57  ;;  %v7369_v18 = vld [vmem:[#allocation30_spill] sm:$0xff] }
 0x5a4   : > { %3284 = vmatpush.xpose.msra.mxu2 %v3127_v34  ;;  %v4150_v49 = vpop.eup %4149  ;;  %4161 = vrcp.f32 %v6468_v43  ;;  %v3112_v41 = vmul.f32 %v4148_v10, %v7369_v18  ;;  %v2821_v43 = vpop.xlane.xlu0 %2820  ;;  %v7384_v57 = vld [vmem:[#allocation158_spill] sm:$0xff] }
 0x5a5   : > { %3222 = vmatpush.xpose.msrb.mxu3 %v3081_v27  ;;  %v4152_v37 = vpop.eup %4151  ;;  %4163 = vrcp.f32 %v6489_v4  ;;  %v7370_v4 = vld [vmem:[#allocation151_spill] sm:$0xff] }
 0x5a6   : > { %3240 = vmatpush.xpose.msra.mxu0 %v3099_v38  ;;  %3262 = vmatpush.xpose.msra.mxu1 %v3113_v24  ;;  %v4154_v9 = vpop.eup %4153  ;;  %4165 = vrcp.f32 %v6423_v6  ;;  %v3079_v8 = vmul.f32 %v4150_v49, %v7370_v4  ;;  %v7371_v6 = vld [vmem:[#allocation145_spill] sm:$0xff] }
 0x5a7   : > { %v4156_v20 = vpop.eup %4155  ;;  %4167 = vrcp.f32 %v6498_v55  ;;  %v3125_v16 = vmul.f32 %v4154_v9, %v7371_v6  ;;  %v3097_v55 = vmul.f32 %v4152_v37, %v7372_v19 }
 0x5a8   : > { %3285 = vmatpush.xpose.msra.mxu2 %v3126_v50  ;;  %v4158_v45 = vpop.eup %4157  ;;  %4169 = vrcp.f32 %v6507_v48  ;;  %v3111_v7 = vmul.f32 %v4156_v20, %v7373_v33  ;;  %v6625_v1 = vpop.xlane.xlu1 %2788  ;;  %v7390_v33 = vld [vmem:[#allocation98_spill] sm:$0xff] }
 0x5a9   : > { %3223 = vmatpush.xpose.msrb.mxu3 %v3080_v26  ;;  %v4160_v53 = vpop.eup %4159  ;;  %4171 = vrcp.f32 %v6510_v30  ;;  %v7374_v30 = vld [vmem:[#allocation13_spill] sm:$0xff]  ;;  %v7383_v26 = vld [vmem:[#allocation127_spill] sm:$0xff] }
 0x5aa   : > { %3241 = vmatpush.xpose.msra.mxu0 %v3098_v51  ;;  %3263 = vmatpush.xpose.msra.mxu1 %v3112_v41  ;;  %v4162_v5 = vpop.eup %4161  ;;  %4173 = vrcp.f32 %v6478_v40  ;;  %v3078_v23 = vmul.f32 %v4158_v45, %v7374_v30  ;;  %v7375_v40 = vld [vmem:[#allocation53_spill] sm:$0xff]  ;;  %v7386_v41 = vld [vmem:[#allocation83_spill] sm:$0xff]  ;;  %v7387_v45 = vld [vmem:[#allocation32_spill] sm:$0xff] }
 0x5ab   : > { %v4164_v42 = vpop.eup %4163  ;;  %4175 = vrcp.f32 %v6496_v36  ;;  %v3124_v29 = vmul.f32 %v4162_v5, %v7375_v40  ;;  %v7376_v36 = vld [vmem:[#allocation122_spill] sm:$0xff] }
 0x5ac   : > { %3286 = vmatpush.xpose.msra.mxu2 %v3125_v16  ;;  %v4166_v48 = vpop.eup %4165  ;;  %4177 = vrcp.f32 %v6536_v31  ;;  %v3096_v35 = vmul.f32 %v4160_v53, %v7376_v36  ;;  %v3110_v2 = vmul.f32 %v4164_v42, %v7377_v56  ;;  %v7391_v30 = vld [vmem:[#allocation14_spill] sm:$0xff] }
 0x5ad   : > { %3224 = vmatpush.xpose.msrb.mxu3 %v3079_v8  ;;  %v4168_v44 = vpop.eup %4167  ;;  %4179 = vrcp.f32 %v6500_v39  ;;  %v7378_v39 = vld [vmem:[#allocation57_spill] sm:$0xff]  ;;  %v7393_v36 = vld [vmem:[#allocation42_spill] sm:$0xff] }
 0x5ae   : > { %3242 = vmatpush.xpose.msra.mxu0 %v3097_v55  ;;  %3264 = vmatpush.xpose.msra.mxu1 %v3111_v7  ;;  %v4170_v17 = vpop.eup %4169  ;;  %4181 = vrcp.f32 %v6514_v12  ;;  %v3077_v27 = vmul.f32 %v4168_v44, %v7378_v39  ;;  %v2849_v12 = vpop.xlane.xlu0 %2848  ;;  %v7388_v8 = vld [vmem:[#allocation101_spill] sm:$0xff] }
 0x5af   : > { %v4172_v31 = vpop.eup %4171  ;;  %4183 = vrcp.f32 %v6516_v59  ;;  %v3123_v47 = vmul.f32 %v4170_v17, %v7379_v62  ;;  %v7380_v59 = vld [vmem:[#allocation146_spill] sm:$0xff] }
 0x5b0   : > { %3287 = vmatpush.xpose.msra.mxu2 %v3124_v29  ;;  %v4174_v60 = vpop.eup %4173  ;;  %4185 = vrcp.f32 %v6591_v14  ;;  %v3095_v32 = vmul.f32 %v4166_v48, %v7380_v59  ;;  %v3109_v38 = vmul.f32 %v4172_v31, %v7381_v0  ;;  %v2819_v25 = vpop.xlane.xlu1 %2818  ;;  %v7395_v31 = vld [vmem:[#allocation71_spill] sm:$0xff] }
 0x5b1   : > { %3225 = vmatpush.xpose.msrb.mxu3 %v3078_v23  ;;  %v4176_v52 = vpop.eup %4175  ;;  %4187 = vrcp.f32 %v6567_v21  ;;  %v7382_v21 = vld [vmem:[#allocation155_spill] sm:$0xff]  ;;  %v529_v23 = vrot.slane %v7391_v30, 4 }
 0x5b2   : > { %3243 = vmatpush.xpose.msra.mxu0 %v3096_v35  ;;  %3265 = vmatpush.xpose.msra.mxu1 %v3110_v2  ;;  %v4178_v34 = vpop.eup %4177  ;;  %4189 = vrcp.f32 %v6502_v13  ;;  %v3076_v24 = vmul.f32 %v4174_v60, %v7382_v21  ;;  %v3094_v37 = vmul.f32 %v4176_v52, %v7383_v26  ;;  %v7398_v52 = vld [vmem:[#allocation141_spill] sm:$0xff]  ;;  %v3296_v26 = vld [vmem:[%s6708_s6] sm:$0xff] }
 0x5b3   : > { %v4180_v15 = vpop.eup %4179  ;;  %4191 = vrcp.f32 %v6557_v58  ;;  %v3122_v49 = vmul.f32 %v4178_v34, %v6412_v46  ;;  %v2817_v46 = vpop.xlane.xlu2 %2816 }
 0x5b4   : > { %3288 = vmatpush.xpose.msra.mxu2 %v3123_v47  ;;  %v4182_v14 = vpop.eup %4181  ;;  %4193 = vrcp.f32 %v2849_v12  ;;  %v3108_v50 = vmul.f32 %v4180_v15, %v7384_v57  ;;  %v7399_v47 = vld [vmem:[#allocation131_spill] sm:$0xff]  ;;  %v3297_v57 = vld [vmem:[%s6708_s6 + $0x8] sm:$0xff] }
 0x5b5   : > { %3226 = vmatpush.xpose.msrb.mxu3 %v3077_v27  ;;  %v4184_v10 = vpop.eup %4183  ;;  %4195 = vrcp.f32 %v2821_v43  ;;  %v3075_v51 = vmul.f32 %v4182_v14, %v7385_v54  ;;  %v7397_v27 = vld [vmem:[#allocation12_spill] sm:$0xff] }
 0x5b6   : > { %3244 = vmatpush.xpose.msra.mxu0 %v3095_v32  ;;  %3266 = vmatpush.xpose.msra.mxu1 %v3109_v38  ;;  %v4186_v13 = vpop.eup %4185  ;;  %4197 = vrcp.f32 %v6603_v61  ;;  %v3093_v4 = vmul.f32 %v4184_v10, %v7387_v45  ;;  %v2787_v55 = vpop.xlane.xlu0 %2786  ;;  %v528_v59 = vrot.slane %v7397_v27, 4 }
 0x5b7   : > { %v4188_v9 = vpop.eup %4187  ;;  %4199 = vrcp.f32 %v6579_v3  ;;  %v3121_v20 = vmul.f32 %v4186_v13, %v7386_v41  ;;  %v7389_v3 = vld [vmem:[#allocation118_spill] sm:$0xff] }
 0x5b8   : > { %3289 = vmatpush.xpose.msra.mxu2 %v3122_v49  ;;  %v4190_v58 = vpop.eup %4189  ;;  %4201 = vrcp.f32 %v2819_v25  ;;  %v3107_v53 = vmul.f32 %v4188_v9, %v7388_v8  ;;  %v2785_v29 = vpop.xlane.xlu1 %2784  ;;  %v3299_v9 = vld [vmem:[%s6708_s6 + $0x18] sm:$0xff] }
 0x5b9   : > { %3227 = vmatpush.xpose.msrb.mxu3 %v3076_v24  ;;  %v4192_v18 = vpop.eup %4191  ;;  %4203 = vrcp.f32 %v2753_v11  ;;  %v3092_v7 = vmul.f32 %v4190_v58, %v7390_v33 }
 0x5ba   : > { %3245 = vmatpush.xpose.msra.mxu0 %v3094_v37  ;;  %3267 = vmatpush.xpose.msra.mxu1 %v3108_v50  ;;  %v4194_v43 = vpop.eup %4193  ;;  %4205 = vrcp.f32 %v2817_v46  ;;  %v3074_v6 = vmul.f32 %v4192_v18, %v7389_v3  ;;  %v3298_v50 = vld [vmem:[%s6708_s6 + $0x10] sm:$0xff] }
 0x5bb   : > { %v4196_v61 = vpop.eup %4195  ;;  %4207 = vrcp.f32 %v6625_v1  ;;  %v3120_v5 = vmul.f32 %v4194_v43, %v6455_v22  ;;  %v7392_v22 = vld [vmem:[#allocation50_spill] sm:$0xff] }
 0x5bc   : > { %3290 = vmatpush.xpose.msra.mxu2 %v3121_v20  ;;  %v4198_v16 = vpop.eup %4197  ;;  %v3106_v42 = vmul.f32 %v4196_v61, %v6438_v63  ;;  %4209 = vrcp.f32 %v2787_v55  ;;  %v7394_v63 = vld [vmem:[#allocation6_spill] sm:$0xff] }
 0x5bd   : > { %3228 = vmatpush.xpose.msrb.mxu3 %v3075_v51  ;;  %v4200_v19 = vpop.eup %4199  ;;  %v3073_v44 = vmul.f32 %v4198_v16, %v6457_v28  ;;  %4211 = vrcp.f32 %v2785_v29  ;;  %v7396_v28 = vld [vmem:[#allocation40_spill] sm:$0xff] }
 0x5be   : > { %3246 = vmatpush.xpose.msra.mxu0 %v3093_v4  ;;  %3268 = vmatpush.xpose.msra.mxu1 %v3107_v53  ;;  %v4202_v48 = vpop.eup %4201  ;;  %v3091_v17 = vmul.f32 %v4200_v19, %v7392_v22 }
 0x5bf   : > { %v4204_v40 = vpop.eup %4203  ;;  %v3105_v35 = vmul.f32 %v4202_v48, %v7393_v36 }
 0x5c0   : > { %3291 = vmatpush.xpose.msra.mxu2 %v3120_v5  ;;  %v4206_v1 = vpop.eup %4205  ;;  %v3072_v2 = vmul.f32 %v4204_v40, %v7394_v63 }
 0x5c1   : > { %3229 = vmatpush.xpose.msrb.mxu3 %v3074_v6  ;;  %v4208_v56 = vpop.eup %4207  ;;  %v3104_v60 = vmul.f32 %v4206_v1, %v7396_v28 }
 0x5c2   : > { %3247 = vmatpush.xpose.msra.mxu0 %v3092_v7  ;;  %3269 = vmatpush.xpose.msra.mxu1 %v3106_v42  ;;  %v3090_v11 = vmul.f32 %v4208_v56, %v7395_v31  ;;  %v4210_v39 = vpop.eup %4209 }
 0x5c3   : > { %3292 = vmatmul.f32.vlgmr.msra.gmra.mxu2 %v529_v23  ;;  %v3089_v12 = vmul.f32 %v4210_v39, %v7398_v52  ;;  %v4212_v62 = vpop.eup %4211 }
 0x5c4   : > { %v3088_v34 = vmul.f32 %v4212_v62, %v7399_v47 }
 0x5c5   : > { %3230 = vmatpush.xpose.msrb.mxu3 %v3073_v44 }
 0x5c6   : > { %3248 = vmatpush.xpose.msra.mxu0 %v3091_v17  ;;  %3270 = vmatpush.xpose.msra.mxu1 %v3105_v35 }
 0x5c9   : > { %3231 = vmatpush.xpose.msrb.mxu3 %v3072_v2 }
 0x5ca   : > { %3249 = vmatpush.xpose.msra.mxu0 %v3090_v11  ;;  %3271 = vmatpush.xpose.msra.mxu1 %v3104_v60 }
 0x5cc   : > { %3232 = vmatmul.f32.vlgmr.msrb.gmra.mxu3 %v7397_v27 }
 0x5cd   : > { %3272 = vmatmul.f32.vlgmr.msra.gmra.mxu1 %v7391_v30 }
 0x5ce   : > { %3250 = vmatpush.xpose.msra.mxu0 %v3089_v12 }
 0x5d2   : > { %3251 = vmatpush.xpose.msra.mxu0 %v3088_v34 }
 0x5d5   : > { %3252 = vmatmul.f32.vlgmr.msra.gmra.mxu0 %v528_v59 }
 0x606   : > { %v3213_v32 = vpop.f32.mrf.mxu2 }
 0x607   : > { %3314 = vst [vmem:[#allocation1 + $0x11] ss:$2 sm:$0xff] %v3213_v32 }
 0x60a   : > { %v3193_v0 = vpop.f32.mrf.mxu1 }
 0x60b   : > { %3312 = vst [vmem:[#allocation1 + $0x10] ss:$2 sm:$0xff] %v3193_v0 }
 0x60f   : > { %v3153_v38 = vpop.f32.mrf.mxu3 }
 0x610   : > { %3308 = vst [vmem:[#allocation1] ss:$2 sm:$0xff] %v3153_v38 }
 0x612   : > { %v3173_v15 = vpop.f32.mrf.mxu0  ;;  %v3324_v25 = vld.sshfl [vmem:[#allocation1 + $0x10] sm:$0xff pattern:$0x75316420] }
 0x613   : > { %3310 = vst [vmem:[#allocation1 + $0x1] ss:$2 sm:$0xff] %v3173_v15 }
 0x61a   : > { %v3323_v37 = vld.sshfl [vmem:[#allocation1] sm:$0xff pattern:$0x75316420] }
 0x646   : > { %v3293_v14 = vpop.f32.mrf.mxu2 }
 0x647   : > { %3322 = vst [vmem:[#allocation1 + $0x31] ss:$2 sm:$0xff] %v3293_v14 }
 0x64a   : > { %v3273_v21 = vpop.f32.mrf.mxu1 }
 0x64b   : > { %3320 = vst [vmem:[#allocation1 + $0x30] ss:$2 sm:$0xff] %v3273_v21 }
 0x64f   : > { %v3233_v24 = vpop.f32.mrf.mxu3 }
 0x650   : > { %3316 = vst [vmem:[#allocation1 + $0x20] ss:$2 sm:$0xff] %v3233_v24 }
 0x652   : > { %v3253_v10 = vpop.f32.mrf.mxu0  ;;  %v3326_v49 = vld.sshfl [vmem:[#allocation1 + $0x30] sm:$0xff pattern:$0x75316420] }
 0x653   : > { %3318 = vst [vmem:[#allocation1 + $0x21] ss:$2 sm:$0xff] %v3253_v10  ;;  %3355 = vmatpush.msra.mxu3 %v3326_v49 }
 0x65a   : > { %v3325_v13 = vld.sshfl [vmem:[#allocation1 + $0x20] sm:$0xff pattern:$0x75316420] }
 0x65b   : > { %3356 = vmatpush.msra.mxu3 %v3325_v13 }
 0x65d   : > { %3357 = vmatpush.msra.mxu3 %v3324_v25 }
 0x65f   : > { %3358 = vmatpush.msra.mxu3 %v3323_v37 }
 0x660   : > { %3666 = vmatmul.msk.f32.vlgmr.msra.gmra.mxu3 %vm370_vm0, %v3296_v26 }
 0x668   : > { %3667 = vmatmul.msk.f32.gmra.mxu3 %vm370_vm0, %v3297_v57 }
 0x670   : > { %3668 = vmatmul.msk.f32.gmra.mxu3 %vm370_vm0, %v3298_v50 }
 0x678   : > { %3669 = vmatmul.msk.f32.gmra.mxu3 %vm370_vm0, %v3299_v9 }
 0x6e3   : > { %v3360_v58 = vpop.f32.mrf.mxu3 }
 0x6e4   : > { %3372 = vst [vmem:[%s345_s30] sm:$0xff] %v3360_v58 }
 0x6eb   : > { %v3363_v54 = vpop.f32.mrf.mxu3  ;;  %v3419_v46 = vld [vmem:[%s345_s30] sm:$0xff] (%p4322_p5) }
 0x6ec   : > { %3373 = vst [vmem:[%s345_s30 + $0x8] sm:$0xff] %v3363_v54 }
 0x6ed   : > { %3420 = vst [vmem:[%s3384_s13] sm:$0xff] (%p4322_p5), %v3419_v46 }
 0x6f3   : > { %v3366_v51 = vpop.f32.mrf.mxu3  ;;  %v3421_v41 = vld [vmem:[%s345_s30 + $0x8] sm:$0xff] (%p4322_p5) }
 0x6f4   : > { %3374 = vst [vmem:[%s345_s30 + $0x10] sm:$0xff] %v3366_v51 }
 0x6f5   : > { %3422 = vst [vmem:[%s3384_s13 + $0x10] sm:$0xff] (%p4322_p5), %v3421_v41 }
 0x6f8   : > { %3382 = sbr.rel (!%p4322_p5) target bundleno = 1797 (0x705), region = 90 }
 0x6fb   : > { %v3369_v18 = vpop.f32.mrf.mxu3  ;;  %v3423_v20 = vld [vmem:[%s345_s30 + $0x10] sm:$0xff] (%p4322_p5) }
 0x6fc   : > { %3375 = vst [vmem:[%s345_s30 + $0x18] sm:$0xff] %v3369_v18 }
 0x6fd   : > { %3424 = vst [vmem:[%s3384_s13 + $0x20] sm:$0xff] %v3423_v20 }
 0x703   : > { %v3425_v43 = vld [vmem:[%s345_s30 + $0x18] sm:$0xff] }
 0x704   : > { %3426 = vst [vmem:[%s3384_s13 + $0x30] sm:$0xff] %v3425_v43 }
 0x705 PF: > { %p14_p11 = scmp.ge.s32.totalorder %s4310_s28, 4   ;;  %s7400_s24 = smov %s4245_s25 }
 0x706   : > { %s7401_s25 = smov %s4320_s8  ;;  %s7402_s26 = smov %s4310_s28 }
 0x707   :  { %16 = sbr.rel (!%p14_p11) target bundleno = 2 (0x2), region = 172 }

</bundles_post_ra>
